<compile_context>
chip_gen: v5e
topology: v5e:2x2
jax: 0.10.0
libtpu: 0.0.40
codegen_flags: <defaults>
</compile_context>

<pallas_src>
import functools

import numpy as np
import jax
import jax.numpy as jnp
from jax import lax
from jax.experimental import pallas as pl
from jax.experimental.pallas import tpu as pltpu


def _round_up(x, m):
    return (x + m - 1) // m * m


def aux_head_kernel(x_ref, w1_ref, b1_ref, w2_ref, b2_ref, wc_ref, bc_ref,
                    o_ref, *, conv1_merged):
    """x_ref: (64, C, TN) bf16 with spatial row s = h*8 + w; batch on lanes."""
    f32 = jnp.float32
    bf16 = jnp.bfloat16

    # relu1 + AvgPool2d(5, stride=3) on the 8x8 map -> 4 pooled window *sums*
    # (the 1/25 average is folded into the conv1 weight).  Per spatial row we
    # relu each of the 8 unique columns exactly once, form the two 5-wide
    # horizontal band sums (sharing columns 3 and 4), and add them into the at
    # most four live tap accumulators -- small live set, no band dictionary.
    taps = [None] * 4                                    # p = kh*2 + kw
    for h in range(8):
        col = [jnp.maximum(x_ref[h * 8 + w].astype(f32), 0.0) for w in range(8)]
        mid = col[3] + col[4]
        band = (col[0] + col[1] + col[2] + mid,          # kw=0 window: w in 0..4
                mid + col[5] + col[6] + col[7])          # kw=1 window: w in 3..7
        for kh in range(2):
            if 3 * kh <= h <= 3 * kh + 4:                # rows of window kh
                for kw in range(2):
                    p = kh * 2 + kw
                    taps[p] = band[kw] if taps[p] is None else taps[p] + band[kw]

    tn = taps[0].shape[1]

    # conv1 (1x1, BN1 + 1/25 folded) + relu2 -> conv2 input (512, TN), rows
    # ordered (kh, kw, channel).
    if conv1_merged:
        # One MXU push with a block-diagonal (512, 4C) weight instead of four
        # tiny K=C pushes (used whenever 4*C <= 128).
        tap_stack = jnp.concatenate(taps, axis=0).astype(bf16)           # (4C, TN)
        h1cat = jnp.maximum(
            jnp.dot(w1_ref[...], tap_stack, preferred_element_type=f32)
            + b1_ref[...], 0.0).astype(bf16)                             # (512, TN)
    else:
        # Large C: per-tap K=C matmuls; results sublane-concatenated at
        # 128-aligned offsets.  Bias broadcast hoisted out of the loop.
        w1 = w1_ref[...]                                                 # (128, C)
        b1 = jnp.broadcast_to(b1_ref[...], (128, tn))
        h1 = [jnp.maximum(jnp.dot(w1, t.astype(bf16),
                                  preferred_element_type=f32) + b1,
                          0.0).astype(bf16)
              for t in taps]
        h1cat = jnp.concatenate(h1, axis=0)                              # (512, TN)

    # conv2 (2x2 on the 2x2 pooled map, BN2 folded) + relu3: one K=512 matmul.
    h2 = jnp.maximum(
        jnp.dot(w2_ref[...], h1cat, preferred_element_type=f32)
        + b2_ref[...], 0.0)                                              # (768, TN)

    # classifier; class rows zero-padded to a multiple of 128 (lane-dense vst).
    o_ref[...] = (jnp.dot(wc_ref[...], h2.astype(bf16),
                          preferred_element_type=f32) + bc_ref[...])


def prepare_aux_head(params, eps=1e-5):
    """One-time folding: BN scales into conv weights, 1/25 of the average pool
    into conv1, bf16 weight casts, class-row padding, conv1 merge layout."""
    s1 = params["gamma1"] / jnp.sqrt(params["rv1"] + eps)
    b1 = params["beta1"] - params["rm1"] * s1
    s2 = params["gamma2"] / jnp.sqrt(params["rv2"] + eps)
    b2 = params["beta2"] - params["rm2"] * s2

    c_in = params["w1"].shape[1]
    classes = params["bc"].shape[0]
    cpad = _round_up(classes, 128)

    # conv1: (128, C, 1, 1) -> (128, C); BN1 scale per output row, 1/25 folded.
    w1t = params["w1"].reshape(128, c_in) * s1[:, None] * (1.0 / 25.0)
    if 4 * c_in <= 128:
        # Merge the 4 per-tap conv1 matmuls into one block-diagonal matmul.
        w1f = jnp.zeros((512, 4 * c_in), jnp.float32)
        for p in range(4):
            w1f = w1f.at[p * 128:(p + 1) * 128, p * c_in:(p + 1) * c_in].set(w1t)
        b1f = jnp.tile(b1.reshape(128, 1), (4, 1))
    else:
        w1f, b1f = w1t, b1.reshape(128, 1)

    # conv2: (768, 128, kh, kw) -> (768, 512), columns ordered (kh, kw, c).
    w2f = jnp.transpose(params["w2"], (0, 2, 3, 1)).reshape(768, 512) * s2[:, None]
    # classifier, output rows zero-padded to a multiple of 128.
    wcf = jnp.zeros((cpad, 768), jnp.float32).at[:classes, :].set(params["wc"])
    bcf = jnp.zeros((cpad,), jnp.float32).at[:classes].set(params["bc"])

    return {
        "w1f": w1f.astype(jnp.bfloat16),
        "b1f": b1f.astype(jnp.float32),
        "w2f": w2f.astype(jnp.bfloat16),
        "b2f": b2.reshape(768, 1).astype(jnp.float32),
        "wcf": wcf.astype(jnp.bfloat16),
        "bcf": bcf.reshape(cpad, 1).astype(jnp.float32),
    }


def _chip_vmem_bytes():
    try:
        return int(pltpu.get_tpu_info().vmem_capacity_bytes)
    except Exception:
        return None          # unknown chip / interpret mode -> conservative default


def _pick_batch_tile(n, c, vmem_bytes):
    """Chip-aware batch tile (lane dim): large enough to amortize per-step
    pipeline overhead, small enough that the double-buffered bf16 x tile plus
    f32 intermediates fit the chip budget (v7x has only 64 MiB VMEM), and
    capped so the grid has >= 2 steps whenever the batch allows it."""
    budget = (vmem_bytes or 64 * 1024 * 1024) // 4

    def tile_bytes(t):
        x_pair = 2 * 64 * c * t * 2                       # double-buffered bf16 x
        interm = t * (4 * c + 512 + 768 + 256) * 4        # taps/h1/h2/out (f32-ish)
        return x_pair + interm

    tn = 1024
    while tn > 128 and tile_bytes(tn) > budget:
        tn //= 2
    n128 = _round_up(n, 128)
    tn = min(tn, n128)
    if n128 >= 256:                                       # keep >= 2 grid steps
        tn = min(tn, max(128, (n128 // 2) // 128 * 128))
    return tn


@functools.partial(jax.jit, static_argnames=("classes",))
def aux_head_cifar(x_nchw, prep, *, classes):
    """x_nchw: (N, C_in, 8, 8) float -> (N, classes) float32 (eval-mode BN)."""
    n, c, h, w = x_nchw.shape
    assert h == 8 and w == 8, "AuxHeadCIFAR assumes 8x8 spatial input"
    cpad = prep["wcf"].shape[0]
    conv1_merged = prep["w1f"].shape[0] == 512

    vmem_bytes = _chip_vmem_bytes()
    tn = _pick_batch_tile(n, c, vmem_bytes)
    n_pad = _round_up(n, tn)

    # (N, C, 8, 8) -> (64, C, N): spatial rows s = h*8 + w, batch on lanes.
    x_t = jnp.transpose(x_nchw.astype(jnp.bfloat16), (2, 3, 1, 0)).reshape(64, c, n)
    if n_pad != n:
        x_t = jnp.pad(x_t, ((0, 0), (0, 0), (0, n_pad - n)))

    grid = (n_pad // tn,)
    flops = n_pad * (150 * c + 2 * 512 * 4 * c + 2 * 512 * 768 + 2 * 768 * cpad)
    bytes_accessed = (2 * (x_t.size + prep["w1f"].size + prep["w2f"].size
                           + prep["wcf"].size)
                      + 4 * (n_pad * cpad + prep["b1f"].size + 768 + cpad))

    kernel = functools.partial(aux_head_kernel, conv1_merged=conv1_merged)
    resident = pl.BlockSpec(memory_space=pltpu.MemorySpace.VMEM)  # whole array, 1 buffer

    out = pl.pallas_call(
        kernel,
        out_shape=jax.ShapeDtypeStruct((cpad, n_pad), jnp.float32),
        grid_spec=pltpu.PrefetchScalarGridSpec(
            num_scalar_prefetch=0,
            grid=grid,
            in_specs=[
                pl.BlockSpec((64, c, tn), lambda i: (0, 0, i)),   # x tile (pipelined)
                resident,                                         # conv1 weight
                resident,                                         # conv1/bn1 bias
                resident,                                         # conv2 weight
                resident,                                         # conv2/bn2 bias
                resident,                                         # classifier weight
                resident,                                         # classifier bias
            ],
            out_specs=pl.BlockSpec((cpad, tn), lambda i: (0, i)),
        ),
        compiler_params=pltpu.CompilerParams(
            dimension_semantics=("parallel",),
            vmem_limit_bytes=(vmem_bytes // 2 if vmem_bytes
                              else 32 * 1024 * 1024),
            # Let XLA fuse the transpose/pad producer into the x input stream
            # instead of a standalone HBM round trip.
            allow_input_fusion=[True, False, False, False, False, False, False],
        ),
        cost_estimate=pl.CostEstimate(
            flops=int(flops), transcendentals=0,
            bytes_accessed=int(bytes_accessed)),
    )(x_t, prep["w1f"], prep["b1f"], prep["w2f"], prep["b2f"],
      prep["wcf"], prep["bcf"])

    # Drop class-row and batch-lane padding; back to (N, classes).
    return out[:classes, :n].T.astype(jnp.float32)


def reference_forward(x_nchw, params):
    """Pure-JAX (XLA) reference mirroring the PyTorch forward (eval-mode BN)."""
    eps = 1e-5
    x = jnp.maximum(x_nchw, 0.0)
    pooled = lax.reduce_window(x, 0.0, lax.add, (1, 1, 5, 5), (1, 1, 3, 3),
                               "VALID") / 25.0
    h1 = lax.conv_general_dilated(pooled, params["w1"], (1, 1), "VALID")
    s1 = params["gamma1"] / jnp.sqrt(params["rv1"] + eps)
    b1 = params["beta1"] - params["rm1"] * s1
    h1 = jnp.maximum(h1 * s1[None, :, None, None] + b1[None, :, None, None], 0.0)
    h2 = lax.conv_general_dilated(h1, params["w2"], (1, 1), "VALID")
    s2 = params["gamma2"] / jnp.sqrt(params["rv2"] + eps)
    b2 = params["beta2"] - params["rm2"] * s2
    h2 = jnp.maximum(h2 * s2[None, :, None, None] + b2[None, :, None, None], 0.0)
    h2 = h2.reshape(h2.shape[0], -1)                                   # (N, 768)
    return h2 @ params["wc"].T + params["bc"]


def make_params(key, c_in, classes):
    ks = jax.random.split(key, 10)
    return {
        "w1": 0.1 * jax.random.normal(ks[0], (128, c_in, 1, 1), jnp.float32),
        "w2": 0.05 * jax.random.normal(ks[1], (768, 128, 2, 2), jnp.float32),
        "gamma1": 1.0 + 0.1 * jax.random.normal(ks[2], (128,), jnp.float32),
        "beta1": 0.1 * jax.random.normal(ks[3], (128,), jnp.float32),
        "rm1": 0.1 * jax.random.normal(ks[4], (128,), jnp.float32),
        "rv1": 1.0 + 0.1 * jax.random.uniform(ks[5], (128,), jnp.float32),
        "gamma2": 1.0 + 0.1 * jax.random.normal(ks[6], (768,), jnp.float32),
        "beta2": 0.1 * jax.random.normal(ks[7], (768,), jnp.float32),
        "rm2": 0.1 * jax.random.normal(ks[8], (768,), jnp.float32),
        "rv2": 1.0 + 0.1 * jax.random.uniform(ks[9], (768,), jnp.float32),
        "wc": 0.02 * jax.random.normal(ks[0], (classes, 768), jnp.float32),
        "bc": 0.01 * jax.random.normal(ks[1], (classes,), jnp.float32),
    }


if __name__ == "__main__":
    N, C_IN, CLASSES = 2, 4, 10
    key = jax.random.PRNGKey(0)
    k_x, k_p = jax.random.split(key)
    x = jax.random.normal(k_x, (N, C_IN, 8, 8), jnp.float32)           # NCHW like PyTorch
    params = make_params(k_p, C_IN, CLASSES)
    prep = prepare_aux_head(params)                                    # fold params ONCE

    out = jax.block_until_ready(aux_head_cifar(x, prep, classes=CLASSES))
    ref = jax.block_until_ready(reference_forward(x, params))

    assert out.shape == (N, CLASSES), out.shape
    # bf16 MXU operands + bf16 activations (f32 accumulation): relaxed tolerance.
    np.testing.assert_allclose(np.asarray(out), np.asarray(ref),
                               rtol=5e-2, atol=1e-2)
    print("KERNEL_OK")
</pallas_src>

<mosaic_0001>
module attributes {stable_mosaic.version = 11 : i64} {
  func.func @aux_head_kernel(%arg0: i32, %arg1: memref<64x4x128xbf16, #tpu.memory_space<vmem>>, %arg2: memref<512x16xbf16, #tpu.memory_space<vmem>>, %arg3: memref<512x1xf32, #tpu.memory_space<vmem>>, %arg4: memref<768x512xbf16, #tpu.memory_space<vmem>>, %arg5: memref<768x1xf32, #tpu.memory_space<vmem>>, %arg6: memref<128x768xbf16, #tpu.memory_space<vmem>>, %arg7: memref<128x1xf32, #tpu.memory_space<vmem>>, %arg8: memref<128x128xf32, #tpu.memory_space<vmem>>) attributes {dimension_semantics = [#tpu.dimension_semantics<parallel>], iteration_bounds = array<i64: 1>, scalar_prefetch = 0 : i64, scratch_operands = 0 : i64, tpu.core_type = #tpu.core_type<tc>, window_params = [{transform_indices = @transform_0, window_bounds = array<i64: 64, 4, 128>}, {pipeline_mode = #tpu.pipeline_mode<synchronous>, transform_indices = @transform_1, window_bounds = array<i64: 512, 16>}, {pipeline_mode = #tpu.pipeline_mode<synchronous>, transform_indices = @transform_2, window_bounds = array<i64: 512, 1>}, {pipeline_mode = #tpu.pipeline_mode<synchronous>, transform_indices = @transform_3, window_bounds = array<i64: 768, 512>}, {pipeline_mode = #tpu.pipeline_mode<synchronous>, transform_indices = @transform_4, window_bounds = array<i64: 768, 1>}, {pipeline_mode = #tpu.pipeline_mode<synchronous>, transform_indices = @transform_5, window_bounds = array<i64: 128, 768>}, {pipeline_mode = #tpu.pipeline_mode<synchronous>, transform_indices = @transform_6, window_bounds = array<i64: 128, 1>}, {transform_indices = @transform_7, window_bounds = array<i64: 128, 128>}]} {
    %c0 = arith.constant 0 : index
    %c0_0 = arith.constant 0 : index
    %c0_1 = arith.constant 0 : index
    %0 = vector.load %arg1[%c0, %c0_0, %c0_1] : memref<64x4x128xbf16, #tpu.memory_space<vmem>>, vector<1x4x128xbf16>
    %1 = vector.shape_cast %0 : vector<1x4x128xbf16> to vector<4x128xbf16>
    %2 = arith.extf %1 : vector<4x128xbf16> to vector<4x128xf32>
    %cst = arith.constant 0.000000e+00 : f32
    %3 = vector.broadcast %cst : f32 to vector<4x128xf32>
    %4 = arith.maximumf %2, %3 : vector<4x128xf32>
    %c1 = arith.constant 1 : index
    %c0_2 = arith.constant 0 : index
    %c0_3 = arith.constant 0 : index
    %5 = vector.load %arg1[%c1, %c0_2, %c0_3] : memref<64x4x128xbf16, #tpu.memory_space<vmem>>, vector<1x4x128xbf16>
    %6 = vector.shape_cast %5 : vector<1x4x128xbf16> to vector<4x128xbf16>
    %7 = arith.extf %6 : vector<4x128xbf16> to vector<4x128xf32>
    %cst_4 = arith.constant 0.000000e+00 : f32
    %8 = vector.broadcast %cst_4 : f32 to vector<4x128xf32>
    %9 = arith.maximumf %7, %8 : vector<4x128xf32>
    %c2 = arith.constant 2 : index
    %c0_5 = arith.constant 0 : index
    %c0_6 = arith.constant 0 : index
    %10 = vector.load %arg1[%c2, %c0_5, %c0_6] : memref<64x4x128xbf16, #tpu.memory_space<vmem>>, vector<1x4x128xbf16>
    %11 = vector.shape_cast %10 : vector<1x4x128xbf16> to vector<4x128xbf16>
    %12 = arith.extf %11 : vector<4x128xbf16> to vector<4x128xf32>
    %cst_7 = arith.constant 0.000000e+00 : f32
    %13 = vector.broadcast %cst_7 : f32 to vector<4x128xf32>
    %14 = arith.maximumf %12, %13 : vector<4x128xf32>
    %c3 = arith.constant 3 : index
    %c0_8 = arith.constant 0 : index
    %c0_9 = arith.constant 0 : index
    %15 = vector.load %arg1[%c3, %c0_8, %c0_9] : memref<64x4x128xbf16, #tpu.memory_space<vmem>>, vector<1x4x128xbf16>
    %16 = vector.shape_cast %15 : vector<1x4x128xbf16> to vector<4x128xbf16>
    %17 = arith.extf %16 : vector<4x128xbf16> to vector<4x128xf32>
    %cst_10 = arith.constant 0.000000e+00 : f32
    %18 = vector.broadcast %cst_10 : f32 to vector<4x128xf32>
    %19 = arith.maximumf %17, %18 : vector<4x128xf32>
    %c4 = arith.constant 4 : index
    %c0_11 = arith.constant 0 : index
    %c0_12 = arith.constant 0 : index
    %20 = vector.load %arg1[%c4, %c0_11, %c0_12] : memref<64x4x128xbf16, #tpu.memory_space<vmem>>, vector<1x4x128xbf16>
    %21 = vector.shape_cast %20 : vector<1x4x128xbf16> to vector<4x128xbf16>
    %22 = arith.extf %21 : vector<4x128xbf16> to vector<4x128xf32>
    %cst_13 = arith.constant 0.000000e+00 : f32
    %23 = vector.broadcast %cst_13 : f32 to vector<4x128xf32>
    %24 = arith.maximumf %22, %23 : vector<4x128xf32>
    %c5 = arith.constant 5 : index
    %c0_14 = arith.constant 0 : index
    %c0_15 = arith.constant 0 : index
    %25 = vector.load %arg1[%c5, %c0_14, %c0_15] : memref<64x4x128xbf16, #tpu.memory_space<vmem>>, vector<1x4x128xbf16>
    %26 = vector.shape_cast %25 : vector<1x4x128xbf16> to vector<4x128xbf16>
    %27 = arith.extf %26 : vector<4x128xbf16> to vector<4x128xf32>
    %cst_16 = arith.constant 0.000000e+00 : f32
    %28 = vector.broadcast %cst_16 : f32 to vector<4x128xf32>
    %29 = arith.maximumf %27, %28 : vector<4x128xf32>
    %c6 = arith.constant 6 : index
    %c0_17 = arith.constant 0 : index
    %c0_18 = arith.constant 0 : index
    %30 = vector.load %arg1[%c6, %c0_17, %c0_18] : memref<64x4x128xbf16, #tpu.memory_space<vmem>>, vector<1x4x128xbf16>
    %31 = vector.shape_cast %30 : vector<1x4x128xbf16> to vector<4x128xbf16>
    %32 = arith.extf %31 : vector<4x128xbf16> to vector<4x128xf32>
    %cst_19 = arith.constant 0.000000e+00 : f32
    %33 = vector.broadcast %cst_19 : f32 to vector<4x128xf32>
    %34 = arith.maximumf %32, %33 : vector<4x128xf32>
    %c7 = arith.constant 7 : index
    %c0_20 = arith.constant 0 : index
    %c0_21 = arith.constant 0 : index
    %35 = vector.load %arg1[%c7, %c0_20, %c0_21] : memref<64x4x128xbf16, #tpu.memory_space<vmem>>, vector<1x4x128xbf16>
    %36 = vector.shape_cast %35 : vector<1x4x128xbf16> to vector<4x128xbf16>
    %37 = arith.extf %36 : vector<4x128xbf16> to vector<4x128xf32>
    %cst_22 = arith.constant 0.000000e+00 : f32
    %38 = vector.broadcast %cst_22 : f32 to vector<4x128xf32>
    %39 = arith.maximumf %37, %38 : vector<4x128xf32>
    %40 = arith.addf %19, %24 : vector<4x128xf32>
    %41 = arith.addf %4, %9 : vector<4x128xf32>
    %42 = arith.addf %41, %14 : vector<4x128xf32>
    %43 = arith.addf %42, %40 : vector<4x128xf32>
    %44 = arith.addf %40, %29 : vector<4x128xf32>
    %45 = arith.addf %44, %34 : vector<4x128xf32>
    %46 = arith.addf %45, %39 : vector<4x128xf32>
    %c8 = arith.constant 8 : index
    %c0_23 = arith.constant 0 : index
    %c0_24 = arith.constant 0 : index
    %47 = vector.load %arg1[%c8, %c0_23, %c0_24] : memref<64x4x128xbf16, #tpu.memory_space<vmem>>, vector<1x4x128xbf16>
    %48 = vector.shape_cast %47 : vector<1x4x128xbf16> to vector<4x128xbf16>
    %49 = arith.extf %48 : vector<4x128xbf16> to vector<4x128xf32>
    %cst_25 = arith.constant 0.000000e+00 : f32
    %50 = vector.broadcast %cst_25 : f32 to vector<4x128xf32>
    %51 = arith.maximumf %49, %50 : vector<4x128xf32>
    %c9 = arith.constant 9 : index
    %c0_26 = arith.constant 0 : index
    %c0_27 = arith.constant 0 : index
    %52 = vector.load %arg1[%c9, %c0_26, %c0_27] : memref<64x4x128xbf16, #tpu.memory_space<vmem>>, vector<1x4x128xbf16>
    %53 = vector.shape_cast %52 : vector<1x4x128xbf16> to vector<4x128xbf16>
    %54 = arith.extf %53 : vector<4x128xbf16> to vector<4x128xf32>
    %cst_28 = arith.constant 0.000000e+00 : f32
    %55 = vector.broadcast %cst_28 : f32 to vector<4x128xf32>
    %56 = arith.maximumf %54, %55 : vector<4x128xf32>
    %c10 = arith.constant 10 : index
    %c0_29 = arith.constant 0 : index
    %c0_30 = arith.constant 0 : index
    %57 = vector.load %arg1[%c10, %c0_29, %c0_30] : memref<64x4x128xbf16, #tpu.memory_space<vmem>>, vector<1x4x128xbf16>
    %58 = vector.shape_cast %57 : vector<1x4x128xbf16> to vector<4x128xbf16>
    %59 = arith.extf %58 : vector<4x128xbf16> to vector<4x128xf32>
    %cst_31 = arith.constant 0.000000e+00 : f32
    %60 = vector.broadcast %cst_31 : f32 to vector<4x128xf32>
    %61 = arith.maximumf %59, %60 : vector<4x128xf32>
    %c11 = arith.constant 11 : index
    %c0_32 = arith.constant 0 : index
    %c0_33 = arith.constant 0 : index
    %62 = vector.load %arg1[%c11, %c0_32, %c0_33] : memref<64x4x128xbf16, #tpu.memory_space<vmem>>, vector<1x4x128xbf16>
    %63 = vector.shape_cast %62 : vector<1x4x128xbf16> to vector<4x128xbf16>
    %64 = arith.extf %63 : vector<4x128xbf16> to vector<4x128xf32>
    %cst_34 = arith.constant 0.000000e+00 : f32
    %65 = vector.broadcast %cst_34 : f32 to vector<4x128xf32>
    %66 = arith.maximumf %64, %65 : vector<4x128xf32>
    %c12 = arith.constant 12 : index
    %c0_35 = arith.constant 0 : index
    %c0_36 = arith.constant 0 : index
    %67 = vector.load %arg1[%c12, %c0_35, %c0_36] : memref<64x4x128xbf16, #tpu.memory_space<vmem>>, vector<1x4x128xbf16>
    %68 = vector.shape_cast %67 : vector<1x4x128xbf16> to vector<4x128xbf16>
    %69 = arith.extf %68 : vector<4x128xbf16> to vector<4x128xf32>
    %cst_37 = arith.constant 0.000000e+00 : f32
    %70 = vector.broadcast %cst_37 : f32 to vector<4x128xf32>
    %71 = arith.maximumf %69, %70 : vector<4x128xf32>
    %c13 = arith.constant 13 : index
    %c0_38 = arith.constant 0 : index
    %c0_39 = arith.constant 0 : index
    %72 = vector.load %arg1[%c13, %c0_38, %c0_39] : memref<64x4x128xbf16, #tpu.memory_space<vmem>>, vector<1x4x128xbf16>
    %73 = vector.shape_cast %72 : vector<1x4x128xbf16> to vector<4x128xbf16>
    %74 = arith.extf %73 : vector<4x128xbf16> to vector<4x128xf32>
    %cst_40 = arith.constant 0.000000e+00 : f32
    %75 = vector.broadcast %cst_40 : f32 to vector<4x128xf32>
    %76 = arith.maximumf %74, %75 : vector<4x128xf32>
    %c14 = arith.constant 14 : index
    %c0_41 = arith.constant 0 : index
    %c0_42 = arith.constant 0 : index
    %77 = vector.load %arg1[%c14, %c0_41, %c0_42] : memref<64x4x128xbf16, #tpu.memory_space<vmem>>, vector<1x4x128xbf16>
    %78 = vector.shape_cast %77 : vector<1x4x128xbf16> to vector<4x128xbf16>
    %79 = arith.extf %78 : vector<4x128xbf16> to vector<4x128xf32>
    %cst_43 = arith.constant 0.000000e+00 : f32
    %80 = vector.broadcast %cst_43 : f32 to vector<4x128xf32>
    %81 = arith.maximumf %79, %80 : vector<4x128xf32>
    %c15 = arith.constant 15 : index
    %c0_44 = arith.constant 0 : index
    %c0_45 = arith.constant 0 : index
    %82 = vector.load %arg1[%c15, %c0_44, %c0_45] : memref<64x4x128xbf16, #tpu.memory_space<vmem>>, vector<1x4x128xbf16>
    %83 = vector.shape_cast %82 : vector<1x4x128xbf16> to vector<4x128xbf16>
    %84 = arith.extf %83 : vector<4x128xbf16> to vector<4x128xf32>
    %cst_46 = arith.constant 0.000000e+00 : f32
    %85 = vector.broadcast %cst_46 : f32 to vector<4x128xf32>
    %86 = arith.maximumf %84, %85 : vector<4x128xf32>
    %87 = arith.addf %66, %71 : vector<4x128xf32>
    %88 = arith.addf %51, %56 : vector<4x128xf32>
    %89 = arith.addf %88, %61 : vector<4x128xf32>
    %90 = arith.addf %89, %87 : vector<4x128xf32>
    %91 = arith.addf %87, %76 : vector<4x128xf32>
    %92 = arith.addf %91, %81 : vector<4x128xf32>
    %93 = arith.addf %92, %86 : vector<4x128xf32>
    %94 = arith.addf %43, %90 : vector<4x128xf32>
    %95 = arith.addf %46, %93 : vector<4x128xf32>
    %c16 = arith.constant 16 : index
    %c0_47 = arith.constant 0 : index
    %c0_48 = arith.constant 0 : index
    %96 = vector.load %arg1[%c16, %c0_47, %c0_48] : memref<64x4x128xbf16, #tpu.memory_space<vmem>>, vector<1x4x128xbf16>
    %97 = vector.shape_cast %96 : vector<1x4x128xbf16> to vector<4x128xbf16>
    %98 = arith.extf %97 : vector<4x128xbf16> to vector<4x128xf32>
    %cst_49 = arith.constant 0.000000e+00 : f32
    %99 = vector.broadcast %cst_49 : f32 to vector<4x128xf32>
    %100 = arith.maximumf %98, %99 : vector<4x128xf32>
    %c17 = arith.constant 17 : index
    %c0_50 = arith.constant 0 : index
    %c0_51 = arith.constant 0 : index
    %101 = vector.load %arg1[%c17, %c0_50, %c0_51] : memref<64x4x128xbf16, #tpu.memory_space<vmem>>, vector<1x4x128xbf16>
    %102 = vector.shape_cast %101 : vector<1x4x128xbf16> to vector<4x128xbf16>
    %103 = arith.extf %102 : vector<4x128xbf16> to vector<4x128xf32>
    %cst_52 = arith.constant 0.000000e+00 : f32
    %104 = vector.broadcast %cst_52 : f32 to vector<4x128xf32>
    %105 = arith.maximumf %103, %104 : vector<4x128xf32>
    %c18 = arith.constant 18 : index
    %c0_53 = arith.constant 0 : index
    %c0_54 = arith.constant 0 : index
    %106 = vector.load %arg1[%c18, %c0_53, %c0_54] : memref<64x4x128xbf16, #tpu.memory_space<vmem>>, vector<1x4x128xbf16>
    %107 = vector.shape_cast %106 : vector<1x4x128xbf16> to vector<4x128xbf16>
    %108 = arith.extf %107 : vector<4x128xbf16> to vector<4x128xf32>
    %cst_55 = arith.constant 0.000000e+00 : f32
    %109 = vector.broadcast %cst_55 : f32 to vector<4x128xf32>
    %110 = arith.maximumf %108, %109 : vector<4x128xf32>
    %c19 = arith.constant 19 : index
    %c0_56 = arith.constant 0 : index
    %c0_57 = arith.constant 0 : index
    %111 = vector.load %arg1[%c19, %c0_56, %c0_57] : memref<64x4x128xbf16, #tpu.memory_space<vmem>>, vector<1x4x128xbf16>
    %112 = vector.shape_cast %111 : vector<1x4x128xbf16> to vector<4x128xbf16>
    %113 = arith.extf %112 : vector<4x128xbf16> to vector<4x128xf32>
    %cst_58 = arith.constant 0.000000e+00 : f32
    %114 = vector.broadcast %cst_58 : f32 to vector<4x128xf32>
    %115 = arith.maximumf %113, %114 : vector<4x128xf32>
    %c20 = arith.constant 20 : index
    %c0_59 = arith.constant 0 : index
    %c0_60 = arith.constant 0 : index
    %116 = vector.load %arg1[%c20, %c0_59, %c0_60] : memref<64x4x128xbf16, #tpu.memory_space<vmem>>, vector<1x4x128xbf16>
    %117 = vector.shape_cast %116 : vector<1x4x128xbf16> to vector<4x128xbf16>
    %118 = arith.extf %117 : vector<4x128xbf16> to vector<4x128xf32>
    %cst_61 = arith.constant 0.000000e+00 : f32
    %119 = vector.broadcast %cst_61 : f32 to vector<4x128xf32>
    %120 = arith.maximumf %118, %119 : vector<4x128xf32>
    %c21 = arith.constant 21 : index
    %c0_62 = arith.constant 0 : index
    %c0_63 = arith.constant 0 : index
    %121 = vector.load %arg1[%c21, %c0_62, %c0_63] : memref<64x4x128xbf16, #tpu.memory_space<vmem>>, vector<1x4x128xbf16>
    %122 = vector.shape_cast %121 : vector<1x4x128xbf16> to vector<4x128xbf16>
    %123 = arith.extf %122 : vector<4x128xbf16> to vector<4x128xf32>
    %cst_64 = arith.constant 0.000000e+00 : f32
    %124 = vector.broadcast %cst_64 : f32 to vector<4x128xf32>
    %125 = arith.maximumf %123, %124 : vector<4x128xf32>
    %c22 = arith.constant 22 : index
    %c0_65 = arith.constant 0 : index
    %c0_66 = arith.constant 0 : index
    %126 = vector.load %arg1[%c22, %c0_65, %c0_66] : memref<64x4x128xbf16, #tpu.memory_space<vmem>>, vector<1x4x128xbf16>
    %127 = vector.shape_cast %126 : vector<1x4x128xbf16> to vector<4x128xbf16>
    %128 = arith.extf %127 : vector<4x128xbf16> to vector<4x128xf32>
    %cst_67 = arith.constant 0.000000e+00 : f32
    %129 = vector.broadcast %cst_67 : f32 to vector<4x128xf32>
    %130 = arith.maximumf %128, %129 : vector<4x128xf32>
    %c23 = arith.constant 23 : index
    %c0_68 = arith.constant 0 : index
    %c0_69 = arith.constant 0 : index
    %131 = vector.load %arg1[%c23, %c0_68, %c0_69] : memref<64x4x128xbf16, #tpu.memory_space<vmem>>, vector<1x4x128xbf16>
    %132 = vector.shape_cast %131 : vector<1x4x128xbf16> to vector<4x128xbf16>
    %133 = arith.extf %132 : vector<4x128xbf16> to vector<4x128xf32>
    %cst_70 = arith.constant 0.000000e+00 : f32
    %134 = vector.broadcast %cst_70 : f32 to vector<4x128xf32>
    %135 = arith.maximumf %133, %134 : vector<4x128xf32>
    %136 = arith.addf %115, %120 : vector<4x128xf32>
    %137 = arith.addf %100, %105 : vector<4x128xf32>
    %138 = arith.addf %137, %110 : vector<4x128xf32>
    %139 = arith.addf %138, %136 : vector<4x128xf32>
    %140 = arith.addf %136, %125 : vector<4x128xf32>
    %141 = arith.addf %140, %130 : vector<4x128xf32>
    %142 = arith.addf %141, %135 : vector<4x128xf32>
    %143 = arith.addf %94, %139 : vector<4x128xf32>
    %144 = arith.addf %95, %142 : vector<4x128xf32>
    %c24 = arith.constant 24 : index
    %c0_71 = arith.constant 0 : index
    %c0_72 = arith.constant 0 : index
    %145 = vector.load %arg1[%c24, %c0_71, %c0_72] : memref<64x4x128xbf16, #tpu.memory_space<vmem>>, vector<1x4x128xbf16>
    %146 = vector.shape_cast %145 : vector<1x4x128xbf16> to vector<4x128xbf16>
    %147 = arith.extf %146 : vector<4x128xbf16> to vector<4x128xf32>
    %cst_73 = arith.constant 0.000000e+00 : f32
    %148 = vector.broadcast %cst_73 : f32 to vector<4x128xf32>
    %149 = arith.maximumf %147, %148 : vector<4x128xf32>
    %c25 = arith.constant 25 : index
    %c0_74 = arith.constant 0 : index
    %c0_75 = arith.constant 0 : index
    %150 = vector.load %arg1[%c25, %c0_74, %c0_75] : memref<64x4x128xbf16, #tpu.memory_space<vmem>>, vector<1x4x128xbf16>
    %151 = vector.shape_cast %150 : vector<1x4x128xbf16> to vector<4x128xbf16>
    %152 = arith.extf %151 : vector<4x128xbf16> to vector<4x128xf32>
    %cst_76 = arith.constant 0.000000e+00 : f32
    %153 = vector.broadcast %cst_76 : f32 to vector<4x128xf32>
    %154 = arith.maximumf %152, %153 : vector<4x128xf32>
    %c26 = arith.constant 26 : index
    %c0_77 = arith.constant 0 : index
    %c0_78 = arith.constant 0 : index
    %155 = vector.load %arg1[%c26, %c0_77, %c0_78] : memref<64x4x128xbf16, #tpu.memory_space<vmem>>, vector<1x4x128xbf16>
    %156 = vector.shape_cast %155 : vector<1x4x128xbf16> to vector<4x128xbf16>
    %157 = arith.extf %156 : vector<4x128xbf16> to vector<4x128xf32>
    %cst_79 = arith.constant 0.000000e+00 : f32
    %158 = vector.broadcast %cst_79 : f32 to vector<4x128xf32>
    %159 = arith.maximumf %157, %158 : vector<4x128xf32>
    %c27 = arith.constant 27 : index
    %c0_80 = arith.constant 0 : index
    %c0_81 = arith.constant 0 : index
    %160 = vector.load %arg1[%c27, %c0_80, %c0_81] : memref<64x4x128xbf16, #tpu.memory_space<vmem>>, vector<1x4x128xbf16>
    %161 = vector.shape_cast %160 : vector<1x4x128xbf16> to vector<4x128xbf16>
    %162 = arith.extf %161 : vector<4x128xbf16> to vector<4x128xf32>
    %cst_82 = arith.constant 0.000000e+00 : f32
    %163 = vector.broadcast %cst_82 : f32 to vector<4x128xf32>
    %164 = arith.maximumf %162, %163 : vector<4x128xf32>
    %c28 = arith.constant 28 : index
    %c0_83 = arith.constant 0 : index
    %c0_84 = arith.constant 0 : index
    %165 = vector.load %arg1[%c28, %c0_83, %c0_84] : memref<64x4x128xbf16, #tpu.memory_space<vmem>>, vector<1x4x128xbf16>
    %166 = vector.shape_cast %165 : vector<1x4x128xbf16> to vector<4x128xbf16>
    %167 = arith.extf %166 : vector<4x128xbf16> to vector<4x128xf32>
    %cst_85 = arith.constant 0.000000e+00 : f32
    %168 = vector.broadcast %cst_85 : f32 to vector<4x128xf32>
    %169 = arith.maximumf %167, %168 : vector<4x128xf32>
    %c29 = arith.constant 29 : index
    %c0_86 = arith.constant 0 : index
    %c0_87 = arith.constant 0 : index
    %170 = vector.load %arg1[%c29, %c0_86, %c0_87] : memref<64x4x128xbf16, #tpu.memory_space<vmem>>, vector<1x4x128xbf16>
    %171 = vector.shape_cast %170 : vector<1x4x128xbf16> to vector<4x128xbf16>
    %172 = arith.extf %171 : vector<4x128xbf16> to vector<4x128xf32>
    %cst_88 = arith.constant 0.000000e+00 : f32
    %173 = vector.broadcast %cst_88 : f32 to vector<4x128xf32>
    %174 = arith.maximumf %172, %173 : vector<4x128xf32>
    %c30 = arith.constant 30 : index
    %c0_89 = arith.constant 0 : index
    %c0_90 = arith.constant 0 : index
    %175 = vector.load %arg1[%c30, %c0_89, %c0_90] : memref<64x4x128xbf16, #tpu.memory_space<vmem>>, vector<1x4x128xbf16>
    %176 = vector.shape_cast %175 : vector<1x4x128xbf16> to vector<4x128xbf16>
    %177 = arith.extf %176 : vector<4x128xbf16> to vector<4x128xf32>
    %cst_91 = arith.constant 0.000000e+00 : f32
    %178 = vector.broadcast %cst_91 : f32 to vector<4x128xf32>
    %179 = arith.maximumf %177, %178 : vector<4x128xf32>
    %c31 = arith.constant 31 : index
    %c0_92 = arith.constant 0 : index
    %c0_93 = arith.constant 0 : index
    %180 = vector.load %arg1[%c31, %c0_92, %c0_93] : memref<64x4x128xbf16, #tpu.memory_space<vmem>>, vector<1x4x128xbf16>
    %181 = vector.shape_cast %180 : vector<1x4x128xbf16> to vector<4x128xbf16>
    %182 = arith.extf %181 : vector<4x128xbf16> to vector<4x128xf32>
    %cst_94 = arith.constant 0.000000e+00 : f32
    %183 = vector.broadcast %cst_94 : f32 to vector<4x128xf32>
    %184 = arith.maximumf %182, %183 : vector<4x128xf32>
    %185 = arith.addf %164, %169 : vector<4x128xf32>
    %186 = arith.addf %149, %154 : vector<4x128xf32>
    %187 = arith.addf %186, %159 : vector<4x128xf32>
    %188 = arith.addf %187, %185 : vector<4x128xf32>
    %189 = arith.addf %185, %174 : vector<4x128xf32>
    %190 = arith.addf %189, %179 : vector<4x128xf32>
    %191 = arith.addf %190, %184 : vector<4x128xf32>
    %192 = arith.addf %143, %188 : vector<4x128xf32>
    %193 = arith.addf %144, %191 : vector<4x128xf32>
    %c32 = arith.constant 32 : index
    %c0_95 = arith.constant 0 : index
    %c0_96 = arith.constant 0 : index
    %194 = vector.load %arg1[%c32, %c0_95, %c0_96] : memref<64x4x128xbf16, #tpu.memory_space<vmem>>, vector<1x4x128xbf16>
    %195 = vector.shape_cast %194 : vector<1x4x128xbf16> to vector<4x128xbf16>
    %196 = arith.extf %195 : vector<4x128xbf16> to vector<4x128xf32>
    %cst_97 = arith.constant 0.000000e+00 : f32
    %197 = vector.broadcast %cst_97 : f32 to vector<4x128xf32>
    %198 = arith.maximumf %196, %197 : vector<4x128xf32>
    %c33 = arith.constant 33 : index
    %c0_98 = arith.constant 0 : index
    %c0_99 = arith.constant 0 : index
    %199 = vector.load %arg1[%c33, %c0_98, %c0_99] : memref<64x4x128xbf16, #tpu.memory_space<vmem>>, vector<1x4x128xbf16>
    %200 = vector.shape_cast %199 : vector<1x4x128xbf16> to vector<4x128xbf16>
    %201 = arith.extf %200 : vector<4x128xbf16> to vector<4x128xf32>
    %cst_100 = arith.constant 0.000000e+00 : f32
    %202 = vector.broadcast %cst_100 : f32 to vector<4x128xf32>
    %203 = arith.maximumf %201, %202 : vector<4x128xf32>
    %c34 = arith.constant 34 : index
    %c0_101 = arith.constant 0 : index
    %c0_102 = arith.constant 0 : index
    %204 = vector.load %arg1[%c34, %c0_101, %c0_102] : memref<64x4x128xbf16, #tpu.memory_space<vmem>>, vector<1x4x128xbf16>
    %205 = vector.shape_cast %204 : vector<1x4x128xbf16> to vector<4x128xbf16>
    %206 = arith.extf %205 : vector<4x128xbf16> to vector<4x128xf32>
    %cst_103 = arith.constant 0.000000e+00 : f32
    %207 = vector.broadcast %cst_103 : f32 to vector<4x128xf32>
    %208 = arith.maximumf %206, %207 : vector<4x128xf32>
    %c35 = arith.constant 35 : index
    %c0_104 = arith.constant 0 : index
    %c0_105 = arith.constant 0 : index
    %209 = vector.load %arg1[%c35, %c0_104, %c0_105] : memref<64x4x128xbf16, #tpu.memory_space<vmem>>, vector<1x4x128xbf16>
    %210 = vector.shape_cast %209 : vector<1x4x128xbf16> to vector<4x128xbf16>
    %211 = arith.extf %210 : vector<4x128xbf16> to vector<4x128xf32>
    %cst_106 = arith.constant 0.000000e+00 : f32
    %212 = vector.broadcast %cst_106 : f32 to vector<4x128xf32>
    %213 = arith.maximumf %211, %212 : vector<4x128xf32>
    %c36 = arith.constant 36 : index
    %c0_107 = arith.constant 0 : index
    %c0_108 = arith.constant 0 : index
    %214 = vector.load %arg1[%c36, %c0_107, %c0_108] : memref<64x4x128xbf16, #tpu.memory_space<vmem>>, vector<1x4x128xbf16>
    %215 = vector.shape_cast %214 : vector<1x4x128xbf16> to vector<4x128xbf16>
    %216 = arith.extf %215 : vector<4x128xbf16> to vector<4x128xf32>
    %cst_109 = arith.constant 0.000000e+00 : f32
    %217 = vector.broadcast %cst_109 : f32 to vector<4x128xf32>
    %218 = arith.maximumf %216, %217 : vector<4x128xf32>
    %c37 = arith.constant 37 : index
    %c0_110 = arith.constant 0 : index
    %c0_111 = arith.constant 0 : index
    %219 = vector.load %arg1[%c37, %c0_110, %c0_111] : memref<64x4x128xbf16, #tpu.memory_space<vmem>>, vector<1x4x128xbf16>
    %220 = vector.shape_cast %219 : vector<1x4x128xbf16> to vector<4x128xbf16>
    %221 = arith.extf %220 : vector<4x128xbf16> to vector<4x128xf32>
    %cst_112 = arith.constant 0.000000e+00 : f32
    %222 = vector.broadcast %cst_112 : f32 to vector<4x128xf32>
    %223 = arith.maximumf %221, %222 : vector<4x128xf32>
    %c38 = arith.constant 38 : index
    %c0_113 = arith.constant 0 : index
    %c0_114 = arith.constant 0 : index
    %224 = vector.load %arg1[%c38, %c0_113, %c0_114] : memref<64x4x128xbf16, #tpu.memory_space<vmem>>, vector<1x4x128xbf16>
    %225 = vector.shape_cast %224 : vector<1x4x128xbf16> to vector<4x128xbf16>
    %226 = arith.extf %225 : vector<4x128xbf16> to vector<4x128xf32>
    %cst_115 = arith.constant 0.000000e+00 : f32
    %227 = vector.broadcast %cst_115 : f32 to vector<4x128xf32>
    %228 = arith.maximumf %226, %227 : vector<4x128xf32>
    %c39 = arith.constant 39 : index
    %c0_116 = arith.constant 0 : index
    %c0_117 = arith.constant 0 : index
    %229 = vector.load %arg1[%c39, %c0_116, %c0_117] : memref<64x4x128xbf16, #tpu.memory_space<vmem>>, vector<1x4x128xbf16>
    %230 = vector.shape_cast %229 : vector<1x4x128xbf16> to vector<4x128xbf16>
    %231 = arith.extf %230 : vector<4x128xbf16> to vector<4x128xf32>
    %cst_118 = arith.constant 0.000000e+00 : f32
    %232 = vector.broadcast %cst_118 : f32 to vector<4x128xf32>
    %233 = arith.maximumf %231, %232 : vector<4x128xf32>
    %234 = arith.addf %213, %218 : vector<4x128xf32>
    %235 = arith.addf %198, %203 : vector<4x128xf32>
    %236 = arith.addf %235, %208 : vector<4x128xf32>
    %237 = arith.addf %236, %234 : vector<4x128xf32>
    %238 = arith.addf %234, %223 : vector<4x128xf32>
    %239 = arith.addf %238, %228 : vector<4x128xf32>
    %240 = arith.addf %239, %233 : vector<4x128xf32>
    %241 = arith.addf %192, %237 : vector<4x128xf32>
    %242 = arith.addf %193, %240 : vector<4x128xf32>
    %243 = arith.addf %188, %237 : vector<4x128xf32>
    %244 = arith.addf %191, %240 : vector<4x128xf32>
    %c40 = arith.constant 40 : index
    %c0_119 = arith.constant 0 : index
    %c0_120 = arith.constant 0 : index
    %245 = vector.load %arg1[%c40, %c0_119, %c0_120] : memref<64x4x128xbf16, #tpu.memory_space<vmem>>, vector<1x4x128xbf16>
    %246 = vector.shape_cast %245 : vector<1x4x128xbf16> to vector<4x128xbf16>
    %247 = arith.extf %246 : vector<4x128xbf16> to vector<4x128xf32>
    %cst_121 = arith.constant 0.000000e+00 : f32
    %248 = vector.broadcast %cst_121 : f32 to vector<4x128xf32>
    %249 = arith.maximumf %247, %248 : vector<4x128xf32>
    %c41 = arith.constant 41 : index
    %c0_122 = arith.constant 0 : index
    %c0_123 = arith.constant 0 : index
    %250 = vector.load %arg1[%c41, %c0_122, %c0_123] : memref<64x4x128xbf16, #tpu.memory_space<vmem>>, vector<1x4x128xbf16>
    %251 = vector.shape_cast %250 : vector<1x4x128xbf16> to vector<4x128xbf16>
    %252 = arith.extf %251 : vector<4x128xbf16> to vector<4x128xf32>
    %cst_124 = arith.constant 0.000000e+00 : f32
    %253 = vector.broadcast %cst_124 : f32 to vector<4x128xf32>
    %254 = arith.maximumf %252, %253 : vector<4x128xf32>
    %c42 = arith.constant 42 : index
    %c0_125 = arith.constant 0 : index
    %c0_126 = arith.constant 0 : index
    %255 = vector.load %arg1[%c42, %c0_125, %c0_126] : memref<64x4x128xbf16, #tpu.memory_space<vmem>>, vector<1x4x128xbf16>
    %256 = vector.shape_cast %255 : vector<1x4x128xbf16> to vector<4x128xbf16>
    %257 = arith.extf %256 : vector<4x128xbf16> to vector<4x128xf32>
    %cst_127 = arith.constant 0.000000e+00 : f32
    %258 = vector.broadcast %cst_127 : f32 to vector<4x128xf32>
    %259 = arith.maximumf %257, %258 : vector<4x128xf32>
    %c43 = arith.constant 43 : index
    %c0_128 = arith.constant 0 : index
    %c0_129 = arith.constant 0 : index
    %260 = vector.load %arg1[%c43, %c0_128, %c0_129] : memref<64x4x128xbf16, #tpu.memory_space<vmem>>, vector<1x4x128xbf16>
    %261 = vector.shape_cast %260 : vector<1x4x128xbf16> to vector<4x128xbf16>
    %262 = arith.extf %261 : vector<4x128xbf16> to vector<4x128xf32>
    %cst_130 = arith.constant 0.000000e+00 : f32
    %263 = vector.broadcast %cst_130 : f32 to vector<4x128xf32>
    %264 = arith.maximumf %262, %263 : vector<4x128xf32>
    %c44 = arith.constant 44 : index
    %c0_131 = arith.constant 0 : index
    %c0_132 = arith.constant 0 : index
    %265 = vector.load %arg1[%c44, %c0_131, %c0_132] : memref<64x4x128xbf16, #tpu.memory_space<vmem>>, vector<1x4x128xbf16>
    %266 = vector.shape_cast %265 : vector<1x4x128xbf16> to vector<4x128xbf16>
    %267 = arith.extf %266 : vector<4x128xbf16> to vector<4x128xf32>
    %cst_133 = arith.constant 0.000000e+00 : f32
    %268 = vector.broadcast %cst_133 : f32 to vector<4x128xf32>
    %269 = arith.maximumf %267, %268 : vector<4x128xf32>
    %c45 = arith.constant 45 : index
    %c0_134 = arith.constant 0 : index
    %c0_135 = arith.constant 0 : index
    %270 = vector.load %arg1[%c45, %c0_134, %c0_135] : memref<64x4x128xbf16, #tpu.memory_space<vmem>>, vector<1x4x128xbf16>
    %271 = vector.shape_cast %270 : vector<1x4x128xbf16> to vector<4x128xbf16>
    %272 = arith.extf %271 : vector<4x128xbf16> to vector<4x128xf32>
    %cst_136 = arith.constant 0.000000e+00 : f32
    %273 = vector.broadcast %cst_136 : f32 to vector<4x128xf32>
    %274 = arith.maximumf %272, %273 : vector<4x128xf32>
    %c46 = arith.constant 46 : index
    %c0_137 = arith.constant 0 : index
    %c0_138 = arith.constant 0 : index
    %275 = vector.load %arg1[%c46, %c0_137, %c0_138] : memref<64x4x128xbf16, #tpu.memory_space<vmem>>, vector<1x4x128xbf16>
    %276 = vector.shape_cast %275 : vector<1x4x128xbf16> to vector<4x128xbf16>
    %277 = arith.extf %276 : vector<4x128xbf16> to vector<4x128xf32>
    %cst_139 = arith.constant 0.000000e+00 : f32
    %278 = vector.broadcast %cst_139 : f32 to vector<4x128xf32>
    %279 = arith.maximumf %277, %278 : vector<4x128xf32>
    %c47 = arith.constant 47 : index
    %c0_140 = arith.constant 0 : index
    %c0_141 = arith.constant 0 : index
    %280 = vector.load %arg1[%c47, %c0_140, %c0_141] : memref<64x4x128xbf16, #tpu.memory_space<vmem>>, vector<1x4x128xbf16>
    %281 = vector.shape_cast %280 : vector<1x4x128xbf16> to vector<4x128xbf16>
    %282 = arith.extf %281 : vector<4x128xbf16> to vector<4x128xf32>
    %cst_142 = arith.constant 0.000000e+00 : f32
    %283 = vector.broadcast %cst_142 : f32 to vector<4x128xf32>
    %284 = arith.maximumf %282, %283 : vector<4x128xf32>
    %285 = arith.addf %264, %269 : vector<4x128xf32>
    %286 = arith.addf %249, %254 : vector<4x128xf32>
    %287 = arith.addf %286, %259 : vector<4x128xf32>
    %288 = arith.addf %287, %285 : vector<4x128xf32>
    %289 = arith.addf %285, %274 : vector<4x128xf32>
    %290 = arith.addf %289, %279 : vector<4x128xf32>
    %291 = arith.addf %290, %284 : vector<4x128xf32>
    %292 = arith.addf %243, %288 : vector<4x128xf32>
    %293 = arith.addf %244, %291 : vector<4x128xf32>
    %c48 = arith.constant 48 : index
    %c0_143 = arith.constant 0 : index
    %c0_144 = arith.constant 0 : index
    %294 = vector.load %arg1[%c48, %c0_143, %c0_144] : memref<64x4x128xbf16, #tpu.memory_space<vmem>>, vector<1x4x128xbf16>
    %295 = vector.shape_cast %294 : vector<1x4x128xbf16> to vector<4x128xbf16>
    %296 = arith.extf %295 : vector<4x128xbf16> to vector<4x128xf32>
    %cst_145 = arith.constant 0.000000e+00 : f32
    %297 = vector.broadcast %cst_145 : f32 to vector<4x128xf32>
    %298 = arith.maximumf %296, %297 : vector<4x128xf32>
    %c49 = arith.constant 49 : index
    %c0_146 = arith.constant 0 : index
    %c0_147 = arith.constant 0 : index
    %299 = vector.load %arg1[%c49, %c0_146, %c0_147] : memref<64x4x128xbf16, #tpu.memory_space<vmem>>, vector<1x4x128xbf16>
    %300 = vector.shape_cast %299 : vector<1x4x128xbf16> to vector<4x128xbf16>
    %301 = arith.extf %300 : vector<4x128xbf16> to vector<4x128xf32>
    %cst_148 = arith.constant 0.000000e+00 : f32
    %302 = vector.broadcast %cst_148 : f32 to vector<4x128xf32>
    %303 = arith.maximumf %301, %302 : vector<4x128xf32>
    %c50 = arith.constant 50 : index
    %c0_149 = arith.constant 0 : index
    %c0_150 = arith.constant 0 : index
    %304 = vector.load %arg1[%c50, %c0_149, %c0_150] : memref<64x4x128xbf16, #tpu.memory_space<vmem>>, vector<1x4x128xbf16>
    %305 = vector.shape_cast %304 : vector<1x4x128xbf16> to vector<4x128xbf16>
    %306 = arith.extf %305 : vector<4x128xbf16> to vector<4x128xf32>
    %cst_151 = arith.constant 0.000000e+00 : f32
    %307 = vector.broadcast %cst_151 : f32 to vector<4x128xf32>
    %308 = arith.maximumf %306, %307 : vector<4x128xf32>
    %c51 = arith.constant 51 : index
    %c0_152 = arith.constant 0 : index
    %c0_153 = arith.constant 0 : index
    %309 = vector.load %arg1[%c51, %c0_152, %c0_153] : memref<64x4x128xbf16, #tpu.memory_space<vmem>>, vector<1x4x128xbf16>
    %310 = vector.shape_cast %309 : vector<1x4x128xbf16> to vector<4x128xbf16>
    %311 = arith.extf %310 : vector<4x128xbf16> to vector<4x128xf32>
    %cst_154 = arith.constant 0.000000e+00 : f32
    %312 = vector.broadcast %cst_154 : f32 to vector<4x128xf32>
    %313 = arith.maximumf %311, %312 : vector<4x128xf32>
    %c52 = arith.constant 52 : index
    %c0_155 = arith.constant 0 : index
    %c0_156 = arith.constant 0 : index
    %314 = vector.load %arg1[%c52, %c0_155, %c0_156] : memref<64x4x128xbf16, #tpu.memory_space<vmem>>, vector<1x4x128xbf16>
    %315 = vector.shape_cast %314 : vector<1x4x128xbf16> to vector<4x128xbf16>
    %316 = arith.extf %315 : vector<4x128xbf16> to vector<4x128xf32>
    %cst_157 = arith.constant 0.000000e+00 : f32
    %317 = vector.broadcast %cst_157 : f32 to vector<4x128xf32>
    %318 = arith.maximumf %316, %317 : vector<4x128xf32>
    %c53 = arith.constant 53 : index
    %c0_158 = arith.constant 0 : index
    %c0_159 = arith.constant 0 : index
    %319 = vector.load %arg1[%c53, %c0_158, %c0_159] : memref<64x4x128xbf16, #tpu.memory_space<vmem>>, vector<1x4x128xbf16>
    %320 = vector.shape_cast %319 : vector<1x4x128xbf16> to vector<4x128xbf16>
    %321 = arith.extf %320 : vector<4x128xbf16> to vector<4x128xf32>
    %cst_160 = arith.constant 0.000000e+00 : f32
    %322 = vector.broadcast %cst_160 : f32 to vector<4x128xf32>
    %323 = arith.maximumf %321, %322 : vector<4x128xf32>
    %c54 = arith.constant 54 : index
    %c0_161 = arith.constant 0 : index
    %c0_162 = arith.constant 0 : index
    %324 = vector.load %arg1[%c54, %c0_161, %c0_162] : memref<64x4x128xbf16, #tpu.memory_space<vmem>>, vector<1x4x128xbf16>
    %325 = vector.shape_cast %324 : vector<1x4x128xbf16> to vector<4x128xbf16>
    %326 = arith.extf %325 : vector<4x128xbf16> to vector<4x128xf32>
    %cst_163 = arith.constant 0.000000e+00 : f32
    %327 = vector.broadcast %cst_163 : f32 to vector<4x128xf32>
    %328 = arith.maximumf %326, %327 : vector<4x128xf32>
    %c55 = arith.constant 55 : index
    %c0_164 = arith.constant 0 : index
    %c0_165 = arith.constant 0 : index
    %329 = vector.load %arg1[%c55, %c0_164, %c0_165] : memref<64x4x128xbf16, #tpu.memory_space<vmem>>, vector<1x4x128xbf16>
    %330 = vector.shape_cast %329 : vector<1x4x128xbf16> to vector<4x128xbf16>
    %331 = arith.extf %330 : vector<4x128xbf16> to vector<4x128xf32>
    %cst_166 = arith.constant 0.000000e+00 : f32
    %332 = vector.broadcast %cst_166 : f32 to vector<4x128xf32>
    %333 = arith.maximumf %331, %332 : vector<4x128xf32>
    %334 = arith.addf %313, %318 : vector<4x128xf32>
    %335 = arith.addf %298, %303 : vector<4x128xf32>
    %336 = arith.addf %335, %308 : vector<4x128xf32>
    %337 = arith.addf %336, %334 : vector<4x128xf32>
    %338 = arith.addf %334, %323 : vector<4x128xf32>
    %339 = arith.addf %338, %328 : vector<4x128xf32>
    %340 = arith.addf %339, %333 : vector<4x128xf32>
    %341 = arith.addf %292, %337 : vector<4x128xf32>
    %342 = arith.addf %293, %340 : vector<4x128xf32>
    %c56 = arith.constant 56 : index
    %c0_167 = arith.constant 0 : index
    %c0_168 = arith.constant 0 : index
    %343 = vector.load %arg1[%c56, %c0_167, %c0_168] : memref<64x4x128xbf16, #tpu.memory_space<vmem>>, vector<1x4x128xbf16>
    %344 = vector.shape_cast %343 : vector<1x4x128xbf16> to vector<4x128xbf16>
    %345 = arith.extf %344 : vector<4x128xbf16> to vector<4x128xf32>
    %cst_169 = arith.constant 0.000000e+00 : f32
    %346 = vector.broadcast %cst_169 : f32 to vector<4x128xf32>
    %347 = arith.maximumf %345, %346 : vector<4x128xf32>
    %c57 = arith.constant 57 : index
    %c0_170 = arith.constant 0 : index
    %c0_171 = arith.constant 0 : index
    %348 = vector.load %arg1[%c57, %c0_170, %c0_171] : memref<64x4x128xbf16, #tpu.memory_space<vmem>>, vector<1x4x128xbf16>
    %349 = vector.shape_cast %348 : vector<1x4x128xbf16> to vector<4x128xbf16>
    %350 = arith.extf %349 : vector<4x128xbf16> to vector<4x128xf32>
    %cst_172 = arith.constant 0.000000e+00 : f32
    %351 = vector.broadcast %cst_172 : f32 to vector<4x128xf32>
    %352 = arith.maximumf %350, %351 : vector<4x128xf32>
    %c58 = arith.constant 58 : index
    %c0_173 = arith.constant 0 : index
    %c0_174 = arith.constant 0 : index
    %353 = vector.load %arg1[%c58, %c0_173, %c0_174] : memref<64x4x128xbf16, #tpu.memory_space<vmem>>, vector<1x4x128xbf16>
    %354 = vector.shape_cast %353 : vector<1x4x128xbf16> to vector<4x128xbf16>
    %355 = arith.extf %354 : vector<4x128xbf16> to vector<4x128xf32>
    %cst_175 = arith.constant 0.000000e+00 : f32
    %356 = vector.broadcast %cst_175 : f32 to vector<4x128xf32>
    %357 = arith.maximumf %355, %356 : vector<4x128xf32>
    %c59 = arith.constant 59 : index
    %c0_176 = arith.constant 0 : index
    %c0_177 = arith.constant 0 : index
    %358 = vector.load %arg1[%c59, %c0_176, %c0_177] : memref<64x4x128xbf16, #tpu.memory_space<vmem>>, vector<1x4x128xbf16>
    %359 = vector.shape_cast %358 : vector<1x4x128xbf16> to vector<4x128xbf16>
    %360 = arith.extf %359 : vector<4x128xbf16> to vector<4x128xf32>
    %cst_178 = arith.constant 0.000000e+00 : f32
    %361 = vector.broadcast %cst_178 : f32 to vector<4x128xf32>
    %362 = arith.maximumf %360, %361 : vector<4x128xf32>
    %c60 = arith.constant 60 : index
    %c0_179 = arith.constant 0 : index
    %c0_180 = arith.constant 0 : index
    %363 = vector.load %arg1[%c60, %c0_179, %c0_180] : memref<64x4x128xbf16, #tpu.memory_space<vmem>>, vector<1x4x128xbf16>
    %364 = vector.shape_cast %363 : vector<1x4x128xbf16> to vector<4x128xbf16>
    %365 = arith.extf %364 : vector<4x128xbf16> to vector<4x128xf32>
    %cst_181 = arith.constant 0.000000e+00 : f32
    %366 = vector.broadcast %cst_181 : f32 to vector<4x128xf32>
    %367 = arith.maximumf %365, %366 : vector<4x128xf32>
    %c61 = arith.constant 61 : index
    %c0_182 = arith.constant 0 : index
    %c0_183 = arith.constant 0 : index
    %368 = vector.load %arg1[%c61, %c0_182, %c0_183] : memref<64x4x128xbf16, #tpu.memory_space<vmem>>, vector<1x4x128xbf16>
    %369 = vector.shape_cast %368 : vector<1x4x128xbf16> to vector<4x128xbf16>
    %370 = arith.extf %369 : vector<4x128xbf16> to vector<4x128xf32>
    %cst_184 = arith.constant 0.000000e+00 : f32
    %371 = vector.broadcast %cst_184 : f32 to vector<4x128xf32>
    %372 = arith.maximumf %370, %371 : vector<4x128xf32>
    %c62 = arith.constant 62 : index
    %c0_185 = arith.constant 0 : index
    %c0_186 = arith.constant 0 : index
    %373 = vector.load %arg1[%c62, %c0_185, %c0_186] : memref<64x4x128xbf16, #tpu.memory_space<vmem>>, vector<1x4x128xbf16>
    %374 = vector.shape_cast %373 : vector<1x4x128xbf16> to vector<4x128xbf16>
    %375 = arith.extf %374 : vector<4x128xbf16> to vector<4x128xf32>
    %cst_187 = arith.constant 0.000000e+00 : f32
    %376 = vector.broadcast %cst_187 : f32 to vector<4x128xf32>
    %377 = arith.maximumf %375, %376 : vector<4x128xf32>
    %c63 = arith.constant 63 : index
    %c0_188 = arith.constant 0 : index
    %c0_189 = arith.constant 0 : index
    %378 = vector.load %arg1[%c63, %c0_188, %c0_189] : memref<64x4x128xbf16, #tpu.memory_space<vmem>>, vector<1x4x128xbf16>
    %379 = vector.shape_cast %378 : vector<1x4x128xbf16> to vector<4x128xbf16>
    %380 = arith.extf %379 : vector<4x128xbf16> to vector<4x128xf32>
    %cst_190 = arith.constant 0.000000e+00 : f32
    %381 = vector.broadcast %cst_190 : f32 to vector<4x128xf32>
    %382 = arith.maximumf %380, %381 : vector<4x128xf32>
    %383 = arith.addf %362, %367 : vector<4x128xf32>
    %384 = arith.addf %347, %352 : vector<4x128xf32>
    %385 = arith.addf %384, %357 : vector<4x128xf32>
    %386 = arith.addf %385, %383 : vector<4x128xf32>
    %387 = arith.addf %383, %372 : vector<4x128xf32>
    %388 = arith.addf %387, %377 : vector<4x128xf32>
    %389 = arith.addf %388, %382 : vector<4x128xf32>
    %390 = arith.addf %341, %386 : vector<4x128xf32>
    %391 = arith.addf %342, %389 : vector<4x128xf32>
    %392 = tpu.concatenate %241, %242, %390, %391 in 0 : vector<4x128xf32>, vector<4x128xf32>, vector<4x128xf32>, vector<4x128xf32> -> vector<16x128xf32>
    %393 = arith.truncf %392 : vector<16x128xf32> to vector<16x128xbf16>
    %c0_191 = arith.constant 0 : index
    %c0_192 = arith.constant 0 : index
    %394 = vector.load %arg2[%c0_191, %c0_192] : memref<512x16xbf16, #tpu.memory_space<vmem>>, vector<512x16xbf16>
    %cst_193 = arith.constant dense<0.000000e+00> : vector<512x128xf32>
    %395 = tpu.matmul %394, %393, %cst_193 {dimension_numbers = #tpu.dot_dimension_numbers<[1], [0], [0], [1], [0, 0, 1, 1], [], []>} : vector<512x16xbf16>, vector<16x128xbf16>, vector<512x128xf32> -> vector<512x128xf32>
    %c0_194 = arith.constant 0 : index
    %c0_195 = arith.constant 0 : index
    %396 = vector.load %arg3[%c0_194, %c0_195] : memref<512x1xf32, #tpu.memory_space<vmem>>, vector<512x1xf32>
    %397 = vector.broadcast %396 : vector<512x1xf32> to vector<512x128xf32>
    %398 = arith.addf %395, %397 : vector<512x128xf32>
    %cst_196 = arith.constant 0.000000e+00 : f32
    %399 = vector.broadcast %cst_196 : f32 to vector<512x128xf32>
    %400 = arith.maximumf %398, %399 : vector<512x128xf32>
    %401 = arith.truncf %400 : vector<512x128xf32> to vector<512x128xbf16>
    %c0_197 = arith.constant 0 : index
    %c0_198 = arith.constant 0 : index
    %402 = vector.load %arg4[%c0_197, %c0_198] : memref<768x512xbf16, #tpu.memory_space<vmem>>, vector<768x512xbf16>
    %cst_199 = arith.constant dense<0.000000e+00> : vector<768x128xf32>
    %403 = tpu.matmul %402, %401, %cst_199 {dimension_numbers = #tpu.dot_dimension_numbers<[1], [0], [0], [1], [0, 0, 1, 1], [], []>} : vector<768x512xbf16>, vector<512x128xbf16>, vector<768x128xf32> -> vector<768x128xf32>
    %c0_200 = arith.constant 0 : index
    %c0_201 = arith.constant 0 : index
    %404 = vector.load %arg5[%c0_200, %c0_201] : memref<768x1xf32, #tpu.memory_space<vmem>>, vector<768x1xf32>
    %405 = vector.broadcast %404 : vector<768x1xf32> to vector<768x128xf32>
    %406 = arith.addf %403, %405 : vector<768x128xf32>
    %cst_202 = arith.constant 0.000000e+00 : f32
    %407 = vector.broadcast %cst_202 : f32 to vector<768x128xf32>
    %408 = arith.maximumf %406, %407 : vector<768x128xf32>
    %c0_203 = arith.constant 0 : index
    %c0_204 = arith.constant 0 : index
    %409 = vector.load %arg6[%c0_203, %c0_204] : memref<128x768xbf16, #tpu.memory_space<vmem>>, vector<128x768xbf16>
    %410 = arith.truncf %408 : vector<768x128xf32> to vector<768x128xbf16>
    %cst_205 = arith.constant dense<0.000000e+00> : vector<128x128xf32>
    %411 = tpu.matmul %409, %410, %cst_205 {dimension_numbers = #tpu.dot_dimension_numbers<[1], [0], [0], [1], [0, 0, 1, 1], [], []>} : vector<128x768xbf16>, vector<768x128xbf16>, vector<128x128xf32> -> vector<128x128xf32>
    %c0_206 = arith.constant 0 : index
    %c0_207 = arith.constant 0 : index
    %412 = vector.load %arg7[%c0_206, %c0_207] : memref<128x1xf32, #tpu.memory_space<vmem>>, vector<128x1xf32>
    %413 = vector.broadcast %412 : vector<128x1xf32> to vector<128x128xf32>
    %414 = arith.addf %411, %413 : vector<128x128xf32>
    %c0_208 = arith.constant 0 : index
    %c0_209 = arith.constant 0 : index
    %415 = vector.load %arg8[%c0_208, %c0_209] : memref<128x128xf32, #tpu.memory_space<vmem>>, vector<128x128xf32>
    tpu.vector_store %arg8[%c0_208, %c0_209], %414 {strides = array<i32>} : memref<128x128xf32, #tpu.memory_space<vmem>>, vector<128x128xf32>,
    return
  }
  func.func @transform_0(%arg0: i32) -> (i32, i32, i32) {
    %c0_i32 = arith.constant 0 : i32
    %c0_i32_0 = arith.constant 0 : i32
    %c0_i32_1 = arith.constant 0 : i32
    return %c0_i32, %c0_i32_0, %arg0 : i32, i32, i32
  }
  func.func @transform_1(%arg0: i32) -> (i32, i32) {
    %c0_i32 = arith.constant 0 : i32
    %c0_i32_0 = arith.constant 0 : i32
    %c0_i32_1 = arith.constant 0 : i32
    return %c0_i32, %c0_i32_0 : i32, i32
  }
  func.func @transform_2(%arg0: i32) -> (i32, i32) {
    %c0_i32 = arith.constant 0 : i32
    %c0_i32_0 = arith.constant 0 : i32
    %c0_i32_1 = arith.constant 0 : i32
    return %c0_i32, %c0_i32_0 : i32, i32
  }
  func.func @transform_3(%arg0: i32) -> (i32, i32) {
    %c0_i32 = arith.constant 0 : i32
    %c0_i32_0 = arith.constant 0 : i32
    %c0_i32_1 = arith.constant 0 : i32
    return %c0_i32, %c0_i32_0 : i32, i32
  }
  func.func @transform_4(%arg0: i32) -> (i32, i32) {
    %c0_i32 = arith.constant 0 : i32
    %c0_i32_0 = arith.constant 0 : i32
    %c0_i32_1 = arith.constant 0 : i32
    return %c0_i32, %c0_i32_0 : i32, i32
  }
  func.func @transform_5(%arg0: i32) -> (i32, i32) {
    %c0_i32 = arith.constant 0 : i32
    %c0_i32_0 = arith.constant 0 : i32
    %c0_i32_1 = arith.constant 0 : i32
    return %c0_i32, %c0_i32_0 : i32, i32
  }
  func.func @transform_6(%arg0: i32) -> (i32, i32) {
    %c0_i32 = arith.constant 0 : i32
    %c0_i32_0 = arith.constant 0 : i32
    %c0_i32_1 = arith.constant 0 : i32
    return %c0_i32, %c0_i32_0 : i32, i32
  }
  func.func @transform_7(%arg0: i32) -> (i32, i32) {
    %c0_i32 = arith.constant 0 : i32
    %c0_i32_0 = arith.constant 0 : i32
    return %c0_i32, %arg0 : i32, i32
  }
}

</mosaic_0001>

<bundles_post_ra>
// kernel: aux_head_cifar.2
= control target key start
LH: loop header
LB: loop body
LE: loop exit
PB: predicated region body
PF: predicated region fallthrough
CT: control target
= control target key end

     0   :  { %s12316_s0 = inlined_call_operand.vmem [shape: bf16[512,16], index: 0, kind: input, shape index: {}]   ;;  %s12317_s1 = inlined_call_operand.vmem [shape: f32[512,1], index: 1, kind: input, shape index: {}]   ;;  %s12318_s2 = inlined_call_operand.vmem [shape: bf16[768,512], index: 2, kind: input, shape index: {}]   ;;  %s12319_s3 = inlined_call_operand.vmem [shape: f32[768,1], index: 3, kind: input, shape index: {}]   ;;  %s12320_s4 = inlined_call_operand.vmem [shape: bf16[128,768], index: 4, kind: input, shape index: {}]   ;;  %s12321_s5 = inlined_call_operand.vmem [shape: f32[128,1], index: 5, kind: input, shape index: {}]   ;;  %s12322_s6 = inlined_call_operand.vmem [shape: bf16[64,4,2], index: 6, kind: input, shape index: {}]   ;;  %s12323_s7 = inlined_call_operand.<no memory space> [shape: bf16[], index: 7, kind: input, shape index: {}]   ;;  %s12324_s8 = inlined_call_operand.vmem [shape: f32[128,128], index: 8, kind: output, shape index: {}]  }
   0x1   :  { %v13_v0 = vstv %s12323_s7 }
   0x2   :  { %v8019_v1 = vunpack.i.l.bf16 %v13_v0 }
   0x3   :  { %v2082_v2 = vld [vmem:[%s12317_s1 + $0x170] sm:$0xff]  ;;  %v41_v5 = vlaneseq  ;;  %v7970_v6 = vmov 0   ;;  %v38_v9 = vld [vmem:[%s12322_s6] sm:$0x3]  ;;  %v6508_v10 = vld [vmem:[%s12322_s6 + $0x2] sm:$0x3] }
   0x4   :  { %v2066_v3 = vld [vmem:[%s12317_s1 + $0xf0] sm:$0xff]  ;;  %7969 = vset.pattern.permute.xlu2 %v7970_v6  ;;  %7968 = vset.pattern.permute.xlu1 %v7970_v6  ;;  %v39_v11 = vunpack.c.l.bf16 %v38_v9  ;;  %v63_v12 = vunpack.c.l.bf16 %v6508_v10  ;;  %v6509_v13 = vld [vmem:[%s12322_s6 + $0x4] sm:$0x3]  ;;  %v6510_v14 = vld [vmem:[%s12322_s6 + $0x6] sm:$0x3]  ;;  %vm1968_vm2 = vcmask 1043456  }
   0x5   :  { %v2050_v4 = vld [vmem:[%s12317_s1 + $0x70] sm:$0xff]  ;;  %7967 = vset.pattern.permute.xlu0 %v7970_v6  ;;  %2332 = vperm.xlu1 %7968, %v2082_v2   ;;  %v8030_v7 = vshrl.u32 %v41_v5, 7  ;;  %v8032_v8 = vand.u32 127, %v41_v5  ;;  %v6511_v15 = vld [vmem:[%s12322_s6 + $0x8] sm:$0x3]  ;;  %v2083_v16 = vld [vmem:[%s12317_s1 + $0x178] sm:$0xff]  ;;  %v88_v17 = vunpack.c.l.bf16 %v6509_v13  ;;  %v113_v18 = vunpack.c.l.bf16 %v6510_v14 }
   0x6   :  { %2252 = vperm.xlu0 %7967, %v2066_v3   ;;  %2172 = vperm.xlu2 %7969, %v2050_v4   ;;  %v138_v19 = vunpack.c.l.bf16 %v6511_v15  ;;  %v6512_v20 = vld [vmem:[%s12322_s6 + $0xa] sm:$0x3]  ;;  %v6513_v21 = vld [vmem:[%s12322_s6 + $0xc] sm:$0x3]  ;;  %v2067_v22 = vld [vmem:[%s12317_s1 + $0xf8] sm:$0xff]  ;;  %vm2580_vm3 = vcmask 130048  }
   0x7   :  { %vm44_vm0 = vcmp.lt.s32.totalorder %v8030_v7, 4  ;;  %vm49_vm1 = vcmp.lt.s32.totalorder %v8032_v8, 2  ;;  %v2051_v23 = vld [vmem:[%s12317_s1 + $0x78] sm:$0xff]  ;;  %v163_v26 = vunpack.c.l.bf16 %v6512_v20  ;;  %v188_v27 = vunpack.c.l.bf16 %v6513_v21  ;;  %v6514_v32 = vld [vmem:[%s12322_s6 + $0xe] sm:$0x3]  ;;  %v2064_v55 = vld [vmem:[%s12317_s1 + $0xe0] sm:$0xff] }
   0x8   :  { %v45_v24 = vsel %vm44_vm0, %v39_v11, %v8019_v1  ;;  %v69_v25 = vsel %vm44_vm0, %v63_v12, %v8019_v1  ;;  %v94_v30 = vsel %vm44_vm0, %v88_v17, %v8019_v1  ;;  %v119_v31 = vsel %vm44_vm0, %v113_v18, %v8019_v1  ;;  %v6515_v37 = vld [vmem:[%s12322_s6 + $0x10] sm:$0x3]  ;;  %v6516_v42 = vld [vmem:[%s12322_s6 + $0x12] sm:$0x3]  ;;  %v6517_v43 = vld [vmem:[%s12322_s6 + $0x14] sm:$0x3] }
   0x9   :  { %v50_v28 = vsel %vm49_vm1, %v45_v24, %v8019_v1  ;;  %v74_v29 = vsel %vm49_vm1, %v69_v25, %v8019_v1  ;;  %v99_v35 = vsel %vm49_vm1, %v94_v30, %v8019_v1  ;;  %v124_v36 = vsel %vm49_vm1, %v119_v31, %v8019_v1  ;;  %v6518_v48 = vld [vmem:[%s12322_s6 + $0x16] sm:$0x3]  ;;  %v6519_v49 = vld [vmem:[%s12322_s6 + $0x18] sm:$0x3]  ;;  %v2065_v50 = vld [vmem:[%s12317_s1 + $0xe8] sm:$0xff] }
   0xa   :  { %v51_v33 = vpack.c.bf16 0.0, %v50_v28  ;;  %v76_v34 = vpack.c.bf16 0.0, %v74_v29  ;;  %v101_v38 = vpack.c.bf16 0.0, %v99_v35  ;;  %v126_v39 = vpack.c.bf16 0.0, %v124_v36  ;;  %v6520_v60 = vld [vmem:[%s12322_s6 + $0x1a] sm:$0x3] }
   0xb   :  { %v144_v40 = vsel %vm44_vm0, %v138_v19, %v8019_v1  ;;  %v169_v41 = vsel %vm44_vm0, %v163_v26, %v8019_v1  ;;  %v194_v46 = vsel %vm44_vm0, %v188_v27, %v8019_v1  ;;  %v213_v47 = vunpack.c.l.bf16 %v6514_v32  ;;  %v6521_v61 = vld [vmem:[%s12322_s6 + $0x1c] sm:$0x3]  ;;  %v6522_v3 = vld [vmem:[%s12322_s6 + $0x1e] sm:$0x3]  ;;  %v6523_v4 = vld [vmem:[%s12322_s6 + $0x20] sm:$0x3] }
   0xc   :  { %54 = vst [vmem:[#allocation7] sm:$0x3] %v51_v33  ;;  %v149_v44 = vsel %vm49_vm1, %v144_v40, %v8019_v1  ;;  %v174_v45 = vsel %vm49_vm1, %v169_v41, %v8019_v1  ;;  %v199_v53 = vsel %vm49_vm1, %v194_v46, %v8019_v1  ;;  %v238_v54 = vunpack.c.l.bf16 %v6515_v37  ;;  %v2080_v5 = vld [vmem:[%s12317_s1 + $0x160] sm:$0xff]  ;;  %v2081_v36 = vld [vmem:[%s12317_s1 + $0x168] sm:$0xff] }
   0xd   :  { %2337 = vperm.xlu1 %7968, %v2083_v16   ;;  %79 = vst [vmem:[#allocation7 + $0x2] sm:$0x3] %v76_v34  ;;  %v151_v51 = vpack.c.bf16 0.0, %v149_v44  ;;  %v176_v52 = vpack.c.bf16 0.0, %v174_v45  ;;  %v201_v56 = vpack.c.bf16 0.0, %v199_v53  ;;  %v219_v57 = vsel %vm44_vm0, %v213_v47, %v8019_v1  ;;  %v2048_v31 = vld [vmem:[%s12317_s1 + $0x60] sm:$0xff] }
   0xe   :  { %2257 = vperm.xlu0 %7967, %v2067_v22   ;;  %2177 = vperm.xlu2 %7969, %v2051_v23   ;;  %104 = vst [vmem:[#allocation7 + $0x4] sm:$0x3] %v101_v38  ;;  %v263_v58 = vunpack.c.l.bf16 %v6516_v42  ;;  %v288_v59 = vunpack.c.l.bf16 %v6517_v43  ;;  %v224_v62 = vsel %vm49_vm1, %v219_v57, %v8019_v1  ;;  %v244_v63 = vsel %vm44_vm0, %v238_v54, %v8019_v1  ;;  %v6524_v12 = vld [vmem:[%s12322_s6 + $0x22] sm:$0x3]  ;;  %v6525_v17 = vld [vmem:[%s12322_s6 + $0x24] sm:$0x3] }
   0xf   :  { %129 = vst [vmem:[#allocation7 + $0x6] sm:$0x3] %v126_v39  ;;  %v313_v0 = vunpack.c.l.bf16 %v6518_v48  ;;  %v338_v2 = vunpack.c.l.bf16 %v6519_v49  ;;  %v226_v6 = vpack.c.bf16 0.0, %v224_v62  ;;  %v249_v9 = vsel %vm49_vm1, %v244_v63, %v8019_v1  ;;  %v6526_v22 = vld [vmem:[%s12322_s6 + $0x26] sm:$0x3]  ;;  %v2049_v37 = vld [vmem:[%s12317_s1 + $0x68] sm:$0xff] }
  0x10   :  { %154 = vst [vmem:[#allocation7 + $0x8] sm:$0x3] %v151_v51  ;;  %v269_v10 = vsel %vm44_vm0, %v263_v58, %v8019_v1  ;;  %v294_v11 = vsel %vm44_vm0, %v288_v59, %v8019_v1  ;;  %v251_v13 = vpack.c.bf16 0.0, %v249_v9  ;;  %v363_v25 = vunpack.c.l.bf16 %v6520_v60  ;;  %v6527_v42 = vld [vmem:[%s12322_s6 + $0x28] sm:$0x3] }
  0x11   :  { %179 = vst [vmem:[#allocation7 + $0xa] sm:$0x3] %v176_v52  ;;  %v274_v14 = vsel %vm49_vm1, %v269_v10, %v8019_v1  ;;  %v299_v15 = vsel %vm49_vm1, %v294_v11, %v8019_v1  ;;  %v319_v16 = vsel %vm44_vm0, %v313_v0, %v8019_v1  ;;  %v344_v21 = vsel %vm44_vm0, %v338_v2, %v8019_v1  ;;  %v6528_v43 = vld [vmem:[%s12322_s6 + $0x2a] sm:$0x3]  ;;  %v6529_v48 = vld [vmem:[%s12322_s6 + $0x2c] sm:$0x3] }
  0x12   :  { %204 = vst [vmem:[#allocation7 + $0xc] sm:$0x3] %v201_v56  ;;  %v276_v18 = vpack.c.bf16 0.0, %v274_v14  ;;  %v301_v19 = vpack.c.bf16 0.0, %v299_v15  ;;  %v324_v20 = vsel %vm49_vm1, %v319_v16, %v8019_v1  ;;  %v349_v24 = vsel %vm49_vm1, %v344_v21, %v8019_v1  ;;  %v6530_v53 = vld [vmem:[%s12322_s6 + $0x2e] sm:$0x3] }
  0x13   :  { %229 = vst [vmem:[#allocation7 + $0xe] sm:$0x3] %v226_v6  ;;  %v326_v23 = vpack.c.bf16 0.0, %v324_v20  ;;  %v388_v26 = vunpack.c.l.bf16 %v6521_v61  ;;  %v351_v27 = vpack.c.bf16 0.0, %v349_v24  ;;  %v413_v28 = vunpack.c.l.bf16 %v6522_v3  ;;  %v6531_v58 = vld [vmem:[%s12322_s6 + $0x30] sm:$0x3] }
  0x14   :  { %254 = vst [vmem:[#allocation7 + $0x10] sm:$0x3] %v251_v13  ;;  %v438_v29 = vunpack.c.l.bf16 %v6523_v4  ;;  %v463_v30 = vunpack.c.l.bf16 %v6524_v12  ;;  %v369_v32 = vsel %vm44_vm0, %v363_v25, %v8019_v1  ;;  %v488_v34 = vunpack.c.l.bf16 %v6525_v17  ;;  %v6532_v59 = vld [vmem:[%s12322_s6 + $0x32] sm:$0x3]  ;;  %v6534_v6 = vld [vmem:[%s12322_s6 + $0x36] sm:$0x3] }
  0x15   :  { %2247 = vperm.xlu1 %7968, %v2065_v50   ;;  %279 = vst [vmem:[#allocation7 + $0x12] sm:$0x3] %v276_v18  ;;  %v394_v33 = vsel %vm44_vm0, %v388_v26, %v8019_v1  ;;  %v513_v35 = vunpack.c.l.bf16 %v6526_v22  ;;  %v374_v38 = vsel %vm49_vm1, %v369_v32, %v8019_v1  ;;  %v419_v40 = vsel %vm44_vm0, %v413_v28, %v8019_v1  ;;  %v6535_v13 = vld [vmem:[%s12322_s6 + $0x38] sm:$0x3]  ;;  %v6536_v14 = vld [vmem:[%s12322_s6 + $0x3a] sm:$0x3] }
  0x16   :  { %2242 = vperm.xlu0 %7967, %v2064_v55   ;;  %2322 = vperm.xlu2 %7969, %v2080_v5   ;;  %304 = vst [vmem:[#allocation7 + $0x14] sm:$0x3] %v301_v19  ;;  %v399_v39 = vsel %vm49_vm1, %v394_v33, %v8019_v1  ;;  %v444_v41 = vsel %vm44_vm0, %v438_v29, %v8019_v1  ;;  %v376_v44 = vpack.c.bf16 0.0, %v374_v38  ;;  %v538_v57 = vunpack.c.l.bf16 %v6527_v42  ;;  %v6533_v5 = vld [vmem:[%s12322_s6 + $0x34] sm:$0x3]  ;;  %v2063_v20 = vld [vmem:[%s12317_s1 + $0xd8] sm:$0xff] }
  0x17   :  { %329 = vst [vmem:[#allocation7 + $0x16] sm:$0x3] %v326_v23  ;;  %v401_v45 = vpack.c.bf16 0.0, %v399_v39  ;;  %v424_v46 = vsel %vm49_vm1, %v419_v40, %v8019_v1  ;;  %v449_v47 = vsel %vm49_vm1, %v444_v41, %v8019_v1  ;;  %v469_v51 = vsel %vm44_vm0, %v463_v30, %v8019_v1  ;;  %v6537_v19 = vld [vmem:[%s12322_s6 + $0x3c] sm:$0x3]  ;;  %v2078_v32 = vld [vmem:[%s12317_s1 + $0x150] sm:$0xff] }
  0x18   :  { %354 = vst [vmem:[#allocation7 + $0x18] sm:$0x3] %v351_v27  ;;  %v426_v49 = vpack.c.bf16 0.0, %v424_v46  ;;  %v451_v50 = vpack.c.bf16 0.0, %v449_v47  ;;  %v494_v52 = vsel %vm44_vm0, %v488_v34, %v8019_v1  ;;  %v474_v54 = vsel %vm49_vm1, %v469_v51, %v8019_v1  ;;  %v6538_v25 = vld [vmem:[%s12322_s6 + $0x3e] sm:$0x3] }
  0x19   :  { %379 = vst [vmem:[#allocation7 + $0x1a] sm:$0x3] %v376_v44  ;;  %v499_v55 = vsel %vm49_vm1, %v494_v52, %v8019_v1  ;;  %v519_v56 = vsel %vm44_vm0, %v513_v35, %v8019_v1  ;;  %v476_v60 = vpack.c.bf16 0.0, %v474_v54  ;;  %v563_v63 = vunpack.c.l.bf16 %v6528_v43  ;;  %v6539_v30 = vld [vmem:[%s12322_s6 + $0x40] sm:$0x3] }
  0x1a   :  { %404 = vst [vmem:[#allocation7 + $0x1c] sm:$0x3] %v401_v45  ;;  %v501_v61 = vpack.c.bf16 0.0, %v499_v55  ;;  %v524_v62 = vsel %vm49_vm1, %v519_v56, %v8019_v1  ;;  %v544_v2 = vsel %vm44_vm0, %v538_v57, %v8019_v1  ;;  %v588_v3 = vunpack.c.l.bf16 %v6529_v48  ;;  %v6540_v45 = vld [vmem:[%s12322_s6 + $0x42] sm:$0x3] }
  0x1b   :  { %429 = vst [vmem:[#allocation7 + $0x1e] sm:$0x3] %v426_v49  ;;  %v526_v0 = vpack.c.bf16 0.0, %v524_v62  ;;  %v613_v4 = vunpack.c.l.bf16 %v6530_v53  ;;  %v549_v9 = vsel %vm49_vm1, %v544_v2, %v8019_v1  ;;  %v569_v10 = vsel %vm44_vm0, %v563_v63, %v8019_v1  ;;  %v6541_v49 = vld [vmem:[%s12322_s6 + $0x44] sm:$0x3]  ;;  %v2079_v62 = vld [vmem:[%s12317_s1 + $0x158] sm:$0xff] }
  0x1c   :  { %454 = vst [vmem:[#allocation7 + $0x20] sm:$0x3] %v451_v50  ;;  %v638_v11 = vunpack.c.l.bf16 %v6531_v58  ;;  %v663_v12 = vunpack.c.l.bf16 %v6532_v59  ;;  %v551_v15 = vpack.c.bf16 0.0, %v549_v9  ;;  %v574_v16 = vsel %vm49_vm1, %v569_v10, %v8019_v1  ;;  %v6542_v50 = vld [vmem:[%s12322_s6 + $0x46] sm:$0x3]  ;;  %v2098_v63 = vld [vmem:[%s12317_s1 + $0x1f0] sm:$0xff] }
  0x1d   :  { %2162 = vperm.xlu1 %7968, %v2048_v31   ;;  %479 = vst [vmem:[#allocation7 + $0x22] sm:$0x3] %v476_v60  ;;  %v594_v17 = vsel %vm44_vm0, %v588_v3, %v8019_v1  ;;  %v619_v18 = vsel %vm44_vm0, %v613_v4, %v8019_v1  ;;  %v576_v21 = vpack.c.bf16 0.0, %v574_v16  ;;  %v2062_v31 = vld [vmem:[%s12317_s1 + $0xd0] sm:$0xff]  ;;  %v688_v35 = vunpack.c.l.bf16 %v6533_v5  ;;  %v6543_v51 = vld [vmem:[%s12322_s6 + $0x48] sm:$0x3] }
  0x1e   :  { %2327 = vperm.xlu0 %7967, %v2081_v36   ;;  %2167 = vperm.xlu2 %7969, %v2049_v37   ;;  %504 = vst [vmem:[#allocation7 + $0x24] sm:$0x3] %v501_v61  ;;  %v599_v22 = vsel %vm49_vm1, %v594_v17, %v8019_v1  ;;  %v624_v23 = vsel %vm49_vm1, %v619_v18, %v8019_v1  ;;  %v713_v36 = vunpack.c.l.bf16 %v6534_v6  ;;  %v738_v38 = vunpack.c.l.bf16 %v6535_v13  ;;  %v6544_v56 = vld [vmem:[%s12322_s6 + $0x4a] sm:$0x3]  ;;  %v6545_v61 = vld [vmem:[%s12322_s6 + $0x4c] sm:$0x3] }
  0x1f   :  { %v644_v24 = vsel %vm44_vm0, %v638_v11, %v8019_v1  ;;  %529 = vst [vmem:[#allocation7 + $0x26] sm:$0x3] %v526_v0  ;;  %v601_v26 = vpack.c.bf16 0.0, %v599_v22  ;;  %v626_v27 = vpack.c.bf16 0.0, %v624_v23  ;;  %v669_v29 = vsel %vm44_vm0, %v663_v12, %v8019_v1  ;;  %v6546_v5 = vld [vmem:[%s12322_s6 + $0x4e] sm:$0x3] }
  0x20   :  { %v649_v28 = vsel %vm49_vm1, %v644_v24, %v8019_v1  ;;  %554 = vst [vmem:[#allocation7 + $0x28] sm:$0x3] %v551_v15  ;;  %v674_v34 = vsel %vm49_vm1, %v669_v29, %v8019_v1  ;;  %v763_v39 = vunpack.c.l.bf16 %v6536_v14  ;;  %v788_v40 = vunpack.c.l.bf16 %v6537_v19  ;;  %v6547_v12 = vld [vmem:[%s12322_s6 + $0x50] sm:$0x3]  ;;  %v2099_v13 = vld [vmem:[%s12317_s1 + $0x1f8] sm:$0xff] }
  0x21   :  { %v651_v33 = vpack.c.bf16 0.0, %v649_v28  ;;  %579 = vst [vmem:[#allocation7 + $0x2a] sm:$0x3] %v576_v21  ;;  %v676_v37 = vpack.c.bf16 0.0, %v674_v34  ;;  %v694_v41 = vsel %vm44_vm0, %v688_v35, %v8019_v1  ;;  %v719_v42 = vsel %vm44_vm0, %v713_v36, %v8019_v1  ;;  %v6548_v18 = vld [vmem:[%s12322_s6 + $0x52] sm:$0x3] }
  0x22   :  { %604 = vst [vmem:[#allocation7 + $0x2c] sm:$0x3] %v601_v26  ;;  %v813_v43 = vunpack.c.l.bf16 %v6538_v25  ;;  %v838_v44 = vunpack.c.l.bf16 %v6539_v30  ;;  %v699_v46 = vsel %vm49_vm1, %v694_v41, %v8019_v1  ;;  %v724_v47 = vsel %vm49_vm1, %v719_v42, %v8019_v1  ;;  %v6550_v36 = vld [vmem:[%s12322_s6 + $0x56] sm:$0x3]  ;;  %v6551_v42 = vld [vmem:[%s12322_s6 + $0x58] sm:$0x3] }
  0x23   :  { %629 = vst [vmem:[#allocation7 + $0x2e] sm:$0x3] %v626_v27  ;;  %v744_v48 = vsel %vm44_vm0, %v738_v38, %v8019_v1  ;;  %v701_v52 = vpack.c.bf16 0.0, %v699_v46  ;;  %v726_v53 = vpack.c.bf16 0.0, %v724_v47  ;;  %v769_v55 = vsel %vm44_vm0, %v763_v39, %v8019_v1 }
  0x24   :  { %654 = vst [vmem:[#allocation7 + $0x30] sm:$0x3] %v651_v33  ;;  %v749_v54 = vsel %vm49_vm1, %v744_v48, %v8019_v1  ;;  %v774_v58 = vsel %vm49_vm1, %v769_v55, %v8019_v1  ;;  %v794_v59 = vsel %vm44_vm0, %v788_v40, %v8019_v1  ;;  %v819_v60 = vsel %vm44_vm0, %v813_v43, %v8019_v1  ;;  %v6552_v43 = vld [vmem:[%s12322_s6 + $0x5a] sm:$0x3]  ;;  %v6553_v48 = vld [vmem:[%s12322_s6 + $0x5c] sm:$0x3] }
  0x25   :  { %2237 = vperm.xlu1 %7968, %v2063_v20   ;;  %679 = vst [vmem:[#allocation7 + $0x32] sm:$0x3] %v676_v37  ;;  %v751_v57 = vpack.c.bf16 0.0, %v749_v54  ;;  %v776_v0 = vpack.c.bf16 0.0, %v774_v58  ;;  %v799_v2 = vsel %vm49_vm1, %v794_v59, %v8019_v1  ;;  %v824_v3 = vsel %vm49_vm1, %v819_v60, %v8019_v1  ;;  %v2047_v37 = vld [vmem:[%s12317_s1 + $0x58] sm:$0xff]  ;;  %v2060_v54 = vld [vmem:[%s12317_s1 + $0xc0] sm:$0xff] }
  0x26   :  { %2232 = vperm.xlu0 %7967, %v2062_v31   ;;  %2312 = vperm.xlu2 %7969, %v2078_v32   ;;  %704 = vst [vmem:[#allocation7 + $0x34] sm:$0x3] %v701_v52  ;;  %v844_v4 = vsel %vm44_vm0, %v838_v44, %v8019_v1  ;;  %v801_v6 = vpack.c.bf16 0.0, %v799_v2  ;;  %v826_v9 = vpack.c.bf16 0.0, %v824_v3  ;;  %v863_v11 = vunpack.c.l.bf16 %v6540_v45  ;;  %v6549_v31 = vld [vmem:[%s12322_s6 + $0x54] sm:$0x3] }
  0x27   :  { %729 = vst [vmem:[#allocation7 + $0x36] sm:$0x3] %v726_v53  ;;  %v849_v10 = vsel %vm49_vm1, %v844_v4, %v8019_v1  ;;  %v888_v15 = vunpack.c.l.bf16 %v6541_v49  ;;  %v913_v16 = vunpack.c.l.bf16 %v6542_v50  ;;  %v938_v17 = vunpack.c.l.bf16 %v6543_v51  ;;  %v6554_v53 = vld [vmem:[%s12322_s6 + $0x5e] sm:$0x3]  ;;  %v2046_v55 = vld [vmem:[%s12317_s1 + $0x50] sm:$0xff] }
  0x28   :  { %754 = vst [vmem:[#allocation7 + $0x38] sm:$0x3] %v751_v57  ;;  %v851_v14 = vpack.c.bf16 0.0, %v849_v10  ;;  %v869_v19 = vsel %vm44_vm0, %v863_v11, %v8019_v1  ;;  %v963_v20 = vunpack.c.l.bf16 %v6544_v56  ;;  %v988_v21 = vunpack.c.l.bf16 %v6545_v61 }
  0x29   :  { %779 = vst [vmem:[#allocation7 + $0x3a] sm:$0x3] %v776_v0  ;;  %v1013_v22 = vunpack.c.l.bf16 %v6546_v5  ;;  %v874_v23 = vsel %vm49_vm1, %v869_v19, %v8019_v1  ;;  %v894_v24 = vsel %vm44_vm0, %v888_v15, %v8019_v1  ;;  %v919_v25 = vsel %vm44_vm0, %v913_v16, %v8019_v1  ;;  %v6555_v5 = vld [vmem:[%s12322_s6 + $0x60] sm:$0x3] }
  0x2a   :  { %804 = vst [vmem:[#allocation7 + $0x3c] sm:$0x3] %v801_v6  ;;  %v1038_v26 = vunpack.c.l.bf16 %v6547_v12  ;;  %v876_v27 = vpack.c.bf16 0.0, %v874_v23  ;;  %v899_v28 = vsel %vm49_vm1, %v894_v24, %v8019_v1  ;;  %v924_v29 = vsel %vm49_vm1, %v919_v25, %v8019_v1  ;;  %v6556_v6 = vld [vmem:[%s12322_s6 + $0x62] sm:$0x3] }
  0x2b   :  { %829 = vst [vmem:[#allocation7 + $0x3e] sm:$0x3] %v826_v9  ;;  %v1063_v30 = vunpack.c.l.bf16 %v6548_v18  ;;  %v901_v32 = vpack.c.bf16 0.0, %v899_v28  ;;  %v926_v33 = vpack.c.bf16 0.0, %v924_v29  ;;  %v944_v34 = vsel %vm44_vm0, %v938_v17, %v8019_v1  ;;  %v6557_v12 = vld [vmem:[%s12322_s6 + $0x64] sm:$0x3] }
  0x2c   :  { %854 = vst [vmem:[#allocation7 + $0x40] sm:$0x3] %v851_v14  ;;  %v969_v35 = vsel %vm44_vm0, %v963_v20, %v8019_v1  ;;  %v949_v38 = vsel %vm49_vm1, %v944_v34, %v8019_v1  ;;  %v994_v40 = vsel %vm44_vm0, %v988_v21, %v8019_v1  ;;  %v1019_v41 = vsel %vm44_vm0, %v1013_v22, %v8019_v1  ;;  %v6559_v18 = vld [vmem:[%s12322_s6 + $0x68] sm:$0x3]  ;;  %v6560_v23 = vld [vmem:[%s12322_s6 + $0x6a] sm:$0x3] }
  0x2d   :  { %2412 = vperm.xlu1 %7968, %v2098_v63   ;;  %879 = vst [vmem:[#allocation7 + $0x42] sm:$0x3] %v876_v27  ;;  %v974_v39 = vsel %vm49_vm1, %v969_v35, %v8019_v1  ;;  %v951_v44 = vpack.c.bf16 0.0, %v949_v38  ;;  %v999_v46 = vsel %vm49_vm1, %v994_v40, %v8019_v1  ;;  %v1024_v47 = vsel %vm49_vm1, %v1019_v41, %v8019_v1  ;;  %v6561_v28 = vld [vmem:[%s12322_s6 + $0x6c] sm:$0x3] }
  0x2e   :  { %2317 = vperm.xlu0 %7967, %v2079_v62   ;;  %2417 = vperm.xlu2 %7969, %v2099_v13   ;;  %904 = vst [vmem:[#allocation7 + $0x44] sm:$0x3] %v901_v32  ;;  %v976_v45 = vpack.c.bf16 0.0, %v974_v39  ;;  %v1001_v49 = vpack.c.bf16 0.0, %v999_v46  ;;  %v1026_v50 = vpack.c.bf16 0.0, %v1024_v47  ;;  %v1044_v51 = vsel %vm44_vm0, %v1038_v26, %v8019_v1 }
  0x2f   :  { %929 = vst [vmem:[#allocation7 + $0x46] sm:$0x3] %v926_v33  ;;  %v1069_v52 = vsel %vm44_vm0, %v1063_v30, %v8019_v1  ;;  %v1049_v56 = vsel %vm49_vm1, %v1044_v51, %v8019_v1  ;;  %v1088_v58 = vunpack.c.l.bf16 %v6549_v31  ;;  %v1113_v59 = vunpack.c.l.bf16 %v6550_v36  ;;  %v6558_v13 = vld [vmem:[%s12322_s6 + $0x66] sm:$0x3] }
  0x30   :  { %954 = vst [vmem:[#allocation7 + $0x48] sm:$0x3] %v951_v44  ;;  %v1074_v57 = vsel %vm49_vm1, %v1069_v52, %v8019_v1  ;;  %v1051_v60 = vpack.c.bf16 0.0, %v1049_v56  ;;  %v1138_v62 = vunpack.c.l.bf16 %v6551_v42  ;;  %v1163_v63 = vunpack.c.l.bf16 %v6552_v43  ;;  %v6563_v42 = vld [vmem:[%s12322_s6 + $0x70] sm:$0x3] }
  0x31   :  { %979 = vst [vmem:[#allocation7 + $0x4a] sm:$0x3] %v976_v45  ;;  %v1076_v61 = vpack.c.bf16 0.0, %v1074_v57  ;;  %v1094_v0 = vsel %vm44_vm0, %v1088_v58, %v8019_v1  ;;  %v1119_v2 = vsel %vm44_vm0, %v1113_v59, %v8019_v1  ;;  %v1188_v3 = vunpack.c.l.bf16 %v6553_v48  ;;  %v6564_v43 = vld [vmem:[%s12322_s6 + $0x72] sm:$0x3] }
  0x32   :  { %1004 = vst [vmem:[#allocation7 + $0x4c] sm:$0x3] %v1001_v49  ;;  %v1213_v4 = vunpack.c.l.bf16 %v6554_v53  ;;  %v1099_v9 = vsel %vm49_vm1, %v1094_v0, %v8019_v1  ;;  %v1124_v10 = vsel %vm49_vm1, %v1119_v2, %v8019_v1  ;;  %v1144_v11 = vsel %vm44_vm0, %v1138_v62, %v8019_v1  ;;  %v6565_v48 = vld [vmem:[%s12322_s6 + $0x74] sm:$0x3]  ;;  %v6566_v53 = vld [vmem:[%s12322_s6 + $0x76] sm:$0x3] }
  0x33   :  { %1029 = vst [vmem:[#allocation7 + $0x4e] sm:$0x3] %v1026_v50  ;;  %v1101_v14 = vpack.c.bf16 0.0, %v1099_v9  ;;  %v1126_v15 = vpack.c.bf16 0.0, %v1124_v10  ;;  %v1149_v16 = vsel %vm49_vm1, %v1144_v11, %v8019_v1  ;;  %v1169_v17 = vsel %vm44_vm0, %v1163_v63, %v8019_v1  ;;  %v6567_v58 = vld [vmem:[%s12322_s6 + $0x78] sm:$0x3] }
  0x34   :  { %1054 = vst [vmem:[#allocation7 + $0x50] sm:$0x3] %v1051_v60  ;;  %v1151_v19 = vpack.c.bf16 0.0, %v1149_v16  ;;  %v1174_v20 = vsel %vm49_vm1, %v1169_v17, %v8019_v1  ;;  %v1194_v21 = vsel %vm44_vm0, %v1188_v3, %v8019_v1  ;;  %v1219_v22 = vsel %vm44_vm0, %v1213_v4, %v8019_v1  ;;  %v6568_v63 = vld [vmem:[%s12322_s6 + $0x7a] sm:$0x3] }
  0x35   :  { %2157 = vperm.xlu1 %7968, %v2047_v37   ;;  %1079 = vst [vmem:[#allocation7 + $0x52] sm:$0x3] %v1076_v61  ;;  %v1176_v24 = vpack.c.bf16 0.0, %v1174_v20  ;;  %v1199_v25 = vsel %vm49_vm1, %v1194_v21, %v8019_v1  ;;  %v1224_v26 = vsel %vm49_vm1, %v1219_v22, %v8019_v1  ;;  %v1238_v27 = vunpack.c.l.bf16 %v6555_v5  ;;  %v6562_v37 = vld [vmem:[%s12322_s6 + $0x6e] sm:$0x3] }
  0x36   :  { %2222 = vperm.xlu2 %7969, %v2060_v54   ;;  %2152 = vperm.xlu0 %7967, %v2046_v55   ;;  %1104 = vst [vmem:[#allocation7 + $0x54] sm:$0x3] %v1101_v14  ;;  %v1201_v29 = vpack.c.bf16 0.0, %v1199_v25  ;;  %v1226_v30 = vpack.c.bf16 0.0, %v1224_v26  ;;  %v1263_v31 = vunpack.c.l.bf16 %v6556_v6  ;;  %v1288_v32 = vunpack.c.l.bf16 %v6557_v12 }
  0x37   :  { %1129 = vst [vmem:[#allocation7 + $0x56] sm:$0x3] %v1126_v15  ;;  %v1244_v33 = vsel %vm44_vm0, %v1238_v27, %v8019_v1  ;;  %v1313_v34 = vunpack.c.l.bf16 %v6558_v13  ;;  %v1338_v35 = vunpack.c.l.bf16 %v6559_v18  ;;  %v1363_v36 = vunpack.c.l.bf16 %v6560_v23 }
  0x38   :  { %1154 = vst [vmem:[#allocation7 + $0x58] sm:$0x3] %v1151_v19  ;;  %v1249_v38 = vsel %vm49_vm1, %v1244_v33, %v8019_v1  ;;  %v1269_v39 = vsel %vm44_vm0, %v1263_v31, %v8019_v1  ;;  %v1294_v40 = vsel %vm44_vm0, %v1288_v32, %v8019_v1  ;;  %v1388_v41 = vunpack.c.l.bf16 %v6561_v28  ;;  %v6569_v19 = vld [vmem:[%s12322_s6 + $0x7c] sm:$0x3] }
  0x39   :  { %1179 = vst [vmem:[#allocation7 + $0x5a] sm:$0x3] %v1176_v24  ;;  %v1251_v44 = vpack.c.bf16 0.0, %v1249_v38  ;;  %v1274_v45 = vsel %vm49_vm1, %v1269_v39, %v8019_v1  ;;  %v1299_v46 = vsel %vm49_vm1, %v1294_v40, %v8019_v1  ;;  %v1319_v47 = vsel %vm44_vm0, %v1313_v34, %v8019_v1  ;;  %v6570_v24 = vld [vmem:[%s12322_s6 + $0x7e] sm:$0x3] }
  0x3a   :  { %1204 = vst [vmem:[#allocation7 + $0x5c] sm:$0x3] %v1201_v29  ;;  %v1276_v49 = vpack.c.bf16 0.0, %v1274_v45  ;;  %v1301_v50 = vpack.c.bf16 0.0, %v1299_v46  ;;  %v1324_v51 = vsel %vm49_vm1, %v1319_v47, %v8019_v1  ;;  %v1344_v52 = vsel %vm44_vm0, %v1338_v35, %v8019_v1  ;;  %v1631_v29 = vld [vmem:[#allocation7] sm:$0x3] }
  0x3b   :  { %1229 = vst [vmem:[#allocation7 + $0x5e] sm:$0x3] %v1226_v30  ;;  %v1326_v54 = vpack.c.bf16 0.0, %v1324_v51  ;;  %v1349_v55 = vsel %vm49_vm1, %v1344_v52, %v8019_v1  ;;  %v1369_v56 = vsel %vm44_vm0, %v1363_v36, %v8019_v1  ;;  %v1394_v57 = vsel %vm44_vm0, %v1388_v41, %v8019_v1  ;;  %v1643_v30 = vld [vmem:[#allocation7 + $0x6] sm:$0x3] }
  0x3c   :  { %1254 = vst [vmem:[#allocation7 + $0x60] sm:$0x3] %v1251_v44  ;;  %v1351_v59 = vpack.c.bf16 0.0, %v1349_v55  ;;  %v1374_v60 = vsel %vm49_vm1, %v1369_v56, %v8019_v1  ;;  %v1399_v61 = vsel %vm49_vm1, %v1394_v57, %v8019_v1  ;;  %v1413_v62 = vunpack.c.l.bf16 %v6562_v37  ;;  %v1647_v35 = vld [vmem:[#allocation7 + $0x8] sm:$0x3] }
  0x3d   :  { %1279 = vst [vmem:[#allocation7 + $0x62] sm:$0x3] %v1276_v49  ;;  %v1376_v0 = vpack.c.bf16 0.0, %v1374_v60  ;;  %v1401_v2 = vpack.c.bf16 0.0, %v1399_v61  ;;  %v1438_v3 = vunpack.c.l.bf16 %v6563_v42  ;;  %v1463_v4 = vunpack.c.l.bf16 %v6564_v43  ;;  %v1635_v39 = vld [vmem:[#allocation7 + $0x2] sm:$0x3] }
  0x3e   :  { %1304 = vst [vmem:[#allocation7 + $0x64] sm:$0x3] %v1301_v50  ;;  %v1419_v5 = vsel %vm44_vm0, %v1413_v62, %v8019_v1  ;;  %v1488_v6 = vunpack.c.l.bf16 %v6565_v48  ;;  %v1513_v9 = vunpack.c.l.bf16 %v6566_v53  ;;  %v1538_v10 = vunpack.c.l.bf16 %v6567_v58  ;;  %v1651_v42 = vld [vmem:[#allocation7 + $0xa] sm:$0x3]  ;;  %v1655_v43 = vld [vmem:[#allocation7 + $0xc] sm:$0x3] }
  0x3f   :  { %1329 = vst [vmem:[#allocation7 + $0x66] sm:$0x3] %v1326_v54  ;;  %v1424_v11 = vsel %vm49_vm1, %v1419_v5, %v8019_v1  ;;  %v1444_v12 = vsel %vm44_vm0, %v1438_v3, %v8019_v1  ;;  %v1469_v13 = vsel %vm44_vm0, %v1463_v4, %v8019_v1  ;;  %v1563_v14 = vunpack.c.l.bf16 %v6568_v63  ;;  %v1639_v46 = vld [vmem:[#allocation7 + $0x4] sm:$0x3]  ;;  %v1659_v48 = vld [vmem:[#allocation7 + $0xe] sm:$0x3] }
  0x40   :  { %1354 = vst [vmem:[#allocation7 + $0x68] sm:$0x3] %v1351_v59  ;;  %v1426_v15 = vpack.c.bf16 0.0, %v1424_v11  ;;  %v1449_v16 = vsel %vm49_vm1, %v1444_v12, %v8019_v1  ;;  %v1474_v17 = vsel %vm49_vm1, %v1469_v13, %v8019_v1  ;;  %v1494_v18 = vsel %vm44_vm0, %v1488_v6, %v8019_v1  ;;  %v1670_v49 = vld [vmem:[#allocation7 + $0x10] sm:$0x3] }
  0x41   :  { %1379 = vst [vmem:[#allocation7 + $0x6a] sm:$0x3] %v1376_v0  ;;  %v1451_v20 = vpack.c.bf16 0.0, %v1449_v16  ;;  %v1476_v21 = vpack.c.bf16 0.0, %v1474_v17  ;;  %v1499_v22 = vsel %vm49_vm1, %v1494_v18, %v8019_v1  ;;  %v1519_v23 = vsel %vm44_vm0, %v1513_v9, %v8019_v1  ;;  %v1674_v50 = vld [vmem:[#allocation7 + $0x12] sm:$0x3] }
  0x42   :  { %1404 = vst [vmem:[#allocation7 + $0x6c] sm:$0x3] %v1401_v2  ;;  %v1501_v25 = vpack.c.bf16 0.0, %v1499_v22  ;;  %v1524_v26 = vsel %vm49_vm1, %v1519_v23, %v8019_v1  ;;  %v1544_v27 = vsel %vm44_vm0, %v1538_v10, %v8019_v1  ;;  %v1569_v28 = vsel %vm44_vm0, %v1563_v14, %v8019_v1  ;;  %v1678_v55 = vld [vmem:[#allocation7 + $0x14] sm:$0x3] }
  0x43   :  { %1429 = vst [vmem:[#allocation7 + $0x6e] sm:$0x3] %v1426_v15  ;;  %v1526_v31 = vpack.c.bf16 0.0, %v1524_v26  ;;  %v1549_v32 = vsel %vm49_vm1, %v1544_v27, %v8019_v1  ;;  %v1574_v33 = vsel %vm49_vm1, %v1569_v28, %v8019_v1  ;;  %v1588_v34 = vunpack.c.l.bf16 %v6569_v19  ;;  %v1682_v56 = vld [vmem:[#allocation7 + $0x16] sm:$0x3] }
  0x44   :  { %1454 = vst [vmem:[#allocation7 + $0x70] sm:$0x3] %v1451_v20  ;;  %v1551_v36 = vpack.c.bf16 0.0, %v1549_v32  ;;  %v1576_v37 = vpack.c.bf16 0.0, %v1574_v33  ;;  %v1613_v38 = vunpack.c.l.bf16 %v6570_v24  ;;  %v1644_v41 = vunpack.c.l.bf16 %v1643_v30  ;;  %v1686_v61 = vld [vmem:[#allocation7 + $0x18] sm:$0x3] }
  0x45   :  { %1479 = vst [vmem:[#allocation7 + $0x72] sm:$0x3] %v1476_v21  ;;  %v1594_v40 = vsel %vm44_vm0, %v1588_v34, %v8019_v1  ;;  %v1648_v47 = vunpack.c.l.bf16 %v1647_v35  ;;  %v1632_v53 = vunpack.c.l.bf16 %v1631_v29  ;;  %v1636_v54 = vunpack.c.l.bf16 %v1635_v39  ;;  %v1690_v62 = vld [vmem:[#allocation7 + $0x1a] sm:$0x3]  ;;  %v1698_v16 = vld [vmem:[#allocation7 + $0x1e] sm:$0x3] }
  0x46   :  { %1504 = vst [vmem:[#allocation7 + $0x74] sm:$0x3] %v1501_v25  ;;  %v1599_v44 = vsel %vm49_vm1, %v1594_v40, %v8019_v1  ;;  %v1619_v45 = vsel %vm44_vm0, %v1613_v38, %v8019_v1  ;;  %v1645_v58 = vmax.f32 %v1644_v41, 0.0  ;;  %v1652_v59 = vunpack.c.l.bf16 %v1651_v42  ;;  %v1723_v17 = vld [vmem:[#allocation7 + $0x26] sm:$0x3] }
  0x47   :  { %1529 = vst [vmem:[#allocation7 + $0x76] sm:$0x3] %v1526_v31  ;;  %v1601_v51 = vpack.c.bf16 0.0, %v1599_v44  ;;  %v1624_v52 = vsel %vm49_vm1, %v1619_v45, %v8019_v1  ;;  %v1649_v7 = vmax.f32 %v1648_v47, 0.0  ;;  %v1656_v60 = vunpack.c.l.bf16 %v1655_v43  ;;  %v1694_v1 = vld [vmem:[#allocation7 + $0x1c] sm:$0x3] }
  0x48   :  { %1554 = vst [vmem:[#allocation7 + $0x78] sm:$0x3] %v1551_v36  ;;  %v1626_v57 = vpack.c.bf16 0.0, %v1624_v52  ;;  %v1653_v63 = vmax.f32 %v1652_v59, 0.0  ;;  %v1671_v2 = vunpack.c.l.bf16 %v1670_v49  ;;  %v1675_v8 = vunpack.c.l.bf16 %v1674_v50  ;;  %v1727_v18 = vld [vmem:[#allocation7 + $0x28] sm:$0x3] }
  0x49   :  { %1579 = vst [vmem:[#allocation7 + $0x7a] sm:$0x3] %v1576_v37  ;;  %v8666_v0 = vadd.f32 %v1649_v7, %v1645_v58  ;;  %v1633_v3 = vmax.f32 %v1632_v53, 0.0  ;;  %v1637_v4 = vmax.f32 %v1636_v54, 0.0  ;;  %v1640_v5 = vunpack.c.l.bf16 %v1639_v46  ;;  %v1731_v22 = vld [vmem:[#allocation7 + $0x2a] sm:$0x3] }
  0x4a   :  { %1604 = vst [vmem:[#allocation7 + $0x7c] sm:$0x3] %v1601_v51  ;;  %v1660_v6 = vunpack.c.l.bf16 %v1659_v48  ;;  %v1657_v9 = vmax.f32 %v1656_v60, 0.0  ;;  %v1679_v11 = vunpack.c.l.bf16 %v1678_v55  ;;  %v1683_v12 = vunpack.c.l.bf16 %v1682_v56  ;;  %v1735_v26 = vld [vmem:[#allocation7 + $0x2c] sm:$0x3] }
  0x4b   :  { %1629 = vst [vmem:[#allocation7 + $0x7e] sm:$0x3] %v1626_v57  ;;  %v1666_v10 = vadd.f32 %v8666_v0, %v1653_v63  ;;  %v1687_v13 = vunpack.c.l.bf16 %v1686_v61  ;;  %v1691_v14 = vunpack.c.l.bf16 %v1690_v62  ;;  %v1695_v15 = vunpack.c.l.bf16 %v1694_v1  ;;  %v1711_v31 = vld [vmem:[#allocation7 + $0x20] sm:$0x3]  ;;  %v1715_v32 = vld [vmem:[#allocation7 + $0x22] sm:$0x3] }
  0x4c   :  { %v1672_v19 = vmax.f32 %v1671_v2, 0.0  ;;  %v1676_v20 = vmax.f32 %v1675_v8, 0.0  ;;  %v1684_v21 = vmax.f32 %v1683_v12, 0.0  ;;  %v1641_v23 = vmax.f32 %v1640_v5, 0.0  ;;  %v1739_v37 = vld [vmem:[#allocation7 + $0x2e] sm:$0x3] }
  0x4d   :  { %v1688_v24 = vmax.f32 %v1687_v13, 0.0  ;;  %v1692_v25 = vmax.f32 %v1691_v14, 0.0  ;;  %v1661_v27 = vmax.f32 %v1660_v6, 0.0  ;;  %v1663_v28 = vadd.f32 %v1637_v4, %v1633_v3  ;;  %v1719_v46 = vld [vmem:[#allocation7 + $0x24] sm:$0x3] }
  0x4e   :  { %v1667_v29 = vadd.f32 %v1666_v10, %v1657_v9  ;;  %v1680_v30 = vmax.f32 %v1679_v11, 0.0  ;;  %v1696_v33 = vmax.f32 %v1695_v15, 0.0  ;;  %v1699_v34 = vunpack.c.l.bf16 %v1698_v16  ;;  %v1764_v50 = vld [vmem:[#allocation7 + $0x36] sm:$0x3]  ;;  %v1752_v54 = vld [vmem:[#allocation7 + $0x30] sm:$0x3] }
  0x4f   :  { %v8669_v35 = vadd.f32 %v1688_v24, %v1684_v21  ;;  %v1724_v36 = vunpack.c.l.bf16 %v1723_v17  ;;  %v1702_v38 = vadd.f32 %v1676_v20, %v1672_v19  ;;  %v1728_v39 = vunpack.c.l.bf16 %v1727_v18  ;;  %v1768_v55 = vld [vmem:[#allocation7 + $0x38] sm:$0x3]  ;;  %v1756_v59 = vld [vmem:[#allocation7 + $0x32] sm:$0x3]  ;;  %v1772_v60 = vld [vmem:[#allocation7 + $0x3a] sm:$0x3] }
  0x50   :  { %v1732_v40 = vunpack.c.l.bf16 %v1731_v22  ;;  %v1736_v41 = vunpack.c.l.bf16 %v1735_v26  ;;  %v1712_v43 = vunpack.c.l.bf16 %v1711_v31  ;;  %v1716_v44 = vunpack.c.l.bf16 %v1715_v32  ;;  %v1776_v8 = vld [vmem:[#allocation7 + $0x3c] sm:$0x3]  ;;  %v1780_v1 = vld [vmem:[#allocation7 + $0x3e] sm:$0x3]  ;;  %v1793_v9 = vld [vmem:[#allocation7 + $0x40] sm:$0x3] }
  0x51   :  { %v1705_v42 = vadd.f32 %v8669_v35, %v1692_v25  ;;  %v1725_v45 = vmax.f32 %v1724_v36, 0.0  ;;  %v1729_v47 = vmax.f32 %v1728_v39, 0.0  ;;  %v1740_v49 = vunpack.c.l.bf16 %v1739_v37  ;;  %v1760_v12 = vld [vmem:[#allocation7 + $0x34] sm:$0x3]  ;;  %v1797_v19 = vld [vmem:[#allocation7 + $0x42] sm:$0x3] }
  0x52   :  { %v1733_v48 = vmax.f32 %v1732_v40, 0.0  ;;  %v8672_v51 = vadd.f32 %v1663_v28, %v1641_v23  ;;  %v1700_v52 = vmax.f32 %v1699_v34, 0.0  ;;  %v1668_v56 = vadd.f32 %v1667_v29, %v1661_v27  ;;  %v1805_v24 = vld [vmem:[#allocation7 + $0x46] sm:$0x3]  ;;  %v1809_v25 = vld [vmem:[#allocation7 + $0x48] sm:$0x3] }
  0x53   :  { %v1706_v53 = vadd.f32 %v1705_v42, %v1696_v33  ;;  %v8674_v57 = vadd.f32 %v1702_v38, %v1680_v30  ;;  %v1737_v58 = vmax.f32 %v1736_v41, 0.0  ;;  %v8676_v7 = vadd.f32 %v1729_v47, %v1725_v45  ;;  %v1801_v30 = vld [vmem:[#allocation7 + $0x44] sm:$0x3]  ;;  %v1813_v31 = vld [vmem:[#allocation7 + $0x4a] sm:$0x3] }
  0x54   :  { %v1713_v61 = vmax.f32 %v1712_v43, 0.0  ;;  %v1717_v62 = vmax.f32 %v1716_v44, 0.0  ;;  %v1720_v63 = vunpack.c.l.bf16 %v1719_v46  ;;  %v1765_v2 = vunpack.c.l.bf16 %v1764_v50  ;;  %v1817_v37 = vld [vmem:[#allocation7 + $0x4c] sm:$0x3]  ;;  %v1821_v42 = vld [vmem:[#allocation7 + $0x4e] sm:$0x3] }
  0x55   :  { %v1741_v3 = vmax.f32 %v1740_v49, 0.0  ;;  %v1746_v4 = vadd.f32 %v8676_v7, %v1733_v48  ;;  %v1753_v5 = vunpack.c.l.bf16 %v1752_v54  ;;  %v1769_v6 = vunpack.c.l.bf16 %v1768_v55  ;;  %v1836_v47 = vld [vmem:[#allocation7 + $0x50] sm:$0x3] }
  0x56   :  { %v1707_v10 = vadd.f32 %v1706_v53, %v1700_v52  ;;  %v1757_v11 = vunpack.c.l.bf16 %v1756_v59  ;;  %v1766_v13 = vmax.f32 %v1765_v2, 0.0  ;;  %v1773_v14 = vunpack.c.l.bf16 %v1772_v60  ;;  %v1840_v53 = vld [vmem:[#allocation7 + $0x52] sm:$0x3]  ;;  %v1844_v59 = vld [vmem:[#allocation7 + $0x54] sm:$0x3] }
  0x57   :  { %v1747_v15 = vadd.f32 %v1746_v4, %v1737_v58  ;;  %v1770_v16 = vmax.f32 %v1769_v6, 0.0  ;;  %v1777_v17 = vunpack.c.l.bf16 %v1776_v8  ;;  %v1781_v18 = vunpack.c.l.bf16 %v1780_v1  ;;  %v1848_v60 = vld [vmem:[#allocation7 + $0x56] sm:$0x3]  ;;  %v1852_v8 = vld [vmem:[#allocation7 + $0x58] sm:$0x3] }
  0x58   :  { %v8679_v20 = vmax.f32 %v1720_v63, 0.0  ;;  %v8681_v21 = vadd.f32 %v1717_v62, %v1713_v61  ;;  %v1774_v22 = vmax.f32 %v1773_v14, 0.0  ;;  %v1794_v23 = vunpack.c.l.bf16 %v1793_v9  ;;  %v1856_v6 = vld [vmem:[#allocation7 + $0x5a] sm:$0x3]  ;;  %v1860_v9 = vld [vmem:[#allocation7 + $0x5c] sm:$0x3] }
  0x59   :  { %v1754_v26 = vmax.f32 %v1753_v5, 0.0  ;;  %v1761_v27 = vunpack.c.l.bf16 %v1760_v12  ;;  %v1778_v28 = vmax.f32 %v1777_v17, 0.0  ;;  %v8683_v29 = vadd.f32 %v1770_v16, %v1766_v13  ;;  %v1864_v14 = vld [vmem:[#allocation7 + $0x5e] sm:$0x3] }
  0x5a   :  { %v1709_v32 = vadd.f32 %v1707_v10, %v1668_v56  ;;  %v1748_v33 = vadd.f32 %v1747_v15, %v1741_v3  ;;  %v1758_v34 = vmax.f32 %v1757_v11, 0.0  ;;  %v1798_v36 = vunpack.c.l.bf16 %v1797_v19 }
  0x5b   :  { %v1782_v38 = vmax.f32 %v1781_v18, 0.0  ;;  %v1787_v39 = vadd.f32 %v8683_v29, %v1774_v22  ;;  %v1806_v40 = vunpack.c.l.bf16 %v1805_v24  ;;  %v1810_v41 = vunpack.c.l.bf16 %v1809_v25  ;;  %v1877_v25 = vld [vmem:[#allocation7 + $0x60] sm:$0x3] }
  0x5c   :  { %v1795_v43 = vmax.f32 %v1794_v23, 0.0  ;;  %v1799_v44 = vmax.f32 %v1798_v36, 0.0  ;;  %v1802_v45 = vunpack.c.l.bf16 %v1801_v30  ;;  %v1814_v46 = vunpack.c.l.bf16 %v1813_v31 }
  0x5d   :  { %v1788_v48 = vadd.f32 %v1787_v39, %v1778_v28  ;;  %v1807_v49 = vmax.f32 %v1806_v40, 0.0  ;;  %v1811_v50 = vmax.f32 %v1810_v41, 0.0  ;;  %v1818_v52 = vunpack.c.l.bf16 %v1817_v37  ;;  %v1893_v39 = vld [vmem:[#allocation7 + $0x68] sm:$0x3]  ;;  %v1897_v40 = vld [vmem:[#allocation7 + $0x6a] sm:$0x3] }
  0x5e   :  { %v1750_v54 = vadd.f32 %v1748_v33, %v1709_v32  ;;  %v1762_v55 = vmax.f32 %v1761_v27, 0.0  ;;  %v1815_v56 = vmax.f32 %v1814_v46, 0.0  ;;  %v1822_v58 = vunpack.c.l.bf16 %v1821_v42  ;;  %v1885_v32 = vld [vmem:[#allocation7 + $0x64] sm:$0x3]  ;;  %v1889_v33 = vld [vmem:[#allocation7 + $0x66] sm:$0x3] }
  0x5f   :  { %v8686_v61 = vadd.f32 %v1788_v48, %v1782_v38  ;;  %v1819_v62 = vmax.f32 %v1818_v52, 0.0  ;;  %v8688_v63 = vadd.f32 %v1811_v50, %v1807_v49  ;;  %v1837_v2 = vunpack.c.l.bf16 %v1836_v47  ;;  %v2061_v47 = vld [vmem:[%s12317_s1 + $0xc8] sm:$0xff] }
  0x60   :  { %v1784_v1 = vadd.f32 %v1758_v34, %v1754_v26  ;;  %v1803_v3 = vmax.f32 %v1802_v45, 0.0  ;;  %v1825_v4 = vadd.f32 %v1799_v44, %v1795_v43  ;;  %v1841_v5 = vunpack.c.l.bf16 %v1840_v53  ;;  %v1881_v26 = vld [vmem:[#allocation7 + $0x62] sm:$0x3]  ;;  %2227 = vperm.xlu0 %7967, %v2061_v47  }
  0x61   :  { %v1823_v10 = vmax.f32 %v1822_v58, 0.0  ;;  %v1828_v11 = vadd.f32 %v8688_v63, %v1815_v56  ;;  %v1845_v12 = vunpack.c.l.bf16 %v1844_v59  ;;  %v1849_v13 = vunpack.c.l.bf16 %v1848_v60  ;;  %v1918_v58 = vld [vmem:[#allocation7 + $0x70] sm:$0x3] }
  0x62   :  { %v1791_v15 = vadd.f32 %v8686_v61, %v1750_v54  ;;  %v1838_v16 = vmax.f32 %v1837_v2, 0.0  ;;  %v1842_v17 = vmax.f32 %v1841_v5, 0.0  ;;  %v1853_v18 = vunpack.c.l.bf16 %v1852_v8  ;;  %v1922_v8 = vld [vmem:[#allocation7 + $0x72] sm:$0x3] }
  0x63   :  { %v1829_v19 = vadd.f32 %v1828_v11, %v1819_v62  ;;  %v1850_v22 = vmax.f32 %v1849_v13, 0.0  ;;  %v1857_v23 = vunpack.c.l.bf16 %v1856_v6  ;;  %v1861_v24 = vunpack.c.l.bf16 %v1860_v9  ;;  %v1930_v6 = vld [vmem:[#allocation7 + $0x76] sm:$0x3]  ;;  %v1934_v9 = vld [vmem:[#allocation7 + $0x78] sm:$0x3] }
  0x64   :  { %v8694_v27 = vadd.f32 %v8672_v51, %v8666_v0  ;;  %v8698_v28 = vadd.f32 %v8674_v57, %v8669_v35  ;;  %v1854_v30 = vmax.f32 %v1853_v18, 0.0  ;;  %v1865_v31 = vunpack.c.l.bf16 %v1864_v14  ;;  %v1901_v35 = vld [vmem:[#allocation7 + $0x6c] sm:$0x3]  ;;  %v1905_v57 = vld [vmem:[#allocation7 + $0x6e] sm:$0x3] }
  0x65   :  { %v8702_v34 = vadd.f32 %v8681_v21, %v8679_v20  ;;  %v1785_v36 = vadd.f32 %v1784_v1, %v1762_v55  ;;  %v1830_v37 = vadd.f32 %v1829_v19, %v1823_v10  ;;  %v1858_v38 = vmax.f32 %v1857_v23, 0.0  ;;  %v2077_v20 = vld [vmem:[%s12317_s1 + $0x148] sm:$0xff]  ;;  %v2076_v21 = vld [vmem:[%s12317_s1 + $0x140] sm:$0xff]  ;;  %v1926_v14 = vld [vmem:[#allocation7 + $0x74] sm:$0x3] }
  0x66   :  { %v1862_v41 = vmax.f32 %v1861_v24, 0.0  ;;  %v8704_v0 = vadd.f32 %v1854_v30, %v1850_v22  ;;  %v1878_v51 = vunpack.c.l.bf16 %v1877_v25  ;;  %v1882_v42 = vunpack.c.l.bf16 %v1881_v26  ;;  %2307 = vperm.xlu2 %7969, %v2077_v20   ;;  %2302 = vperm.xlu1 %7968, %v2076_v21   ;;  %v2044_v22 = vld [vmem:[%s12317_s1 + $0x40] sm:$0xff] }
  0x67   :  { %v1826_v43 = vadd.f32 %v1825_v4, %v1803_v3  ;;  %v1832_v44 = vadd.f32 %v1830_v37, %v1791_v15  ;;  %v1846_v45 = vmax.f32 %v1845_v12, 0.0  ;;  %v1868_v46 = vadd.f32 %v1842_v17, %v1838_v16  ;;  %v1938_v15 = vld [vmem:[#allocation7 + $0x7a] sm:$0x3]  ;;  %v1946_v26 = vld [vmem:[#allocation7 + $0x7e] sm:$0x3] }
  0x68   :  { %v1866_v48 = vmax.f32 %v1865_v31, 0.0  ;;  %v1871_v49 = vadd.f32 %v8704_v0, %v1858_v38  ;;  %v1886_v50 = vunpack.c.l.bf16 %v1885_v32  ;;  %v1890_v52 = vunpack.c.l.bf16 %v1889_v33  ;;  %v2096_v30 = vld [vmem:[%s12317_s1 + $0x1e0] sm:$0xff] }
  0x69   :  { %v1879_v53 = vmax.f32 %v1878_v51, 0.0  ;;  %v1883_v54 = vmax.f32 %v1882_v42, 0.0  ;;  %v1894_v55 = vunpack.c.l.bf16 %v1893_v39  ;;  %v1898_v56 = vunpack.c.l.bf16 %v1897_v40  ;;  %1960 = vst [vmem:[#allocation1 + $0x1] ss:$2 sm:$0xff] %v1832_v44  ;;  %2402 = vperm.xlu0 %7967, %v2096_v30   ;;  %v2041_v30 = vld [vmem:[%s12317_s1 + $0x28] sm:$0xff] }
  0x6a   :  { %v1872_v59 = vadd.f32 %v1871_v49, %v1862_v41  ;;  %v1891_v60 = vmax.f32 %v1890_v52, 0.0  ;;  %v1902_v62 = vunpack.c.l.bf16 %v1901_v35  ;;  %v1906_v2 = vunpack.c.l.bf16 %v1905_v57 }
  0x6b   :  { %v8717_v1 = vadd.f32 %v1785_v36, %v8683_v29  ;;  %v8720_v3 = vadd.f32 %v1826_v43, %v8688_v63  ;;  %v1895_v4 = vmax.f32 %v1894_v55, 0.0  ;;  %v1899_v5 = vmax.f32 %v1898_v56, 0.0  ;;  %v1942_v29 = vld [vmem:[#allocation7 + $0x7c] sm:$0x3]  ;;  %v2097_v63 = vld [vmem:[%s12317_s1 + $0x1e8] sm:$0xff] }
  0x6c   :  { %v1834_v10 = vadd.f32 %v1830_v37, %v8686_v61  ;;  %v1869_v11 = vadd.f32 %v1868_v46, %v1846_v45  ;;  %v1887_v12 = vmax.f32 %v1886_v50, 0.0  ;;  %v1919_v13 = vunpack.c.l.bf16 %v1918_v58 }
  0x6d   :  { %v1903_v16 = vmax.f32 %v1902_v62, 0.0  ;;  %v1908_v17 = vadd.f32 %v1895_v4, %v1891_v60  ;;  %v1909_v18 = vadd.f32 %v1883_v54, %v1879_v53  ;;  %v1923_v19 = vunpack.c.l.bf16 %v1922_v8  ;;  %v2075_v4 = vld [vmem:[%s12317_s1 + $0x138] sm:$0xff] }
  0x6e   :  { %v1873_v23 = vadd.f32 %v1872_v59, %v1866_v48  ;;  %v1907_v61 = vmax.f32 %v1906_v2, 0.0  ;;  %v1931_v24 = vunpack.c.l.bf16 %v1930_v6  ;;  %v1935_v25 = vunpack.c.l.bf16 %v1934_v9  ;;  %2407 = vperm.xlu1 %7968, %v2097_v63   ;;  %2142 = vperm.xlu2 %7969, %v2044_v22   ;;  %v2074_v9 = vld [vmem:[%s12317_s1 + $0x130] sm:$0xff]  ;;  %v2093_v22 = vld [vmem:[%s12317_s1 + $0x1c8] sm:$0xff] }
  0x6f   :  { %v1912_v31 = vadd.f32 %v1908_v17, %v1899_v5  ;;  %v1920_v32 = vmax.f32 %v1919_v13, 0.0  ;;  %v1924_v33 = vmax.f32 %v1923_v19, 0.0  ;;  %v1927_v36 = vunpack.c.l.bf16 %v1926_v14  ;;  %v2094_v5 = vld [vmem:[%s12317_s1 + $0x1d0] sm:$0xff]  ;;  %v2043_v14 = vld [vmem:[%s12317_s1 + $0x38] sm:$0xff]  ;;  %v2057_v19 = vld [vmem:[%s12317_s1 + $0xa8] sm:$0xff] }
  0x70   :  { %v1932_v37 = vmax.f32 %v1931_v24, 0.0  ;;  %v1936_v38 = vmax.f32 %v1935_v25, 0.0  ;;  %v1939_v39 = vunpack.c.l.bf16 %v1938_v15  ;;  %v1943_v40 = vunpack.c.l.bf16 %v1942_v29  ;;  %v1961_v59 = vld.sshfl [vmem:[#allocation1] sm:$0xff pattern:$0x75316420]  ;;  %v2073_v24 = vld [vmem:[%s12317_s1 + $0x128] sm:$0xff] }
  0x71   :  { %v1708_v41 = vadd.f32 %v8698_v28, %v8694_v27  ;;  %v1745_v51 = vadd.f32 %v8702_v34, %v8676_v7  ;;  %v1913_v42 = vadd.f32 %v1912_v31, %v1903_v16  ;;  %v1947_v35 = vunpack.c.l.bf16 %v1946_v26  ;;  %v2058_v7 = vld [vmem:[%s12317_s1 + $0xb0] sm:$0xff]  ;;  %v2059_v34 = vld [vmem:[%s12317_s1 + $0xb8] sm:$0xff]  ;;  %v7691_v15 = vld [vmem:[%s12316_s0] sm:$0xff] }
  0x72   :  { %v1875_v57 = vadd.f32 %v1873_v23, %v1834_v10  ;;  %v1940_v43 = vmax.f32 %v1939_v39, 0.0  ;;  %v1944_v44 = vmax.f32 %v1943_v40, 0.0  ;;  %v1949_v45 = vadd.f32 %v1936_v38, %v1932_v37  ;;  %v2095_v16 = vld [vmem:[%s12317_s1 + $0x1d8] sm:$0xff]  ;;  %v2056_v29 = vld [vmem:[%s12317_s1 + $0xa0] sm:$0xff]  ;;  %v2054_v26 = vld [vmem:[%s12317_s1 + $0x90] sm:$0xff] }
  0x73   :  { %v1833_v46 = vadd.f32 %v8720_v3, %v8717_v1  ;;  %v1870_v20 = vadd.f32 %v1869_v11, %v8704_v0  ;;  %v1910_v21 = vadd.f32 %v1909_v18, %v1887_v12  ;;  %v1914_v47 = vadd.f32 %v1913_v42, %v1907_v61  ;;  %v2045_v0 = vld [vmem:[%s12317_s1 + $0x48] sm:$0xff]  ;;  %v2072_v18 = vld [vmem:[%s12317_s1 + $0x120] sm:$0xff]  ;;  %v2071_v37 = vld [vmem:[%s12317_s1 + $0x118] sm:$0xff] }
  0x74   :  { %v1928_v48 = vmax.f32 %v1927_v36, 0.0  ;;  %v1948_v49 = vmax.f32 %v1947_v35, 0.0  ;;  %v1950_v27 = vadd.f32 %v1924_v33, %v1920_v32  ;;  %v1953_v28 = vadd.f32 %v1949_v45, %v1940_v43  ;;  %2147 = vperm.xlu0 %7967, %v2045_v0   ;;  %v2092_v23 = vld [vmem:[%s12317_s1 + $0x1c0] sm:$0xff]  ;;  %v7692_v61 = vld [vmem:[%s12316_s0 + $0x8] sm:$0xff]  ;;  %v2070_v38 = vld [vmem:[%s12317_s1 + $0x110] sm:$0xff] }
  0x75   :  { %v1749_v50 = vadd.f32 %v1745_v51, %v1708_v41  ;;  %v1916_v52 = vadd.f32 %v1914_v47, %v1875_v57  ;;  %v1874_v54 = vadd.f32 %v1870_v20, %v1833_v46  ;;  %v1911_v55 = vadd.f32 %v1910_v21, %v1908_v17  ;;  %v8772_v17 = vpop.permute.xlu2 %2172  ;;  %v2040_v31 = vld [vmem:[%s12317_s1 + $0x20] sm:$0xff]  ;;  %v7693_v39 = vld [vmem:[%s12316_s0 + $0x10] sm:$0xff]  ;;  %v2055_v40 = vld [vmem:[%s12317_s1 + $0x98] sm:$0xff] }
  0x76   :  { %v1954_v53 = vadd.f32 %v1953_v28, %v1944_v44  ;;  %v1951_v56 = vadd.f32 %v1950_v27, %v1928_v48  ;;  %2212 = vperm.xlu1 %7968, %v2058_v7   ;;  %2217 = vperm.xlu2 %7969, %v2059_v34   ;;  %v2091_v35 = vld [vmem:[%s12317_s1 + $0x1b8] sm:$0xff]  ;;  %v2038_v57 = vld [vmem:[%s12317_s1 + $0x10] sm:$0xff]  ;;  %v2052_v20 = vld [vmem:[%s12317_s1 + $0x80] sm:$0xff] }
  0x77   :  { %v1790_v60 = vadd.f32 %v8717_v1, %v1749_v50  ;;  %v1915_v2 = vadd.f32 %v1911_v55, %v1874_v54  ;;  %v8809_v32 = vpop.permute.xlu1 %2332  ;;  %v2090_v43 = vld [vmem:[%s12317_s1 + $0x1b0] sm:$0xff]  ;;  %v2053_v21 = vld [vmem:[%s12317_s1 + $0x88] sm:$0xff]  ;;  %v7694_v47 = vld [vmem:[%s12316_s0 + $0x18] sm:$0xff] }
  0x78   :  { %v1955_v58 = vadd.f32 %v1954_v53, %v1948_v49  ;;  %v1952_v8 = vadd.f32 %v1951_v56, %v1949_v45  ;;  %v8811_v33 = vpop.permute.xlu0 %2252  ;;  %v2039_v48 = vld [vmem:[%s12317_s1 + $0x18] sm:$0xff]  ;;  %v7719_v7 = vld [vmem:[%s12316_s0 + $0xe0] sm:$0xff]  ;;  %v2069_v34 = vld [vmem:[%s12317_s1 + $0x108] sm:$0xff] }
  0x79   :  { %v1831_v6 = vadd.f32 %v8720_v3, %v1790_v60  ;;  %v2042_v3 = vld [vmem:[%s12317_s1 + $0x30] sm:$0xff]  ;;  %12325 = vst [vmem:[#allocation8_spill] sm:$0xff] %v8811_v33  ;;  %v2088_v50 = vld [vmem:[%s12317_s1 + $0x1a0] sm:$0xff]  ;;  %v2037_v55 = vld [vmem:[%s12317_s1 + $0x8] sm:$0xff] }
  0x7a   :  { %v1957_v62 = vadd.f32 %v1955_v58, %v1916_v52  ;;  %v1956_v1 = vadd.f32 %v1952_v8, %v1915_v2  ;;  %v2068_v52 = vld [vmem:[%s12317_s1 + $0x100] sm:$0xff]  ;;  %v7712_v8 = vld [vmem:[%s12316_s0 + $0xa8] sm:$0xff] }
  0x7b   :  { %v1969_v10 = vsel %vm1968_vm2, %v1831_v6, %v1961_v59  ;;  %v2036_v56 = vld [vmem:[%s12317_s1] sm:$0xff]  ;;  %v2089_v59 = vld [vmem:[%s12317_s1 + $0x1a8] sm:$0xff]  ;;  %v2087_v6 = vld [vmem:[%s12317_s1 + $0x198] sm:$0xff] }
  0x7c   :  { %1965 = vst [vmem:[#allocation1 + $0x1] ss:$2 sm:$0xff] %v1957_v62  ;;  %2292 = vperm.xlu0 %7967, %v2074_v9   ;;  %v7695_v58 = vld [vmem:[%s12316_s0 + $0x20] sm:$0xff]  ;;  %v2086_v9 = vld [vmem:[%s12317_s1 + $0x190] sm:$0xff] }
  0x7d   :  { %v8783_v63 = vpop.permute.xlu2 %2177 }
  0x7e   :  { %2297 = vperm.xlu1 %7968, %v2075_v4   ;;  %2392 = vperm.xlu2 %7969, %v2094_v5   ;;  %v7720_v4 = vld [vmem:[%s12316_s0 + $0xe8] sm:$0xff]  ;;  %v2084_v5 = vld [vmem:[%s12317_s1 + $0x180] sm:$0xff] }
  0x7f   :  { %v8828_v41 = vpop.permute.xlu1 %2337 }
  0x80   :  { %v8830_v51 = vpop.permute.xlu0 %2257 }
  0x81   :  { %12326 = vst [vmem:[#allocation9_spill] sm:$0xff] %v8830_v51 }
  0x83   :  { %v1966_v11 = vld.sshfl [vmem:[#allocation1] sm:$0xff pattern:$0x75316420] }
  0x84   :  { %v1970_v12 = vsel %vm1968_vm2, %v1956_v1, %v1966_v11  ;;  %2397 = vperm.xlu0 %7967, %v2095_v16  }
  0x85   :  { %v1971_v13 = vpack.c.bf16 %v1970_v12, %v1969_v10  ;;  %v8798_v25 = vpop.permute.xlu2 %2322  ;;  %v3135_v12 = vld [vmem:[%s12319_s3 + $0x8] sm:$0xff] }
  0x86   :  { %2137 = vperm.xlu2 %7969, %v2043_v14   ;;  %2132 = vperm.xlu1 %7968, %v2042_v3   ;;  %v7696_v14 = vld [vmem:[%s12316_s0 + $0x28] sm:$0xff] }
  0x87   :  { %2684 = vmatpush.bf16.msra.mxu0 %v1971_v13  ;;  %7965 = vmatpush.bf16.msra.mxu3 %v1971_v13  ;;  %v8843_v44 = vpop.permute.xlu1 %2247  ;;  %v2085_v3 = vld [vmem:[%s12317_s1 + $0x188] sm:$0xff] }
  0x88   :  { %7963 = vmatpush.bf16.msra.mxu1 %v1971_v13  ;;  %7964 = vmatpush.bf16.msra.mxu2 %v1971_v13  ;;  %12327 = vst [vmem:[#allocation10_spill] sm:$0xff] %v8843_v44  ;;  %v8845_v45 = vpop.permute.xlu0 %2242  ;;  %v3134_v13 = vld [vmem:[%s12319_s3] sm:$0xff] }
  0x89   :  { %12328 = vst [vmem:[#allocation11_spill] sm:$0xff] %v8845_v45 }
  0x8a   :  { %6699 = vmatmul.msk.bf16.vlgmr.msra.gmra.mxu0 %vm2580_vm3, %v7691_v15  ;;  %6727 = vmatmul.msk.bf16.vlgmr.msra.gmra.mxu3 %vm2580_vm3, %v7719_v7 }
  0x8b   :  { %6720 = vmatmul.msk.bf16.vlgmr.msra.gmra.mxu1 %vm2580_vm3, %v7712_v8 }
  0x8c   :  { %2202 = vperm.xlu0 %7967, %v2056_v29   ;;  %v3138_v29 = vld [vmem:[%s12319_s3 + $0x20] sm:$0xff] }
  0x8d   :  { %v8813_v36 = vpop.permute.xlu2 %2167 }
  0x8e   :  { %2282 = vperm.xlu2 %7969, %v2072_v18   ;;  %2207 = vperm.xlu1 %7968, %v2057_v19   ;;  %v7713_v18 = vld [vmem:[%s12316_s0 + $0xb0] sm:$0xff] }
  0x8f   :  { %v8864_v27 = vpop.permute.xlu1 %2162 }
  0x90   :  { %v8862_v49 = vpop.permute.xlu0 %2327 }
  0x94   :  { %2287 = vperm.xlu0 %7967, %v2073_v24  }
  0x95   :  { %v8832_v42 = vpop.permute.xlu2 %2312 }
  0x96   :  { %2387 = vperm.xlu2 %7969, %v2093_v22   ;;  %2382 = vperm.xlu1 %7968, %v2092_v23   ;;  %v3137_v22 = vld [vmem:[%s12319_s3 + $0x18] sm:$0xff]  ;;  %v3136_v23 = vld [vmem:[%s12319_s3 + $0x10] sm:$0xff] }
  0x97   :  { %v8883_v0 = vpop.permute.xlu1 %2237 }
  0x98   :  { %v8881_v53 = vpop.permute.xlu0 %2232  ;;  %12331 = vst [vmem:[#allocation14_spill] sm:$0xff] %v8883_v0 }
  0x99   :  { %12330 = vst [vmem:[#allocation13_spill] sm:$0xff] %v8881_v53 }
  0x9a   :  { %6700 = vmatmul.msk.bf16.gmra.mxu0 %vm2580_vm3, %v7692_v61  ;;  %6728 = vmatmul.msk.bf16.gmra.mxu3 %vm2580_vm3, %v7720_v4 }
  0x9b   :  { %6721 = vmatmul.msk.bf16.gmra.mxu1 %vm2580_vm3, %v7713_v18  ;;  %v7699_v18 = vld [vmem:[%s12316_s0 + $0x40] sm:$0xff] }
  0x9c   :  { %2122 = vperm.xlu0 %7967, %v2040_v31  }
  0x9d   :  { %v8847_v46 = vpop.permute.xlu2 %2417 }
  0x9e   :  { %2192 = vperm.xlu2 %7969, %v2054_v26   ;;  %2127 = vperm.xlu1 %7968, %v2041_v30   ;;  %v7697_v26 = vld [vmem:[%s12316_s0 + $0x30] sm:$0xff] }
  0x9f   :  { %v8902_v62 = vpop.permute.xlu1 %2412  ;;  %v7721_v30 = vld [vmem:[%s12316_s0 + $0xf0] sm:$0xff] }
  0xa0   :  { %v8900_v60 = vpop.permute.xlu0 %2317 }
  0xa4   :  { %2197 = vperm.xlu0 %7967, %v2055_v40  }
  0xa5   :  { %v8866_v28 = vpop.permute.xlu2 %2222 }
  0xa6   :  { %2277 = vperm.xlu2 %7969, %v2071_v37   ;;  %2272 = vperm.xlu1 %7968, %v2070_v38   ;;  %12329 = vst [vmem:[#allocation12_spill] sm:$0xff] %v8866_v28  ;;  %v3139_v37 = vld [vmem:[%s12319_s3 + $0x28] sm:$0xff]  ;;  %v3141_v38 = vld [vmem:[%s12319_s3 + $0x38] sm:$0xff] }
  0xa7   :  { %v8923_v1 = vpop.permute.xlu1 %2157 }
  0xa8   :  { %v8925_v10 = vpop.permute.xlu0 %2152 }
  0xaa   :  { %6701 = vmatmul.msk.bf16.gmra.mxu0 %vm2580_vm3, %v7693_v39  ;;  %v3140_v39 = vld [vmem:[%s12319_s3 + $0x30] sm:$0xff]  ;;  %6729 = vmatmul.msk.bf16.gmra.mxu3 %vm2580_vm3, %v7721_v30 }
  0xab   :  { %v3152_v30 = vld [vmem:[%s12319_s3 + $0x90] sm:$0xff] }
  0xac   :  { %2372 = vperm.xlu0 %7967, %v2090_v43   ;;  %v3144_v43 = vld [vmem:[%s12319_s3 + $0x50] sm:$0xff] }
  0xae   :  { %2377 = vperm.xlu1 %7968, %v2091_v35   ;;  %2112 = vperm.xlu2 %7969, %v2038_v57   ;;  %v3142_v57 = vld [vmem:[%s12319_s3 + $0x40] sm:$0xff] }
  0xb4   :  { %2117 = vperm.xlu0 %7967, %v2039_v48  }
  0xb6   :  { %2182 = vperm.xlu1 %7968, %v2052_v20   ;;  %2187 = vperm.xlu2 %7969, %v2053_v21   ;;  %v3143_v20 = vld [vmem:[%s12319_s3 + $0x48] sm:$0xff]  ;;  %v7714_v21 = vld [vmem:[%s12316_s0 + $0xb8] sm:$0xff] }
  0xb7   :  { %6722 = vmatmul.msk.bf16.gmra.mxu1 %vm2580_vm3, %v7714_v21  ;;  %v3155_v21 = vld [vmem:[%s12319_s3 + $0xa8] sm:$0xff] }
  0xba   :  { %6702 = vmatmul.msk.bf16.gmra.mxu0 %vm2580_vm3, %v7694_v47 }
  0xbc   :  { %2262 = vperm.xlu0 %7967, %v2068_v52   ;;  %v7722_v52 = vld [vmem:[%s12316_s0 + $0xf8] sm:$0xff] }
  0xbd   :  { %6730 = vmatmul.msk.bf16.gmra.mxu3 %vm2580_vm3, %v7722_v52 }
  0xbe   :  { %2267 = vperm.xlu1 %7968, %v2069_v34   ;;  %2362 = vperm.xlu2 %7969, %v2088_v50   ;;  %v7698_v34 = vld [vmem:[%s12316_s0 + $0x38] sm:$0xff]  ;;  %v7717_v50 = vld [vmem:[%s12316_s0 + $0xd0] sm:$0xff] }
  0xbf   :  { %6725 = vmatmul.msk.bf16.vlgmr.msra.gmra.mxu2 %vm2580_vm3, %v7717_v50  ;;  %v7716_v50 = vld [vmem:[%s12316_s0 + $0xc8] sm:$0xff] }
  0xc0   :  { %v8885_v54 = vpop.permute.xlu2 %2307 }
  0xc1   :  { %12332 = vst [vmem:[#allocation15_spill] sm:$0xff] %v8885_v54 }
  0xc4   :  { %2367 = vperm.xlu0 %7967, %v2089_v59  }
  0xc6   :  { %2107 = vperm.xlu2 %7969, %v2037_v55   ;;  %2102 = vperm.xlu1 %7968, %v2036_v56   ;;  %v3145_v55 = vld [vmem:[%s12319_s3 + $0x58] sm:$0xff]  ;;  %v3147_v56 = vld [vmem:[%s12319_s3 + $0x68] sm:$0xff] }
  0xc8   :  { %v8904_v2 = vpop.permute.xlu2 %2142 }
  0xca   :  { %6703 = vmatmul.msk.bf16.gmra.mxu0 %vm2580_vm3, %v7695_v58  ;;  %v3146_v58 = vld [vmem:[%s12319_s3 + $0x60] sm:$0xff] }
  0xcc   :  { %2352 = vperm.xlu0 %7967, %v2086_v9   ;;  %v3149_v9 = vld [vmem:[%s12319_s3 + $0x78] sm:$0xff] }
  0xce   :  { %2342 = vperm.xlu2 %7969, %v2084_v5   ;;  %2357 = vperm.xlu1 %7968, %v2087_v6   ;;  %v3148_v5 = vld [vmem:[%s12319_s3 + $0x70] sm:$0xff]  ;;  %v3150_v6 = vld [vmem:[%s12319_s3 + $0x80] sm:$0xff] }
  0xd0   :  { %v8927_v11 = vpop.permute.xlu2 %2217 }
  0xd1   :  { %12333 = vst [vmem:[#allocation16_spill] sm:$0xff] %v8927_v11 }
  0xd2   :  { %v8944_v16 = vpop.permute.xlu0 %2227 }
  0xd3   :  { %12335 = vst [vmem:[#allocation18_spill] sm:$0xff] %v8944_v16 }
  0xd4   :  { %2347 = vperm.xlu0 %7967, %v2085_v3  }
  0xd6   :  { %3237 = vperm.xlu2 %7969, %v3135_v12   ;;  %3232 = vperm.xlu1 %7968, %v3134_v13   ;;  %v7715_v12 = vld [vmem:[%s12316_s0 + $0xc0] sm:$0xff] }
  0xd7   :  { %6723 = vmatmul.msk.bf16.gmra.mxu1 %vm2580_vm3, %v7715_v12 }
  0xd8   :  { %v8942_v15 = vpop.permute.xlu1 %2302  ;;  %v8949_v19 = vpop.permute.xlu2 %2392 }
  0xd9   :  { %12334 = vst [vmem:[#allocation17_spill] sm:$0xff] %v8942_v15 }
  0xda   :  { %6704 = vmatmul.msk.bf16.gmra.mxu0 %vm2580_vm3, %v7696_v14 }
  0xdb   :  { %v8963_v24 = vpop.permute.xlu0 %2402 }
  0xdc   :  { %3242 = vperm.xlu0 %7967, %v3136_v23   ;;  %v3151_v23 = vld [vmem:[%s12319_s3 + $0x88] sm:$0xff] }
  0xde   :  { %3252 = vperm.xlu2 %7969, %v3138_v29   ;;  %3247 = vperm.xlu1 %7968, %v3137_v22   ;;  %v7718_v29 = vld [vmem:[%s12316_s0 + $0xd8] sm:$0xff] }
  0xdf   :  { %6726 = vmatmul.msk.bf16.gmra.mxu2 %vm2580_vm3, %v7718_v29 }
  0xe0   :  { %v8961_v61 = vpop.permute.xlu1 %2407  ;;  %v8971_v31 = vpop.permute.xlu2 %2137 }
  0xe4   :  { %3257 = vperm.xlu0 %7967, %v3139_v37  }
  0xe6   :  { %3267 = vperm.xlu2 %7969, %v3141_v38   ;;  %3262 = vperm.xlu1 %7968, %v3140_v39   ;;  %v8986_v35 = vpop.permute.xlu0 %2147 }
  0xe7   :  { %6724 = vmatmul.msk.bf16.gmra.mxu1 %vm2580_vm3, %v7716_v50  ;;  %v7701_v50 = vld [vmem:[%s12316_s0 + $0x50] sm:$0xff] }
  0xe8   :  { %v8984_v40 = vpop.permute.xlu1 %2212  ;;  %v9000_v47 = vpop.permute.xlu2 %2282 }
  0xe9   :  { %12336 = vst [vmem:[#allocation19_spill] sm:$0xff] %v8984_v40  ;;  %v3197_v40 = vld [vmem:[%s12319_s3 + $0x1f8] sm:$0xff] }
  0xea   :  { %6705 = vmatmul.msk.bf16.gmra.mxu0 %vm2580_vm3, %v7697_v26  ;;  %12337 = vst [vmem:[#allocation20_spill] sm:$0xff] %v9000_v47  ;;  %v3153_v26 = vld [vmem:[%s12319_s3 + $0x98] sm:$0xff] }
  0xec   :  { %3272 = vperm.xlu0 %7967, %v3142_v57  }
  0xee   :  { %3282 = vperm.xlu2 %7969, %v3144_v43   ;;  %3277 = vperm.xlu1 %7968, %v3143_v20   ;;  %v9005_v7 = vpop.permute.xlu0 %2292  ;;  %v3154_v43 = vld [vmem:[%s12319_s3 + $0xa0] sm:$0xff]  ;;  %v3156_v20 = vld [vmem:[%s12319_s3 + $0xb0] sm:$0xff] }
  0xef   :  { %12339 = vst [vmem:[#allocation22_spill] sm:$0xff] %v9005_v7 }
  0xf0   :  { %v9002_v48 = vpop.permute.xlu1 %2297  ;;  %v9030_v8 = vpop.permute.xlu2 %2387 }
  0xf1   :  { %12338 = vst [vmem:[#allocation21_spill] sm:$0xff] %v9002_v48 }
  0xf4   :  { %3287 = vperm.xlu0 %7967, %v3145_v55   ;;  %v7700_v55 = vld [vmem:[%s12316_s0 + $0x48] sm:$0xff] }
  0xf6   :  { %3297 = vperm.xlu2 %7969, %v3147_v56   ;;  %3292 = vperm.xlu1 %7968, %v3146_v58   ;;  %v9032_v4 = vpop.permute.xlu0 %2397  ;;  %v3157_v58 = vld [vmem:[%s12319_s3 + $0xb8] sm:$0xff] }
  0xf8   :  { %v9028_v59 = vpop.permute.xlu1 %2132  ;;  %v9051_v3 = vpop.permute.xlu2 %2192 }
  0xf9   :  { %12342 = vst [vmem:[#allocation25_spill] sm:$0xff] %v9051_v3  ;;  %v3212_v3 = vld [vmem:[%s12319_s3 + $0x270] sm:$0xff] }
  0xfa   :  { %6706 = vmatmul.msk.bf16.gmra.mxu0 %vm2580_vm3, %v7698_v34 }
  0xfc   :  { %3302 = vperm.xlu0 %7967, %v3148_v5   ;;  %v3159_v5 = vld [vmem:[%s12319_s3 + $0xc8] sm:$0xff] }
  0xfe   :  { %3312 = vperm.xlu2 %7969, %v3150_v6   ;;  %3307 = vperm.xlu1 %7968, %v3149_v9   ;;  %v9049_v14 = vpop.permute.xlu0 %2202  ;;  %v3158_v6 = vld [vmem:[%s12319_s3 + $0xc0] sm:$0xff] }
  0xff   :  { %12341 = vst [vmem:[#allocation24_spill] sm:$0xff] %v9049_v14 }
 0x100   :  { %v9046_v13 = vpop.permute.xlu1 %2207  ;;  %v9078_v57 = vpop.permute.xlu2 %2277 }
 0x101   :  { %12340 = vst [vmem:[#allocation23_spill] sm:$0xff] %v9046_v13  ;;  %v3229_v13 = vld [vmem:[%s12319_s3 + $0x2f8] sm:$0xff] }
 0x102   :  { %12344 = vst [vmem:[#allocation27_spill] sm:$0xff] %v9078_v57 }
 0x104   :  { %3317 = vperm.xlu0 %7967, %v3151_v23   ;;  %v3160_v23 = vld [vmem:[%s12319_s3 + $0xd0] sm:$0xff] }
 0x106   :  { %3327 = vperm.xlu2 %7969, %v3153_v26   ;;  %3322 = vperm.xlu1 %7968, %v3152_v30   ;;  %v9074_v38 = vpop.permute.xlu0 %2287  ;;  %v3162_v26 = vld [vmem:[%s12319_s3 + $0xe0] sm:$0xff]  ;;  %v3161_v30 = vld [vmem:[%s12319_s3 + $0xd8] sm:$0xff] }
 0x107   :  { %v9059_v22 = vpop.f32.mrf.mxu0  ;;  %12343 = vst [vmem:[#allocation26_spill] sm:$0xff] %v9074_v38 }
 0x108   :  { %v9072_v37 = vpop.permute.xlu1 %2382  ;;  %v2113_v9 = vpop.permute.xlu2 %2112 }
 0x10a   :  { %6707 = vmatmul.msk.bf16.gmra.mxu0 %vm2580_vm3, %v7699_v18 }
 0x10c   :  { %3332 = vperm.xlu0 %7967, %v3154_v43  }
 0x10e   :  { %3342 = vperm.xlu2 %7969, %v3156_v20   ;;  %3337 = vperm.xlu1 %7968, %v3155_v21   ;;  %v2123_v52 = vpop.permute.xlu0 %2122 }
 0x10f   :  { %v9076_v39 = vpop.f32.mrf.mxu0 }
 0x110   :  { %v2128_v34 = vpop.permute.xlu1 %2127  ;;  %v9121_v20 = vpop.permute.xlu2 %2187 }
 0x114   :  { %3347 = vperm.xlu0 %7967, %v3157_v58   ;;  %v3163_v58 = vld [vmem:[%s12319_s3 + $0xe8] sm:$0xff] }
 0x116   :  { %3357 = vperm.xlu2 %7969, %v3159_v5   ;;  %3352 = vperm.xlu1 %7968, %v3158_v6   ;;  %v9108_v18 = vpop.permute.xlu0 %2197  ;;  %v3165_v5 = vld [vmem:[%s12319_s3 + $0xf8] sm:$0xff]  ;;  %v3164_v6 = vld [vmem:[%s12319_s3 + $0xf0] sm:$0xff] }
 0x117   :  { %v2691_v56 = vpop.f32.mrf.mxu0  ;;  %12346 = vst [vmem:[#allocation29_spill] sm:$0xff] %v9108_v18  ;;  %v3228_v18 = vld [vmem:[%s12319_s3 + $0x2f0] sm:$0xff] }
 0x118   :  { %v9106_v12 = vpop.permute.xlu1 %2272  ;;  %v9140_v47 = vpop.permute.xlu2 %2362 }
 0x119   :  { %12345 = vst [vmem:[#allocation28_spill] sm:$0xff] %v9106_v12 }
 0x11a   :  { %6708 = vmatmul.msk.bf16.gmra.mxu0 %vm2580_vm3, %v7700_v55 }
 0x11c   :  { %3362 = vperm.xlu0 %7967, %v3160_v23   ;;  %v2692_v23 = vadd.f32 %v2691_v56, %v2113_v9  ;;  %v3168_v56 = vld [vmem:[%s12319_s3 + $0x110] sm:$0xff] }
 0x11e   :  { %3372 = vperm.xlu2 %7969, %v3162_v26   ;;  %3367 = vperm.xlu1 %7968, %v3161_v30   ;;  %v9123_v21 = vpop.permute.xlu0 %2372  ;;  %v2848_v38 = vmax.f32 %v2692_v23, 0.0 }
 0x11f   :  { %v2693_v29 = vpop.f32.mrf.mxu0 }
 0x120   :  { %v9119_v43 = vpop.permute.xlu1 %2377 }
 0x124   :  { %3377 = vperm.xlu0 %7967, %v3163_v58   ;;  %v3166_v58 = vld [vmem:[%s12319_s3 + $0x100] sm:$0xff] }
 0x126   :  { %3387 = vperm.xlu2 %7969, %v3165_v5   ;;  %3382 = vperm.xlu1 %7968, %v3164_v6   ;;  %v2118_v30 = vpop.permute.xlu0 %2117 }
 0x127   :  { %v2696_v55 = vpop.f32.mrf.mxu0  ;;  %v2694_v57 = vadd.f32 %v2693_v29, %v2118_v30 }
 0x128   :  { %v9138_v26 = vpop.permute.xlu1 %2182  ;;  %v2697_v12 = vadd.f32 %v2696_v55, %v2123_v52  ;;  %v3167_v52 = vld [vmem:[%s12319_s3 + $0x108] sm:$0xff]  ;;  %v3180_v55 = vld [vmem:[%s12319_s3 + $0x170] sm:$0xff] }
 0x129   :  { %v2849_v7 = vmax.f32 %v2694_v57, 0.0 }
 0x12a   :  { %6709 = vmatmul.msk.bf16.gmra.mxu0 %vm2580_vm3, %v7701_v50  ;;  %v2850_v15 = vmax.f32 %v2697_v12, 0.0  ;;  %v7702_v12 = vld [vmem:[%s12316_s0 + $0x58] sm:$0xff]  ;;  %v2108_v50 = vpop.permute.xlu2 %2107 }
 0x12b   :  { %v9151_v9 = vpack.c.bf16 %v2849_v7, %v2848_v38  ;;  %v3178_v7 = vld [vmem:[%s12319_s3 + $0x160] sm:$0xff] }
 0x12c   :  { %3392 = vperm.xlu0 %7967, %v3166_v58  }
 0x12e   :  { %3402 = vperm.xlu2 %7969, %v3168_v56   ;;  %3397 = vperm.xlu1 %7968, %v3167_v52   ;;  %v3179_v52 = vld [vmem:[%s12319_s3 + $0x168] sm:$0xff]  ;;  %v9294_v11 = vpop.permute.xlu0 %2262 }
 0x12f   :  { %v2698_v54 = vpop.f32.mrf.mxu0  ;;  %12348 = vst [vmem:[#allocation31_spill] sm:$0xff] %v9294_v11 }
 0x130   :  { %v2699_v48 = vadd.f32 %v2698_v54, %v2128_v34  ;;  %v9153_v54 = vpop.permute.xlu1 %2267 }
 0x131   :  { %12347 = vst [vmem:[#allocation30_spill] sm:$0xff] %v9153_v54 }
 0x132   :  { %v2851_v57 = vmax.f32 %v2699_v48, 0.0  ;;  %v3181_v48 = vld [vmem:[%s12319_s3 + $0x178] sm:$0xff] }
 0x134   :  { %v9155_v34 = vpack.c.bf16 %v2851_v57, %v2850_v15  ;;  %3462 = vperm.xlu0 %7967, %v3180_v55   ;;  %v2689_v15 = vadd.f32 %v9076_v39, %v2108_v50  ;;  %v3177_v57 = vld [vmem:[%s12319_s3 + $0x158] sm:$0xff]  ;;  %v3176_v39 = vld [vmem:[%s12319_s3 + $0x150] sm:$0xff]  ;;  %v3174_v55 = vld [vmem:[%s12319_s3 + $0x140] sm:$0xff] }
 0x136   :  { %3452 = vperm.xlu2 %7969, %v3178_v7   ;;  %3467 = vperm.xlu1 %7968, %v3181_v48   ;;  %v2847_v30 = vmax.f32 %v2689_v15, 0.0  ;;  %v3172_v7 = vld [vmem:[%s12319_s3 + $0x130] sm:$0xff]  ;;  %v3175_v48 = vld [vmem:[%s12319_s3 + $0x148] sm:$0xff]  ;;  %v9202_v15 = vpop.f32.mrf.mxu3 }
 0x137   :  { %v2701_v29 = vpop.f32.mrf.mxu0 }
 0x138   :  { %v2103_v38 = vpop.permute.xlu1 %2102  ;;  %v2702_v23 = vadd.f32 %v2701_v29, %v9028_v59  ;;  %v7703_v29 = vld [vmem:[%s12316_s0 + $0x60] sm:$0xff] }
 0x139   :  { %v2687_v5 = vadd.f32 %v9059_v22, %v2103_v38 }
 0x13a   :  { %6710 = vmatmul.msk.bf16.gmra.mxu0 %vm2580_vm3, %v7702_v12  ;;  %v2852_v59 = vmax.f32 %v2702_v23, 0.0  ;;  %v3170_v23 = vld [vmem:[%s12319_s3 + $0x120] sm:$0xff] }
 0x13b   :  { %v2846_v6 = vmax.f32 %v2687_v5, 0.0  ;;  %v3173_v5 = vld [vmem:[%s12319_s3 + $0x138] sm:$0xff] }
 0x13c   :  { %3457 = vperm.xlu0 %7967, %v3179_v52  }
 0x13d   :  { %v9183_v22 = vpack.c.bf16 %v2847_v30, %v2846_v6  ;;  %v3171_v6 = vld [vmem:[%s12319_s3 + $0x128] sm:$0xff]  ;;  %v9215_v30 = vpop.f32.mrf.mxu1 }
 0x13e   :  { %3447 = vperm.xlu2 %7969, %v3177_v57   ;;  %3442 = vperm.xlu1 %7968, %v3176_v39   ;;  %v3169_v57 = vld [vmem:[%s12319_s3 + $0x118] sm:$0xff]  ;;  %v3183_v39 = vld [vmem:[%s12319_s3 + $0x188] sm:$0xff] }
 0x13f   :  { %v2703_v58 = vpop.f32.mrf.mxu0 }
 0x140   :  { %v2704_v56 = vadd.f32 %v2703_v58, %v8971_v31  ;;  %v9217_v58 = vpop.f32.mrf.mxu3 }
 0x142   :  { %v2853_v12 = vmax.f32 %v2704_v56, 0.0  ;;  %v7704_v56 = vld [vmem:[%s12316_s0 + $0x68] sm:$0xff] }
 0x144   :  { %v9185_v31 = vpack.c.bf16 %v2853_v12, %v2852_v59  ;;  %3432 = vperm.xlu0 %7967, %v3174_v55   ;;  %v3182_v59 = vld [vmem:[%s12319_s3 + $0x180] sm:$0xff] }
 0x145   :  { %v9234_v12 = vpop.f32.mrf.mxu1 }
 0x146   :  { %3422 = vperm.xlu2 %7969, %v3172_v7   ;;  %3437 = vperm.xlu1 %7968, %v3175_v48   ;;  %v3184_v7 = vld [vmem:[%s12319_s3 + $0x190] sm:$0xff]  ;;  %v3186_v48 = vld [vmem:[%s12319_s3 + $0x1a0] sm:$0xff] }
 0x147   :  { %v9190_v50 = vpop.f32.mrf.mxu0 }
 0x14a   :  { %6711 = vmatmul.msk.bf16.gmra.mxu0 %vm2580_vm3, %v7703_v29  ;;  %v9236_v29 = vpop.f32.mrf.mxu3 }
 0x14c   :  { %3427 = vperm.xlu0 %7967, %v3173_v5   ;;  %v3185_v5 = vld [vmem:[%s12319_s3 + $0x198] sm:$0xff] }
 0x14e   :  { %3417 = vperm.xlu2 %7969, %v3171_v6   ;;  %3412 = vperm.xlu1 %7968, %v3170_v23   ;;  %v9247_v6 = vpop.f32.mrf.mxu1 }
 0x14f   :  { %v9204_v38 = vpop.f32.mrf.mxu0 }
 0x152   :  { %v9249_v23 = vpop.f32.mrf.mxu3 }
 0x154   :  { %3407 = vperm.xlu0 %7967, %v3169_v57  }
 0x156   :  { %3477 = vperm.xlu2 %7969, %v3183_v39   ;;  %3472 = vperm.xlu1 %7968, %v3182_v59   ;;  %v3187_v39 = vld [vmem:[%s12319_s3 + $0x1a8] sm:$0xff]  ;;  %v3189_v59 = vld [vmem:[%s12319_s3 + $0x1b8] sm:$0xff] }
 0x157   :  { %v9222_v52 = vpop.f32.mrf.mxu0 }
 0x15a   :  { %6712 = vmatmul.msk.bf16.gmra.mxu0 %vm2580_vm3, %v7704_v56  ;;  %v7705_v56 = vld [vmem:[%s12316_s0 + $0x70] sm:$0xff] }
 0x15c   :  { %3482 = vperm.xlu0 %7967, %v3184_v7   ;;  %v3188_v7 = vld [vmem:[%s12319_s3 + $0x1b0] sm:$0xff] }
 0x15e   :  { %3492 = vperm.xlu2 %7969, %v3186_v48   ;;  %3487 = vperm.xlu1 %7968, %v3185_v5   ;;  %v9264_v48 = vpop.f32.mrf.mxu1  ;;  %v2836_v5 = vpop.f32.mrf.mxu3 }
 0x15f   :  { %v2713_v55 = vpop.f32.mrf.mxu0  ;;  %v2837_v51 = vadd.f32 %v2836_v5, %v8963_v24  ;;  %v2832_v24 = vadd.f32 %v9236_v29, %v8949_v19  ;;  %v3194_v19 = vld [vmem:[%s12319_s3 + $0x1e0] sm:$0xff] }
 0x164   :  { %3497 = vperm.xlu0 %7967, %v3187_v39   ;;  %v3213_v39 = vld [vmem:[%s12319_s3 + $0x278] sm:$0xff] }
 0x166   :  { %3507 = vperm.xlu2 %7969, %v3189_v59   ;;  %3502 = vperm.xlu1 %7968, %v3188_v7   ;;  %v2838_v59 = vpop.f32.mrf.mxu3  ;;  %v7706_v7 = vld [vmem:[%s12316_s0 + $0x78] sm:$0xff] }
 0x167   :  { %v2716_v57 = vpop.f32.mrf.mxu0  ;;  %v2839_v44 = vadd.f32 %v2838_v59, %v8961_v61  ;;  %v2829_v59 = vadd.f32 %v9217_v58, %v9030_v8  ;;  %v3208_v8 = vld [vmem:[%s12319_s3 + $0x250] sm:$0xff] }
 0x16a   :  { %6713 = vmatmul.msk.bf16.gmra.mxu0 %vm2580_vm3, %v7705_v56  ;;  %v9275_v56 = vpop.f32.mrf.mxu1 }
 0x16c   :  { %3622 = vperm.xlu0 %7967, %v3212_v3   ;;  %v3196_v3 = vld [vmem:[%s12319_s3 + $0x1f0] sm:$0xff] }
 0x16e   :  { %3702 = vperm.xlu2 %7969, %v3228_v18   ;;  %3627 = vperm.xlu1 %7968, %v3213_v39   ;;  %v9292_v39 = vpop.f32.mrf.mxu2  ;;  %v2841_v28 = vpop.f32.mrf.mxu3 }
 0x16f   :  { %v2718_v54 = vpop.f32.mrf.mxu0 }
 0x170   :  { %v2719_v0 = vadd.f32 %v2718_v54, %v8813_v36  ;;  %v2714_v54 = vadd.f32 %v2713_v55, %v8923_v1  ;;  %v2709_v1 = vadd.f32 %v9204_v38, %v8986_v35  ;;  %v2906_v55 = vmax.f32 %v2837_v51, 0.0  ;;  %v3195_v35 = vld [vmem:[%s12319_s3 + $0x1e8] sm:$0xff] }
 0x172   :  { %v9290_v18 = vpop.f32.mrf.mxu1  ;;  %v2857_v61 = vmax.f32 %v2714_v54, 0.0  ;;  %v2855_v29 = vmax.f32 %v2709_v1, 0.0 }
 0x174   :  { %3707 = vperm.xlu0 %7967, %v3229_v13   ;;  %v3226_v13 = vld [vmem:[%s12319_s3 + $0x2e0] sm:$0xff] }
 0x176   :  { %3547 = vperm.xlu2 %7969, %v3197_v40   ;;  %3542 = vperm.xlu1 %7968, %v3196_v3   ;;  %v3210_v40 = vld [vmem:[%s12319_s3 + $0x260] sm:$0xff]  ;;  %v2859_v3 = vmax.f32 %v2719_v0, 0.0  ;;  %v9315_v33 = vpop.f32.mrf.mxu2 }
 0x177   :  { %v2721_v14 = vpop.f32.mrf.mxu0 }
 0x178   :  { %v2722_v16 = vadd.f32 %v2721_v14, %v8772_v17  ;;  %v2717_v17 = vadd.f32 %v2716_v57, %v8864_v27  ;;  %v2712_v27 = vadd.f32 %v9222_v52, %v8925_v10  ;;  %v2834_v10 = vadd.f32 %v9249_v23, %v9032_v4 }
 0x179   :  { %v2907_v57 = vmax.f32 %v2839_v44, 0.0  ;;  %v2707_v4 = vadd.f32 %v9190_v50, %v8904_v2  ;;  %v2827_v23 = vadd.f32 %v9202_v15, %v9072_v37  ;;  %v3224_v15 = vld [vmem:[%s12319_s3 + $0x2d0] sm:$0xff] }
 0x17a   :  { %6714 = vmatmul.msk.bf16.gmra.mxu0 %vm2580_vm3, %v7706_v7  ;;  %v3211_v7 = vld [vmem:[%s12319_s3 + $0x268] sm:$0xff]  ;;  %v2860_v14 = vmax.f32 %v2722_v16, 0.0  ;;  %v2368_v16 = vpop.permute.xlu0 %2367  ;;  %v2856_v51 = vmax.f32 %v2712_v27, 0.0 }
 0x17b   :  { %v2940_v50 = vpack.c.bf16 %v2907_v57, %v2906_v55 }
 0x17c   :  { %3612 = vperm.xlu0 %7967, %v3210_v40   ;;  %v2843_v40 = vpop.f32.mrf.mxu3 }
 0x17d   :  { %v2844_v0 = vadd.f32 %v2843_v40, %v8847_v46  ;;  %v3227_v46 = vld [vmem:[%s12319_s3 + $0x2e8] sm:$0xff] }
 0x17e   :  { %3692 = vperm.xlu2 %7969, %v3226_v13   ;;  %3617 = vperm.xlu1 %7968, %v3211_v7   ;;  %v2904_v13 = vmax.f32 %v2832_v24, 0.0  ;;  %v2905_v7 = vmax.f32 %v2834_v10, 0.0  ;;  %v2821_v2 = vpop.f32.mrf.mxu2  ;;  %v2819_v24 = vadd.f32 %v9315_v33, %v2368_v16  ;;  %v2799_v33 = vadd.f32 %v9264_v48, %v8862_v49 }
 0x17f   :  { %v2723_v53 = vpop.f32.mrf.mxu0  ;;  %v2909_v5 = vmax.f32 %v2844_v0, 0.0  ;;  %v2804_v0 = vadd.f32 %v9290_v18, %v8828_v41  ;;  %v2792_v48 = vadd.f32 %v9215_v30, %v8832_v42 }
 0x180   :  { %v2724_v45 = vadd.f32 %v2723_v53, %v8783_v63  ;;  %v2842_v63 = vadd.f32 %v2841_v28, %v8902_v62  ;;  %v9310_v53 = vpop.f32.mrf.mxu1  ;;  %v7707_v28 = vld [vmem:[%s12316_s0 + $0x80] sm:$0xff]  ;;  %v2939_v58 = vpack.c.bf16 %v2905_v7, %v2904_v13  ;;  %v2899_v16 = vmax.f32 %v2819_v24, 0.0  ;;  %v3221_v24 = vld [vmem:[%s12319_s3 + $0x2b8] sm:$0xff] }
 0x181   :  { %v2893_v41 = vmax.f32 %v2804_v0, 0.0  ;;  %v6733_v7 = vld [vmem:[%s12318_s2] sm:$0xf] }
 0x182   :  { %v2861_v36 = vmax.f32 %v2724_v45, 0.0  ;;  %v2858_v45 = vmax.f32 %v2717_v17, 0.0  ;;  %v2908_v62 = vmax.f32 %v2842_v63, 0.0  ;;  %v2915_v17 = vpack.c.bf16 %v2857_v61, %v2856_v51  ;;  %v2353_v27 = vpop.permute.xlu0 %2352 }
 0x183   :  { %v2902_v63 = vmax.f32 %v2827_v23, 0.0  ;;  %v2817_v61 = vadd.f32 %v9292_v39, %v9140_v47  ;;  %v2797_v47 = vadd.f32 %v9247_v6, %v8798_v25  ;;  %v3192_v25 = vld [vmem:[%s12319_s3 + $0x1d0] sm:$0xff]  ;;  %v2358_v6 = vpop.permute.xlu1 %2357  ;;  %v2794_v51 = vadd.f32 %v9234_v12, %v8900_v60 }
 0x184   :  { %v2917_v11 = vpack.c.bf16 %v2861_v36, %v2860_v14  ;;  %3697 = vperm.xlu0 %7967, %v3227_v46   ;;  %v2941_v44 = vpack.c.bf16 %v2909_v5, %v2908_v62  ;;  %v2854_v14 = vmax.f32 %v2707_v4, 0.0  ;;  %v2802_v62 = vadd.f32 %v9275_v56, %v8809_v32  ;;  %v7708_v32 = vld [vmem:[%s12316_s0 + $0x88] sm:$0xff]  ;;  %v3193_v5 = vld [vmem:[%s12319_s3 + $0x1d8] sm:$0xff]  ;;  %v7725_v60 = vld [vmem:[%s12318_s2 + $0xc] sm:$0xf0] }
 0x185   :  { %v2898_v39 = vmax.f32 %v2817_v61, 0.0  ;;  %v2888_v12 = vmax.f32 %v2792_v48, 0.0  ;;  %v3214_v48 = vld [vmem:[%s12319_s3 + $0x280] sm:$0xff] }
 0x186   :  { %4670 = vmatpush.bf16.msrb.mxu1 %v2917_v11  ;;  %v2916_v11 = vpack.c.bf16 %v2859_v3, %v2858_v45  ;;  %3537 = vperm.xlu2 %7969, %v3195_v35   ;;  %v2903_v3 = vmax.f32 %v2829_v59, 0.0  ;;  %v2914_v37 = vpack.c.bf16 %v2855_v29, %v2854_v14  ;;  %v2822_v45 = vadd.f32 %v2821_v2, %v9123_v21  ;;  %v2823_v21 = vpop.f32.mrf.mxu2  ;;  %v3207_v14 = vld [vmem:[%s12319_s3 + $0x248] sm:$0xff] }
 0x187   :  { %v2726_v52 = vpop.f32.mrf.mxu0  ;;  %3532 = vperm.xlu1 %7968, %v3194_v19   ;;  %5417 = vmatpush.bf16.msrb.mxu0 %v2941_v44  ;;  %v2824_v55 = vadd.f32 %v2823_v21, %v9119_v43  ;;  %v2892_v57 = vmax.f32 %v2802_v62, 0.0  ;;  %v2343_v19 = vpop.permute.xlu2 %2342  ;;  %v2890_v44 = vmax.f32 %v2797_v47, 0.0  ;;  %v2891_v29 = vmax.f32 %v2799_v33, 0.0  ;;  %v3205_v62 = vld [vmem:[%s12319_s3 + $0x238] sm:$0xff]  ;;  %v3203_v21 = vld [vmem:[%s12319_s3 + $0x228] sm:$0xff] }
 0x188   :  { %v9341_v38 = vpop.f32.mrf.mxu1  ;;  %v2727_v36 = vadd.f32 %v2726_v52, %v9138_v26  ;;  %v3209_v26 = vld [vmem:[%s12319_s3 + $0x258] sm:$0xff]  ;;  %v2938_v10 = vpack.c.bf16 %v2903_v3, %v2902_v63  ;;  %v2807_v59 = vadd.f32 %v9310_v53, %v2343_v19  ;;  %v2936_v30 = vpack.c.bf16 %v2899_v16, %v2898_v39  ;;  %v3219_v47 = vld [vmem:[%s12319_s3 + $0x2a8] sm:$0xff] }
 0x189   :  { %v2901_v18 = vmax.f32 %v2824_v55, 0.0  ;;  %v2933_v35 = vpack.c.bf16 %v2893_v41, %v2892_v57  ;;  %v7733_v55 = vld [vmem:[%s12318_s2 + $0x4c] sm:$0xf0]  ;;  %v3201_v16 = vld [vmem:[%s12319_s3 + $0x218] sm:$0xff] }
 0x18a   :  { %6715 = vmatmul.msk.bf16.gmra.mxu0 %vm2580_vm3, %v7707_v28  ;;  %4671 = vmatpush.bf16.msrb.mxu1 %v2916_v11  ;;  %v2900_v11 = vmax.f32 %v2822_v45, 0.0  ;;  %v2348_v4 = vpop.permute.xlu0 %2347  ;;  %v3200_v41 = vld [vmem:[%s12319_s3 + $0x210] sm:$0xff] }
 0x18b   :  { %5418 = vmatpush.bf16.msrb.mxu0 %v2940_v50  ;;  %v2809_v13 = vadd.f32 %v9341_v38, %v2348_v4  ;;  %5168 = vmatpush.bf16.msrb.mxu3 %v2933_v35  ;;  %v2894_v38 = vmax.f32 %v2807_v59, 0.0  ;;  %v3206_v50 = vld [vmem:[%s12319_s3 + $0x240] sm:$0xff]  ;;  %v3215_v4 = vld [vmem:[%s12319_s3 + $0x288] sm:$0xff] }
 0x18c   :  { %3602 = vperm.xlu0 %7967, %v3208_v8   ;;  %v2937_v49 = vpack.c.bf16 %v2901_v18, %v2900_v11  ;;  %v6765_v11 = vld [vmem:[%s12318_s2 + $0x40] sm:$0xf] }
 0x18d   :  { %v2895_v2 = vmax.f32 %v2809_v13, 0.0  ;;  %v6766_v33 = vor.u32 %v7733_v55, %v6765_v11  ;;  %v7711_v18 = vld [vmem:[%s12316_s0 + $0xa0] sm:$0xff]  ;;  %v5860_v13 = vld [vmem:[%s12321_s5 + $0x10] sm:$0xff] }
 0x18e   :  { %4672 = vmatpush.bf16.msrb.mxu1 %v2915_v17  ;;  %3682 = vperm.xlu2 %7969, %v3224_v15   ;;  %v2889_v17 = vmax.f32 %v2794_v51, 0.0  ;;  %v3223_v15 = vld [vmem:[%s12319_s3 + $0x2c8] sm:$0xff] }
 0x18f   :  { %v2728_v54 = vpop.f32.mrf.mxu0  ;;  %3607 = vperm.xlu1 %7968, %v3209_v26   ;;  %5419 = vmatpush.bf16.msrb.mxu0 %v2939_v58  ;;  %v3190_v26 = vld [vmem:[%s12319_s3 + $0x1c0] sm:$0xff]  ;;  %v5859_v51 = vld [vmem:[%s12321_s5 + $0x8] sm:$0xff] }
 0x190   :  { %v2729_v40 = vadd.f32 %v2728_v54, %v9121_v20  ;;  %v2862_v20 = vmax.f32 %v2727_v36, 0.0  ;;  %v2811_v1 = vpop.f32.mrf.mxu1  ;;  %v2932_v36 = vpack.c.bf16 %v2891_v29, %v2890_v44  ;;  %v6734_v54 = vor.u32 %v7725_v60, %v6733_v7  ;;  %v6749_v58 = vld [vmem:[%s12318_s2 + $0x20] sm:$0xf]  ;;  %v5863_v60 = vld [vmem:[%s12321_s5 + $0x28] sm:$0xff] }
 0x191   :  { %v2812_v43 = vadd.f32 %v2811_v1, %v2353_v27  ;;  %v2931_v3 = vpack.c.bf16 %v2889_v17, %v2888_v12  ;;  %v7729_v27 = vld [vmem:[%s12318_s2 + $0x2c] sm:$0xf0]  ;;  %v7710_v1 = vld [vmem:[%s12316_s0 + $0x98] sm:$0xff]  ;;  %v5858_v44 = vld [vmem:[%s12321_s5] sm:$0xff] }
 0x192   :  { %v2863_v28 = vmax.f32 %v2729_v40, 0.0  ;;  %4673 = vmatpush.bf16.msrb.mxu1 %v2914_v37  ;;  %5169 = vmatpush.bf16.msrb.mxu3 %v2932_v36  ;;  %v2934_v40 = vpack.c.bf16 %v2895_v2, %v2894_v38  ;;  %v7709_v37 = vld [vmem:[%s12316_s0 + $0x90] sm:$0xff]  ;;  %v6750_v0 = vor.u32 %v7729_v27, %v6749_v58  ;;  %v6797_v29 = vld [vmem:[%s12318_s2 + $0x80] sm:$0xf]  ;;  %v5865_v12 = vld [vmem:[%s12321_s5 + $0x38] sm:$0xff] }
 0x193   :  { %5420 = vmatpush.bf16.msrb.mxu0 %v2938_v10  ;;  %v2896_v42 = vmax.f32 %v2812_v43, 0.0  ;;  %v3202_v10 = vld [vmem:[%s12319_s3 + $0x220] sm:$0xff]  ;;  %v3217_v43 = vld [vmem:[%s12319_s3 + $0x298] sm:$0xff]  ;;  %v5864_v17 = vld [vmem:[%s12321_s5 + $0x30] sm:$0xff] }
 0x194   :  { %v9366_v52 = vpack.c.bf16 %v2863_v28, %v2862_v20  ;;  %v3204_v20 = vld [vmem:[%s12319_s3 + $0x230] sm:$0xff]  ;;  %v6813_v38 = vld [vmem:[%s12318_s2 + $0xa0] sm:$0xf]  ;;  %v5867_v36 = vld [vmem:[%s12321_s5 + $0x48] sm:$0xff] }
 0x195   :  { %v3220_v28 = vld [vmem:[%s12319_s3 + $0x2b0] sm:$0xff] }
 0x196   :  { %4674 = vmatpush.bf16.msrb.mxu1 %v9185_v31  ;;  %v3225_v31 = vld [vmem:[%s12319_s3 + $0x2d8] sm:$0xff]  ;;  %3527 = vperm.xlu2 %7969, %v3193_v5   ;;  %v6781_v5 = vld [vmem:[%s12318_s2 + $0x60] sm:$0xf]  ;;  %v7745_v2 = vld [vmem:[%s12318_s2 + $0xac] sm:$0xf0] }
 0x197   :  { %v9377_v56 = vpop.f32.mrf.mxu0  ;;  %3687 = vperm.xlu0 %7967, %v3225_v31   ;;  %3522 = vperm.xlu1 %7968, %v3192_v25   ;;  %v3216_v31 = vld [vmem:[%s12319_s3 + $0x290] sm:$0xff] }
 0x198   :  { %v2813_v46 = vpop.f32.mrf.mxu1  ;;  %5421 = vmatpush.bf16.msrb.mxu0 %v2937_v49  ;;  %5170 = vmatpush.bf16.msrb.mxu3 %v2931_v3  ;;  %v7737_v25 = vld [vmem:[%s12318_s2 + $0x6c] sm:$0xf0]  ;;  %v5869_v3 = vld [vmem:[%s12321_s5 + $0x58] sm:$0xff] }
 0x199   :  { %v2814_v23 = vadd.f32 %v2813_v46, %v2358_v6  ;;  %v3198_v6 = vld [vmem:[%s12319_s3 + $0x200] sm:$0xff]  ;;  %v3199_v46 = vld [vmem:[%s12319_s3 + $0x208] sm:$0xff]  ;;  %v6782_v35 = vor.u32 %v7737_v25, %v6781_v5  ;;  %v7749_v58 = vld [vmem:[%s12318_s2 + $0xcc] sm:$0xf0] }
 0x19a   :  { %6716 = vmatmul.msk.bf16.gmra.mxu0 %vm2580_vm3, %v7708_v32  ;;  %4675 = vmatpush.bf16.msrb.mxu1 %v9155_v34  ;;  %v3218_v32 = vld [vmem:[%s12319_s3 + $0x2a0] sm:$0xff]  ;;  %v12355_v25 = vld [vmem:[#allocation18_spill] sm:$0xff] }
 0x19b   :  { %v2897_v34 = vmax.f32 %v2814_v23, 0.0  ;;  %v7741_v23 = vld [vmem:[%s12318_s2 + $0x8c] sm:$0xf0] }
 0x19c   :  { %5422 = vmatpush.bf16.msrb.mxu0 %v2936_v30  ;;  %v5861_v30 = vld [vmem:[%s12321_s5 + $0x18] sm:$0xff] }
 0x19d   :  { %v2935_v63 = vpack.c.bf16 %v2897_v34, %v2896_v42  ;;  %v5862_v42 = vld [vmem:[%s12321_s5 + $0x20] sm:$0xff]  ;;  %v6798_v34 = vor.u32 %v7741_v23, %v6797_v29 }
 0x19e   :  { %4676 = vmatpush.bf16.msrb.mxu1 %v9151_v9  ;;  %v3222_v9 = vld [vmem:[%s12319_s3 + $0x2c0] sm:$0xff] }
 0x19f   :  { %v9403_v53 = vpop.f32.mrf.mxu0  ;;  %3592 = vperm.xlu0 %7967, %v3206_v50   ;;  %3672 = vperm.xlu2 %7969, %v3222_v9   ;;  %v5866_v9 = vld [vmem:[%s12321_s5 + $0x40] sm:$0xff] }
 0x1a0   :  { %3597 = vperm.xlu1 %7968, %v3207_v14   ;;  %5423 = vmatpush.bf16.msrb.mxu0 %v2935_v63  ;;  %v5868_v14 = vld [vmem:[%s12321_s5 + $0x50] sm:$0xff]  ;;  %v6814_v63 = vor.u32 %v7745_v2, %v6813_v38 }
 0x1a1   :  { %v12361_v2 = vld [vmem:[#allocation29_spill] sm:$0xff] }
 0x1a2   :  { %4677 = vmatpush.bf16.msrb.mxu1 %v9183_v22  ;;  %v3191_v22 = vld [vmem:[%s12319_s3 + $0x1c8] sm:$0xff] }
 0x1a4   :  { %5424 = vmatpush.bf16.msrb.mxu0 %v2934_v40  ;;  %v5871_v40 = vld [vmem:[%s12321_s5 + $0x68] sm:$0xff] }
 0x1a5   :  { %4678 = vmatmul.bf16.vlgmr.msrb.gmra.mxu1 %v6734_v54 }
 0x1a7   :  { %v9418_v8 = vpop.f32.mrf.mxu0  ;;  %3677 = vperm.xlu0 %7967, %v3223_v15   ;;  %3517 = vperm.xlu2 %7969, %v3191_v22   ;;  %v12349_v15 = vld [vmem:[#allocation8_spill] sm:$0xff] }
 0x1a8   :  { %3512 = vperm.xlu1 %7968, %v3190_v26   ;;  %v6829_v26 = vld [vmem:[%s12318_s2 + $0xc0] sm:$0xf] }
 0x1aa   :  { %6717 = vmatmul.msk.bf16.gmra.mxu0 %vm2580_vm3, %v7709_v37  ;;  %v5870_v37 = vld [vmem:[%s12321_s5 + $0x60] sm:$0xff] }
 0x1af   :  { %v9436_v45 = vpop.f32.mrf.mxu0  ;;  %3582 = vperm.xlu0 %7967, %v3204_v20   ;;  %3662 = vperm.xlu2 %7969, %v3220_v28   ;;  %v12350_v20 = vld [vmem:[#allocation10_spill] sm:$0xff] }
 0x1b0   :  { %3587 = vperm.xlu1 %7968, %v3205_v62   ;;  %v12351_v62 = vld [vmem:[#allocation9_spill] sm:$0xff] }
 0x1b5   :  { %4683 = vmatmul.bf16.gmra.mxu1 %v6750_v0 }
 0x1b7   :  { %v9450_v61 = vpop.f32.mrf.mxu0  ;;  %3667 = vperm.xlu0 %7967, %v3221_v24   ;;  %3577 = vperm.xlu2 %7969, %v3203_v21   ;;  %v5873_v24 = vld [vmem:[%s12321_s5 + $0x78] sm:$0xff]  ;;  %v6830_v21 = vor.u32 %v7749_v58, %v6829_v26 }
 0x1b8   :  { %3572 = vperm.xlu1 %7968, %v3202_v10   ;;  %v12352_v10 = vld [vmem:[#allocation11_spill] sm:$0xff] }
 0x1ba   :  { %6718 = vmatmul.msk.bf16.gmra.mxu0 %vm2580_vm3, %v7710_v1  ;;  %v5872_v1 = vld [vmem:[%s12321_s5 + $0x70] sm:$0xff] }
 0x1bf   :  { %v9468_v57 = vpop.f32.mrf.mxu0  ;;  %3652 = vperm.xlu0 %7967, %v3218_v32   ;;  %3562 = vperm.xlu2 %7969, %v3200_v41   ;;  %v12353_v41 = vld [vmem:[#allocation14_spill] sm:$0xff] }
 0x1c0   :  { %3657 = vperm.xlu1 %7968, %v3219_v47  }
 0x1c5   :  { %4688 = vmatmul.bf16.gmra.mxu1 %v6766_v33 }
 0x1c7   :  { %v9482_v39 = vpop.f32.mrf.mxu0  ;;  %3567 = vperm.xlu0 %7967, %v3201_v16   ;;  %3647 = vperm.xlu2 %7969, %v3217_v43   ;;  %v12354_v16 = vld [vmem:[#allocation13_spill] sm:$0xff] }
 0x1c8   :  { %3642 = vperm.xlu1 %7968, %v3216_v31  }
 0x1ca   :  { %6719 = vmatmul.msk.bf16.gmra.mxu0 %vm2580_vm3, %v7711_v18 }
 0x1cf   :  { %v9500_v49 = vpop.f32.mrf.mxu0  ;;  %3552 = vperm.xlu0 %7967, %v3198_v6   ;;  %3632 = vperm.xlu2 %7969, %v3214_v48  }
 0x1d0   :  { %3557 = vperm.xlu1 %7968, %v3199_v46   ;;  %v2749_v6 = vadd.f32 %v9500_v49, %v12355_v25  ;;  %v6845_v49 = vld [vmem:[%s12318_s2 + $0xe0] sm:$0xf] }
 0x1d2   :  { %v2871_v23 = vmax.f32 %v2749_v6, 0.0 }
 0x1d5   :  { %4693 = vmatmul.bf16.gmra.mxu1 %v6782_v35  ;;  %v12356_v35 = vld [vmem:[#allocation12_spill] sm:$0xff] }
 0x1d7   :  { %v2751_v19 = vpop.f32.mrf.mxu0  ;;  %3637 = vperm.xlu0 %7967, %v3215_v4   ;;  %5881 = vperm.xlu2 %7969, %v5859_v51   ;;  %v2747_v4 = vadd.f32 %v9482_v39, %v12356_v35  ;;  %v7753_v39 = vld [vmem:[%s12318_s2 + $0xec] sm:$0xf0]  ;;  %v7724_v35 = vld [vmem:[%s12318_s2 + $0xc] sm:$0xf] }
 0x1d8   :  { %5876 = vperm.xlu1 %7968, %v5858_v44   ;;  %v2752_v43 = vadd.f32 %v2751_v19, %v12354_v16  ;;  %v12357_v44 = vld [vmem:[#allocation16_spill] sm:$0xff]  ;;  %v12358_v19 = vld [vmem:[#allocation19_spill] sm:$0xff]  ;;  %v7765_v16 = vld [vmem:[%s12318_s2 + $0x14c] sm:$0xf0] }
 0x1d9   :  { %v2744_v29 = vadd.f32 %v9468_v57, %v12357_v44 }
 0x1da   :  { %v2872_v51 = vmax.f32 %v2752_v43, 0.0  ;;  %v7731_v43 = vld [vmem:[%s12318_s2 + $0x44] sm:$0xf] }
 0x1df   :  { %v2753_v59 = vpop.f32.mrf.mxu0  ;;  %5886 = vperm.xlu0 %7967, %v5860_v13   ;;  %5896 = vperm.xlu2 %7969, %v5862_v42   ;;  %v2742_v13 = vadd.f32 %v9450_v61, %v12358_v19  ;;  %v2870_v42 = vmax.f32 %v2747_v4, 0.0 }
 0x1e0   :  { %5891 = vperm.xlu1 %7968, %v5861_v30   ;;  %v2754_v47 = vadd.f32 %v2753_v59, %v12353_v41 }
 0x1e1   :  { %v2868_v38 = vmax.f32 %v2742_v13, 0.0  ;;  %v7769_v13 = vld [vmem:[%s12318_s2 + $0x16c] sm:$0xf0] }
 0x1e2   :  { %v2873_v48 = vmax.f32 %v2754_v47, 0.0 }
 0x1e4   :  { %v2923_v59 = vpack.c.bf16 %v2873_v48, %v2872_v51  ;;  %v6743_v51 = vld [vmem:[%s12318_s2 + $0x18] sm:$0xf0] }
 0x1e5   :  { %4698 = vmatmul.bf16.gmra.mxu1 %v6798_v34  ;;  %v12359_v34 = vld [vmem:[#allocation23_spill] sm:$0xff]  ;;  %v6746_v44 = vor.u32 %v7724_v35, %v6743_v51  ;;  %v7726_v35 = vld [vmem:[%s12318_s2 + $0x14] sm:$0xf0] }
 0x1e6   :  { %v2739_v57 = vadd.f32 %v9436_v45, %v12359_v34  ;;  %v12364_v34 = vld [vmem:[#allocation21_spill] sm:$0xff] }
 0x1e7   :  { %v2756_v7 = vpop.f32.mrf.mxu0  ;;  %5901 = vperm.xlu0 %7967, %v5863_v60   ;;  %5911 = vperm.xlu2 %7969, %v5865_v12   ;;  %v2922_v60 = vpack.c.bf16 %v2871_v23, %v2870_v42  ;;  %v6846_v12 = vor.u32 %v7753_v39, %v6845_v49  ;;  %v6909_v23 = vld [vmem:[%s12318_s2 + $0x160] sm:$0xf]  ;;  %v7735_v42 = vld [vmem:[%s12318_s2 + $0x64] sm:$0xf]  ;;  %v6783_v49 = vld [vmem:[%s12318_s2 + $0x70] sm:$0xf0] }
 0x1e8   :  { %5906 = vperm.xlu1 %7968, %v5864_v17   ;;  %v2757_v11 = vadd.f32 %v2756_v7, %v12352_v10  ;;  %v2869_v7 = vmax.f32 %v2744_v29, 0.0  ;;  %v12360_v17 = vld [vmem:[#allocation24_spill] sm:$0xff]  ;;  %v7727_v10 = vld [vmem:[%s12318_s2 + $0x24] sm:$0xf]  ;;  %5425 = vmatmul.bf16.vlgmr.msrb.gmra.mxu0 %v6746_v44 }
 0x1e9   :  { %v2737_v61 = vadd.f32 %v9418_v8, %v12360_v17  ;;  %v6786_v17 = vor.u32 %v7735_v42, %v6783_v49  ;;  %v7732_v44 = vld [vmem:[%s12318_s2 + $0x4c] sm:$0xf]  ;;  %v7777_v42 = vld [vmem:[%s12318_s2 + $0x1ac] sm:$0xf0]  ;;  %v7743_v49 = vld [vmem:[%s12318_s2 + $0xa4] sm:$0xf] }
 0x1ea   :  { %v2874_v31 = vmax.f32 %v2757_v11, 0.0 }
 0x1ef   :  { %v2758_v50 = vpop.f32.mrf.mxu0  ;;  %5916 = vperm.xlu0 %7967, %v5866_v9   ;;  %5926 = vperm.xlu2 %7969, %v5868_v14   ;;  %v2867_v9 = vmax.f32 %v2739_v57, 0.0  ;;  %v2921_v14 = vpack.c.bf16 %v2869_v7, %v2868_v38  ;;  %v12365_v7 = vld [vmem:[#allocation15_spill] sm:$0xff] }
 0x1f0   :  { %5921 = vperm.xlu1 %7968, %v5867_v36   ;;  %v2759_v28 = vadd.f32 %v2758_v50, %v12350_v20  ;;  %v2734_v50 = vadd.f32 %v9403_v53, %v12361_v2  ;;  %v12362_v36 = vld [vmem:[#allocation25_spill] sm:$0xff]  ;;  %v3233_v20 = vpop.permute.xlu1 %3232 }
 0x1f1   :  { %v7757_v53 = vld [vmem:[%s12318_s2 + $0x10c] sm:$0xf0] }
 0x1f2   :  { %v2875_v33 = vmax.f32 %v2759_v28, 0.0 }
 0x1f4   :  { %v2924_v46 = vpack.c.bf16 %v2875_v33, %v2874_v31  ;;  %v6767_v31 = vld [vmem:[%s12318_s2 + $0x50] sm:$0xf0] }
 0x1f5   :  { %4703 = vmatmul.bf16.gmra.mxu1 %v6814_v63  ;;  %v2732_v63 = vadd.f32 %v9377_v56, %v12362_v36  ;;  %v7723_v56 = vld [vmem:[%s12318_s2 + $0x4] sm:$0xf]  ;;  %v6770_v48 = vor.u32 %v7731_v43, %v6767_v31 }
 0x1f7   :  { %v2761_v54 = vpop.f32.mrf.mxu0  ;;  %5931 = vperm.xlu0 %7967, %v5869_v3   ;;  %5941 = vperm.xlu2 %7969, %v5871_v40   ;;  %v2865_v3 = vmax.f32 %v2734_v50, 0.0 }
 0x1f8   :  { %5936 = vperm.xlu1 %7968, %v5870_v37   ;;  %v2762_v22 = vadd.f32 %v2761_v54, %v12349_v15  ;;  %v2866_v54 = vmax.f32 %v2737_v61, 0.0  ;;  %v2864_v37 = vmax.f32 %v2732_v63, 0.0  ;;  %v6861_v15 = vld [vmem:[%s12318_s2 + $0x100] sm:$0xf]  ;;  %v12366_v61 = vld [vmem:[#allocation22_spill] sm:$0xff] }
 0x1f9   :  { %v6862_v58 = vor.u32 %v7757_v53, %v6861_v15  ;;  %v6759_v15 = vld [vmem:[%s12318_s2 + $0x38] sm:$0xf0] }
 0x1fa   :  { %v2876_v55 = vmax.f32 %v2762_v22, 0.0  ;;  %v2920_v40 = vpack.c.bf16 %v2867_v9, %v2866_v54  ;;  %v2919_v8 = vpack.c.bf16 %v2865_v3, %v2864_v37  ;;  %v6735_v22 = vld [vmem:[%s12318_s2 + $0x10] sm:$0xf0]  ;;  %v12368_v3 = vld [vmem:[#allocation20_spill] sm:$0xff] }
 0x1ff   :  { %v2763_v27 = vpop.f32.mrf.mxu0  ;;  %5946 = vperm.xlu0 %7967, %v5872_v1  }
 0x200   :  { %v2764_v0 = vadd.f32 %v2763_v27, %v12351_v62  ;;  %5951 = vperm.xlu1 %7968, %v5873_v24   ;;  %v6738_v27 = vor.u32 %v7723_v56, %v6735_v22  ;;  %v6877_v24 = vld [vmem:[%s12318_s2 + $0x120] sm:$0xf] }
 0x201   :  { %v12369_v56 = vld [vmem:[#allocation27_spill] sm:$0xff] }
 0x202   :  { %v2877_v32 = vmax.f32 %v2764_v0, 0.0 }
 0x204   :  { %v2925_v18 = vpack.c.bf16 %v2877_v32, %v2876_v55 }
 0x205   :  { %4708 = vmatmul.bf16.gmra.mxu1 %v6830_v21  ;;  %v7761_v21 = vld [vmem:[%s12318_s2 + $0x12c] sm:$0xf0] }
 0x206   :  { %4919 = vmatpush.bf16.msrb.mxu2 %v2925_v18  ;;  %v6878_v55 = vor.u32 %v7761_v21, %v6877_v24  ;;  %v6893_v18 = vld [vmem:[%s12318_s2 + $0x140] sm:$0xf]  ;;  %v12371_v21 = vld [vmem:[#allocation30_spill] sm:$0xff] }
 0x207   :  { %v9586_v5 = vpop.f32.mrf.mxu0  ;;  %v6894_v6 = vor.u32 %v7765_v16, %v6893_v18  ;;  %v7739_v18 = vld [vmem:[%s12318_s2 + $0x84] sm:$0xf] }
 0x20a   :  { %4920 = vmatpush.bf16.msrb.mxu2 %v2924_v46 }
 0x20e   :  { %4921 = vmatpush.bf16.msrb.mxu2 %v2923_v59  ;;  %v12363_v59 = vld [vmem:[#allocation17_spill] sm:$0xff] }
 0x20f   :  { %v9602_v30 = vpop.f32.mrf.mxu0 }
 0x212   :  { %4922 = vmatpush.bf16.msrb.mxu2 %v2922_v60 }
 0x215   :  { %4713 = vmatmul.bf16.gmra.mxu1 %v6846_v12  ;;  %v6910_v12 = vor.u32 %v7769_v13, %v6909_v23  ;;  %v6775_v23 = vld [vmem:[%s12318_s2 + $0x58] sm:$0xf0]  ;;  %v6941_v13 = vld [vmem:[%s12318_s2 + $0x1a0] sm:$0xf] }
 0x216   :  { %4923 = vmatpush.bf16.msrb.mxu2 %v2921_v14  ;;  %v12367_v14 = vld [vmem:[#allocation26_spill] sm:$0xff] }
 0x217   :  { %v9612_v45 = vpop.f32.mrf.mxu0 }
 0x21a   :  { %4924 = vmatpush.bf16.msrb.mxu2 %v2920_v40 }
 0x21e   :  { %4925 = vmatpush.bf16.msrb.mxu2 %v2919_v8  ;;  %v7728_v8 = vld [vmem:[%s12318_s2 + $0x2c] sm:$0xf] }
 0x21f   :  { %v9626_v26 = vpop.f32.mrf.mxu0  ;;  %v6762_v53 = vor.u32 %v7728_v8, %v6759_v15 }
 0x220   :  { %v2774_v22 = vadd.f32 %v9626_v26, %v12369_v56  ;;  %v6925_v26 = vld [vmem:[%s12318_s2 + $0x180] sm:$0xf]  ;;  %v7734_v56 = vld [vmem:[%s12318_s2 + $0x54] sm:$0xf0] }
 0x221   :  { %5430 = vmatmul.bf16.gmra.mxu0 %v6762_v53  ;;  %v6773_v53 = vld [vmem:[%s12318_s2 + $0x48] sm:$0xf] }
 0x222   :  { %v4679_v28 = vpop.f32.mrf.mxu1  ;;  %4926 = vmatpush.bf16.msrb.mxu2 %v9366_v52  ;;  %v6751_v52 = vld [vmem:[%s12318_s2 + $0x30] sm:$0xf0] }
 0x223   :  { %v9629_v62 = vadd.f32 %v4679_v28, %v3233_v20  ;;  %v6754_v32 = vor.u32 %v7727_v10, %v6751_v52  ;;  %v12370_v20 = vld [vmem:[#allocation28_spill] sm:$0xff]  ;;  %v2769_v10 = vadd.f32 %v9602_v30, %v12371_v21  ;;  %v2881_v52 = vmax.f32 %v2774_v22, 0.0  ;;  %v6799_v30 = vld [vmem:[%s12318_s2 + $0x90] sm:$0xf0]  ;;  %v6973_v21 = vld [vmem:[%s12318_s2 + $0x1e0] sm:$0xf] }
 0x224   :  { %v2772_v28 = vadd.f32 %v9612_v45, %v12370_v20  ;;  %v7773_v45 = vld [vmem:[%s12318_s2 + $0x18c] sm:$0xf0]  ;;  %v6807_v20 = vld [vmem:[%s12318_s2 + $0x98] sm:$0xf0] }
 0x225   :  { %4718 = vmatmul.bf16.gmra.mxu1 %v6862_v58  ;;  %4927 = vmatmul.bf16.vlgmr.msrb.gmra.mxu2 %v6738_v27  ;;  %v2879_v16 = vmax.f32 %v2769_v10, 0.0  ;;  %v6926_v31 = vor.u32 %v7773_v45, %v6925_v26  ;;  %v6789_v45 = vld [vmem:[%s12318_s2 + $0x68] sm:$0xf] }
 0x227   :  { %v2776_v0 = vpop.f32.mrf.mxu0 }
 0x228   :  { %v2777_v40 = vadd.f32 %v2776_v0, %v12368_v3  ;;  %v7747_v3 = vld [vmem:[%s12318_s2 + $0xc4] sm:$0xf] }
 0x22a   :  { %v9631_v1 = vpop.f32.mrf.mxu1  ;;  %v2882_v0 = vmax.f32 %v2777_v40, 0.0  ;;  %v6831_v40 = vld [vmem:[%s12318_s2 + $0xd0] sm:$0xf0] }
 0x22b   :  { %v6834_v8 = vor.u32 %v7747_v3, %v6831_v40 }
 0x22f   :  { %v2778_v11 = vpop.f32.mrf.mxu0 }
 0x230   :  { %v2779_v36 = vadd.f32 %v2778_v11, %v12367_v14 }
 0x232   :  { %v9645_v41 = vpop.f32.mrf.mxu1  ;;  %v2883_v58 = vmax.f32 %v2779_v36, 0.0 }
 0x234   :  { %v2928_v11 = vpack.c.bf16 %v2883_v58, %v2882_v0  ;;  %v6774_v58 = vor.u32 %v7734_v56, %v6773_v53 }
 0x235   :  { %4723 = vmatmul.bf16.gmra.mxu1 %v6878_v55  ;;  %4932 = vmatmul.bf16.gmra.mxu2 %v6754_v32  ;;  %v2880_v55 = vmax.f32 %v2772_v28, 0.0  ;;  %v12372_v32 = vld [vmem:[#allocation31_spill] sm:$0xff] }
 0x237   :  { %v2781_v47 = vpop.f32.mrf.mxu0  ;;  %v2927_v43 = vpack.c.bf16 %v2881_v52, %v2880_v55  ;;  %v7785_v52 = vld [vmem:[%s12318_s2 + $0x1ec] sm:$0xf0]  ;;  %v6847_v55 = vld [vmem:[%s12318_s2 + $0xf0] sm:$0xf0] }
 0x238   :  { %v2782_v38 = vadd.f32 %v2781_v47, %v12366_v61  ;;  %v2767_v47 = vadd.f32 %v9586_v5, %v12372_v32  ;;  %v6741_v5 = vld [vmem:[%s12318_s2 + $0x8] sm:$0xf]  ;;  %v6974_v26 = vor.u32 %v7785_v52, %v6973_v21  ;;  %v6855_v21 = vld [vmem:[%s12318_s2 + $0xf8] sm:$0xf0] }
 0x239   :  { %v6742_v51 = vor.u32 %v7726_v35, %v6741_v5  ;;  %v6989_v5 = vld [vmem:[%s12318_s2 + $0x200] sm:$0xf]  ;;  %v7789_v35 = vld [vmem:[%s12318_s2 + $0x20c] sm:$0xf0] }
 0x23a   :  { %v9647_v33 = vpop.f32.mrf.mxu1  ;;  %v2884_v37 = vmax.f32 %v2782_v38, 0.0  ;;  %v7736_v38 = vld [vmem:[%s12318_s2 + $0x6c] sm:$0xf] }
 0x23f   :  { %v2783_v25 = vpop.f32.mrf.mxu0 }
 0x240   :  { %v2784_v57 = vadd.f32 %v2783_v25, %v12364_v34  ;;  %v6802_v25 = vor.u32 %v7739_v18, %v6799_v30  ;;  %v9747_v34 = vpop.permute.xlu2 %3237  ;;  %v7738_v18 = vld [vmem:[%s12318_s2 + $0x74] sm:$0xf0] }
 0x241   :  { %v6790_v30 = vor.u32 %v7738_v18, %v6789_v45  ;;  %v4682_v3 = vadd.f32 %v9631_v1, %v9747_v34  ;;  %v7752_v1 = vld [vmem:[%s12318_s2 + $0xec] sm:$0xf]  ;;  %v3248_v45 = vpop.permute.xlu1 %3247  ;;  %v7763_v18 = vld [vmem:[%s12318_s2 + $0x144] sm:$0xf] }
 0x242   :  { %v9661_v46 = vpop.f32.mrf.mxu1  ;;  %v2885_v63 = vmax.f32 %v2784_v57, 0.0  ;;  %v6942_v57 = vor.u32 %v7777_v42, %v6941_v13  ;;  %v6805_v42 = vld [vmem:[%s12318_s2 + $0x88] sm:$0xf] }
 0x244   :  { %v2929_v27 = vpack.c.bf16 %v2885_v63, %v2884_v37  ;;  %v6957_v63 = vld [vmem:[%s12318_s2 + $0x1c0] sm:$0xf] }
 0x245   :  { %4728 = vmatmul.bf16.gmra.mxu1 %v6894_v6  ;;  %4937 = vmatmul.bf16.gmra.mxu2 %v6770_v48  ;;  %v2878_v6 = vmax.f32 %v2767_v47, 0.0 }
 0x247   :  { %v2786_v4 = vpop.f32.mrf.mxu0 }
 0x248   :  { %v2787_v19 = vadd.f32 %v2786_v4, %v12363_v59  ;;  %v2926_v4 = vpack.c.bf16 %v2879_v16, %v2878_v6  ;;  %v6778_v59 = vor.u32 %v7732_v44, %v6775_v23  ;;  %v9763_v14 = vpop.permute.xlu2 %3252  ;;  %v7744_v16 = vld [vmem:[%s12318_s2 + $0xac] sm:$0xf]  ;;  %v6990_v44 = vor.u32 %v7789_v35, %v6989_v5 }
 0x24a   :  { %v9669_v29 = vpop.f32.mrf.mxu1  ;;  %v2886_v2 = vmax.f32 %v2787_v19, 0.0  ;;  %5435 = vmatmul.bf16.gmra.mxu0 %v6778_v59 }
 0x24f   :  { %v2788_v39 = vpop.f32.mrf.mxu0 }
 0x250   :  { %v2789_v60 = vadd.f32 %v2788_v39, %v12365_v7  ;;  %v6815_v39 = vld [vmem:[%s12318_s2 + $0xb0] sm:$0xf0]  ;;  %v9787_v22 = vpop.permute.xlu2 %3267 }
 0x251   :  { %v6818_v7 = vor.u32 %v7743_v49, %v6815_v39  ;;  %v7742_v49 = vld [vmem:[%s12318_s2 + $0x94] sm:$0xf0] }
 0x252   :  { %v2887_v50 = vmax.f32 %v2789_v60, 0.0  ;;  %v9687_v9 = vpop.f32.mrf.mxu1 }
 0x254   :  { %v2930_v54 = vpack.c.bf16 %v2887_v50, %v2886_v2  ;;  %v6791_v2 = vld [vmem:[%s12318_s2 + $0x78] sm:$0xf0] }
 0x255   :  { %4733 = vmatmul.bf16.gmra.mxu1 %v6910_v12  ;;  %4942 = vmatmul.bf16.gmra.mxu2 %v6786_v17  ;;  %v6757_v12 = vld [vmem:[%s12318_s2 + $0x28] sm:$0xf]  ;;  %v7730_v17 = vld [vmem:[%s12318_s2 + $0x34] sm:$0xf0]  ;;  %v6794_v50 = vor.u32 %v7736_v38, %v6791_v2 }
 0x256   :  { %5171 = vmatpush.bf16.msrb.mxu3 %v2930_v54  ;;  %v6758_v61 = vor.u32 %v7730_v17, %v6757_v12  ;;  %v7781_v54 = vld [vmem:[%s12318_s2 + $0x1cc] sm:$0xf0]  ;;  %v6839_v12 = vld [vmem:[%s12318_s2 + $0xd8] sm:$0xf0] }
 0x257   :  { %v6958_v37 = vor.u32 %v7781_v54, %v6957_v63  ;;  %v7793_v63 = vld [vmem:[%s12318_s2 + $0x22c] sm:$0xf0]  ;;  %v7759_v54 = vld [vmem:[%s12318_s2 + $0x124] sm:$0xf] }
 0x258   :  { %v9800_v10 = vpop.permute.xlu2 %3282 }
 0x25a   :  { %v9701_v24 = vpop.f32.mrf.mxu1  ;;  %5172 = vmatpush.bf16.msrb.mxu3 %v2929_v27  ;;  %5440 = vmatmul.bf16.gmra.mxu0 %v6794_v50  ;;  %v7740_v27 = vld [vmem:[%s12318_s2 + $0x8c] sm:$0xf]  ;;  %v7005_v50 = vld [vmem:[%s12318_s2 + $0x220] sm:$0xf] }
 0x25b   :  { %v6810_v28 = vor.u32 %v7740_v27, %v6807_v20  ;;  %v7746_v27 = vld [vmem:[%s12318_s2 + $0xb4] sm:$0xf0] }
 0x25e   :  { %5173 = vmatpush.bf16.msrb.mxu3 %v2928_v11  ;;  %v7751_v11 = vld [vmem:[%s12318_s2 + $0xe4] sm:$0xf] }
 0x25f   :  { %v6850_v32 = vor.u32 %v7751_v11, %v6847_v55  ;;  %v6858_v11 = vor.u32 %v7752_v1, %v6855_v21  ;;  %v6887_v21 = vld [vmem:[%s12318_s2 + $0x138] sm:$0xf0] }
 0x262   :  { %v9719_v48 = vpop.f32.mrf.mxu1  ;;  %5174 = vmatpush.bf16.msrb.mxu3 %v2927_v43  ;;  %v6823_v43 = vld [vmem:[%s12318_s2 + $0xb8] sm:$0xf0] }
 0x265   :  { %4738 = vmatmul.bf16.gmra.mxu1 %v6926_v31  ;;  %4947 = vmatmul.bf16.gmra.mxu2 %v6802_v25  ;;  %v9825_v31 = vpop.permute.xlu2 %3297  ;;  %v6826_v25 = vor.u32 %v7744_v16, %v6823_v43  ;;  %v4687_v16 = vadd.f32 %v9647_v33, %v3248_v45  ;;  %v7756_v33 = vld [vmem:[%s12318_s2 + $0x10c] sm:$0xf] }
 0x266   :  { %5175 = vmatpush.bf16.msrb.mxu3 %v2926_v4  ;;  %v7755_v4 = vld [vmem:[%s12318_s2 + $0x104] sm:$0xf] }
 0x269   :  { %5176 = vmatmul.bf16.vlgmr.msrb.gmra.mxu3 %v6742_v51  ;;  %v6863_v51 = vld [vmem:[%s12318_s2 + $0x110] sm:$0xf0] }
 0x26a   :  { %v9733_v19 = vpop.f32.mrf.mxu1  ;;  %5445 = vmatmul.bf16.gmra.mxu0 %v6810_v28  ;;  %v6866_v23 = vor.u32 %v7755_v4, %v6863_v51  ;;  %v3243_v28 = vpop.permute.xlu0 %3242  ;;  %v6837_v51 = vld [vmem:[%s12318_s2 + $0xc8] sm:$0xf] }
 0x26b   :  { %v4685_v34 = vadd.f32 %v9645_v41, %v3243_v28  ;;  %v7797_v41 = vld [vmem:[%s12318_s2 + $0x24c] sm:$0xf0]  ;;  %v7760_v28 = vld [vmem:[%s12318_s2 + $0x12c] sm:$0xf] }
 0x26d   :  { %v3313_v59 = vpop.permute.xlu2 %3312 }
 0x272   :  { %v9749_v60 = vpop.f32.mrf.mxu1 }
 0x275   :  { %4743 = vmatmul.bf16.gmra.mxu1 %v6942_v57  ;;  %4952 = vmatmul.bf16.gmra.mxu2 %v6818_v7  ;;  %v6806_v57 = vor.u32 %v7742_v49, %v6805_v42  ;;  %v7748_v7 = vld [vmem:[%s12318_s2 + $0xcc] sm:$0xf]  ;;  %v6871_v42 = vld [vmem:[%s12318_s2 + $0x118] sm:$0xf0] }
 0x279   :  { %5181 = vmatmul.bf16.gmra.mxu3 %v6758_v61  ;;  %v6842_v61 = vor.u32 %v7748_v7, %v6839_v12 }
 0x27a   :  { %v9765_v36 = vpop.f32.mrf.mxu1  ;;  %5450 = vmatmul.bf16.gmra.mxu0 %v6826_v25 }
 0x282   :  { %v9779_v15 = vpop.f32.mrf.mxu1 }
 0x285   :  { %4748 = vmatmul.bf16.gmra.mxu1 %v6958_v37  ;;  %4957 = vmatmul.bf16.gmra.mxu2 %v6834_v8  ;;  %v7006_v8 = vor.u32 %v7793_v63, %v7005_v50  ;;  %v6911_v50 = vld [vmem:[%s12318_s2 + $0x170] sm:$0xf0] }
 0x289   :  { %5186 = vmatmul.bf16.gmra.mxu3 %v6774_v58  ;;  %v6821_v58 = vld [vmem:[%s12318_s2 + $0xa8] sm:$0xf] }
 0x28a   :  { %v9795_v0 = vpop.f32.mrf.mxu1  ;;  %5455 = vmatmul.bf16.gmra.mxu0 %v6842_v61  ;;  %v6822_v20 = vor.u32 %v7746_v27, %v6821_v58  ;;  %v3258_v61 = vpop.permute.xlu0 %3257  ;;  %v6853_v58 = vld [vmem:[%s12318_s2 + $0xe8] sm:$0xf]  ;;  %v7754_v27 = vld [vmem:[%s12318_s2 + $0xf4] sm:$0xf0] }
 0x28b   :  { %v4692_v63 = vadd.f32 %v9669_v29, %v3258_v61  ;;  %v6854_v29 = vor.u32 %v7754_v27, %v6853_v58  ;;  %v7775_v58 = vld [vmem:[%s12318_s2 + $0x1a4] sm:$0xf]  ;;  %v6943_v27 = vld [vmem:[%s12318_s2 + $0x1b0] sm:$0xf0] }
 0x292   :  { %v9811_v47 = vpop.f32.mrf.mxu1 }
 0x295   :  { %4753 = vmatmul.bf16.gmra.mxu1 %v6974_v26  ;;  %4962 = vmatmul.bf16.gmra.mxu2 %v6850_v32  ;;  %v7021_v32 = vld [vmem:[%s12318_s2 + $0x240] sm:$0xf] }
 0x296   :  { %v7022_v5 = vor.u32 %v7797_v41, %v7021_v32  ;;  %v7053_v41 = vld [vmem:[%s12318_s2 + $0x280] sm:$0xf] }
 0x299   :  { %5191 = vmatmul.bf16.gmra.mxu3 %v6790_v30  ;;  %v6895_v30 = vld [vmem:[%s12318_s2 + $0x150] sm:$0xf0] }
 0x29a   :  { %v9827_v6 = vpop.f32.mrf.mxu1  ;;  %5460 = vmatmul.bf16.gmra.mxu0 %v6858_v11  ;;  %v6898_v35 = vor.u32 %v7763_v18, %v6895_v30  ;;  %v6890_v11 = vor.u32 %v7760_v28, %v6887_v21  ;;  %v7771_v18 = vld [vmem:[%s12318_s2 + $0x184] sm:$0xf]  ;;  %v6927_v30 = vld [vmem:[%s12318_s2 + $0x190] sm:$0xf0] }
 0x2a2   :  { %v4719_v13 = vpop.f32.mrf.mxu1 }
 0x2a3   :  { %v9847_v39 = vadd.f32 %v4719_v13, %v3313_v59  ;;  %v4690_v59 = vadd.f32 %v9661_v46, %v9763_v14  ;;  %v9923_v13 = vpop.f32.mrf.mxu0  ;;  %v7801_v46 = vld [vmem:[%s12318_s2 + $0x26c] sm:$0xf0]  ;;  %v7767_v14 = vld [vmem:[%s12318_s2 + $0x164] sm:$0xf] }
 0x2a5   :  { %4758 = vmatmul.bf16.gmra.mxu1 %v6990_v44  ;;  %4967 = vmatmul.bf16.gmra.mxu2 %v6866_v23  ;;  %v7750_v44 = vld [vmem:[%s12318_s2 + $0xd4] sm:$0xf0] }
 0x2a6   :  { %v6838_v23 = vor.u32 %v7750_v44, %v6837_v51  ;;  %v6930_v44 = vor.u32 %v7771_v18, %v6927_v30  ;;  %v7768_v30 = vld [vmem:[%s12318_s2 + $0x16c] sm:$0xf] }
 0x2a8   :  { %v4928_v17 = vpop.f32.mrf.mxu2 }
 0x2a9   :  { %v9856_v38 = vadd.f32 %v4928_v17, %v9629_v62  ;;  %5196 = vmatmul.bf16.gmra.mxu3 %v6806_v57  ;;  %v6879_v62 = vld [vmem:[%s12318_s2 + $0x130] sm:$0xf0]  ;;  %v6874_v57 = vor.u32 %v7756_v33, %v6871_v42  ;;  %v7037_v17 = vld [vmem:[%s12318_s2 + $0x260] sm:$0xf]  ;;  %v6869_v33 = vld [vmem:[%s12318_s2 + $0x108] sm:$0xf] }
 0x2aa   :  { %v9858_v2 = vpop.f32.mrf.mxu1  ;;  %v6882_v53 = vor.u32 %v7759_v54, %v6879_v62  ;;  %v7764_v42 = vld [vmem:[%s12318_s2 + $0x14c] sm:$0xf] }
 0x2ab   :  { %5465 = vmatmul.bf16.gmra.mxu0 %v6874_v57  ;;  %v9945_v54 = vpop.f32.mrf.mxu0 }
 0x2b0   :  { %v4930_v40 = vpop.f32.mrf.mxu2 }
 0x2b1   :  { %v9874_v37 = vadd.f32 %v4930_v40, %v4682_v3  ;;  %v7038_v40 = vor.u32 %v7801_v46, %v7037_v17  ;;  %v6903_v17 = vld [vmem:[%s12318_s2 + $0x158] sm:$0xf0] }
 0x2b2   :  { %v9876_v56 = vpop.f32.mrf.mxu1  ;;  %v6906_v46 = vor.u32 %v7764_v42, %v6903_v17  ;;  %v7813_v17 = vld [vmem:[%s12318_s2 + $0x2cc] sm:$0xf0] }
 0x2b5   :  { %4763 = vmatmul.bf16.gmra.mxu1 %v7006_v8  ;;  %4972 = vmatmul.bf16.gmra.mxu2 %v6882_v53  ;;  %v6914_v8 = vor.u32 %v7767_v14, %v6911_v50 }
 0x2b8   :  { %v4933_v52 = vpop.f32.mrf.mxu2 }
 0x2b9   :  { %v9891_v55 = vadd.f32 %v4933_v52, %v4685_v34  ;;  %5201 = vmatmul.bf16.gmra.mxu3 %v6822_v20  ;;  %v3263_v20 = vpop.permute.xlu1 %3262  ;;  %v9961_v34 = vpop.f32.mrf.mxu0 }
 0x2ba   :  { %v9893_v26 = vpop.f32.mrf.mxu1  ;;  %v4695_v1 = vadd.f32 %v9687_v9, %v3263_v20  ;;  %v7805_v9 = vld [vmem:[%s12318_s2 + $0x28c] sm:$0xf0] }
 0x2bb   :  { %5470 = vmatmul.bf16.gmra.mxu0 %v6890_v11  ;;  %v7054_v51 = vor.u32 %v7805_v9, %v7053_v41  ;;  %v6885_v41 = vld [vmem:[%s12318_s2 + $0x128] sm:$0xf]  ;;  %v7762_v9 = vld [vmem:[%s12318_s2 + $0x134] sm:$0xf0] }
 0x2bc   :  { %v6886_v18 = vor.u32 %v7762_v9, %v6885_v41  ;;  %v6935_v41 = vld [vmem:[%s12318_s2 + $0x198] sm:$0xf0] }
 0x2c0   :  { %v4935_v43 = vpop.f32.mrf.mxu2 }
 0x2c1   :  { %v9908_v25 = vadd.f32 %v4935_v43, %v4687_v16  ;;  %v4697_v16 = vadd.f32 %v9701_v24, %v9787_v22  ;;  %v9984_v43 = vpop.f32.mrf.mxu0  ;;  %v3273_v22 = vpop.permute.xlu0 %3272 }
 0x2c2   :  { %v9910_v4 = vpop.f32.mrf.mxu1 }
 0x2c5   :  { %4768 = vmatmul.bf16.gmra.mxu1 %v7022_v5  ;;  %4977 = vmatmul.bf16.gmra.mxu2 %v6898_v35 }
 0x2c8   :  { %v4938_v49 = vpop.f32.mrf.mxu2 }
 0x2c9   :  { %v9928_v7 = vadd.f32 %v4938_v49, %v4690_v59  ;;  %5206 = vmatmul.bf16.gmra.mxu3 %v6838_v23  ;;  %v7758_v59 = vld [vmem:[%s12318_s2 + $0x114] sm:$0xf0]  ;;  %v4700_v49 = vadd.f32 %v9719_v48, %v3273_v22  ;;  %v10000_v57 = vpop.f32.mrf.mxu0  ;;  %v7069_v48 = vld [vmem:[%s12318_s2 + $0x2a0] sm:$0xf] }
 0x2ca   :  { %v9930_v12 = vpop.f32.mrf.mxu1  ;;  %v6870_v24 = vor.u32 %v7758_v59, %v6869_v33 }
 0x2cb   :  { %5475 = vmatmul.bf16.gmra.mxu0 %v6906_v46  ;;  %v6959_v46 = vld [vmem:[%s12318_s2 + $0x1d0] sm:$0xf0] }
 0x2d0   :  { %v4940_v62 = vpop.f32.mrf.mxu2 }
 0x2d1   :  { %v9947_v3 = vadd.f32 %v4940_v62, %v4692_v63  ;;  %v10024_v20 = vpop.f32.mrf.mxu0 }
 0x2d2   :  { %v9949_v53 = vpop.f32.mrf.mxu1 }
 0x2d5   :  { %4773 = vmatmul.bf16.gmra.mxu1 %v7038_v40  ;;  %4982 = vmatmul.bf16.gmra.mxu2 %v6914_v8  ;;  %v3278_v40 = vpop.permute.xlu1 %3277  ;;  %v7809_v8 = vld [vmem:[%s12318_s2 + $0x2ac] sm:$0xf0] }
 0x2d6   :  { %v7070_v21 = vor.u32 %v7809_v8, %v7069_v48 }
 0x2d8   :  { %v4943_v52 = vpop.f32.mrf.mxu2 }
 0x2d9   :  { %v9966_v32 = vadd.f32 %v4943_v52, %v4695_v1  ;;  %5211 = vmatmul.bf16.gmra.mxu3 %v6854_v29  ;;  %v4702_v29 = vadd.f32 %v9733_v19, %v3278_v40  ;;  %v6946_v52 = vor.u32 %v7775_v58, %v6943_v27  ;;  %v6901_v58 = vld [vmem:[%s12318_s2 + $0x148] sm:$0xf]  ;;  %v7766_v27 = vld [vmem:[%s12318_s2 + $0x154] sm:$0xf0] }
 0x2da   :  { %v9968_v45 = vpop.f32.mrf.mxu1 }
 0x2e0   :  { %v4945_v5 = vpop.f32.mrf.mxu2 }
 0x2e1   :  { %v9986_v35 = vadd.f32 %v4945_v5, %v4697_v16  ;;  %v10041_v5 = vpop.f32.mrf.mxu0 }
 0x2e2   :  { %v9988_v23 = vpop.f32.mrf.mxu1 }
 0x2e5   :  { %4778 = vmatmul.bf16.gmra.mxu1 %v7054_v51  ;;  %4987 = vmatmul.bf16.gmra.mxu2 %v6930_v44  ;;  %v6919_v51 = vld [vmem:[%s12318_s2 + $0x178] sm:$0xf0] }
 0x2e6   :  { %v6922_v33 = vor.u32 %v7768_v30, %v6919_v51  ;;  %v7101_v51 = vld [vmem:[%s12318_s2 + $0x2e0] sm:$0xf] }
 0x2e8   :  { %v4948_v61 = vpop.f32.mrf.mxu2  ;;  %5480 = vmatmul.bf16.gmra.mxu0 %v6922_v33  ;;  %v7817_v33 = vld [vmem:[%s12318_s2 + $0x2ec] sm:$0xf0] }
 0x2e9   :  { %v10005_v14 = vadd.f32 %v4948_v61, %v4700_v49  ;;  %5216 = vmatmul.bf16.gmra.mxu3 %v6870_v24  ;;  %v7085_v49 = vld [vmem:[%s12318_s2 + $0x2c0] sm:$0xf]  ;;  %v7779_v61 = vld [vmem:[%s12318_s2 + $0x1c4] sm:$0xf] }
 0x2ea   :  { %v10007_v50 = vpop.f32.mrf.mxu1  ;;  %v7086_v48 = vor.u32 %v7813_v17, %v7085_v49  ;;  %v6962_v40 = vor.u32 %v7779_v61, %v6959_v46  ;;  %v7102_v49 = vor.u32 %v7817_v33, %v7101_v51  ;;  %v6917_v46 = vld [vmem:[%s12318_s2 + $0x168] sm:$0xf]  ;;  %v7787_v51 = vld [vmem:[%s12318_s2 + $0x204] sm:$0xf]  ;;  %v6991_v33 = vld [vmem:[%s12318_s2 + $0x210] sm:$0xf0] }
 0x2ec   :  { %v5177_v63 = vpop.f32.mrf.mxu3 }
 0x2ed   :  { %v5178_v62 = vadd.f32 %v5177_v63, %v9856_v38 }
 0x2ef   :  { %v5427_v38 = vadd.f32 %v9923_v13, %v5178_v62  ;;  %v10066_v62 = vpop.f32.mrf.mxu0 }
 0x2f0   :  { %v4950_v28 = vpop.f32.mrf.mxu2 }
 0x2f1   :  { %v10026_v1 = vadd.f32 %v4950_v28, %v4702_v29  ;;  %v5666_v59 = vmax.f32 %v5427_v38, 0.0  ;;  %v7772_v28 = vld [vmem:[%s12318_s2 + $0x18c] sm:$0xf] }
 0x2f2   :  { %v10028_v11 = vpop.f32.mrf.mxu1 }
 0x2f4   :  { %v5179_v19 = vpop.f32.mrf.mxu3 }
 0x2f5   :  { %v5180_v13 = vadd.f32 %v5179_v19, %v9874_v37  ;;  %4783 = vmatmul.bf16.gmra.mxu1 %v7070_v21  ;;  %4992 = vmatmul.bf16.gmra.mxu2 %v6946_v52  ;;  %v6938_v19 = vor.u32 %v7772_v28, %v6935_v41  ;;  %v10132_v41 = vpop.permute.xlu0 %3287 }
 0x2f7   :  { %v5429_v16 = vadd.f32 %v9945_v54, %v5180_v13  ;;  %v10083_v52 = vpop.f32.mrf.mxu0 }
 0x2f8   :  { %v10046_v44 = vpop.f32.mrf.mxu2  ;;  %5485 = vmatmul.bf16.gmra.mxu0 %v6938_v19 }
 0x2f9   :  { %v5667_v37 = vmax.f32 %v5429_v16, 0.0  ;;  %5221 = vmatmul.bf16.gmra.mxu3 %v6886_v18 }
 0x2fa   :  { %v10048_v24 = vpop.f32.mrf.mxu1 }
 0x2fb   :  { %v10050_v22 = vpack.c.bf16 %v5667_v37, %v5666_v59  ;;  %v7783_v59 = vld [vmem:[%s12318_s2 + $0x1e4] sm:$0xf]  ;;  %v6975_v37 = vld [vmem:[%s12318_s2 + $0x1f0] sm:$0xf0] }
 0x2fc   :  { %v5182_v42 = vpop.f32.mrf.mxu3  ;;  %v6978_v17 = vor.u32 %v7783_v59, %v6975_v37 }
 0x2fd   :  { %v5183_v54 = vadd.f32 %v5182_v42, %v9891_v55 }
 0x2ff   :  { %v5432_v63 = vadd.f32 %v9961_v34, %v5183_v54  ;;  %v6902_v34 = vor.u32 %v7766_v27, %v6901_v58  ;;  %v10108_v54 = vpop.f32.mrf.mxu0  ;;  %v7776_v58 = vld [vmem:[%s12318_s2 + $0x1ac] sm:$0xf] }
 0x300   :  { %v10068_v55 = vpop.f32.mrf.mxu2 }
 0x301   :  { %v5668_v13 = vmax.f32 %v5432_v63, 0.0  ;;  %v7770_v63 = vld [vmem:[%s12318_s2 + $0x174] sm:$0xf0] }
 0x302   :  { %v10070_v8 = vpop.f32.mrf.mxu1 }
 0x304   :  { %v5184_v29 = vpop.f32.mrf.mxu3 }
 0x305   :  { %v5185_v38 = vadd.f32 %v5184_v29, %v9908_v25  ;;  %4788 = vmatmul.bf16.gmra.mxu1 %v7086_v48  ;;  %4997 = vmatmul.bf16.gmra.mxu2 %v6962_v40 }
 0x307   :  { %v5434_v21 = vadd.f32 %v9984_v43, %v5185_v38  ;;  %v10125_v29 = vpop.f32.mrf.mxu0  ;;  %v6951_v38 = vld [vmem:[%s12318_s2 + $0x1b8] sm:$0xf0] }
 0x308   :  { %v10088_v9 = vpop.f32.mrf.mxu2  ;;  %v6954_v28 = vor.u32 %v7776_v58, %v6951_v38 }
 0x309   :  { %v5669_v25 = vmax.f32 %v5434_v21, 0.0  ;;  %5226 = vmatmul.bf16.gmra.mxu3 %v6902_v34 }
 0x30a   :  { %v10090_v18 = vpop.f32.mrf.mxu1  ;;  %5490 = vmatmul.bf16.gmra.mxu0 %v6954_v28 }
 0x30b   :  { %v10092_v30 = vpack.c.bf16 %v5669_v25, %v5668_v13 }
 0x30c   :  { %v5187_v16 = vpop.f32.mrf.mxu3 }
 0x30d   :  { %v5188_v43 = vadd.f32 %v5187_v16, %v9928_v7  ;;  %v7117_v16 = vld [vmem:[%s12318_s2 + $0x300] sm:$0xf] }
 0x30f   :  { %v5437_v42 = vadd.f32 %v10000_v57, %v5188_v43  ;;  %v6918_v57 = vor.u32 %v7770_v63, %v6917_v46  ;;  %v7821_v43 = vld [vmem:[%s12318_s2 + $0x30c] sm:$0xf0]  ;;  %v10152_v37 = vpop.f32.mrf.mxu0  ;;  %v6933_v63 = vld [vmem:[%s12318_s2 + $0x188] sm:$0xf] }
 0x310   :  { %v10110_v7 = vpop.f32.mrf.mxu2 }
 0x311   :  { %v5670_v21 = vmax.f32 %v5437_v42, 0.0  ;;  %v7118_v42 = vor.u32 %v7821_v43, %v7117_v16 }
 0x312   :  { %v10112_v61 = vpop.f32.mrf.mxu1 }
 0x314   :  { %v5189_v48 = vpop.f32.mrf.mxu3 }
 0x315   :  { %v5190_v40 = vadd.f32 %v5189_v48, %v9947_v3  ;;  %4793 = vmatmul.bf16.gmra.mxu1 %v7102_v49  ;;  %5002 = vmatmul.bf16.gmra.mxu2 %v6978_v17  ;;  %v6994_v49 = vor.u32 %v7787_v51, %v6991_v33  ;;  %v10156_v17 = vpop.permute.xlu1 %3292  ;;  %v7774_v48 = vld [vmem:[%s12318_s2 + $0x194] sm:$0xf0] }
 0x316   :  { %v6934_v58 = vor.u32 %v7774_v48, %v6933_v63  ;;  %v7791_v63 = vld [vmem:[%s12318_s2 + $0x224] sm:$0xf]  ;;  %v7007_v48 = vld [vmem:[%s12318_s2 + $0x230] sm:$0xf0] }
 0x317   :  { %v5439_v27 = vadd.f32 %v10024_v20, %v5190_v40  ;;  %v10166_v40 = vpop.permute.xlu0 %3302  ;;  %v10173_v28 = vpop.f32.mrf.mxu0 }
 0x318   :  { %v10130_v34 = vpop.f32.mrf.mxu2 }
 0x319   :  { %v5671_v3 = vmax.f32 %v5439_v27, 0.0  ;;  %5231 = vmatmul.bf16.gmra.mxu3 %v6918_v57  ;;  %v7780_v27 = vld [vmem:[%s12318_s2 + $0x1cc] sm:$0xf] }
 0x31a   :  { %v10134_v19 = vpop.f32.mrf.mxu1 }
 0x31b   :  { %v10136_v13 = vpack.c.bf16 %v5671_v3, %v5670_v21  ;;  %v6967_v21 = vld [vmem:[%s12318_s2 + $0x1d8] sm:$0xf0] }
 0x31c   :  { %v5192_v20 = vpop.f32.mrf.mxu3 }
 0x31d   :  { %v5193_v25 = vadd.f32 %v5192_v20, %v9966_v32  ;;  %v6970_v20 = vor.u32 %v7780_v27, %v6967_v21  ;;  %v7010_v21 = vor.u32 %v7791_v63, %v7007_v48  ;;  %v6983_v63 = vld [vmem:[%s12318_s2 + $0x1f8] sm:$0xf0] }
 0x31f   :  { %v5442_v59 = vadd.f32 %v10041_v5, %v5193_v25  ;;  %5495 = vmatmul.bf16.gmra.mxu0 %v6970_v20  ;;  %v6949_v20 = vld [vmem:[%s12318_s2 + $0x1a8] sm:$0xf] }
 0x320   :  { %v10154_v32 = vpop.f32.mrf.mxu2 }
 0x321   :  { %v5672_v25 = vmax.f32 %v5442_v59, 0.0  ;;  %v3318_v59 = vpop.permute.xlu0 %3317 }
 0x322   :  { %v10158_v46 = vpop.f32.mrf.mxu1 }
 0x324   :  { %v5194_v5 = vpop.f32.mrf.mxu3 }
 0x325   :  { %v5195_v57 = vadd.f32 %v5194_v5, %v9986_v35  ;;  %4798 = vmatmul.bf16.gmra.mxu1 %v7118_v42  ;;  %5007 = vmatmul.bf16.gmra.mxu2 %v6994_v49  ;;  %v7133_v49 = vld [vmem:[%s12318_s2 + $0x320] sm:$0xf]  ;;  %v4722_v5 = vadd.f32 %v9858_v2, %v3318_v59 }
 0x327   :  { %v5444_v38 = vadd.f32 %v10066_v62, %v5195_v57  ;;  %v10185_v62 = vpop.permute.xlu1 %3307  ;;  %v10202_v57 = vpop.f32.mrf.mxu0 }
 0x328   :  { %v4968_v3 = vpop.f32.mrf.mxu2 }
 0x329   :  { %v5673_v16 = vmax.f32 %v5444_v38, 0.0  ;;  %v10179_v35 = vadd.f32 %v4968_v3, %v9847_v39  ;;  %5236 = vmatmul.bf16.gmra.mxu3 %v6934_v58  ;;  %v7825_v39 = vld [vmem:[%s12318_s2 + $0x32c] sm:$0xf0] }
 0x32a   :  { %v10181_v43 = vpop.f32.mrf.mxu1  ;;  %v7134_v38 = vor.u32 %v7825_v39, %v7133_v49 }
 0x32b   :  { %v10183_v51 = vpack.c.bf16 %v5673_v16, %v5672_v25  ;;  %v7778_v25 = vld [vmem:[%s12318_s2 + $0x1b4] sm:$0xf0] }
 0x32c   :  { %v5197_v33 = vpop.f32.mrf.mxu3  ;;  %v6950_v16 = vor.u32 %v7778_v25, %v6949_v20  ;;  %v7149_v25 = vld [vmem:[%s12318_s2 + $0x340] sm:$0xf] }
 0x32d   :  { %v5198_v42 = vadd.f32 %v5197_v33, %v10005_v14 }
 0x32f   :  { %v5447_v14 = vadd.f32 %v10083_v52, %v5198_v42  ;;  %v3323_v33 = vpop.permute.xlu1 %3322  ;;  %v7784_v42 = vld [vmem:[%s12318_s2 + $0x1ec] sm:$0xf]  ;;  %v10220_v39 = vpop.f32.mrf.mxu0 }
 0x330   :  { %v4970_v58 = vpop.f32.mrf.mxu2  ;;  %v4725_v49 = vadd.f32 %v9876_v56, %v3323_v33 }
 0x331   :  { %v10204_v27 = vadd.f32 %v4970_v58, %v4722_v5  ;;  %v5674_v5 = vmax.f32 %v5447_v14, 0.0  ;;  %v7829_v14 = vld [vmem:[%s12318_s2 + $0x34c] sm:$0xf0] }
 0x332   :  { %v10206_v3 = vpop.f32.mrf.mxu1 }
 0x334   :  { %v5199_v2 = vpop.f32.mrf.mxu3 }
 0x335   :  { %v5200_v52 = vadd.f32 %v5199_v2, %v10026_v1  ;;  %4803 = vmatmul.bf16.gmra.mxu1 %v7134_v38  ;;  %5012 = vmatmul.bf16.gmra.mxu2 %v7010_v21  ;;  %v6986_v1 = vor.u32 %v7784_v42, %v6983_v63  ;;  %v3328_v2 = vpop.permute.xlu2 %3327  ;;  %v4707_v42 = vadd.f32 %v9765_v36, %v10132_v41 }
 0x336   :  { %v4727_v33 = vadd.f32 %v9893_v26, %v3328_v2  ;;  %v7782_v26 = vld [vmem:[%s12318_s2 + $0x1d4] sm:$0xf0]  ;;  %v7788_v2 = vld [vmem:[%s12318_s2 + $0x20c] sm:$0xf] }
 0x337   :  { %v5449_v59 = vadd.f32 %v10108_v54, %v5200_v52  ;;  %5500 = vmatmul.bf16.gmra.mxu0 %v6986_v1  ;;  %v4705_v54 = vadd.f32 %v9749_v60, %v9800_v10  ;;  %v7795_v52 = vld [vmem:[%s12318_s2 + $0x244] sm:$0xf]  ;;  %v10247_v10 = vpop.f32.mrf.mxu0 }
 0x338   :  { %v4973_v48 = vpop.f32.mrf.mxu2 }
 0x339   :  { %v5675_v58 = vmax.f32 %v5449_v59, 0.0  ;;  %v10225_v38 = vadd.f32 %v4973_v48, %v4725_v49  ;;  %5241 = vmatmul.bf16.gmra.mxu3 %v6950_v16  ;;  %v7023_v16 = vld [vmem:[%s12318_s2 + $0x250] sm:$0xf0]  ;;  %v4954_v60 = vadd.f32 %v10046_v44, %v4705_v54  ;;  %v7150_v48 = vor.u32 %v7829_v14, %v7149_v25  ;;  %v3333_v25 = vpop.permute.xlu0 %3332 }
 0x33a   :  { %v10227_v21 = vpop.f32.mrf.mxu1  ;;  %v7026_v1 = vor.u32 %v7795_v52, %v7023_v16  ;;  %v4956_v44 = vadd.f32 %v10068_v55, %v4707_v42  ;;  %v4730_v14 = vadd.f32 %v9910_v4, %v3333_v25  ;;  %v6999_v55 = vld [vmem:[%s12318_s2 + $0x218] sm:$0xf0] }
 0x33b   :  { %v10229_v20 = vpack.c.bf16 %v5675_v58, %v5674_v5  ;;  %v6965_v58 = vld [vmem:[%s12318_s2 + $0x1c8] sm:$0xf] }
 0x33c   :  { %v5202_v56 = vpop.f32.mrf.mxu3 }
 0x33d   :  { %v5203_v59 = vadd.f32 %v5202_v56, %v4954_v60  ;;  %v6966_v56 = vor.u32 %v7782_v26, %v6965_v58  ;;  %v3338_v58 = vpop.permute.xlu1 %3337  ;;  %v7833_v26 = vld [vmem:[%s12318_s2 + $0x36c] sm:$0xf0] }
 0x33f   :  { %v5452_v36 = vadd.f32 %v10125_v29, %v5203_v59  ;;  %v10268_v16 = vpop.f32.mrf.mxu0 }
 0x340   :  { %v4975_v49 = vpop.f32.mrf.mxu2 }
 0x341   :  { %v10251_v63 = vadd.f32 %v4975_v49, %v4727_v33  ;;  %v7002_v33 = vor.u32 %v7788_v2, %v6999_v55  ;;  %v5676_v60 = vmax.f32 %v5452_v36, 0.0  ;;  %v4732_v36 = vadd.f32 %v9930_v12, %v3338_v58  ;;  %v7786_v12 = vld [vmem:[%s12318_s2 + $0x1f4] sm:$0xf0]  ;;  %v7792_v58 = vld [vmem:[%s12318_s2 + $0x22c] sm:$0xf] }
 0x342   :  { %v10253_v5 = vpop.f32.mrf.mxu1 }
 0x344   :  { %v5204_v54 = vpop.f32.mrf.mxu3 }
 0x345   :  { %v5205_v41 = vadd.f32 %v5204_v54, %v4956_v44  ;;  %4808 = vmatmul.bf16.gmra.mxu1 %v7150_v48  ;;  %5017 = vmatmul.bf16.gmra.mxu2 %v7026_v1  ;;  %v7165_v1 = vld [vmem:[%s12318_s2 + $0x360] sm:$0xf]  ;;  %v7799_v44 = vld [vmem:[%s12318_s2 + $0x264] sm:$0xf]  ;;  %v7039_v54 = vld [vmem:[%s12318_s2 + $0x270] sm:$0xf0] }
 0x347   :  { %v5454_v52 = vadd.f32 %v10152_v37, %v5205_v41  ;;  %5505 = vmatmul.bf16.gmra.mxu0 %v7002_v33  ;;  %v4710_v37 = vadd.f32 %v9779_v15, %v10156_v17  ;;  %v10295_v17 = vpop.f32.mrf.mxu0  ;;  %v4712_v41 = vadd.f32 %v9795_v0, %v9825_v31 }
 0x348   :  { %v4978_v29 = vpop.f32.mrf.mxu2 }
 0x349   :  { %v5677_v42 = vmax.f32 %v5454_v52, 0.0  ;;  %v10273_v49 = vadd.f32 %v4978_v29, %v4730_v14  ;;  %5246 = vmatmul.bf16.gmra.mxu3 %v6966_v56  ;;  %v4959_v15 = vadd.f32 %v10088_v9, %v4710_v37  ;;  %v7166_v14 = vor.u32 %v7833_v26, %v7165_v1  ;;  %v6981_v29 = vld [vmem:[%s12318_s2 + $0x1e8] sm:$0xf] }
 0x34a   :  { %v10275_v59 = vpop.f32.mrf.mxu1  ;;  %v7042_v52 = vor.u32 %v7799_v44, %v7039_v54  ;;  %v4961_v9 = vadd.f32 %v10110_v7, %v4712_v41  ;;  %v7015_v7 = vld [vmem:[%s12318_s2 + $0x238] sm:$0xf0]  ;;  %v4715_v41 = vadd.f32 %v9811_v47, %v10166_v40 }
 0x34b   :  { %v10277_v48 = vpack.c.bf16 %v5677_v42, %v5676_v60  ;;  %v6982_v60 = vor.u32 %v7786_v12, %v6981_v29  ;;  %v3343_v42 = vpop.permute.xlu2 %3342  ;;  %v7055_v29 = vld [vmem:[%s12318_s2 + $0x290] sm:$0xf0] }
 0x34c   :  { %v5207_v4 = vpop.f32.mrf.mxu3  ;;  %v4964_v47 = vadd.f32 %v10130_v34, %v4715_v41 }
 0x34d   :  { %v5208_v25 = vadd.f32 %v5207_v4, %v4959_v15  ;;  %v4735_v4 = vadd.f32 %v9949_v53, %v3343_v42 }
 0x34f   :  { %v5457_v0 = vadd.f32 %v10173_v28, %v5208_v25  ;;  %v10313_v1 = vpop.f32.mrf.mxu0  ;;  %v3348_v25 = vpop.permute.xlu0 %3347 }
 0x350   :  { %v4980_v56 = vpop.f32.mrf.mxu2  ;;  %v4737_v12 = vadd.f32 %v9968_v45, %v3348_v25  ;;  %v7790_v45 = vld [vmem:[%s12318_s2 + $0x214] sm:$0xf0] }
 0x351   :  { %v10299_v2 = vadd.f32 %v4980_v56, %v4732_v36  ;;  %v5678_v28 = vmax.f32 %v5457_v0, 0.0  ;;  %v7018_v36 = vor.u32 %v7792_v58, %v7015_v7  ;;  %v7181_v56 = vld [vmem:[%s12318_s2 + $0x380] sm:$0xf]  ;;  %v3353_v7 = vpop.permute.xlu1 %3352 }
 0x352   :  { %v10301_v55 = vpop.f32.mrf.mxu1 }
 0x354   :  { %v5209_v33 = vpop.f32.mrf.mxu3 }
 0x355   :  { %v5210_v31 = vadd.f32 %v5209_v33, %v4961_v9  ;;  %4813 = vmatmul.bf16.gmra.mxu1 %v7166_v14  ;;  %5022 = vmatmul.bf16.gmra.mxu2 %v7042_v52  ;;  %v7837_v14 = vld [vmem:[%s12318_s2 + $0x38c] sm:$0xf0]  ;;  %v7803_v52 = vld [vmem:[%s12318_s2 + $0x284] sm:$0xf]  ;;  %v4717_v9 = vadd.f32 %v9827_v6, %v10185_v62 }
 0x356   :  { %v7058_v42 = vor.u32 %v7803_v52, %v7055_v29 }
 0x357   :  { %v5459_v37 = vadd.f32 %v10202_v57, %v5210_v31  ;;  %5510 = vmatmul.bf16.gmra.mxu0 %v7018_v36  ;;  %v10341_v40 = vpop.f32.mrf.mxu0  ;;  %v4966_v34 = vadd.f32 %v10154_v32, %v4717_v9  ;;  %v7031_v32 = vld [vmem:[%s12318_s2 + $0x258] sm:$0xf0]  ;;  %v7841_v9 = vld [vmem:[%s12318_s2 + $0x3ac] sm:$0xf0] }
 0x358   :  { %v4983_v26 = vpop.f32.mrf.mxu2 }
 0x359   :  { %v5679_v44 = vmax.f32 %v5459_v37, 0.0  ;;  %v10321_v54 = vadd.f32 %v4983_v26, %v4735_v4  ;;  %5251 = vmatmul.bf16.gmra.mxu3 %v6982_v60  ;;  %v7182_v60 = vor.u32 %v7837_v14, %v7181_v56  ;;  %v6997_v37 = vld [vmem:[%s12318_s2 + $0x208] sm:$0xf] }
 0x35a   :  { %v10323_v53 = vpop.f32.mrf.mxu1  ;;  %v6998_v26 = vor.u32 %v7790_v45, %v6997_v37 }
 0x35b   :  { %v5816_v57 = vpack.c.bf16 %v5679_v44, %v5678_v28  ;;  %v4740_v28 = vadd.f32 %v9988_v23, %v3353_v7 }
 0x35c   :  { %v5212_v15 = vpop.f32.mrf.mxu3 }
 0x35d   :  { %v5213_v0 = vadd.f32 %v5212_v15, %v4964_v47  ;;  %v7796_v15 = vld [vmem:[%s12318_s2 + $0x24c] sm:$0xf]  ;;  %v3358_v47 = vpop.permute.xlu2 %3357 }
 0x35e   :  { %v7034_v14 = vor.u32 %v7796_v15, %v7031_v32  ;;  %v7800_v15 = vld [vmem:[%s12318_s2 + $0x26c] sm:$0xf] }
 0x35f   :  { %v5462_v6 = vadd.f32 %v10220_v39, %v5213_v0  ;;  %v10359_v36 = vpop.f32.mrf.mxu0  ;;  %v7071_v0 = vld [vmem:[%s12318_s2 + $0x2b0] sm:$0xf0] }
 0x360   :  { %v4985_v33 = vpop.f32.mrf.mxu2 }
 0x361   :  { %v10345_v31 = vadd.f32 %v4985_v33, %v4737_v12  ;;  %v5680_v39 = vmax.f32 %v5462_v6, 0.0  ;;  %v7197_v12 = vld [vmem:[%s12318_s2 + $0x3a0] sm:$0xf]  ;;  %v7807_v33 = vld [vmem:[%s12318_s2 + $0x2a4] sm:$0xf] }
 0x362   :  { %v10347_v4 = vpop.f32.mrf.mxu1 }
 0x364   :  { %v5214_v58 = vpop.f32.mrf.mxu3 }
 0x365   :  { %v5215_v62 = vadd.f32 %v5214_v58, %v4966_v34  ;;  %4818 = vmatmul.bf16.gmra.mxu1 %v7182_v60  ;;  %5027 = vmatmul.bf16.gmra.mxu2 %v7058_v42  ;;  %v7198_v34 = vor.u32 %v7841_v9, %v7197_v12  ;;  %v7074_v58 = vor.u32 %v7807_v33, %v7071_v0  ;;  %v7845_v12 = vld [vmem:[%s12318_s2 + $0x3cc] sm:$0xf0]  ;;  %v10437_v33 = vpop.permute.xlu2 %3372 }
 0x367   :  { %v5464_v44 = vadd.f32 %v10247_v10, %v5215_v62  ;;  %5515 = vmatmul.bf16.gmra.mxu0 %v7034_v14  ;;  %v10386_v42 = vpop.f32.mrf.mxu0  ;;  %v7013_v62 = vld [vmem:[%s12318_s2 + $0x228] sm:$0xf] }
 0x368   :  { %v4988_v41 = vpop.f32.mrf.mxu2 }
 0x369   :  { %v5681_v56 = vmax.f32 %v5464_v44, 0.0  ;;  %v10367_v25 = vadd.f32 %v4988_v41, %v4740_v28  ;;  %5256 = vmatmul.bf16.gmra.mxu3 %v6998_v26  ;;  %v10408_v41 = vpop.permute.xlu1 %3367 }
 0x36a   :  { %v10369_v23 = vpop.f32.mrf.mxu1 }
 0x36b   :  { %v5817_v10 = vpack.c.bf16 %v5681_v56, %v5680_v39 }
 0x36c   :  { %v5217_v52 = vpop.f32.mrf.mxu3 }
 0x36d   :  { %v5218_v29 = vadd.f32 %v5217_v52, %v10179_v35  ;;  %6194 = vmatpush.bf16.msra.mxu1 %v5817_v10  ;;  %v4742_v35 = vadd.f32 %v10007_v50, %v3358_v47  ;;  %v7794_v50 = vld [vmem:[%s12318_s2 + $0x234] sm:$0xf0]  ;;  %v7087_v47 = vld [vmem:[%s12318_s2 + $0x2d0] sm:$0xf0] }
 0x36e   :  { %v7014_v7 = vor.u32 %v7794_v50, %v7013_v62 }
 0x36f   :  { %v5467_v60 = vadd.f32 %v10268_v16, %v5218_v29  ;;  %v10403_v44 = vpop.f32.mrf.mxu0  ;;  %v7213_v29 = vld [vmem:[%s12318_s2 + $0x3c0] sm:$0xf] }
 0x370   :  { %v4990_v37 = vpop.f32.mrf.mxu2 }
 0x371   :  { %v10388_v45 = vadd.f32 %v4990_v37, %v4742_v35  ;;  %6195 = vmatpush.bf16.msra.mxu1 %v5816_v57  ;;  %v10400_v57 = vpop.permute.xlu0 %3362  ;;  %v5682_v39 = vmax.f32 %v5467_v60, 0.0  ;;  %v7214_v35 = vor.u32 %v7845_v12, %v7213_v29  ;;  %v10443_v37 = vpop.permute.xlu1 %3382  ;;  %v7229_v12 = vld [vmem:[%s12318_s2 + $0x3e0] sm:$0xf] }
 0x372   :  { %v10390_v6 = vpop.f32.mrf.mxu1 }
 0x373   :  { %12373 = vst [vmem:[#allocation8_spill] sm:$0xff] %v10390_v6 }
 0x374   :  { %v5219_v26 = vpop.f32.mrf.mxu3 }
 0x375   :  { %v5220_v16 = vadd.f32 %v5219_v26, %v10204_v27  ;;  %4823 = vmatmul.bf16.gmra.mxu1 %v7198_v34  ;;  %5032 = vmatmul.bf16.gmra.mxu2 %v7074_v58  ;;  %v7047_v27 = vld [vmem:[%s12318_s2 + $0x278] sm:$0xf0]  ;;  %v7798_v58 = vld [vmem:[%s12318_s2 + $0x254] sm:$0xf0] }
 0x376   :  { %6196 = vmatpush.bf16.msra.mxu1 %v10277_v48  ;;  %v7050_v56 = vor.u32 %v7800_v15, %v7047_v27  ;;  %v7063_v15 = vld [vmem:[%s12318_s2 + $0x298] sm:$0xf0] }
 0x377   :  { %v5469_v28 = vadd.f32 %v10295_v17, %v5220_v16  ;;  %v10435_v9 = vpop.f32.mrf.mxu0 }
 0x378   :  { %v10410_v32 = vpop.f32.mrf.mxu2  ;;  %5520 = vmatmul.bf16.gmra.mxu0 %v7050_v56 }
 0x379   :  { %v5683_v48 = vmax.f32 %v5469_v28, 0.0  ;;  %5261 = vmatmul.bf16.gmra.mxu3 %v7014_v7  ;;  %v7804_v7 = vld [vmem:[%s12318_s2 + $0x28c] sm:$0xf] }
 0x37a   :  { %6197 = vmatpush.bf16.msra.mxu1 %v10229_v20  ;;  %v10416_v17 = vpop.f32.mrf.mxu1  ;;  %v7811_v20 = vld [vmem:[%s12318_s2 + $0x2c4] sm:$0xf] }
 0x37b   :  { %12374 = vst [vmem:[#allocation10_spill] sm:$0xff] %v10416_v17  ;;  %v10418_v14 = vpack.c.bf16 %v5683_v48, %v5682_v39  ;;  %v7090_v60 = vor.u32 %v7811_v20, %v7087_v47  ;;  %v7066_v39 = vor.u32 %v7804_v7, %v7063_v15  ;;  %v10467_v48 = vpop.permute.xlu2 %3387  ;;  %v7849_v20 = vld [vmem:[%s12318_s2 + $0x3ec] sm:$0xf0]  ;;  %v7103_v47 = vld [vmem:[%s12318_s2 + $0x2f0] sm:$0xf0] }
 0x37c   :  { %v5222_v10 = vpop.f32.mrf.mxu3  ;;  %v7111_v17 = vld [vmem:[%s12318_s2 + $0x2f8] sm:$0xf0] }
 0x37d   :  { %v5223_v52 = vadd.f32 %v5222_v10, %v10225_v38  ;;  %v10474_v10 = vpop.permute.xlu1 %3397 }
 0x37e   :  { %6198 = vmatpush.bf16.msra.mxu1 %v10183_v51  ;;  %v10441_v51 = vpop.permute.xlu0 %3377 }
 0x37f   :  { %v5472_v38 = vadd.f32 %v10313_v1, %v5223_v52  ;;  %v7029_v1 = vld [vmem:[%s12318_s2 + $0x248] sm:$0xf]  ;;  %v10457_v16 = vpop.f32.mrf.mxu0 }
 0x380   :  { %v10439_v0 = vpop.f32.mrf.mxu2  ;;  %v7030_v26 = vor.u32 %v7798_v58, %v7029_v1 }
 0x382   :  { %6199 = vmatpush.bf16.msra.mxu1 %v10136_v13  ;;  %v10446_v34 = vpop.f32.mrf.mxu1 }
 0x383   :  { %12375 = vst [vmem:[#allocation9_spill] sm:$0xff] %v10446_v34  ;;  %v7077_v34 = vld [vmem:[%s12318_s2 + $0x2a8] sm:$0xf] }
 0x384   :  { %v5224_v62 = vpop.f32.mrf.mxu3 }
 0x385   :  { %v5225_v50 = vadd.f32 %v5224_v62, %v10251_v63  ;;  %4828 = vmatmul.bf16.gmra.mxu1 %v7214_v35  ;;  %5037 = vmatmul.bf16.gmra.mxu2 %v7090_v60  ;;  %v5684_v63 = vmax.f32 %v5472_v38, 0.0  ;;  %v7230_v60 = vor.u32 %v7849_v20, %v7229_v12  ;;  %v7045_v62 = vld [vmem:[%s12318_s2 + $0x268] sm:$0xf]  ;;  %v7079_v12 = vld [vmem:[%s12318_s2 + $0x2b8] sm:$0xf0] }
 0x386   :  { %6200 = vmatpush.bf16.msra.mxu1 %v10092_v30 }
 0x387   :  { %v5474_v13 = vadd.f32 %v10341_v40, %v5225_v50  ;;  %v3393_v40 = vpop.permute.xlu0 %3392  ;;  %v10490_v35 = vpop.f32.mrf.mxu0  ;;  %v7802_v50 = vld [vmem:[%s12318_s2 + $0x274] sm:$0xf0] }
 0x388   :  { %v10462_v28 = vpop.f32.mrf.mxu2  ;;  %5525 = vmatmul.bf16.gmra.mxu0 %v7066_v39  ;;  %v7046_v15 = vor.u32 %v7802_v50, %v7045_v62  ;;  %v7245_v62 = vld [vmem:[%s12318_s2 + $0x400] sm:$0xf] }
 0x389   :  { %v5685_v27 = vmax.f32 %v5474_v13, 0.0  ;;  %5266 = vmatmul.bf16.gmra.mxu3 %v7030_v26  ;;  %v10502_v26 = vpop.permute.xlu2 %3402 }
 0x38a   :  { %6201 = vmatpush.bf16.msra.mxu1 %v10050_v22  ;;  %v10470_v30 = vpop.f32.mrf.mxu1  ;;  %v7815_v22 = vld [vmem:[%s12318_s2 + $0x2e4] sm:$0xf] }
 0x38b   :  { %12376 = vst [vmem:[#allocation11_spill] sm:$0xff] %v10470_v30  ;;  %v10472_v56 = vpack.c.bf16 %v5685_v27, %v5684_v63  ;;  %v7106_v1 = vor.u32 %v7815_v22, %v7103_v47  ;;  %v10507_v63 = vpop.permute.xlu1 %3467 }
 0x38c   :  { %v5227_v52 = vpop.f32.mrf.mxu3  ;;  %12379 = vst [vmem:[#allocation18_spill] sm:$0xff] %v10507_v63 }
 0x38d   :  { %v5228_v29 = vadd.f32 %v5227_v52, %v10273_v49  ;;  %v7808_v52 = vld [vmem:[%s12318_s2 + $0x2ac] sm:$0xf] }
 0x38e   :  { %v7082_v22 = vor.u32 %v7808_v52, %v7079_v12 }
 0x38f   :  { %v5477_v38 = vadd.f32 %v10359_v36, %v5228_v29  ;;  %v10504_v36 = vpop.permute.xlu0 %3462  ;;  %v10510_v39 = vpop.f32.mrf.mxu0 }
 0x390   :  { %v10492_v49 = vpop.f32.mrf.mxu2  ;;  %12378 = vst [vmem:[#allocation13_spill] sm:$0xff] %v10504_v36 }
 0x391   :  { %v10528_v50 = vpop.permute.xlu2 %3452 }
 0x392   :  { %v10494_v58 = vpop.f32.mrf.mxu1  ;;  %12381 = vst [vmem:[#allocation16_spill] sm:$0xff] %v10528_v50 }
 0x393   :  { %12377 = vst [vmem:[#allocation14_spill] sm:$0xff] %v10494_v58  ;;  %v10544_v52 = vpop.permute.xlu1 %3442  ;;  %v4760_v58 = vadd.f32 %v10158_v46, %v3393_v40 }
 0x394   :  { %v5229_v13 = vpop.f32.mrf.mxu3  ;;  %12383 = vst [vmem:[#allocation23_spill] sm:$0xff] %v10544_v52  ;;  %v7093_v52 = vld [vmem:[%s12318_s2 + $0x2c8] sm:$0xf] }
 0x395   :  { %v5230_v7 = vadd.f32 %v5229_v13, %v10299_v2  ;;  %4833 = vmatmul.bf16.gmra.mxu1 %v7230_v60  ;;  %5042 = vmatmul.bf16.gmra.mxu2 %v7106_v1  ;;  %v5686_v2 = vmax.f32 %v5477_v38, 0.0  ;;  %v7853_v38 = vld [vmem:[%s12318_s2 + $0x40c] sm:$0xf0]  ;;  %v7819_v13 = vld [vmem:[%s12318_s2 + $0x304] sm:$0xf] }
 0x397   :  { %v5479_v27 = vadd.f32 %v10386_v42, %v5230_v7  ;;  %v7119_v7 = vld [vmem:[%s12318_s2 + $0x310] sm:$0xf0] }
 0x398   :  { %v10515_v29 = vpop.f32.mrf.mxu2  ;;  %5530 = vmatmul.bf16.gmra.mxu0 %v7082_v22 }
 0x399   :  { %v5687_v20 = vmax.f32 %v5479_v27, 0.0  ;;  %5271 = vmatmul.bf16.gmra.mxu3 %v7046_v15  ;;  %v10539_v15 = vpop.permute.xlu0 %3457  ;;  %v10542_v27 = vpop.f32.mrf.mxu0 }
 0x39a   :  { %v10520_v47 = vpop.f32.mrf.mxu1  ;;  %12382 = vst [vmem:[#allocation19_spill] sm:$0xff] %v10539_v15  ;;  %v7261_v15 = vld [vmem:[%s12318_s2 + $0x420] sm:$0xf] }
 0x39b   :  { %12380 = vst [vmem:[#allocation12_spill] sm:$0xff] %v10520_v47  ;;  %v10522_v42 = vpack.c.bf16 %v5687_v20, %v5686_v2  ;;  %v7246_v2 = vor.u32 %v7853_v38, %v7245_v62  ;;  %v7122_v20 = vor.u32 %v7819_v13, %v7119_v7  ;;  %v7806_v47 = vld [vmem:[%s12318_s2 + $0x294] sm:$0xf0]  ;;  %v7812_v13 = vld [vmem:[%s12318_s2 + $0x2cc] sm:$0xf]  ;;  %v10564_v7 = vpop.permute.xlu2 %3447  ;;  %v10573_v40 = vpop.permute.xlu1 %3437 }
 0x39c   :  { %v5232_v60 = vpop.f32.mrf.mxu3  ;;  %12384 = vst [vmem:[#allocation24_spill] sm:$0xff] %v10564_v7 }
 0x39d   :  { %v5233_v1 = vadd.f32 %v5232_v60, %v10321_v54  ;;  %v7061_v60 = vld [vmem:[%s12318_s2 + $0x288] sm:$0xf] }
 0x39f   :  { %v5482_v54 = vadd.f32 %v10403_v44, %v5233_v1  ;;  %v7062_v1 = vor.u32 %v7806_v47, %v7061_v60 }
 0x3a0   :  { %v10546_v12 = vpop.f32.mrf.mxu2 }
 0x3a1   :  { %v10559_v38 = vpop.f32.mrf.mxu0  ;;  %v5688_v47 = vmax.f32 %v5482_v54, 0.0  ;;  %v7135_v54 = vld [vmem:[%s12318_s2 + $0x330] sm:$0xf0] }
 0x3a2   :  { %v10548_v22 = vpop.f32.mrf.mxu1 }
 0x3a4   :  { %v5234_v63 = vpop.f32.mrf.mxu3 }
 0x3a5   :  { %v5235_v44 = vadd.f32 %v5234_v63, %v10345_v31  ;;  %4838 = vmatmul.bf16.gmra.mxu1 %v7246_v2  ;;  %5047 = vmatmul.bf16.gmra.mxu2 %v7122_v20  ;;  %v7095_v31 = vld [vmem:[%s12318_s2 + $0x2d8] sm:$0xf0]  ;;  %v10569_v63 = vpop.permute.xlu0 %3432 }
 0x3a7   :  { %v5484_v62 = vadd.f32 %v10435_v9, %v5235_v44  ;;  %v7098_v9 = vor.u32 %v7812_v13, %v7095_v31 }
 0x3a8   :  { %v5008_v36 = vpop.f32.mrf.mxu2 }
 0x3a9   :  { %v5689_v2 = vmax.f32 %v5484_v62, 0.0  ;;  %v10571_v46 = vadd.f32 %v5008_v36, %v4760_v58  ;;  %5276 = vmatmul.bf16.gmra.mxu3 %v7062_v1  ;;  %5535 = vmatmul.bf16.gmra.mxu0 %v7098_v9  ;;  %v7857_v58 = vld [vmem:[%s12318_s2 + $0x42c] sm:$0xf0]  ;;  %v7823_v36 = vld [vmem:[%s12318_s2 + $0x324] sm:$0xf]  ;;  %v4762_v1 = vadd.f32 %v10181_v43, %v10474_v10  ;;  %v10595_v62 = vpop.f32.mrf.mxu0  ;;  %v10599_v9 = vpop.permute.xlu2 %3422 }
 0x3aa   :  { %v10575_v20 = vpop.f32.mrf.mxu1  ;;  %v7810_v43 = vld [vmem:[%s12318_s2 + $0x2b4] sm:$0xf0] }
 0x3ab   :  { %v10577_v60 = vpack.c.bf16 %v5689_v2, %v5688_v47  ;;  %v7262_v47 = vor.u32 %v7857_v58, %v7261_v15  ;;  %v7138_v2 = vor.u32 %v7823_v36, %v7135_v54  ;;  %v7078_v15 = vor.u32 %v7810_v43, %v7077_v34 }
 0x3ac   :  { %v5237_v44 = vpop.f32.mrf.mxu3  ;;  %v4765_v58 = vadd.f32 %v10206_v3, %v10502_v26 }
 0x3ad   :  { %v5238_v30 = vadd.f32 %v5237_v44, %v10367_v25 }
 0x3af   :  { %v5487_v25 = vadd.f32 %v10457_v16, %v5238_v30  ;;  %v10609_v16 = vpop.permute.xlu0 %3427  ;;  %v3413_v30 = vpop.permute.xlu1 %3412 }
 0x3b0   :  { %v5010_v13 = vpop.f32.mrf.mxu2 }
 0x3b1   :  { %v10597_v31 = vadd.f32 %v5010_v13, %v4762_v1  ;;  %v7816_v13 = vld [vmem:[%s12318_s2 + $0x2ec] sm:$0xf]  ;;  %v3418_v26 = vpop.permute.xlu2 %3417 }
 0x3b2   :  { %v10601_v44 = vpop.f32.mrf.mxu1  ;;  %v7114_v34 = vor.u32 %v7816_v13, %v7111_v17  ;;  %v7861_v17 = vld [vmem:[%s12318_s2 + $0x44c] sm:$0xf0]  ;;  %v4747_v13 = vadd.f32 %v10048_v24, %v10408_v41 }
 0x3b4   :  { %v5239_v10 = vpop.f32.mrf.mxu3  ;;  %v10615_v54 = vpop.f32.mrf.mxu0 }
 0x3b5   :  { %v5240_v1 = vadd.f32 %v5239_v10, %v10388_v45  ;;  %4843 = vmatmul.bf16.gmra.mxu1 %v7262_v47  ;;  %5052 = vmatmul.bf16.gmra.mxu2 %v7138_v2  ;;  %v5690_v45 = vmax.f32 %v5487_v25, 0.0  ;;  %v4745_v10 = vadd.f32 %v10028_v11, %v10400_v57 }
 0x3b7   :  { %v5489_v36 = vadd.f32 %v10490_v35, %v5240_v1  ;;  %v7277_v1 = vld [vmem:[%s12318_s2 + $0x440] sm:$0xf]  ;;  %v3408_v25 = vpop.permute.xlu0 %3407  ;;  %v4994_v57 = vadd.f32 %v10410_v32, %v4745_v10  ;;  %v4996_v32 = vadd.f32 %v10439_v0, %v4747_v13  ;;  %v4750_v13 = vadd.f32 %v10070_v8, %v10437_v33 }
 0x3b8   :  { %v5013_v50 = vpop.f32.mrf.mxu2  ;;  %v4767_v11 = vadd.f32 %v10227_v21, %v3408_v25  ;;  %v7278_v7 = vor.u32 %v7861_v17, %v7277_v1  ;;  %v7814_v21 = vld [vmem:[%s12318_s2 + $0x2d4] sm:$0xf0]  ;;  %v4770_v25 = vadd.f32 %v10253_v5, %v3413_v30 }
 0x3b9   :  { %v5691_v47 = vmax.f32 %v5489_v36, 0.0  ;;  %v10623_v2 = vadd.f32 %v5013_v50, %v4765_v58  ;;  %5281 = vmatmul.bf16.gmra.mxu3 %v7078_v15  ;;  %5540 = vmatmul.bf16.gmra.mxu0 %v7114_v34  ;;  %v10634_v36 = vpop.permute.xlu1 %3472  ;;  %v7827_v50 = vld [vmem:[%s12318_s2 + $0x344] sm:$0xf]  ;;  %v7151_v15 = vld [vmem:[%s12318_s2 + $0x350] sm:$0xf0]  ;;  %v10663_v1 = vpop.permute.xlu2 %3477  ;;  %v4999_v8 = vadd.f32 %v10462_v28, %v4750_v13  ;;  %v4775_v13 = vadd.f32 %v10301_v55, %v10599_v9 }
 0x3ba   :  { %v10625_v3 = vpop.f32.mrf.mxu1  ;;  %v7818_v28 = vld [vmem:[%s12318_s2 + $0x2f4] sm:$0xf0] }
 0x3bb   :  { %12385 = vst [vmem:[#allocation29_spill] sm:$0xff] %v10625_v3  ;;  %v10627_v35 = vpack.c.bf16 %v5691_v47, %v5690_v45  ;;  %v7154_v3 = vor.u32 %v7827_v50, %v7151_v15  ;;  %v7820_v15 = vld [vmem:[%s12318_s2 + $0x30c] sm:$0xf] }
 0x3bc   :  { %v5242_v43 = vpop.f32.mrf.mxu3  ;;  %v10647_v58 = vpop.f32.mrf.mxu0 }
 0x3bd   :  { %v5243_v47 = vadd.f32 %v5242_v43, %v4994_v57  ;;  %v7094_v43 = vor.u32 %v7814_v21, %v7093_v52  ;;  %v7831_v21 = vld [vmem:[%s12318_s2 + $0x364] sm:$0xf] }
 0x3bf   :  { %v5492_v24 = vadd.f32 %v10510_v39, %v5243_v47  ;;  %v7127_v39 = vld [vmem:[%s12318_s2 + $0x318] sm:$0xf0]  ;;  %v7865_v47 = vld [vmem:[%s12318_s2 + $0x46c] sm:$0xf0] }
 0x3c0   :  { %v5015_v45 = vpop.f32.mrf.mxu2  ;;  %v7130_v5 = vor.u32 %v7820_v15, %v7127_v39 }
 0x3c1   :  { %v10651_v34 = vadd.f32 %v5015_v45, %v4767_v11  ;;  %v10672_v0 = vpop.permute.xlu1 %3487  ;;  %v5692_v52 = vmax.f32 %v5492_v24, 0.0  ;;  %v7293_v45 = vld [vmem:[%s12318_s2 + $0x460] sm:$0xf]  ;;  %v10701_v24 = vpop.permute.xlu2 %3492 }
 0x3c2   :  { %v10653_v6 = vpop.f32.mrf.mxu1  ;;  %v7294_v15 = vor.u32 %v7865_v47, %v7293_v45  ;;  %v7824_v47 = vld [vmem:[%s12318_s2 + $0x32c] sm:$0xf] }
 0x3c4   :  { %v5244_v10 = vpop.f32.mrf.mxu3  ;;  %v10667_v50 = vpop.f32.mrf.mxu0 }
 0x3c5   :  { %v5245_v41 = vadd.f32 %v5244_v10, %v4996_v32  ;;  %4848 = vmatmul.bf16.gmra.mxu1 %v7278_v7  ;;  %5057 = vmatmul.bf16.gmra.mxu2 %v7154_v3  ;;  %v7167_v32 = vld [vmem:[%s12318_s2 + $0x370] sm:$0xf0]  ;;  %v4772_v10 = vadd.f32 %v10275_v59, %v3418_v26  ;;  %v7109_v59 = vld [vmem:[%s12318_s2 + $0x2e8] sm:$0xf] }
 0x3c7   :  { %v5494_v17 = vadd.f32 %v10542_v27, %v5245_v41  ;;  %v4752_v41 = vadd.f32 %v10090_v18, %v10441_v51 }
 0x3c8   :  { %v5018_v11 = vpop.f32.mrf.mxu2 }
 0x3c9   :  { %v5693_v7 = vmax.f32 %v5494_v17, 0.0  ;;  %v10677_v3 = vadd.f32 %v5018_v11, %v4770_v25  ;;  %5286 = vmatmul.bf16.gmra.mxu3 %v7094_v43  ;;  %5545 = vmatmul.bf16.gmra.mxu0 %v7130_v5  ;;  %v7170_v11 = vor.u32 %v7831_v21, %v7167_v32  ;;  %v3503_v39 = vpop.permute.xlu1 %3502  ;;  %v5001_v26 = vadd.f32 %v10492_v49, %v4752_v41  ;;  %v3508_v55 = vpop.permute.xlu2 %3507 }
 0x3ca   :  { %v10679_v27 = vpop.f32.mrf.mxu1 }
 0x3cb   :  { %v10681_v30 = vpack.c.bf16 %v5693_v7, %v5692_v52 }
 0x3cc   :  { %v5247_v57 = vpop.f32.mrf.mxu3  ;;  %v10699_v33 = vpop.f32.mrf.mxu0 }
 0x3cd   :  { %v5248_v25 = vadd.f32 %v5247_v57, %v4999_v8  ;;  %v7110_v57 = vor.u32 %v7818_v28, %v7109_v59  ;;  %v7183_v59 = vld [vmem:[%s12318_s2 + $0x390] sm:$0xf0]  ;;  %v4777_v28 = vadd.f32 %v10323_v53, %v10609_v16  ;;  %v7822_v53 = vld [vmem:[%s12318_s2 + $0x314] sm:$0xf0] }
 0x3cf   :  { %v5497_v51 = vadd.f32 %v10559_v38, %v5248_v25  ;;  %v7143_v38 = vld [vmem:[%s12318_s2 + $0x338] sm:$0xf0] }
 0x3d0   :  { %v5020_v43 = vpop.f32.mrf.mxu2  ;;  %v7146_v41 = vor.u32 %v7824_v47, %v7143_v38  ;;  %v7125_v47 = vld [vmem:[%s12318_s2 + $0x308] sm:$0xf]  ;;  %v4780_v38 = vadd.f32 %v10347_v4, %v10569_v63 }
 0x3d1   :  { %v10705_v17 = vadd.f32 %v5020_v43, %v4772_v10  ;;  %v5694_v32 = vmax.f32 %v5497_v51, 0.0 }
 0x3d2   :  { %v4814_v52 = vpop.f32.mrf.mxu1 }
 0x3d3   :  { %v10714_v7 = vadd.f32 %v4814_v52, %v3503_v39  ;;  %v7869_v39 = vld [vmem:[%s12318_s2 + $0x48c] sm:$0xf0]  ;;  %v7835_v52 = vld [vmem:[%s12318_s2 + $0x384] sm:$0xf] }
 0x3d4   :  { %v5249_v18 = vpop.f32.mrf.mxu3  ;;  %v10723_v49 = vpop.f32.mrf.mxu0 }
 0x3d5   :  { %v5250_v5 = vadd.f32 %v5249_v18, %v5001_v26  ;;  %4853 = vmatmul.bf16.gmra.mxu1 %v7294_v15  ;;  %5062 = vmatmul.bf16.gmra.mxu2 %v7170_v11  ;;  %v4755_v15 = vadd.f32 %v10112_v61, %v10443_v37  ;;  %v7309_v11 = vld [vmem:[%s12318_s2 + $0x480] sm:$0xf]  ;;  %v4757_v37 = vadd.f32 %v10134_v19, %v10467_v48 }
 0x3d7   :  { %v5499_v45 = vadd.f32 %v10595_v62, %v5250_v5  ;;  %v5004_v61 = vadd.f32 %v10515_v29, %v4755_v15  ;;  %v5006_v19 = vadd.f32 %v10546_v12, %v4757_v37  ;;  %v7159_v12 = vld [vmem:[%s12318_s2 + $0x358] sm:$0xf0] }
 0x3d8   :  { %v5023_v21 = vpop.f32.mrf.mxu2 }
 0x3d9   :  { %v5695_v10 = vmax.f32 %v5499_v45, 0.0  ;;  %v10728_v8 = vadd.f32 %v5023_v21, %v4775_v13  ;;  %5291 = vmatmul.bf16.gmra.mxu3 %v7110_v57  ;;  %5550 = vmatmul.bf16.gmra.mxu0 %v7146_v41  ;;  %v7310_v57 = vor.u32 %v7869_v39, %v7309_v11  ;;  %v7186_v13 = vor.u32 %v7835_v52, %v7183_v59  ;;  %v7325_v39 = vld [vmem:[%s12318_s2 + $0x4a0] sm:$0xf]  ;;  %v7873_v52 = vld [vmem:[%s12318_s2 + $0x4ac] sm:$0xf0] }
 0x3da   :  { %v4816_v9 = vpop.f32.mrf.mxu1  ;;  %v7126_v21 = vor.u32 %v7822_v53, %v7125_v47  ;;  %v7839_v59 = vld [vmem:[%s12318_s2 + $0x3a4] sm:$0xf]  ;;  %v7141_v53 = vld [vmem:[%s12318_s2 + $0x328] sm:$0xf] }
 0x3db   :  { %v10730_v62 = vadd.f32 %v4816_v9, %v3508_v55  ;;  %v5824_v43 = vpack.c.bf16 %v5695_v10, %v5694_v32  ;;  %v7828_v10 = vld [vmem:[%s12318_s2 + $0x34c] sm:$0xf] }
 0x3dc   :  { %v5252_v25 = vpop.f32.mrf.mxu3  ;;  %v10751_v18 = vpop.f32.mrf.mxu0  ;;  %v7162_v15 = vor.u32 %v7828_v10, %v7159_v12  ;;  %v7341_v12 = vld [vmem:[%s12318_s2 + $0x4c0] sm:$0xf] }
 0x3dd   :  { %v5253_v51 = vadd.f32 %v5252_v25, %v5004_v61 }
 0x3df   :  { %v5502_v29 = vadd.f32 %v10615_v54, %v5253_v51 }
 0x3e0   :  { %v5025_v26 = vpop.f32.mrf.mxu2 }
 0x3e1   :  { %v10753_v5 = vadd.f32 %v5025_v26, %v4777_v28  ;;  %v5696_v54 = vmax.f32 %v5502_v29, 0.0  ;;  %v7199_v28 = vld [vmem:[%s12318_s2 + $0x3b0] sm:$0xf0] }
 0x3e2   :  { %v10755_v45 = vpop.f32.mrf.mxu1 }
 0x3e4   :  { %v5254_v48 = vpop.f32.mrf.mxu3  ;;  %v10771_v55 = vpop.f32.mrf.mxu0 }
 0x3e5   :  { %v5255_v16 = vadd.f32 %v5254_v48, %v5006_v19  ;;  %4858 = vmatmul.bf16.gmra.mxu1 %v7310_v57  ;;  %5067 = vmatmul.bf16.gmra.mxu2 %v7186_v13  ;;  %v7326_v57 = vor.u32 %v7873_v52, %v7325_v39  ;;  %v7202_v13 = vor.u32 %v7839_v59, %v7199_v28  ;;  %v7832_v48 = vld [vmem:[%s12318_s2 + $0x36c] sm:$0xf]  ;;  %v7157_v39 = vld [vmem:[%s12318_s2 + $0x348] sm:$0xf]  ;;  %v7830_v52 = vld [vmem:[%s12318_s2 + $0x354] sm:$0xf0] }
 0x3e6   :  { %v7158_v28 = vor.u32 %v7830_v52, %v7157_v39  ;;  %v10910_v39 = vpop.permute.xlu0 %3482 }
 0x3e7   :  { %v5504_v32 = vadd.f32 %v10647_v58, %v5255_v16 }
 0x3e8   :  { %v5028_v41 = vpop.f32.mrf.mxu2 }
 0x3e9   :  { %v5697_v9 = vmax.f32 %v5504_v32, 0.0  ;;  %v10776_v25 = vadd.f32 %v5028_v41, %v4780_v38  ;;  %5296 = vmatmul.bf16.gmra.mxu3 %v7126_v21  ;;  %5555 = vmatmul.bf16.gmra.mxu0 %v7162_v15  ;;  %v7175_v21 = vld [vmem:[%s12318_s2 + $0x378] sm:$0xf0] }
 0x3ea   :  { %v10778_v4 = vpop.f32.mrf.mxu1  ;;  %v7178_v32 = vor.u32 %v7832_v48, %v7175_v21 }
 0x3eb   :  { %v5825_v63 = vpack.c.bf16 %v5697_v9, %v5696_v54  ;;  %v7877_v54 = vld [vmem:[%s12318_s2 + $0x4cc] sm:$0xf0]  ;;  %v7215_v9 = vld [vmem:[%s12318_s2 + $0x3d0] sm:$0xf0] }
 0x3ec   :  { %v5257_v58 = vpop.f32.mrf.mxu3  ;;  %v10796_v26 = vpop.f32.mrf.mxu0 }
 0x3ed   :  { %v5258_v11 = vadd.f32 %v5257_v58, %v10571_v46  ;;  %6243 = vmatpush.bf16.msra.mxu2 %v5825_v63  ;;  %v4782_v46 = vadd.f32 %v10369_v23, %v10573_v40  ;;  %v7826_v23 = vld [vmem:[%s12318_s2 + $0x334] sm:$0xf0]  ;;  %v7342_v58 = vor.u32 %v7877_v54, %v7341_v12 }
 0x3ee   :  { %v7142_v19 = vor.u32 %v7826_v23, %v7141_v53 }
 0x3ef   :  { %v5507_v61 = vadd.f32 %v10667_v50, %v5258_v11 }
 0x3f0   :  { %v5030_v37 = vpop.f32.mrf.mxu2 }
 0x3f1   :  { %v10798_v51 = vadd.f32 %v5030_v37, %v4782_v46  ;;  %6244 = vmatpush.bf16.msra.mxu2 %v5824_v43  ;;  %v7836_v46 = vld [vmem:[%s12318_s2 + $0x38c] sm:$0xf] }
 0x3f2   :  { %v10800_v47 = vpop.f32.mrf.mxu1 }
 0x3f4   :  { %v5259_v40 = vpop.f32.mrf.mxu3 }
 0x3f5   :  { %v5260_v50 = vadd.f32 %v5259_v40, %v10597_v31  ;;  %4863 = vmatmul.bf16.gmra.mxu1 %v7326_v57  ;;  %5072 = vmatmul.bf16.gmra.mxu2 %v7202_v13  ;;  %v10816_v16 = vpop.f32.mrf.mxu0  ;;  %v5698_v31 = vmax.f32 %v5507_v61, 0.0  ;;  %v7191_v57 = vld [vmem:[%s12318_s2 + $0x398] sm:$0xf0] }
 0x3f6   :  { %6245 = vmatpush.bf16.msra.mxu2 %v10681_v30  ;;  %v7194_v53 = vor.u32 %v7836_v46, %v7191_v57  ;;  %v7373_v46 = vld [vmem:[%s12318_s2 + $0x500] sm:$0xf]  ;;  %v7885_v57 = vld [vmem:[%s12318_s2 + $0x50c] sm:$0xf0] }
 0x3f7   :  { %v5509_v43 = vadd.f32 %v10699_v33, %v5260_v50  ;;  %v7357_v50 = vld [vmem:[%s12318_s2 + $0x4e0] sm:$0xf] }
 0x3f8   :  { %v10814_v29 = vpop.f32.mrf.mxu2 }
 0x3f9   :  { %v5699_v38 = vmax.f32 %v5509_v43, 0.0  ;;  %5301 = vmatmul.bf16.gmra.mxu3 %v7142_v19  ;;  %5560 = vmatmul.bf16.gmra.mxu0 %v7178_v32  ;;  %v7881_v19 = vld [vmem:[%s12318_s2 + $0x4ec] sm:$0xf0]  ;;  %v7231_v43 = vld [vmem:[%s12318_s2 + $0x3f0] sm:$0xf0] }
 0x3fa   :  { %6246 = vmatpush.bf16.msra.mxu2 %v10627_v35  ;;  %v10822_v30 = vpop.f32.mrf.mxu1  ;;  %v7843_v35 = vld [vmem:[%s12318_s2 + $0x3c4] sm:$0xf] }
 0x3fb   :  { %v10824_v33 = vpack.c.bf16 %v5699_v38, %v5698_v31  ;;  %v7358_v31 = vor.u32 %v7881_v19, %v7357_v50  ;;  %v7374_v50 = vor.u32 %v7885_v57, %v7373_v46  ;;  %v7389_v57 = vld [vmem:[%s12318_s2 + $0x520] sm:$0xf] }
 0x3fc   :  { %v5262_v10 = vpop.f32.mrf.mxu3 }
 0x3fd   :  { %v5263_v41 = vadd.f32 %v5262_v10, %v10623_v2  ;;  %v10843_v63 = vpop.f32.mrf.mxu0  ;;  %v7173_v10 = vld [vmem:[%s12318_s2 + $0x368] sm:$0xf] }
 0x3fe   :  { %6247 = vmatpush.bf16.msra.mxu2 %v10577_v60  ;;  %v7218_v60 = vor.u32 %v7843_v35, %v7215_v9  ;;  %v7840_v9 = vld [vmem:[%s12318_s2 + $0x3ac] sm:$0xf] }
 0x3ff   :  { %v5512_v2 = vadd.f32 %v10723_v49, %v5263_v41  ;;  %v7834_v41 = vld [vmem:[%s12318_s2 + $0x374] sm:$0xf0] }
 0x400   :  { %v10841_v15 = vpop.f32.mrf.mxu2 }
 0x402   :  { %6248 = vmatpush.bf16.msra.mxu2 %v10522_v42  ;;  %v10846_v11 = vpop.f32.mrf.mxu1 }
 0x404   :  { %v5264_v59 = vpop.f32.mrf.mxu3 }
 0x405   :  { %v5265_v49 = vadd.f32 %v5264_v59, %v10651_v34  ;;  %4868 = vmatmul.bf16.gmra.mxu1 %v7342_v58  ;;  %5077 = vmatmul.bf16.gmra.mxu2 %v7218_v60  ;;  %v10862_v37 = vpop.f32.mrf.mxu0  ;;  %v5700_v34 = vmax.f32 %v5512_v2, 0.0  ;;  %v7207_v60 = vld [vmem:[%s12318_s2 + $0x3b8] sm:$0xf0] }
 0x406   :  { %6249 = vmatpush.bf16.msra.mxu2 %v10472_v56  ;;  %v7210_v59 = vor.u32 %v7840_v9, %v7207_v60 }
 0x407   :  { %v5514_v42 = vadd.f32 %v10751_v18, %v5265_v49 }
 0x408   :  { %v10860_v61 = vpop.f32.mrf.mxu2 }
 0x409   :  { %v5701_v13 = vmax.f32 %v5514_v42, 0.0  ;;  %5306 = vmatmul.bf16.gmra.mxu3 %v7158_v28  ;;  %5565 = vmatmul.bf16.gmra.mxu0 %v7194_v53  ;;  %v10929_v53 = vpop.permute.xlu1 %3627 }
 0x40a   :  { %6250 = vmatpush.bf16.msra.mxu2 %v10418_v14  ;;  %v10868_v56 = vpop.f32.mrf.mxu1  ;;  %v7847_v14 = vld [vmem:[%s12318_s2 + $0x3e4] sm:$0xf]  ;;  %12386 = vst [vmem:[#allocation25_spill] sm:$0xff] %v10929_v53 }
 0x40b   :  { %v10870_v18 = vpack.c.bf16 %v5701_v13, %v5700_v34  ;;  %v7234_v38 = vor.u32 %v7847_v14, %v7231_v43  ;;  %v7851_v34 = vld [vmem:[%s12318_s2 + $0x404] sm:$0xf]  ;;  %v7247_v13 = vld [vmem:[%s12318_s2 + $0x410] sm:$0xf0]  ;;  %v7189_v43 = vld [vmem:[%s12318_s2 + $0x388] sm:$0xf] }
 0x40c   :  { %v5267_v23 = vpop.f32.mrf.mxu3  ;;  %v7250_v19 = vor.u32 %v7851_v34, %v7247_v13  ;;  %v7889_v34 = vld [vmem:[%s12318_s2 + $0x52c] sm:$0xf0]  ;;  %v7855_v13 = vld [vmem:[%s12318_s2 + $0x424] sm:$0xf] }
 0x40d   :  { %v5268_v40 = vadd.f32 %v5267_v23, %v10677_v3  ;;  %v10888_v3 = vpop.f32.mrf.mxu0 }
 0x40f   :  { %v5517_v48 = vadd.f32 %v10771_v55, %v5268_v40  ;;  %v7174_v55 = vor.u32 %v7834_v41, %v7173_v10  ;;  %v10947_v41 = vpop.permute.xlu2 %3702 }
 0x410   :  { %v10886_v21 = vpop.f32.mrf.mxu2  ;;  %12387 = vst [vmem:[#allocation17_spill] sm:$0xff] %v10947_v41 }
 0x411   :  { %v10960_v60 = vpop.permute.xlu1 %3542 }
 0x412   :  { %v10890_v32 = vpop.f32.mrf.mxu1 }
 0x414   :  { %v5269_v12 = vpop.f32.mrf.mxu3 }
 0x415   :  { %v5270_v54 = vadd.f32 %v5269_v12, %v10705_v17  ;;  %4873 = vmatmul.bf16.gmra.mxu1 %v7358_v31  ;;  %5082 = vmatmul.bf16.gmra.mxu2 %v7234_v38  ;;  %v10905_v58 = vpop.f32.mrf.mxu0  ;;  %v5702_v17 = vmax.f32 %v5517_v48, 0.0  ;;  %v7838_v48 = vld [vmem:[%s12318_s2 + $0x394] sm:$0xf0]  ;;  %v10944_v31 = vpop.permute.xlu0 %3497  ;;  %v4800_v12 = vadd.f32 %v10548_v22, %v10634_v36 }
 0x416   :  { %v7190_v10 = vor.u32 %v7838_v48, %v7189_v43 }
 0x417   :  { %v5519_v35 = vadd.f32 %v10796_v26, %v5270_v54  ;;  %v10988_v48 = vpop.permute.xlu2 %3547 }
 0x418   :  { %v10903_v2 = vpop.f32.mrf.mxu2 }
 0x419   :  { %v5703_v52 = vmax.f32 %v5519_v35, 0.0  ;;  %5311 = vmatmul.bf16.gmra.mxu3 %v7174_v55  ;;  %5570 = vmatmul.bf16.gmra.mxu0 %v7210_v59  ;;  %v7844_v55 = vld [vmem:[%s12318_s2 + $0x3cc] sm:$0xf] }
 0x41a   :  { %v10912_v49 = vpop.f32.mrf.mxu1 }
 0x41b   :  { %v10914_v26 = vpack.c.bf16 %v5703_v52, %v5702_v17 }
 0x41c   :  { %v5272_v28 = vpop.f32.mrf.mxu3 }
 0x41d   :  { %v5273_v42 = vadd.f32 %v5272_v28, %v10728_v8  ;;  %v10934_v40 = vpop.f32.mrf.mxu0 }
 0x41f   :  { %v5522_v8 = vadd.f32 %v10816_v16, %v5273_v42  ;;  %v10968_v42 = vpop.permute.xlu0 %3622 }
 0x420   :  { %v10932_v23 = vpop.f32.mrf.mxu2 }
 0x421   :  { %v5704_v17 = vmax.f32 %v5522_v8, 0.0  ;;  %v7263_v8 = vld [vmem:[%s12318_s2 + $0x430] sm:$0xf0] }
 0x422   :  { %v10936_v14 = vpop.f32.mrf.mxu1 }
 0x424   :  { %v5274_v38 = vpop.f32.mrf.mxu3 }
 0x425   :  { %v5275_v16 = vadd.f32 %v5274_v38, %v10753_v5  ;;  %4878 = vmatmul.bf16.gmra.mxu1 %v7374_v50  ;;  %5087 = vmatmul.bf16.gmra.mxu2 %v7250_v19  ;;  %v7223_v5 = vld [vmem:[%s12318_s2 + $0x3d8] sm:$0xf0]  ;;  %v4802_v50 = vadd.f32 %v10575_v20, %v10663_v1  ;;  %v7842_v20 = vld [vmem:[%s12318_s2 + $0x3b4] sm:$0xf0]  ;;  %v11000_v1 = vpop.permute.xlu1 %3617 }
 0x426   :  { %v10955_v9 = vpop.f32.mrf.mxu0  ;;  %v7226_v22 = vor.u32 %v7844_v55, %v7223_v5  ;;  %12388 = vst [vmem:[#allocation21_spill] sm:$0xff] %v11000_v1 }
 0x427   :  { %v5524_v54 = vadd.f32 %v10843_v63, %v5275_v16  ;;  %v7390_v16 = vor.u32 %v7889_v34, %v7389_v57  ;;  %v11003_v5 = vpop.permute.xlu0 %3707 }
 0x428   :  { %v5048_v35 = vpop.f32.mrf.mxu2  ;;  %12389 = vst [vmem:[#allocation15_spill] sm:$0xff] %v11003_v5 }
 0x429   :  { %v5705_v52 = vmax.f32 %v5524_v54, 0.0  ;;  %v10962_v59 = vadd.f32 %v5048_v35, %v4800_v12  ;;  %5316 = vmatmul.bf16.gmra.mxu3 %v7190_v10  ;;  %5575 = vmatmul.bf16.gmra.mxu0 %v7226_v22  ;;  %v7266_v10 = vor.u32 %v7855_v13, %v7263_v8  ;;  %v7205_v54 = vld [vmem:[%s12318_s2 + $0x3a8] sm:$0xf]  ;;  %v7848_v22 = vld [vmem:[%s12318_s2 + $0x3ec] sm:$0xf] }
 0x42a   :  { %v10964_v36 = vpop.f32.mrf.mxu1  ;;  %v7206_v35 = vor.u32 %v7842_v20, %v7205_v54  ;;  %v7893_v20 = vld [vmem:[%s12318_s2 + $0x54c] sm:$0xf0] }
 0x42b   :  { %v10966_v63 = vpack.c.bf16 %v5705_v52, %v5704_v17  ;;  %v4805_v17 = vadd.f32 %v10601_v44, %v10910_v39 }
 0x42c   :  { %v5277_v28 = vpop.f32.mrf.mxu3 }
 0x42d   :  { %v5278_v46 = vadd.f32 %v5277_v28, %v10776_v25 }
 0x42e   :  { %v10986_v43 = vpop.f32.mrf.mxu0 }
 0x42f   :  { %v5527_v25 = vadd.f32 %v10862_v37, %v5278_v46 }
 0x430   :  { %v5050_v19 = vpop.f32.mrf.mxu2 }
 0x431   :  { %v10990_v38 = vadd.f32 %v5050_v19, %v4802_v50  ;;  %v5706_v57 = vmax.f32 %v5527_v25, 0.0  ;;  %v11024_v19 = vpop.permute.xlu1 %3532  ;;  %v7405_v25 = vld [vmem:[%s12318_s2 + $0x540] sm:$0xf] }
 0x432   :  { %v10992_v12 = vpop.f32.mrf.mxu1  ;;  %v7406_v5 = vor.u32 %v7893_v20, %v7405_v25 }
 0x434   :  { %v5279_v37 = vpop.f32.mrf.mxu3 }
 0x435   :  { %v5280_v55 = vadd.f32 %v5279_v37, %v10798_v51  ;;  %4883 = vmatmul.bf16.gmra.mxu1 %v7390_v16  ;;  %5092 = vmatmul.bf16.gmra.mxu2 %v7266_v10  ;;  %v7239_v51 = vld [vmem:[%s12318_s2 + $0x3f8] sm:$0xf0]  ;;  %v12391_v16 = vld [vmem:[#allocation23_spill] sm:$0xff]  ;;  %v12392_v10 = vld [vmem:[#allocation8_spill] sm:$0xff] }
 0x436   :  { %v11011_v46 = vpop.f32.mrf.mxu0  ;;  %v7242_v8 = vor.u32 %v7848_v22, %v7239_v51  ;;  %v4785_v54 = vadd.f32 %v12392_v10, %v12391_v16  ;;  %v7859_v37 = vld [vmem:[%s12318_s2 + $0x444] sm:$0xf]  ;;  %v12394_v22 = vld [vmem:[#allocation24_spill] sm:$0xff] }
 0x437   :  { %v5529_v52 = vadd.f32 %v10888_v3, %v5280_v55  ;;  %v11020_v3 = vpop.permute.xlu2 %3692  ;;  %v7279_v55 = vld [vmem:[%s12318_s2 + $0x450] sm:$0xf0] }
 0x438   :  { %v5053_v28 = vpop.f32.mrf.mxu2  ;;  %12390 = vst [vmem:[#allocation22_spill] sm:$0xff] %v11020_v3  ;;  %v7282_v3 = vor.u32 %v7859_v37, %v7279_v55  ;;  %v4810_v37 = vadd.f32 %v10653_v6, %v10701_v24 }
 0x439   :  { %v5707_v34 = vmax.f32 %v5529_v52, 0.0  ;;  %v11016_v13 = vadd.f32 %v5053_v28, %v4805_v17  ;;  %5321 = vmatmul.bf16.gmra.mxu3 %v7206_v35  ;;  %5580 = vmatmul.bf16.gmra.mxu0 %v7242_v8  ;;  %v12393_v35 = vld [vmem:[#allocation29_spill] sm:$0xff]  ;;  %v5034_v52 = vadd.f32 %v10814_v29, %v4785_v54  ;;  %v12395_v28 = vld [vmem:[#allocation10_spill] sm:$0xff]  ;;  %v11047_v8 = vpop.permute.xlu0 %3612  ;;  %v11063_v20 = vpop.permute.xlu1 %3607 }
 0x43a   :  { %v11018_v44 = vpop.f32.mrf.mxu1  ;;  %v4807_v17 = vadd.f32 %v12393_v35, %v10672_v0  ;;  %v4787_v51 = vadd.f32 %v12395_v28, %v12394_v22  ;;  %12396 = vst [vmem:[#allocation26_spill] sm:$0xff] %v11047_v8  ;;  %v7221_v0 = vld [vmem:[%s12318_s2 + $0x3c8] sm:$0xf]  ;;  %v7846_v29 = vld [vmem:[%s12318_s2 + $0x3d4] sm:$0xf0] }
 0x43b   :  { %v11022_v39 = vpack.c.bf16 %v5707_v34, %v5706_v57  ;;  %v7222_v25 = vor.u32 %v7846_v29, %v7221_v0  ;;  %12397 = vst [vmem:[#allocation20_spill] sm:$0xff] %v11063_v20  ;;  %v12399_v0 = vld [vmem:[#allocation16_spill] sm:$0xff]  ;;  %v12400_v29 = vld [vmem:[#allocation9_spill] sm:$0xff] }
 0x43c   :  { %v5282_v50 = vpop.f32.mrf.mxu3  ;;  %v5036_v54 = vadd.f32 %v10841_v15, %v4787_v51  ;;  %v7852_v15 = vld [vmem:[%s12318_s2 + $0x40c] sm:$0xf] }
 0x43d   :  { %v5283_v16 = vadd.f32 %v5282_v50, %v5034_v52 }
 0x43e   :  { %v11045_v34 = vpop.f32.mrf.mxu0 }
 0x43f   :  { %v11060_v22 = vpop.permute.xlu2 %3537  ;;  %v5532_v50 = vadd.f32 %v10905_v58, %v5283_v16  ;;  %v7255_v58 = vld [vmem:[%s12318_s2 + $0x418] sm:$0xf0] }
 0x440   :  { %v5055_v57 = vpop.f32.mrf.mxu2 }
 0x441   :  { %v11049_v10 = vadd.f32 %v5055_v57, %v4807_v17  ;;  %v7258_v57 = vor.u32 %v7852_v15, %v7255_v58  ;;  %v11080_v24 = vpop.permute.xlu0 %3697  ;;  %v12403_v58 = vld [vmem:[#allocation11_spill] sm:$0xff]  ;;  %v11109_v1 = vpop.permute.xlu1 %3522 }
 0x442   :  { %v11051_v41 = vpop.f32.mrf.mxu1  ;;  %12398 = vst [vmem:[#allocation27_spill] sm:$0xff] %v11080_v24 }
 0x444   :  { %v5284_v35 = vpop.f32.mrf.mxu3 }
 0x445   :  { %v5285_v17 = vadd.f32 %v5284_v35, %v5036_v54  ;;  %4888 = vmatmul.bf16.gmra.mxu1 %v7406_v5  ;;  %5097 = vmatmul.bf16.gmra.mxu2 %v7282_v3  ;;  %v5708_v5 = vmax.f32 %v5532_v50, 0.0  ;;  %v4790_v54 = vadd.f32 %v12400_v29, %v12399_v0  ;;  %v7421_v35 = vld [vmem:[%s12318_s2 + $0x560] sm:$0xf]  ;;  %v7897_v50 = vld [vmem:[%s12318_s2 + $0x56c] sm:$0xf0] }
 0x446   :  { %v11071_v28 = vpop.f32.mrf.mxu0  ;;  %v7422_v24 = vor.u32 %v7897_v50, %v7421_v35 }
 0x447   :  { %v5534_v55 = vadd.f32 %v10934_v40, %v5285_v17  ;;  %v7863_v17 = vld [vmem:[%s12318_s2 + $0x464] sm:$0xf]  ;;  %v5039_v15 = vadd.f32 %v10860_v61, %v4790_v54  ;;  %v7850_v61 = vld [vmem:[%s12318_s2 + $0x3f4] sm:$0xf0] }
 0x448   :  { %v5058_v52 = vpop.f32.mrf.mxu2 }
 0x449   :  { %v5709_v3 = vmax.f32 %v5534_v55, 0.0  ;;  %v11076_v51 = vadd.f32 %v5058_v52, %v4810_v37  ;;  %5326 = vmatmul.bf16.gmra.mxu3 %v7222_v25  ;;  %5585 = vmatmul.bf16.gmra.mxu0 %v7258_v57  ;;  %v7295_v25 = vld [vmem:[%s12318_s2 + $0x470] sm:$0xf0]  ;;  %v11098_v37 = vpop.permute.xlu2 %3682  ;;  %v4812_v55 = vadd.f32 %v10679_v27, %v10944_v31  ;;  %v12402_v52 = vld [vmem:[#allocation19_spill] sm:$0xff]  ;;  %v7237_v27 = vld [vmem:[%s12318_s2 + $0x3e8] sm:$0xf] }
 0x44a   :  { %v11078_v6 = vpop.f32.mrf.mxu1  ;;  %12401 = vst [vmem:[#allocation28_spill] sm:$0xff] %v11098_v37  ;;  %v7298_v53 = vor.u32 %v7863_v17, %v7295_v25  ;;  %v7238_v17 = vor.u32 %v7850_v61, %v7237_v27  ;;  %v12405_v61 = vld [vmem:[#allocation13_spill] sm:$0xff] }
 0x44b   :  { %v11082_v40 = vpack.c.bf16 %v5709_v3, %v5708_v5  ;;  %v4792_v5 = vadd.f32 %v12403_v58, %v12402_v52 }
 0x44c   :  { %v5287_v16 = vpop.f32.mrf.mxu3 }
 0x44d   :  { %v5288_v0 = vadd.f32 %v5287_v16, %v5039_v15  ;;  %v5041_v31 = vadd.f32 %v10886_v21, %v4792_v5  ;;  %v11120_v16 = vpop.permute.xlu0 %3602  ;;  %v7271_v21 = vld [vmem:[%s12318_s2 + $0x438] sm:$0xf0] }
 0x44e   :  { %v11105_v57 = vpop.f32.mrf.mxu0  ;;  %12404 = vst [vmem:[#allocation30_spill] sm:$0xff] %v11120_v16 }
 0x44f   :  { %v5537_v35 = vadd.f32 %v10955_v9, %v5288_v0  ;;  %v11139_v0 = vpop.permute.xlu1 %3597 }
 0x450   :  { %v5060_v3 = vpop.f32.mrf.mxu2 }
 0x451   :  { %v11107_v29 = vadd.f32 %v5060_v3, %v4812_v55  ;;  %v7856_v55 = vld [vmem:[%s12318_s2 + $0x42c] sm:$0xf]  ;;  %v5710_v58 = vmax.f32 %v5537_v35, 0.0  ;;  %v7437_v35 = vld [vmem:[%s12318_s2 + $0x580] sm:$0xf] }
 0x452   :  { %v11111_v8 = vpop.f32.mrf.mxu1 }
 0x454   :  { %v5289_v54 = vpop.f32.mrf.mxu3 }
 0x455   :  { %v5290_v50 = vadd.f32 %v5289_v54, %v5041_v31  ;;  %4893 = vmatmul.bf16.gmra.mxu1 %v7422_v24  ;;  %5102 = vmatmul.bf16.gmra.mxu2 %v7298_v53  ;;  %v7274_v53 = vor.u32 %v7856_v55, %v7271_v21  ;;  %v11135_v24 = vpop.permute.xlu2 %3527  ;;  %v12406_v31 = vld [vmem:[#allocation14_spill] sm:$0xff]  ;;  %v12409_v21 = vld [vmem:[#allocation12_spill] sm:$0xff] }
 0x456   :  { %v11127_v52 = vpop.f32.mrf.mxu0  ;;  %v4795_v54 = vadd.f32 %v12406_v31, %v12405_v61 }
 0x457   :  { %v5539_v25 = vadd.f32 %v10986_v43, %v5290_v50  ;;  %v7867_v50 = vld [vmem:[%s12318_s2 + $0x484] sm:$0xf] }
 0x458   :  { %v5063_v15 = vpop.f32.mrf.mxu2  ;;  %v5044_v55 = vadd.f32 %v10903_v2, %v4795_v54  ;;  %v7854_v2 = vld [vmem:[%s12318_s2 + $0x414] sm:$0xf0] }
 0x459   :  { %v5711_v5 = vmax.f32 %v5539_v25, 0.0  ;;  %v11133_v9 = vadd.f32 %v5063_v15, %v10714_v7  ;;  %5331 = vmatmul.bf16.gmra.mxu3 %v7238_v17  ;;  %5590 = vmatmul.bf16.gmra.mxu0 %v7274_v53  ;;  %v7901_v7 = vld [vmem:[%s12318_s2 + $0x58c] sm:$0xf0]  ;;  %v7311_v17 = vld [vmem:[%s12318_s2 + $0x490] sm:$0xf0]  ;;  %v11155_v25 = vpop.permute.xlu0 %3687  ;;  %v12408_v15 = vld [vmem:[#allocation18_spill] sm:$0xff] }
 0x45a   :  { %v11137_v43 = vpop.f32.mrf.mxu1  ;;  %12407 = vst [vmem:[#allocation31_spill] sm:$0xff] %v11155_v25  ;;  %v7438_v37 = vor.u32 %v7901_v7, %v7437_v35  ;;  %v7314_v20 = vor.u32 %v7867_v50, %v7311_v17  ;;  %v7253_v25 = vld [vmem:[%s12318_s2 + $0x408] sm:$0xf]  ;;  %v3513_v7 = vpop.permute.xlu1 %3512 }
 0x45b   :  { %v5832_v3 = vpack.c.bf16 %v5711_v5, %v5710_v58  ;;  %v4797_v58 = vadd.f32 %v12409_v21, %v12408_v15  ;;  %v7254_v35 = vor.u32 %v7854_v2, %v7253_v25  ;;  %v4820_v50 = vadd.f32 %v10755_v45, %v3513_v7  ;;  %v7860_v21 = vld [vmem:[%s12318_s2 + $0x44c] sm:$0xf]  ;;  %v7327_v7 = vld [vmem:[%s12318_s2 + $0x4b0] sm:$0xf0] }
 0x45c   :  { %v5292_v27 = vpop.f32.mrf.mxu3 }
 0x45d   :  { %v5293_v61 = vadd.f32 %v5292_v27, %v5044_v55  ;;  %v5046_v54 = vadd.f32 %v10932_v23, %v4797_v58  ;;  %v11174_v15 = vpop.permute.xlu2 %3672 }
 0x45e   :  { %v11160_v53 = vpop.f32.mrf.mxu0  ;;  %12410 = vst [vmem:[#allocation23_spill] sm:$0xff] %v11174_v15 }
 0x460   :  { %v5065_v5 = vpop.f32.mrf.mxu2 }
 0x461   :  { %v11163_v31 = vadd.f32 %v5065_v5, %v10730_v62  ;;  %v5542_v62 = vadd.f32 %v11011_v46, %v5293_v61  ;;  %v7287_v46 = vld [vmem:[%s12318_s2 + $0x458] sm:$0xf0]  ;;  %v11187_v58 = vpop.permute.xlu0 %3592 }
 0x462   :  { %v11165_v16 = vpop.f32.mrf.mxu1  ;;  %v7290_v45 = vor.u32 %v7860_v21, %v7287_v46 }
 0x464   :  { %v5294_v27 = vpop.f32.mrf.mxu3 }
 0x465   :  { %v5295_v55 = vadd.f32 %v5294_v27, %v5046_v54  ;;  %4898 = vmatmul.bf16.gmra.mxu1 %v7438_v37  ;;  %5107 = vmatmul.bf16.gmra.mxu2 %v7314_v20  ;;  %v5712_v20 = vmax.f32 %v5542_v62, 0.0  ;;  %v7453_v27 = vld [vmem:[%s12318_s2 + $0x5a0] sm:$0xf]  ;;  %v7905_v62 = vld [vmem:[%s12318_s2 + $0x5ac] sm:$0xf0] }
 0x466   :  { %v11182_v23 = vpop.f32.mrf.mxu0  ;;  %v7454_v46 = vor.u32 %v7905_v62, %v7453_v27  ;;  %v7864_v27 = vld [vmem:[%s12318_s2 + $0x46c] sm:$0xf] }
 0x467   :  { %v5544_v17 = vadd.f32 %v11045_v34, %v5295_v55  ;;  %v3518_v55 = vpop.permute.xlu2 %3517 }
 0x468   :  { %v5068_v5 = vpop.f32.mrf.mxu2 }
 0x469   :  { %v5713_v37 = vmax.f32 %v5544_v17, 0.0  ;;  %v11189_v25 = vadd.f32 %v5068_v5, %v4820_v50  ;;  %5336 = vmatmul.bf16.gmra.mxu3 %v7254_v35  ;;  %5595 = vmatmul.bf16.gmra.mxu0 %v7290_v45  ;;  %v7871_v35 = vld [vmem:[%s12318_s2 + $0x4a4] sm:$0xf]  ;;  %v7269_v45 = vld [vmem:[%s12318_s2 + $0x428] sm:$0xf] }
 0x46a   :  { %v11191_v34 = vpop.f32.mrf.mxu1 }
 0x46b   :  { %v5833_v61 = vpack.c.bf16 %v5713_v37, %v5712_v20  ;;  %v7330_v20 = vor.u32 %v7871_v35, %v7327_v7  ;;  %v7303_v35 = vld [vmem:[%s12318_s2 + $0x478] sm:$0xf0] }
 0x46c   :  { %v5297_v2 = vpop.f32.mrf.mxu3 }
 0x46d   :  { %v5298_v54 = vadd.f32 %v5297_v2, %v10962_v59  ;;  %6292 = vmatpush.bf16.msra.mxu3 %v5833_v61  ;;  %v4822_v59 = vadd.f32 %v10778_v4, %v3518_v55  ;;  %v7858_v4 = vld [vmem:[%s12318_s2 + $0x434] sm:$0xf0]  ;;  %v11220_v61 = vpop.permute.xlu0 %3677 }
 0x46e   :  { %v11208_v21 = vpop.f32.mrf.mxu0  ;;  %12411 = vst [vmem:[#allocation8_spill] sm:$0xff] %v11220_v61 }
 0x46f   :  { %v5547_v50 = vadd.f32 %v11071_v28, %v5298_v54 }
 0x470   :  { %v5070_v17 = vpop.f32.mrf.mxu2 }
 0x471   :  { %v11210_v5 = vadd.f32 %v5070_v17, %v4822_v59  ;;  %6293 = vmatpush.bf16.msra.mxu3 %v5832_v3  ;;  %v7270_v3 = vor.u32 %v7858_v4, %v7269_v45  ;;  %v7306_v59 = vor.u32 %v7864_v27, %v7303_v35  ;;  %v7469_v45 = vld [vmem:[%s12318_s2 + $0x5c0] sm:$0xf]  ;;  %v7343_v4 = vld [vmem:[%s12318_s2 + $0x4d0] sm:$0xf0]  ;;  %v7285_v27 = vld [vmem:[%s12318_s2 + $0x448] sm:$0xf] }
 0x472   :  { %v11212_v37 = vpop.f32.mrf.mxu1  ;;  %v7862_v35 = vld [vmem:[%s12318_s2 + $0x454] sm:$0xf0] }
 0x474   :  { %v5299_v28 = vpop.f32.mrf.mxu3 }
 0x475   :  { %v5300_v2 = vadd.f32 %v5299_v28, %v10990_v38  ;;  %4903 = vmatmul.bf16.gmra.mxu1 %v7454_v46  ;;  %5112 = vmatmul.bf16.gmra.mxu2 %v7330_v20  ;;  %v5714_v38 = vmax.f32 %v5547_v50, 0.0  ;;  %v11240_v46 = vpop.permute.xlu0 %3582  ;;  %v7875_v50 = vld [vmem:[%s12318_s2 + $0x4c4] sm:$0xf] }
 0x476   :  { %6294 = vmatpush.bf16.msra.mxu3 %v11082_v40  ;;  %v11230_v62 = vpop.f32.mrf.mxu0 }
 0x477   :  { %v5549_v54 = vadd.f32 %v11105_v57, %v5300_v2 }
 0x478   :  { %v11228_v55 = vpop.f32.mrf.mxu2 }
 0x479   :  { %v5715_v7 = vmax.f32 %v5549_v54, 0.0  ;;  %5341 = vmatmul.bf16.gmra.mxu3 %v7270_v3  ;;  %5600 = vmatmul.bf16.gmra.mxu0 %v7306_v59  ;;  %v7286_v59 = vor.u32 %v7862_v35, %v7285_v27  ;;  %v7485_v35 = vld [vmem:[%s12318_s2 + $0x5e0] sm:$0xf] }
 0x47a   :  { %6295 = vmatpush.bf16.msra.mxu3 %v11022_v39  ;;  %v11236_v40 = vpop.f32.mrf.mxu1  ;;  %v7909_v39 = vld [vmem:[%s12318_s2 + $0x5cc] sm:$0xf0] }
 0x47b   :  { %v11238_v57 = vpack.c.bf16 %v5715_v7, %v5714_v38  ;;  %v7470_v3 = vor.u32 %v7909_v39, %v7469_v45 }
 0x47c   :  { %v5302_v17 = vpop.f32.mrf.mxu3 }
 0x47d   :  { %v5303_v20 = vadd.f32 %v5302_v17, %v11016_v13 }
 0x47e   :  { %6296 = vmatpush.bf16.msra.mxu3 %v10966_v63  ;;  %v11259_v2 = vpop.f32.mrf.mxu0  ;;  %v7346_v63 = vor.u32 %v7875_v50, %v7343_v4 }
 0x47f   :  { %v5552_v13 = vadd.f32 %v11127_v52, %v5303_v20  ;;  %v11270_v52 = vpop.permute.xlu1 %3587  ;;  %v7868_v20 = vld [vmem:[%s12318_s2 + $0x48c] sm:$0xf] }
 0x480   :  { %v11257_v28 = vpop.f32.mrf.mxu2 }
 0x481   :  { %v5716_v50 = vmax.f32 %v5552_v13, 0.0  ;;  %v7913_v13 = vld [vmem:[%s12318_s2 + $0x5ec] sm:$0xf0] }
 0x482   :  { %6297 = vmatpush.bf16.msra.mxu3 %v10914_v26  ;;  %v11262_v54 = vpop.f32.mrf.mxu1  ;;  %v11274_v26 = vpop.permute.xlu0 %3667 }
 0x483   :  { %12412 = vst [vmem:[#allocation29_spill] sm:$0xff] %v11262_v54  ;;  %v7351_v54 = vld [vmem:[%s12318_s2 + $0x4d8] sm:$0xf0] }
 0x484   :  { %v5304_v38 = vpop.f32.mrf.mxu3  ;;  %12413 = vst [vmem:[#allocation24_spill] sm:$0xff] %v11274_v26 }
 0x485   :  { %v5305_v7 = vadd.f32 %v5304_v38, %v11049_v10  ;;  %4908 = vmatmul.bf16.gmra.mxu1 %v7470_v3  ;;  %5117 = vmatmul.bf16.gmra.mxu2 %v7346_v63  ;;  %v7319_v10 = vld [vmem:[%s12318_s2 + $0x498] sm:$0xf0]  ;;  %v7359_v38 = vld [vmem:[%s12318_s2 + $0x4f0] sm:$0xf0] }
 0x486   :  { %6298 = vmatpush.bf16.msra.mxu3 %v10870_v18  ;;  %v11282_v39 = vpop.f32.mrf.mxu0  ;;  %v7322_v18 = vor.u32 %v7868_v20, %v7319_v10  ;;  %v7486_v20 = vor.u32 %v7913_v13, %v7485_v35 }
 0x487   :  { %v5554_v17 = vadd.f32 %v11160_v53, %v5305_v7  ;;  %v11305_v7 = vpop.permute.xlu1 %3572 }
 0x488   :  { %v11280_v45 = vpop.f32.mrf.mxu2 }
 0x489   :  { %v5717_v4 = vmax.f32 %v5554_v17, 0.0  ;;  %5346 = vmatmul.bf16.gmra.mxu3 %v7286_v59  ;;  %5605 = vmatmul.bf16.gmra.mxu0 %v7322_v18  ;;  %v7301_v18 = vld [vmem:[%s12318_s2 + $0x468] sm:$0xf] }
 0x48a   :  { %6299 = vmatpush.bf16.msra.mxu3 %v10824_v33  ;;  %v11288_v3 = vpop.f32.mrf.mxu1  ;;  %v7879_v33 = vld [vmem:[%s12318_s2 + $0x4e4] sm:$0xf] }
 0x48b   :  { %12414 = vst [vmem:[#allocation10_spill] sm:$0xff] %v11288_v3  ;;  %v11290_v53 = vpack.c.bf16 %v5717_v4, %v5716_v50  ;;  %v7362_v10 = vor.u32 %v7879_v33, %v7359_v38  ;;  %v11312_v50 = vpop.permute.xlu0 %3652  ;;  %v7872_v33 = vld [vmem:[%s12318_s2 + $0x4ac] sm:$0xf] }
 0x48c   :  { %v5307_v63 = vpop.f32.mrf.mxu3  ;;  %12415 = vst [vmem:[#allocation16_spill] sm:$0xff] %v11312_v50 }
 0x48d   :  { %v5308_v27 = vadd.f32 %v5307_v63, %v11076_v51  ;;  %v7866_v63 = vld [vmem:[%s12318_s2 + $0x474] sm:$0xf0] }
 0x48e   :  { %v11310_v17 = vpop.f32.mrf.mxu0  ;;  %v7302_v35 = vor.u32 %v7866_v63, %v7301_v18 }
 0x48f   :  { %v5557_v51 = vadd.f32 %v11182_v23, %v5308_v27 }
 0x490   :  { %v11308_v59 = vpop.f32.mrf.mxu2 }
 0x492   :  { %v4874_v4 = vpop.f32.mrf.mxu1 }
 0x493   :  { %v11321_v61 = vadd.f32 %v4874_v4, %v10968_v42  ;;  %v7335_v42 = vld [vmem:[%s12318_s2 + $0x4b8] sm:$0xf0]  ;;  %v5718_v4 = vmax.f32 %v5557_v51, 0.0  ;;  %v7375_v51 = vld [vmem:[%s12318_s2 + $0x510] sm:$0xf0] }
 0x494   :  { %v5309_v23 = vpop.f32.mrf.mxu3 }
 0x495   :  { %12416 = vst [vmem:[#allocation9_spill] sm:$0xff] %v11321_v61  ;;  %v5310_v27 = vadd.f32 %v5309_v23, %v11107_v29  ;;  %4913 = vmatmul.bf16.gmra.mxu1 %v7486_v20  ;;  %5122 = vmatmul.bf16.gmra.mxu2 %v7362_v10  ;;  %v7338_v29 = vor.u32 %v7872_v33, %v7335_v42  ;;  %v11335_v20 = vpop.permute.xlu1 %3657  ;;  %v11339_v10 = vpop.permute.xlu0 %3567  ;;  %v7883_v23 = vld [vmem:[%s12318_s2 + $0x504] sm:$0xf] }
 0x496   :  { %v11330_v15 = vpop.f32.mrf.mxu0  ;;  %12417 = vst [vmem:[#allocation19_spill] sm:$0xff] %v11335_v20  ;;  %v7378_v33 = vor.u32 %v7883_v23, %v7375_v51 }
 0x497   :  { %v5559_v13 = vadd.f32 %v11208_v21, %v5310_v27  ;;  %v7501_v27 = vld [vmem:[%s12320_s4] sm:$0xf] }
 0x498   :  { %v11328_v38 = vpop.f32.mrf.mxu2 }
 0x499   :  { %v5719_v61 = vmax.f32 %v5559_v13, 0.0  ;;  %5351 = vmatmul.bf16.gmra.mxu3 %v7302_v35  ;;  %5610 = vmatmul.bf16.gmra.mxu0 %v7338_v29  ;;  %v7317_v29 = vld [vmem:[%s12318_s2 + $0x488] sm:$0xf] }
 0x49b   :  { %v11337_v21 = vpack.c.bf16 %v5719_v61, %v5718_v4  ;;  %v7918_v61 = vld [vmem:[%s12320_s4 + $0x14] sm:$0xf0]  ;;  %v11359_v4 = vpop.permute.xlu2 %3662 }
 0x49c   :  { %v5312_v18 = vpop.f32.mrf.mxu3  ;;  %v7502_v42 = vor.u32 %v7918_v61, %v7501_v27  ;;  %12418 = vst [vmem:[#allocation11_spill] sm:$0xff] %v11359_v4  ;;  %v7876_v61 = vld [vmem:[%s12318_s2 + $0x4cc] sm:$0xf] }
 0x49d   :  { %v5313_v63 = vadd.f32 %v5312_v18, %v11133_v9  ;;  %v7870_v18 = vld [vmem:[%s12318_s2 + $0x494] sm:$0xf0]  ;;  %v11367_v26 = vpop.permute.xlu1 %3642  ;;  %v3553_v23 = vpop.permute.xlu0 %3552 }
 0x49e   :  { %v11357_v9 = vpop.f32.mrf.mxu0  ;;  %v4840_v51 = vadd.f32 %v10936_v14, %v3553_v23 }
 0x49f   :  { %v5562_v35 = vadd.f32 %v11230_v62, %v5313_v63  ;;  %v7318_v63 = vor.u32 %v7870_v18, %v7317_v29 }
 0x4a0   :  { %v11355_v13 = vpop.f32.mrf.mxu2 }
 0x4a4   :  { %v5314_v3 = vpop.f32.mrf.mxu3 }
 0x4a5   :  { %v5315_v62 = vadd.f32 %v5314_v3, %v11163_v31  ;;  %5127 = vmatmul.bf16.gmra.mxu2 %v7378_v33  ;;  %6202 = vmatmul.bf16.vlgmr.msra.gmra.mxu1 %v7502_v42  ;;  %v5720_v31 = vmax.f32 %v5562_v35, 0.0  ;;  %v7354_v42 = vor.u32 %v7876_v61, %v7351_v54  ;;  %v3558_v23 = vpop.permute.xlu1 %3557  ;;  %v7391_v35 = vld [vmem:[%s12318_s2 + $0x530] sm:$0xf0]  ;;  %v7525_v54 = vld [vmem:[%s12320_s4 + $0x30] sm:$0xf] }
 0x4a6   :  { %v11375_v20 = vpop.f32.mrf.mxu0 }
 0x4a7   :  { %v5564_v27 = vadd.f32 %v11259_v2, %v5315_v62  ;;  %v11384_v2 = vpop.permute.xlu2 %3577  ;;  %v7887_v62 = vld [vmem:[%s12318_s2 + $0x524] sm:$0xf] }
 0x4a8   :  { %v5088_v4 = vpop.f32.mrf.mxu2 }
 0x4a9   :  { %v5721_v3 = vmax.f32 %v5564_v27, 0.0  ;;  %v11380_v33 = vadd.f32 %v5088_v4, %v4840_v51  ;;  %5356 = vmatmul.bf16.gmra.mxu3 %v7318_v63  ;;  %5615 = vmatmul.bf16.gmra.mxu0 %v7354_v42  ;;  %v7924_v4 = vld [vmem:[%s12320_s4 + $0x44] sm:$0xf0]  ;;  %v4842_v63 = vadd.f32 %v10964_v36, %v3558_v23 }
 0x4aa   :  { %v7333_v42 = vld [vmem:[%s12318_s2 + $0x4a8] sm:$0xf] }
 0x4ab   :  { %v11382_v14 = vpack.c.bf16 %v5721_v3, %v5720_v31  ;;  %v7394_v31 = vor.u32 %v7887_v62, %v7391_v35  ;;  %v7526_v3 = vor.u32 %v7924_v4, %v7525_v54  ;;  %v7880_v35 = vld [vmem:[%s12318_s2 + $0x4ec] sm:$0xf] }
 0x4ac   :  { %v5317_v29 = vpop.f32.mrf.mxu3 }
 0x4ad   :  { %v5318_v18 = vadd.f32 %v5317_v29, %v11189_v25  ;;  %v7874_v29 = vld [vmem:[%s12318_s2 + $0x4b4] sm:$0xf0] }
 0x4ae   :  { %v11401_v27 = vpop.f32.mrf.mxu0 }
 0x4af   :  { %v5567_v25 = vadd.f32 %v11282_v39, %v5318_v18  ;;  %v7334_v39 = vor.u32 %v7874_v29, %v7333_v42  ;;  %v3563_v18 = vpop.permute.xlu2 %3562  ;;  %v7891_v42 = vld [vmem:[%s12318_s2 + $0x544] sm:$0xf]  ;;  %v7549_v29 = vld [vmem:[%s12320_s4 + $0x60] sm:$0xf] }
 0x4b0   :  { %v5090_v51 = vpop.f32.mrf.mxu2  ;;  %v4845_v23 = vadd.f32 %v10992_v12, %v3563_v18 }
 0x4b1   :  { %v11403_v61 = vadd.f32 %v5090_v51, %v4842_v63  ;;  %v7367_v63 = vld [vmem:[%s12318_s2 + $0x4f8] sm:$0xf0] }
 0x4b4   :  { %v5319_v50 = vpop.f32.mrf.mxu3 }
 0x4b5   :  { %v5320_v36 = vadd.f32 %v5319_v50, %v11210_v5  ;;  %5132 = vmatmul.bf16.gmra.mxu2 %v7394_v31  ;;  %6207 = vmatmul.bf16.gmra.mxu1 %v7526_v3  ;;  %v5722_v5 = vmax.f32 %v5567_v25, 0.0  ;;  %v7370_v31 = vor.u32 %v7880_v35, %v7367_v63  ;;  %v4825_v3 = vadd.f32 %v10800_v47, %v11109_v1  ;;  %v7407_v25 = vld [vmem:[%s12318_s2 + $0x550] sm:$0xf0] }
 0x4b6   :  { %v11417_v4 = vpop.f32.mrf.mxu0  ;;  %v4827_v1 = vadd.f32 %v10822_v30, %v11135_v24  ;;  %v11456_v30 = vpop.f32.mrf.mxu1 }
 0x4b7   :  { %v5569_v62 = vadd.f32 %v11310_v17, %v5320_v36  ;;  %v7930_v36 = vld [vmem:[%s12320_s4 + $0x74] sm:$0xf0]  ;;  %v5074_v47 = vadd.f32 %v11228_v55, %v4825_v3 }
 0x4b8   :  { %v5093_v54 = vpop.f32.mrf.mxu2  ;;  %v7550_v63 = vor.u32 %v7930_v36, %v7549_v29  ;;  %v5076_v55 = vadd.f32 %v11257_v28, %v4827_v1  ;;  %v7895_v1 = vld [vmem:[%s12318_s2 + $0x564] sm:$0xf] }
 0x4b9   :  { %v5723_v50 = vmax.f32 %v5569_v62, 0.0  ;;  %v11422_v51 = vadd.f32 %v5093_v54, %v4845_v23  ;;  %5361 = vmatmul.bf16.gmra.mxu3 %v7334_v39  ;;  %5620 = vmatmul.bf16.gmra.mxu0 %v7370_v31  ;;  %v4847_v39 = vadd.f32 %v11018_v44, %v11339_v10  ;;  %v7410_v54 = vor.u32 %v7891_v42, %v7407_v25  ;;  %v7878_v44 = vld [vmem:[%s12318_s2 + $0x4d4] sm:$0xf0]  ;;  %v7884_v42 = vld [vmem:[%s12318_s2 + $0x50c] sm:$0xf] }
 0x4bb   :  { %v11424_v12 = vpack.c.bf16 %v5723_v50, %v5722_v5  ;;  %v7349_v5 = vld [vmem:[%s12318_s2 + $0x4c8] sm:$0xf] }
 0x4bc   :  { %v5322_v17 = vpop.f32.mrf.mxu3  ;;  %v7350_v31 = vor.u32 %v7878_v44, %v7349_v5  ;;  %v4832_v5 = vadd.f32 %v10868_v56, %v11060_v22 }
 0x4bd   :  { %v5323_v62 = vadd.f32 %v5322_v17, %v5074_v47  ;;  %v4850_v17 = vadd.f32 %v11051_v41, %v11305_v7 }
 0x4be   :  { %v11445_v23 = vpop.f32.mrf.mxu0 }
 0x4bf   :  { %v5572_v24 = vadd.f32 %v11330_v15, %v5323_v62  ;;  %v7383_v15 = vld [vmem:[%s12318_s2 + $0x518] sm:$0xf0]  ;;  %v7573_v62 = vld [vmem:[%s12320_s4 + $0x90] sm:$0xf] }
 0x4c0   :  { %v5095_v18 = vpop.f32.mrf.mxu2  ;;  %v7386_v47 = vor.u32 %v7884_v42, %v7383_v15  ;;  %v4855_v42 = vadd.f32 %v11111_v8, %v11240_v46  ;;  %v7888_v15 = vld [vmem:[%s12318_s2 + $0x52c] sm:$0xf] }
 0x4c1   :  { %v11447_v35 = vadd.f32 %v5095_v18, %v4847_v39  ;;  %v5724_v29 = vmax.f32 %v5572_v24, 0.0  ;;  %v7423_v18 = vld [vmem:[%s12318_s2 + $0x570] sm:$0xf0] }
 0x4c4   :  { %v5324_v10 = vpop.f32.mrf.mxu3 }
 0x4c5   :  { %v5325_v50 = vadd.f32 %v5324_v10, %v5076_v55  ;;  %5137 = vmatmul.bf16.gmra.mxu2 %v7410_v54  ;;  %6212 = vmatmul.bf16.gmra.mxu1 %v7550_v63  ;;  %v7936_v54 = vld [vmem:[%s12320_s4 + $0xa4] sm:$0xf0]  ;;  %v4852_v63 = vadd.f32 %v11078_v6, %v11384_v2  ;;  %v7882_v6 = vld [vmem:[%s12318_s2 + $0x4f4] sm:$0xf0] }
 0x4c6   :  { %v11465_v28 = vpop.f32.mrf.mxu0 }
 0x4c7   :  { %v5574_v3 = vadd.f32 %v11357_v9, %v5325_v50  ;;  %v4830_v9 = vadd.f32 %v10846_v11, %v11024_v19  ;;  %v11491_v19 = vpop.f32.mrf.mxu1  ;;  %v7426_v50 = vor.u32 %v7895_v1, %v7423_v18  ;;  %v4835_v1 = vadd.f32 %v10890_v32, %v10960_v60  ;;  %v7899_v18 = vld [vmem:[%s12318_s2 + $0x584] sm:$0xf] }
 0x4c8   :  { %v5098_v25 = vpop.f32.mrf.mxu2  ;;  %v4837_v60 = vadd.f32 %v10912_v49, %v10988_v48 }
 0x4c9   :  { %v5725_v36 = vmax.f32 %v5574_v3, 0.0  ;;  %v11470_v39 = vadd.f32 %v5098_v25, %v4850_v17  ;;  %5366 = vmatmul.bf16.gmra.mxu3 %v7350_v31  ;;  %5625 = vmatmul.bf16.gmra.mxu0 %v7386_v47  ;;  %v5079_v11 = vadd.f32 %v11280_v45, %v4830_v9  ;;  %v7574_v31 = vor.u32 %v7936_v54, %v7573_v62  ;;  %v7365_v17 = vld [vmem:[%s12318_s2 + $0x4e8] sm:$0xf]  ;;  %v7439_v62 = vld [vmem:[%s12318_s2 + $0x590] sm:$0xf0] }
 0x4ca   :  { %v5081_v45 = vadd.f32 %v11308_v59, %v4832_v5  ;;  %v7366_v3 = vor.u32 %v7882_v6, %v7365_v17  ;;  %v7399_v59 = vld [vmem:[%s12318_s2 + $0x538] sm:$0xf0]  ;;  %v7597_v54 = vld [vmem:[%s12320_s4 + $0xc0] sm:$0xf]  ;;  %v5084_v32 = vadd.f32 %v11328_v38, %v4835_v1  ;;  %v7381_v6 = vld [vmem:[%s12318_s2 + $0x508] sm:$0xf] }
 0x4cb   :  { %v11472_v41 = vpack.c.bf16 %v5725_v36, %v5724_v29  ;;  %v7402_v8 = vor.u32 %v7888_v15, %v7399_v59  ;;  %v7948_v1 = vld [vmem:[%s12320_s4 + $0x104] sm:$0xf0] }
 0x4cc   :  { %v5327_v7 = vpop.f32.mrf.mxu3 }
 0x4cd   :  { %v5328_v10 = vadd.f32 %v5327_v7, %v5079_v11  ;;  %v4857_v11 = vadd.f32 %v11137_v43, %v11270_v52  ;;  %v7886_v43 = vld [vmem:[%s12318_s2 + $0x514] sm:$0xf0]  ;;  %v5086_v52 = vadd.f32 %v11355_v13, %v4837_v60  ;;  %v7397_v60 = vld [vmem:[%s12318_s2 + $0x528] sm:$0xf] }
 0x4ce   :  { %v11495_v55 = vpop.f32.mrf.mxu0 }
 0x4cf   :  { %v5577_v56 = vadd.f32 %v11375_v20, %v5328_v10  ;;  %v11518_v20 = vpop.f32.mrf.mxu1 }
 0x4d0   :  { %v5100_v44 = vpop.f32.mrf.mxu2 }
 0x4d1   :  { %v11497_v24 = vadd.f32 %v5100_v44, %v4852_v63  ;;  %v5726_v47 = vmax.f32 %v5577_v56, 0.0  ;;  %v7942_v63 = vld [vmem:[%s12320_s4 + $0xd4] sm:$0xf0]  ;;  %v4860_v56 = vadd.f32 %v11165_v16, %v11187_v58 }
 0x4d2   :  { %v7598_v17 = vor.u32 %v7942_v63, %v7597_v54 }
 0x4d4   :  { %v5329_v2 = vpop.f32.mrf.mxu3 }
 0x4d5   :  { %v5330_v22 = vadd.f32 %v5329_v2, %v5081_v45  ;;  %5142 = vmatmul.bf16.gmra.mxu2 %v7426_v50  ;;  %6217 = vmatmul.bf16.gmra.mxu1 %v7574_v31  ;;  %v7442_v31 = vor.u32 %v7899_v18, %v7439_v62  ;;  %v7382_v2 = vor.u32 %v7886_v43, %v7381_v6 }
 0x4d6   :  { %v11513_v36 = vpop.f32.mrf.mxu0 }
 0x4d7   :  { %v5579_v25 = vadd.f32 %v11401_v27, %v5330_v22  ;;  %v11552_v38 = vpop.f32.mrf.mxu1 }
 0x4d8   :  { %v5103_v29 = vpop.f32.mrf.mxu2 }
 0x4d9   :  { %v5727_v7 = vmax.f32 %v5579_v25, 0.0  ;;  %v11520_v9 = vadd.f32 %v5103_v29, %v4855_v42  ;;  %5371 = vmatmul.bf16.gmra.mxu3 %v7366_v3  ;;  %5630 = vmatmul.bf16.gmra.mxu0 %v7402_v8  ;;  %v7892_v3 = vld [vmem:[%s12318_s2 + $0x54c] sm:$0xf]  ;;  %v7455_v8 = vld [vmem:[%s12318_s2 + $0x5b0] sm:$0xf0] }
 0x4db   :  { %v5840_v46 = vpack.c.bf16 %v5727_v7, %v5726_v47  ;;  %v7903_v7 = vld [vmem:[%s12318_s2 + $0x5a4] sm:$0xf] }
 0x4dc   :  { %v5332_v27 = vpop.f32.mrf.mxu3 }
 0x4dd   :  { %v5333_v10 = vadd.f32 %v5332_v27, %v5084_v32  ;;  %v7621_v27 = vld [vmem:[%s12320_s4 + $0xf0] sm:$0xf] }
 0x4de   :  { %v11541_v44 = vpop.f32.mrf.mxu0  ;;  %v7622_v32 = vor.u32 %v7948_v1, %v7621_v27 }
 0x4df   :  { %v5582_v48 = vadd.f32 %v11417_v4, %v5333_v10  ;;  %v7415_v4 = vld [vmem:[%s12318_s2 + $0x558] sm:$0xf0] }
 0x4e0   :  { %v5105_v5 = vpop.f32.mrf.mxu2  ;;  %v7418_v59 = vor.u32 %v7892_v3, %v7415_v4 }
 0x4e1   :  { %v11543_v50 = vadd.f32 %v5105_v5, %v4857_v11  ;;  %v5728_v25 = vmax.f32 %v5582_v48, 0.0  ;;  %v7458_v11 = vor.u32 %v7903_v7, %v7455_v8  ;;  %v7890_v5 = vld [vmem:[%s12318_s2 + $0x534] sm:$0xf0]  ;;  %v7447_v8 = vld [vmem:[%s12318_s2 + $0x598] sm:$0xf0] }
 0x4e4   :  { %v5334_v49 = vpop.f32.mrf.mxu3 }
 0x4e5   :  { %v5335_v45 = vadd.f32 %v5334_v49, %v5086_v52  ;;  %5147 = vmatmul.bf16.gmra.mxu2 %v7442_v31  ;;  %6222 = vmatmul.bf16.gmra.mxu1 %v7598_v17  ;;  %v7896_v31 = vld [vmem:[%s12318_s2 + $0x56c] sm:$0xf] }
 0x4e6   :  { %v11561_v13 = vpop.f32.mrf.mxu0 }
 0x4e7   :  { %v5584_v22 = vadd.f32 %v11445_v23, %v5335_v45  ;;  %v11568_v23 = vpop.f32.mrf.mxu1  ;;  %v7907_v45 = vld [vmem:[%s12318_s2 + $0x5c4] sm:$0xf] }
 0x4e8   :  { %v5108_v42 = vpop.f32.mrf.mxu2 }
 0x4e9   :  { %v5729_v15 = vmax.f32 %v5584_v22, 0.0  ;;  %v11566_v29 = vadd.f32 %v5108_v42, %v4860_v56  ;;  %5376 = vmatmul.bf16.gmra.mxu3 %v7382_v2  ;;  %5635 = vmatmul.bf16.gmra.mxu0 %v7418_v59  ;;  %v7471_v2 = vld [vmem:[%s12318_s2 + $0x5d0] sm:$0xf0]  ;;  %v7954_v56 = vld [vmem:[%s12320_s4 + $0x134] sm:$0xf0] }
 0x4eb   :  { %v5841_v16 = vpack.c.bf16 %v5729_v15, %v5728_v25  ;;  %v7413_v25 = vld [vmem:[%s12318_s2 + $0x548] sm:$0xf]  ;;  %v7894_v15 = vld [vmem:[%s12318_s2 + $0x554] sm:$0xf0] }
 0x4ec   :  { %v5337_v58 = vpop.f32.mrf.mxu3 }
 0x4ed   :  { %v5338_v47 = vadd.f32 %v5337_v58, %v11380_v33  ;;  %6341 = vmatpush.bf16.msrb.mxu1 %v5841_v16  ;;  %v4862_v33 = vadd.f32 %v11191_v34, %v11139_v0  ;;  %v7398_v34 = vor.u32 %v7890_v5, %v7397_v60  ;;  %v7414_v16 = vor.u32 %v7894_v15, %v7413_v25  ;;  %v7503_v25 = vld [vmem:[%s12320_s4 + $0x18] sm:$0xf0] }
 0x4ee   :  { %v11586_v54 = vpop.f32.mrf.mxu0 }
 0x4ef   :  { %v5587_v18 = vadd.f32 %v11465_v28, %v5338_v47  ;;  %v11598_v28 = vpop.f32.mrf.mxu1 }
 0x4f0   :  { %v5110_v62 = vpop.f32.mrf.mxu2 }
 0x4f1   :  { %v11588_v63 = vadd.f32 %v5110_v62, %v4862_v33  ;;  %6342 = vmatpush.bf16.msrb.mxu1 %v5840_v46  ;;  %v5730_v43 = vmax.f32 %v5587_v18, 0.0  ;;  %v7911_v62 = vld [vmem:[%s12318_s2 + $0x5e4] sm:$0xf] }
 0x4f4   :  { %v5339_v10 = vpop.f32.mrf.mxu3 }
 0x4f5   :  { %v5340_v0 = vadd.f32 %v5339_v10, %v11403_v61  ;;  %5152 = vmatmul.bf16.gmra.mxu2 %v7458_v11  ;;  %6227 = vmatmul.bf16.gmra.mxu1 %v7622_v32  ;;  %v7431_v61 = vld [vmem:[%s12318_s2 + $0x578] sm:$0xf0]  ;;  %v7487_v11 = vld [vmem:[%s12318_s2 + $0x5f0] sm:$0xf0]  ;;  %v7960_v32 = vld [vmem:[%s12320_s4 + $0x164] sm:$0xf0] }
 0x4f6   :  { %6343 = vmatpush.bf16.msrb.mxu1 %v11472_v41  ;;  %v11606_v6 = vpop.f32.mrf.mxu0  ;;  %v7434_v41 = vor.u32 %v7896_v31, %v7431_v61  ;;  %v7490_v10 = vor.u32 %v7911_v62, %v7487_v11  ;;  %v7479_v11 = vld [vmem:[%s12318_s2 + $0x5d8] sm:$0xf0] }
 0x4f7   :  { %v5589_v46 = vadd.f32 %v11495_v55, %v5340_v0  ;;  %v11633_v42 = vpop.f32.mrf.mxu1 }
 0x4f8   :  { %v11604_v17 = vpop.f32.mrf.mxu2 }
 0x4f9   :  { %v5731_v52 = vmax.f32 %v5589_v46, 0.0  ;;  %5381 = vmatmul.bf16.gmra.mxu3 %v7398_v34  ;;  %5640 = vmatmul.bf16.gmra.mxu0 %v7434_v41  ;;  %v7429_v34 = vld [vmem:[%s12318_s2 + $0x568] sm:$0xf]  ;;  %v7898_v46 = vld [vmem:[%s12318_s2 + $0x574] sm:$0xf0] }
 0x4fa   :  { %6344 = vmatpush.bf16.msrb.mxu1 %v11424_v12  ;;  %v7645_v12 = vld [vmem:[%s12320_s4 + $0x120] sm:$0xf]  ;;  %v7904_v41 = vld [vmem:[%s12318_s2 + $0x5ac] sm:$0xf] }
 0x4fb   :  { %v11612_v55 = vpack.c.bf16 %v5731_v52, %v5730_v43  ;;  %v7646_v4 = vor.u32 %v7954_v56, %v7645_v12 }
 0x4fc   :  { %v5342_v49 = vpop.f32.mrf.mxu3 }
 0x4fd   :  { %v5343_v48 = vadd.f32 %v5342_v49, %v11422_v51 }
 0x4fe   :  { %6345 = vmatpush.bf16.msrb.mxu1 %v11382_v14  ;;  %v11631_v3 = vpop.f32.mrf.mxu0  ;;  %v7474_v14 = vor.u32 %v7907_v45, %v7471_v2  ;;  %v7463_v45 = vld [vmem:[%s12318_s2 + $0x5b8] sm:$0xf0] }
 0x4ff   :  { %v5592_v51 = vadd.f32 %v11513_v36, %v5343_v48 }
 0x500   :  { %v11629_v22 = vpop.f32.mrf.mxu2 }
 0x502   :  { %6346 = vmatpush.bf16.msrb.mxu1 %v11337_v21  ;;  %v7900_v21 = vld [vmem:[%s12318_s2 + $0x58c] sm:$0xf] }
 0x503   :  { %v7450_v1 = vor.u32 %v7900_v21, %v7447_v8 }
 0x504   :  { %v5344_v59 = vpop.f32.mrf.mxu3 }
 0x505   :  { %v5345_v36 = vadd.f32 %v5344_v59, %v11447_v35  ;;  %5157 = vmatmul.bf16.gmra.mxu2 %v7474_v14  ;;  %6232 = vmatmul.bf16.gmra.mxu1 %v7646_v4  ;;  %v5732_v35 = vmax.f32 %v5592_v51, 0.0  ;;  %v7915_v4 = vld [vmem:[%s12320_s4 + $0x4] sm:$0xf] }
 0x506   :  { %6347 = vmatpush.bf16.msrb.mxu1 %v11290_v53  ;;  %v11650_v7 = vpop.f32.mrf.mxu0  ;;  %v11656_v53 = vpop.f32.mrf.mxu1 }
 0x507   :  { %v5594_v58 = vadd.f32 %v11541_v44, %v5345_v36 }
 0x508   :  { %v11648_v47 = vpop.f32.mrf.mxu2 }
 0x509   :  { %v5733_v27 = vmax.f32 %v5594_v58, 0.0  ;;  %5386 = vmatmul.bf16.gmra.mxu3 %v7414_v16  ;;  %5645 = vmatmul.bf16.gmra.mxu0 %v7450_v1  ;;  %v7506_v16 = vor.u32 %v7915_v4, %v7503_v25  ;;  %v7445_v58 = vld [vmem:[%s12318_s2 + $0x588] sm:$0xf]  ;;  %v7912_v25 = vld [vmem:[%s12318_s2 + $0x5ec] sm:$0xf] }
 0x50a   :  { %6348 = vmatpush.bf16.msrb.mxu1 %v11238_v57  ;;  %v7669_v57 = vld [vmem:[%s12320_s4 + $0x150] sm:$0xf] }
 0x50b   :  { %v11658_v44 = vpack.c.bf16 %v5733_v27, %v5732_v35  ;;  %v7670_v0 = vor.u32 %v7960_v32, %v7669_v57 }
 0x50c   :  { %v5347_v33 = vpop.f32.mrf.mxu3 }
 0x50d   :  { %v5348_v18 = vadd.f32 %v5347_v33, %v11470_v39  ;;  %v7908_v33 = vld [vmem:[%s12318_s2 + $0x5cc] sm:$0xf] }
 0x50e   :  { %v11676_v39 = vpop.f32.mrf.mxu0  ;;  %v11684_v61 = vpop.f32.mrf.mxu1 }
 0x50f   :  { %v5597_v60 = vadd.f32 %v11561_v13, %v5348_v18  ;;  %v7430_v13 = vor.u32 %v7898_v46, %v7429_v34  ;;  %v3638_v34 = vpop.permute.xlu0 %3637  ;;  %v7921_v46 = vld [vmem:[%s12320_s4 + $0x34] sm:$0xf] }
 0x510   :  { %v11674_v5 = vpop.f32.mrf.mxu2 }
 0x511   :  { %v5734_v2 = vmax.f32 %v5597_v60, 0.0  ;;  %v7482_v60 = vor.u32 %v7908_v33, %v7479_v11 }
 0x514   :  { %v5349_v31 = vpop.f32.mrf.mxu3 }
 0x515   :  { %v5350_v43 = vadd.f32 %v5349_v31, %v11497_v24  ;;  %5162 = vmatmul.bf16.gmra.mxu2 %v7490_v10  ;;  %6237 = vmatmul.bf16.gmra.mxu1 %v7670_v0  ;;  %v7466_v24 = vor.u32 %v7904_v41, %v7463_v45  ;;  %v7527_v31 = vld [vmem:[%s12320_s4 + $0x48] sm:$0xf0] }
 0x516   :  { %v11693_v48 = vpop.f32.mrf.mxu0  ;;  %v7530_v45 = vor.u32 %v7921_v46, %v7527_v31 }
 0x517   :  { %v5599_v52 = vadd.f32 %v11586_v54, %v5350_v43  ;;  %v11700_v54 = vpop.permute.xlu2 %3647  ;;  %v4882_v43 = vadd.f32 %v11518_v20, %v3638_v34 }
 0x518   :  { %v11691_v49 = vpop.f32.mrf.mxu2 }
 0x519   :  { %v5735_v12 = vmax.f32 %v5599_v52, 0.0  ;;  %5391 = vmatmul.bf16.gmra.mxu3 %v7430_v13  ;;  %5650 = vmatmul.bf16.gmra.mxu0 %v7466_v24 }
 0x51b   :  { %v11698_v56 = vpack.c.bf16 %v5735_v12, %v5734_v2  ;;  %v7906_v2 = vld [vmem:[%s12318_s2 + $0x5b4] sm:$0xf0] }
 0x51c   :  { %v5352_v51 = vpop.f32.mrf.mxu3 }
 0x51d   :  { %v5353_v14 = vadd.f32 %v5352_v51, %v11520_v9  ;;  %v7902_v9 = vld [vmem:[%s12318_s2 + $0x594] sm:$0xf0] }
 0x51e   :  { %v11712_v36 = vpop.f32.mrf.mxu0  ;;  %v7446_v35 = vor.u32 %v7902_v9, %v7445_v58 }
 0x51f   :  { %v5602_v15 = vadd.f32 %v11606_v6, %v5353_v14  ;;  %v3633_v27 = vpop.permute.xlu2 %3632  ;;  %v4885_v14 = vadd.f32 %v11552_v38, %v11367_v26 }
 0x520   :  { %v11710_v59 = vpop.f32.mrf.mxu2  ;;  %v4880_v6 = vadd.f32 %v11491_v19, %v3633_v27  ;;  %v7927_v27 = vld [vmem:[%s12320_s4 + $0x64] sm:$0xf] }
 0x521   :  { %v5736_v57 = vmax.f32 %v5602_v15, 0.0 }
 0x524   :  { %v5354_v21 = vpop.f32.mrf.mxu3 }
 0x525   :  { %v5355_v8 = vadd.f32 %v5354_v21, %v11543_v50  ;;  %6251 = vmatmul.bf16.vlgmr.msra.gmra.mxu2 %v7506_v16  ;;  %v7495_v16 = vld [vmem:[%s12318_s2 + $0x5f8] sm:$0xf0] }
 0x526   :  { %v11726_v62 = vpop.f32.mrf.mxu0  ;;  %v7498_v21 = vor.u32 %v7912_v25, %v7495_v16  ;;  %v12424_v25 = vld [vmem:[#allocation19_spill] sm:$0xff] }
 0x527   :  { %v5604_v1 = vadd.f32 %v11631_v3, %v5355_v8  ;;  %v11735_v3 = vpop.f32.mrf.mxu1 }
 0x528   :  { %v5128_v18 = vpop.f32.mrf.mxu2 }
 0x529   :  { %v5737_v50 = vmax.f32 %v5604_v1, 0.0  ;;  %v11731_v32 = vadd.f32 %v5128_v18, %v4880_v6  ;;  %5396 = vmatmul.bf16.gmra.mxu3 %v7446_v35  ;;  %5655 = vmatmul.bf16.gmra.mxu0 %v7482_v60  ;;  %v7551_v6 = vld [vmem:[%s12320_s4 + $0x78] sm:$0xf0]  ;;  %v4887_v1 = vadd.f32 %v11568_v23, %v11700_v54  ;;  %v7910_v23 = vld [vmem:[%s12318_s2 + $0x5d4] sm:$0xf0] }
 0x52b   :  { %v11733_v19 = vpack.c.bf16 %v5737_v50, %v5736_v57  ;;  %v12420_v57 = vld [vmem:[#allocation20_spill] sm:$0xff] }
 0x52c   :  { %v5357_v10 = vpop.f32.mrf.mxu3  ;;  %v4867_v50 = vadd.f32 %v11236_v40, %v12420_v57 }
 0x52d   :  { %v5358_v0 = vadd.f32 %v5357_v10, %v11566_v29  ;;  %v7461_v29 = vld [vmem:[%s12318_s2 + $0x5a8] sm:$0xf]  ;;  %v7554_v10 = vor.u32 %v7927_v27, %v7551_v6  ;;  %v12426_v27 = vld [vmem:[#allocation10_spill] sm:$0xff] }
 0x52e   :  { %v11754_v12 = vpop.f32.mrf.mxu0  ;;  %v7462_v20 = vor.u32 %v7906_v2, %v7461_v29 }
 0x52f   :  { %v5607_v13 = vadd.f32 %v11650_v7, %v5358_v0  ;;  %v11757_v7 = vpop.f32.mrf.mxu1  ;;  %v7477_v0 = vld [vmem:[%s12318_s2 + $0x5c8] sm:$0xf] }
 0x530   :  { %v5130_v52 = vpop.f32.mrf.mxu2  ;;  %v7478_v40 = vor.u32 %v7910_v23, %v7477_v0 }
 0x531   :  { %v11746_v41 = vadd.f32 %v5130_v52, %v4882_v43  ;;  %v5738_v58 = vmax.f32 %v5607_v13, 0.0  ;;  %v12421_v43 = vld [vmem:[#allocation16_spill] sm:$0xff] }
 0x532   :  { %v4890_v13 = vadd.f32 %v11598_v28, %v12421_v43  ;;  %v7933_v28 = vld [vmem:[%s12320_s4 + $0x94] sm:$0xf] }
 0x534   :  { %v5359_v24 = vpop.f32.mrf.mxu3 }
 0x535   :  { %v5360_v51 = vadd.f32 %v5359_v24, %v11588_v63  ;;  %6256 = vmatmul.bf16.gmra.mxu2 %v7530_v45 }
 0x536   :  { %v11772_v38 = vpop.f32.mrf.mxu0 }
 0x537   :  { %v5609_v4 = vadd.f32 %v11676_v39, %v5360_v51  ;;  %v12419_v39 = vld [vmem:[#allocation30_spill] sm:$0xff]  ;;  %v11785_v18 = vpop.f32.mrf.mxu1 }
 0x538   :  { %v5133_v15 = vpop.f32.mrf.mxu2  ;;  %v4865_v35 = vadd.f32 %v11212_v37, %v12419_v39 }
 0x539   :  { %v5739_v63 = vmax.f32 %v5609_v4, 0.0  ;;  %v11768_v9 = vadd.f32 %v5133_v15, %v4885_v14  ;;  %5401 = vmatmul.bf16.gmra.mxu3 %v7462_v20  ;;  %5660 = vmatmul.bf16.gmra.mxu0 %v7498_v21  ;;  %v12422_v20 = vld [vmem:[#allocation26_spill] sm:$0xff]  ;;  %v12423_v14 = vld [vmem:[#allocation29_spill] sm:$0xff]  ;;  %v4892_v15 = vadd.f32 %v11633_v42, %v12424_v25 }
 0x53a   :  { %v5114_v33 = vadd.f32 %v11604_v17, %v4865_v35  ;;  %v5116_v17 = vadd.f32 %v11629_v22, %v4867_v50  ;;  %v4870_v4 = vadd.f32 %v12423_v14, %v12422_v20  ;;  %v12425_v35 = vld [vmem:[#allocation21_spill] sm:$0xff]  ;;  %v7922_v14 = vld [vmem:[%s12320_s4 + $0x3c] sm:$0xf] }
 0x53b   :  { %v11770_v8 = vpack.c.bf16 %v5739_v63, %v5738_v58  ;;  %v7916_v58 = vld [vmem:[%s12320_s4 + $0xc] sm:$0xf]  ;;  %v7511_v63 = vld [vmem:[%s12320_s4 + $0x20] sm:$0xf0]  ;;  %v4872_v6 = vadd.f32 %v12426_v27, %v12425_v35  ;;  %v12430_v25 = vld [vmem:[#allocation25_spill] sm:$0xff] }
 0x53c   :  { %v5362_v26 = vpop.f32.mrf.mxu3  ;;  %v5119_v16 = vadd.f32 %v11648_v47, %v4870_v4  ;;  %v7514_v39 = vor.u32 %v7916_v58, %v7511_v63  ;;  %v7493_v47 = vld [vmem:[%s12318_s2 + $0x5e8] sm:$0xf]  ;;  %v7535_v4 = vld [vmem:[%s12320_s4 + $0x50] sm:$0xf0]  ;;  %v7919_v63 = vld [vmem:[%s12320_s4 + $0x1c] sm:$0xf0] }
 0x53d   :  { %v5363_v37 = vadd.f32 %v5362_v26, %v5114_v33  ;;  %v5121_v57 = vadd.f32 %v11674_v5, %v4872_v6 }
 0x53e   :  { %v11799_v31 = vpop.f32.mrf.mxu0  ;;  %6349 = vmatmul.bf16.vlgmr.msrb.gmra.mxu1 %v7514_v39 }
 0x53f   :  { %v5612_v34 = vadd.f32 %v11693_v48, %v5363_v37  ;;  %v11806_v22 = vpop.f32.mrf.mxu1 }
 0x540   :  { %v5135_v11 = vpop.f32.mrf.mxu2 }
 0x541   :  { %v11789_v60 = vadd.f32 %v5135_v11, %v4887_v1  ;;  %v5740_v29 = vmax.f32 %v5612_v34, 0.0  ;;  %v7914_v11 = vld [vmem:[%s12318_s2 + $0x5f4] sm:$0xf0] }
 0x542   :  { %v7494_v23 = vor.u32 %v7914_v11, %v7493_v47 }
 0x544   :  { %v5364_v54 = vpop.f32.mrf.mxu3 }
 0x545   :  { %v5365_v46 = vadd.f32 %v5364_v54, %v5116_v17  ;;  %6261 = vmatmul.bf16.gmra.mxu2 %v7554_v10  ;;  %v12427_v17 = vld [vmem:[#allocation11_spill] sm:$0xff] }
 0x546   :  { %v11827_v26 = vpop.f32.mrf.mxu0  ;;  %v4895_v54 = vadd.f32 %v11656_v53, %v12427_v17  ;;  %v7599_v53 = vld [vmem:[%s12320_s4 + $0xd8] sm:$0xf0]  ;;  %v7945_v17 = vld [vmem:[%s12320_s4 + $0xf4] sm:$0xf] }
 0x547   :  { %v5614_v52 = vadd.f32 %v11712_v36, %v5365_v46  ;;  %v7575_v36 = vld [vmem:[%s12320_s4 + $0xa8] sm:$0xf0]  ;;  %v11840_v50 = vpop.f32.mrf.mxu1 }
 0x548   :  { %v5138_v45 = vpop.f32.mrf.mxu2  ;;  %v7578_v42 = vor.u32 %v7933_v28, %v7575_v36  ;;  %v7538_v36 = vor.u32 %v7922_v14, %v7535_v4 }
 0x549   :  { %v5741_v2 = vmax.f32 %v5614_v52, 0.0  ;;  %v11804_v24 = vadd.f32 %v5138_v45, %v4890_v13  ;;  %5406 = vmatmul.bf16.gmra.mxu3 %v7478_v40 }
 0x54b   :  { %v11808_v51 = vpack.c.bf16 %v5741_v2, %v5740_v29 }
 0x54c   :  { %v5367_v48 = vpop.f32.mrf.mxu3 }
 0x54d   :  { %v5368_v1 = vadd.f32 %v5367_v48, %v5119_v16  ;;  %v12429_v48 = vld [vmem:[#allocation9_spill] sm:$0xff] }
 0x54e   :  { %v5628_v5 = vpop.f32.mrf.mxu0  ;;  %v5124_v20 = vadd.f32 %v11691_v49, %v12429_v48  ;;  %v7509_v49 = vld [vmem:[%s12320_s4 + $0x8] sm:$0xf]  ;;  %6354 = vmatmul.bf16.gmra.mxu1 %v7538_v36 }
 0x54f   :  { %v5617_v10 = vadd.f32 %v11726_v62, %v5368_v1  ;;  %v11848_v29 = vpop.f32.mrf.mxu1  ;;  %v7939_v62 = vld [vmem:[%s12320_s4 + $0xc4] sm:$0xf]  ;;  %v7510_v6 = vor.u32 %v7919_v63, %v7509_v49  ;;  %v7557_v49 = vld [vmem:[%s12320_s4 + $0x68] sm:$0xf]  ;;  %v7931_v63 = vld [vmem:[%s12320_s4 + $0x7c] sm:$0xf0] }
 0x550   :  { %v5140_v21 = vpop.f32.mrf.mxu2  ;;  %v12431_v1 = vld [vmem:[#allocation23_spill] sm:$0xff] }
 0x551   :  { %v11831_v33 = vadd.f32 %v5140_v21, %v4892_v15  ;;  %v5742_v40 = vmax.f32 %v5617_v10, 0.0  ;;  %v4877_v15 = vadd.f32 %v11456_v30, %v12430_v25 }
 0x553   :  { %v5126_v21 = vadd.f32 %v11710_v59, %v4877_v15 }
 0x554   :  { %v5369_v37 = vpop.f32.mrf.mxu3 }
 0x555   :  { %v5370_v0 = vadd.f32 %v5369_v37, %v5121_v57  ;;  %6266 = vmatmul.bf16.gmra.mxu2 %v7578_v42  ;;  %v4900_v42 = vadd.f32 %v11735_v3, %v12431_v1  ;;  %v7623_v3 = vld [vmem:[%s12320_s4 + $0x108] sm:$0xf0] }
 0x556   :  { %v5631_v35 = vpop.f32.mrf.mxu0 }
 0x557   :  { %v5619_v34 = vadd.f32 %v11754_v12, %v5370_v0  ;;  %v12428_v12 = vld [vmem:[#allocation24_spill] sm:$0xff]  ;;  %v11881_v11 = vpop.f32.mrf.mxu1 }
 0x558   :  { %v5143_v46 = vpop.f32.mrf.mxu2  ;;  %v4897_v2 = vadd.f32 %v11684_v61, %v12428_v12  ;;  %v7602_v61 = vor.u32 %v7939_v62, %v7599_v53  ;;  %v7533_v62 = vld [vmem:[%s12320_s4 + $0x38] sm:$0xf] }
 0x559   :  { %v5743_v43 = vmax.f32 %v5619_v34, 0.0  ;;  %v11846_v13 = vadd.f32 %v5143_v46, %v4895_v54  ;;  %5411 = vmatmul.bf16.gmra.mxu3 %v7494_v23  ;;  %v7928_v34 = vld [vmem:[%s12320_s4 + $0x6c] sm:$0xf] }
 0x55b   :  { %v5848_v52 = vpack.c.bf16 %v5743_v43, %v5742_v40  ;;  %v7626_v43 = vor.u32 %v7945_v17, %v7623_v3 }
 0x55c   :  { %v5372_v45 = vpop.f32.mrf.mxu3 }
 0x55d   :  { %v5373_v16 = vadd.f32 %v5372_v45, %v5124_v20 }
 0x55f   :  { %v5622_v27 = vadd.f32 %v11772_v38, %v5373_v16  ;;  %v11901_v45 = vpop.f32.mrf.mxu1  ;;  %v7583_v16 = vld [vmem:[%s12320_s4 + $0xb0] sm:$0xf0] }
 0x560   :  { %v5145_v28 = vpop.f32.mrf.mxu2 }
 0x561   :  { %v11868_v58 = vadd.f32 %v5145_v28, %v4897_v2  ;;  %v5744_v37 = vmax.f32 %v5622_v27, 0.0  ;;  %v7558_v27 = vor.u32 %v7931_v63, %v7557_v49 }
 0x564   :  { %v5374_v39 = vpop.f32.mrf.mxu3 }
 0x565   :  { %v5375_v30 = vadd.f32 %v5374_v39, %v5126_v21  ;;  %6271 = vmatmul.bf16.gmra.mxu2 %v7602_v61 }
 0x567   :  { %v5624_v47 = vadd.f32 %v11799_v31, %v5375_v30  ;;  %v5633_v31 = vpop.f32.mrf.mxu0  ;;  %v11916_v36 = vpop.f32.mrf.mxu1 }
 0x568   :  { %v5148_v57 = vpop.f32.mrf.mxu2 }
 0x569   :  { %v5745_v10 = vmax.f32 %v5624_v47, 0.0  ;;  %v11883_v0 = vadd.f32 %v5148_v57, %v4900_v42  ;;  %6300 = vmatmul.bf16.vlgmr.msra.gmra.mxu3 %v7510_v6 }
 0x56b   :  { %v5849_v59 = vpack.c.bf16 %v5745_v10, %v5744_v37  ;;  %v7957_v10 = vld [vmem:[%s12320_s4 + $0x154] sm:$0xf] }
 0x56c   :  { %v5377_v23 = vpop.f32.mrf.mxu3 }
 0x56d   :  { %v5378_v38 = vadd.f32 %v5377_v23, %v11731_v32  ;;  %6390 = vmatpush.bf16.msrb.mxu2 %v5849_v59  ;;  %v7559_v32 = vld [vmem:[%s12320_s4 + $0x80] sm:$0xf0]  ;;  %v7940_v23 = vld [vmem:[%s12320_s4 + $0xcc] sm:$0xf] }
 0x56e   :  { %v7562_v40 = vor.u32 %v7928_v34, %v7559_v32 }
 0x56f   :  { %v5627_v54 = vadd.f32 %v11827_v26, %v5378_v38  ;;  %v7925_v26 = vld [vmem:[%s12320_s4 + $0x4c] sm:$0xf0]  ;;  %v5636_v20 = vpop.f32.mrf.mxu0  ;;  %v11942_v30 = vpop.f32.mrf.mxu1 }
 0x570   :  { %v11899_v46 = vpop.f32.mrf.mxu2  ;;  %6359 = vmatmul.bf16.gmra.mxu1 %v7562_v40  ;;  %v7534_v2 = vor.u32 %v7925_v26, %v7533_v62 }
 0x571   :  { %6391 = vmatpush.bf16.msrb.mxu2 %v5848_v52  ;;  %v5746_v14 = vmax.f32 %v5627_v54, 0.0  ;;  %v7937_v54 = vld [vmem:[%s12320_s4 + $0xac] sm:$0xf0] }
 0x574   :  { %v5379_v53 = vpop.f32.mrf.mxu3 }
 0x575   :  { %v5380_v12 = vadd.f32 %v5379_v53, %v11746_v41  ;;  %6276 = vmatmul.bf16.gmra.mxu2 %v7626_v43 }
 0x576   :  { %6392 = vmatpush.bf16.msrb.mxu2 %v11808_v51  ;;  %v7951_v51 = vld [vmem:[%s12320_s4 + $0x124] sm:$0xf] }
 0x577   :  { %v5629_v52 = vadd.f32 %v5628_v5, %v5380_v12  ;;  %v7647_v5 = vld [vmem:[%s12320_s4 + $0x138] sm:$0xf0]  ;;  %v5638_v21 = vpop.f32.mrf.mxu0  ;;  %v11963_v38 = vpop.f32.mrf.mxu1 }
 0x578   :  { %v11911_v48 = vpop.f32.mrf.mxu2  ;;  %v7650_v61 = vor.u32 %v7951_v51, %v7647_v5  ;;  %v7631_v51 = vld [vmem:[%s12320_s4 + $0x110] sm:$0xf0] }
 0x579   :  { %v5747_v4 = vmax.f32 %v5629_v52, 0.0  ;;  %6305 = vmatmul.bf16.gmra.mxu3 %v7534_v2 }
 0x57a   :  { %6393 = vmatpush.bf16.msrb.mxu2 %v11770_v8  ;;  %v7934_v8 = vld [vmem:[%s12320_s4 + $0x9c] sm:$0xf] }
 0x57b   :  { %v11914_v28 = vpack.c.bf16 %v5747_v4, %v5746_v14  ;;  %v7920_v4 = vld [vmem:[%s12320_s4 + $0x24] sm:$0xf0] }
 0x57c   :  { %v5382_v25 = vpop.f32.mrf.mxu3 }
 0x57d   :  { %v5383_v41 = vadd.f32 %v5382_v25, %v11768_v9 }
 0x57e   :  { %6394 = vmatpush.bf16.msrb.mxu2 %v11733_v19  ;;  %v7586_v19 = vor.u32 %v7934_v8, %v7583_v16  ;;  %v7605_v16 = vld [vmem:[%s12320_s4 + $0xc8] sm:$0xf] }
 0x57f   :  { %v5632_v15 = vadd.f32 %v5631_v35, %v5383_v41  ;;  %v5641_v37 = vpop.f32.mrf.mxu0  ;;  %v11976_v2 = vpop.f32.mrf.mxu1  ;;  %v7946_v41 = vld [vmem:[%s12320_s4 + $0xfc] sm:$0xf] }
 0x580   :  { %v11932_v9 = vpop.f32.mrf.mxu2  ;;  %6364 = vmatmul.bf16.gmra.mxu1 %v7586_v19  ;;  %v7943_v19 = vld [vmem:[%s12320_s4 + $0xdc] sm:$0xf0] }
 0x581   :  { %v5748_v1 = vmax.f32 %v5632_v15, 0.0  ;;  %v7634_v15 = vor.u32 %v7946_v41, %v7631_v51 }
 0x582   :  { %6395 = vmatpush.bf16.msrb.mxu2 %v11698_v56 }
 0x584   :  { %v5384_v39 = vpop.f32.mrf.mxu3 }
 0x585   :  { %v5385_v35 = vadd.f32 %v5384_v39, %v11789_v60  ;;  %6281 = vmatmul.bf16.gmra.mxu2 %v7650_v61  ;;  %v5877_v39 = vpop.permute.xlu1 %5876 }
 0x586   :  { %6396 = vmatpush.bf16.msrb.mxu2 %v11658_v44  ;;  %v7671_v44 = vld [vmem:[%s12320_s4 + $0x168] sm:$0xf0] }
 0x587   :  { %v5634_v56 = vadd.f32 %v5633_v31, %v5385_v35  ;;  %v7674_v3 = vor.u32 %v7957_v10, %v7671_v44  ;;  %v7581_v31 = vld [vmem:[%s12320_s4 + $0x98] sm:$0xf]  ;;  %v5643_v43 = vpop.f32.mrf.mxu0  ;;  %v12001_v61 = vpop.f32.mrf.mxu1  ;;  %v6204_v35 = vadd.f32 %v11916_v36, %v5877_v39 }
 0x588   :  { %v11945_v6 = vpop.f32.mrf.mxu2  ;;  %v7582_v40 = vor.u32 %v7937_v54, %v7581_v31  ;;  %v7926_v36 = vld [vmem:[%s12320_s4 + $0x54] sm:$0xf0]  ;;  %v12432_v31 = vld [vmem:[#allocation8_spill] sm:$0xff] }
 0x589   :  { %v5749_v42 = vmax.f32 %v5634_v56, 0.0  ;;  %6310 = vmatmul.bf16.gmra.mxu3 %v7558_v27  ;;  %v4902_v54 = vadd.f32 %v11757_v7, %v12432_v31  ;;  %v7938_v31 = vld [vmem:[%s12320_s4 + $0xb4] sm:$0xf0] }
 0x58a   :  { %6397 = vmatpush.bf16.msrb.mxu2 %v11612_v55  ;;  %v7607_v55 = vld [vmem:[%s12320_s4 + $0xe0] sm:$0xf0] }
 0x58b   :  { %v11948_v47 = vpack.c.bf16 %v5749_v42, %v5748_v1  ;;  %v7610_v17 = vor.u32 %v7940_v23, %v7607_v55  ;;  %v7952_v55 = vld [vmem:[%s12320_s4 + $0x12c] sm:$0xf] }
 0x58c   :  { %v5387_v57 = vpop.f32.mrf.mxu3 }
 0x58d   :  { %v5388_v60 = vadd.f32 %v5387_v57, %v11804_v24 }
 0x58f   :  { %v5637_v59 = vadd.f32 %v5636_v20, %v5388_v60 }
 0x590   :  { %v11965_v24 = vpop.f32.mrf.mxu2  ;;  %6369 = vmatmul.bf16.gmra.mxu1 %v7610_v17  ;;  %v7655_v17 = vld [vmem:[%s12320_s4 + $0x140] sm:$0xf0] }
 0x591   :  { %v5750_v53 = vmax.f32 %v5637_v59, 0.0  ;;  %v12010_v59 = vpop.f32.mrf.mxu1 }
 0x594   :  { %v5389_v34 = vpop.f32.mrf.mxu3 }
 0x595   :  { %v5390_v32 = vadd.f32 %v5389_v34, %v11831_v33  ;;  %6286 = vmatmul.bf16.gmra.mxu2 %v7674_v3  ;;  %v7517_v33 = vld [vmem:[%s12320_s4 + $0x10] sm:$0xf]  ;;  %v7658_v3 = vor.u32 %v7952_v55, %v7655_v17  ;;  %v12073_v55 = vpop.permute.xlu1 %5891 }
 0x596   :  { %v7518_v8 = vor.u32 %v7920_v4, %v7517_v33 }
 0x597   :  { %v5639_v62 = vadd.f32 %v5638_v21, %v5390_v32  ;;  %v7606_v21 = vor.u32 %v7943_v19, %v7605_v16  ;;  %v7629_v32 = vld [vmem:[%s12320_s4 + $0xf8] sm:$0xf]  ;;  %v7565_v16 = vld [vmem:[%s12320_s4 + $0x70] sm:$0xf] }
 0x598   :  { %v11974_v26 = vpop.f32.mrf.mxu2 }
 0x599   :  { %v5751_v12 = vmax.f32 %v5639_v62, 0.0  ;;  %6315 = vmatmul.bf16.gmra.mxu3 %v7582_v40  ;;  %v7949_v40 = vld [vmem:[%s12320_s4 + $0x10c] sm:$0xf0]  ;;  %v6218_v4 = vpop.f32.mrf.mxu1 }
 0x59b   :  { %v11978_v52 = vpack.c.bf16 %v5751_v12, %v5750_v53 }
 0x59c   :  { %v5392_v20 = vpop.f32.mrf.mxu3 }
 0x59d   :  { %v5393_v14 = vadd.f32 %v5392_v20, %v11846_v13  ;;  %v5646_v13 = vpop.f32.mrf.mxu0  ;;  %v7630_v20 = vor.u32 %v7949_v40, %v7629_v32  ;;  %v7677_v32 = vld [vmem:[%s12320_s4 + $0x158] sm:$0xf]  ;;  %v7961_v40 = vld [vmem:[%s12320_s4 + $0x16c] sm:$0xf0] }
 0x59f   :  { %v5642_v25 = vadd.f32 %v5641_v37, %v5393_v14  ;;  %v5887_v14 = vpop.permute.xlu0 %5886 }
 0x5a0   :  { %v11993_v5 = vpop.f32.mrf.mxu2  ;;  %6374 = vmatmul.bf16.gmra.mxu1 %v7634_v15  ;;  %v6209_v7 = vadd.f32 %v11963_v38, %v5887_v14  ;;  %v7932_v38 = vld [vmem:[%s12320_s4 + $0x84] sm:$0xf0] }
 0x5a1   :  { %v5752_v1 = vmax.f32 %v5642_v25, 0.0 }
 0x5a4   :  { %v5394_v49 = vpop.f32.mrf.mxu3 }
 0x5a5   :  { %v5395_v63 = vadd.f32 %v5394_v49, %v11868_v58  ;;  %6398 = vmatmul.bf16.vlgmr.msrb.gmra.mxu2 %v7518_v8  ;;  %v5648_v37 = vpop.f32.mrf.mxu0  ;;  %v7541_v58 = vld [vmem:[%s12320_s4 + $0x40] sm:$0xf]  ;;  %v7958_v49 = vld [vmem:[%s12320_s4 + $0x15c] sm:$0xf] }
 0x5a6   :  { %v7542_v34 = vor.u32 %v7926_v36, %v7541_v58 }
 0x5a7   :  { %v5644_v27 = vadd.f32 %v5643_v43, %v5395_v63  ;;  %v5151_v43 = vadd.f32 %v11899_v46, %v4902_v54  ;;  %v12042_v46 = vpop.permute.xlu2 %5881  ;;  %v7679_v63 = vld [vmem:[%s12320_s4 + $0x170] sm:$0xf0] }
 0x5a8   :  { %v6252_v56 = vpop.f32.mrf.mxu2  ;;  %v7682_v39 = vor.u32 %v7958_v49, %v7679_v63  ;;  %v7613_v49 = vld [vmem:[%s12320_s4 + $0xd0] sm:$0xf]  ;;  %v7944_v63 = vld [vmem:[%s12320_s4 + $0xe4] sm:$0xf0] }
 0x5a9   :  { %v5753_v42 = vmax.f32 %v5644_v27, 0.0  ;;  %v12005_v57 = vadd.f32 %v6252_v56, %v6204_v35  ;;  %6320 = vmatmul.bf16.gmra.mxu3 %v7606_v21  ;;  %v7566_v35 = vor.u32 %v7932_v38, %v7565_v16  ;;  %v12062_v27 = vpop.f32.mrf.mxu1  ;;  %v7653_v56 = vld [vmem:[%s12320_s4 + $0x128] sm:$0xf]  ;;  %v12433_v16 = vld [vmem:[#allocation17_spill] sm:$0xff] }
 0x5aa   :  { %v4915_v38 = vadd.f32 %v11881_v11, %v12433_v16  ;;  %v12436_v11 = vld [vmem:[#allocation15_spill] sm:$0xff] }
 0x5ab   :  { %v12007_v60 = vpack.c.bf16 %v5753_v42, %v5752_v1  ;;  %v7955_v1 = vld [vmem:[%s12320_s4 + $0x13c] sm:$0xf0] }
 0x5ac   :  { %v5397_v10 = vpop.f32.mrf.mxu3 }
 0x5ad   :  { %v5398_v44 = vadd.f32 %v5397_v10, %v11883_v0  ;;  %v12035_v53 = vpop.f32.mrf.mxu0 }
 0x5af   :  { %v5647_v23 = vadd.f32 %v5646_v13, %v5398_v44  ;;  %v5897_v10 = vpop.permute.xlu2 %5896 }
 0x5b0   :  { %v12024_v0 = vpop.f32.mrf.mxu2  ;;  %6379 = vmatmul.bf16.gmra.mxu1 %v7658_v3  ;;  %v6214_v44 = vadd.f32 %v12001_v61, %v5897_v10  ;;  %v7589_v3 = vld [vmem:[%s12320_s4 + $0xa0] sm:$0xf] }
 0x5b1   :  { %v5754_v41 = vmax.f32 %v5647_v23, 0.0 }
 0x5b4   :  { %v5399_v62 = vpop.f32.mrf.mxu3 }
 0x5b5   :  { %v5400_v12 = vadd.f32 %v5399_v62, %v5151_v43  ;;  %6403 = vmatmul.bf16.gmra.mxu2 %v7542_v34  ;;  %v12052_v19 = vpop.f32.mrf.mxu0  ;;  %v7590_v34 = vor.u32 %v7938_v31, %v7589_v3  ;;  %v7678_v62 = vor.u32 %v7961_v40, %v7677_v32  ;;  %v7614_v31 = vor.u32 %v7944_v63, %v7613_v49 }
 0x5b7   :  { %v5649_v33 = vadd.f32 %v5648_v37, %v5400_v12  ;;  %v7654_v37 = vor.u32 %v7955_v1, %v7653_v56  ;;  %v5907_v12 = vpop.permute.xlu1 %5906  ;;  %v12435_v56 = vld [vmem:[#allocation22_spill] sm:$0xff] }
 0x5b8   :  { %v6257_v25 = vpop.f32.mrf.mxu2  ;;  %v6219_v14 = vadd.f32 %v6218_v4, %v5907_v12  ;;  %v12434_v4 = vld [vmem:[#allocation27_spill] sm:$0xff]  ;;  %v4910_v1 = vadd.f32 %v11840_v50, %v12435_v56 }
 0x5b9   :  { %v5755_v51 = vmax.f32 %v5649_v33, 0.0  ;;  %v12038_v13 = vadd.f32 %v6257_v25, %v6209_v7  ;;  %6325 = vmatmul.bf16.gmra.mxu3 %v7630_v20  ;;  %v6223_v20 = vpop.f32.mrf.mxu1  ;;  %v12091_v25 = vpop.permute.xlu0 %5901 }
 0x5bb   :  { %v12040_v15 = vpack.c.bf16 %v5755_v51, %v5754_v41 }
 0x5bc   :  { %v12044_v8 = vpop.f32.mrf.mxu3 }
 0x5bd   :  { %v5656_v36 = vpop.f32.mrf.mxu0 }
 0x5c0   :  { %v12060_v21 = vpop.f32.mrf.mxu2  ;;  %6384 = vmatmul.bf16.gmra.mxu1 %v7682_v39  ;;  %v4912_v39 = vadd.f32 %v11848_v29, %v12434_v4  ;;  %v5159_v29 = vadd.f32 %v11945_v6, %v4910_v1  ;;  %v12123_v1 = vpop.permute.xlu2 %5911 }
 0x5c4   :  { %v5404_v42 = vpop.f32.mrf.mxu3 }
 0x5c5   :  { %6408 = vmatmul.bf16.gmra.mxu2 %v7566_v35  ;;  %v5658_v61 = vpop.f32.mrf.mxu0  ;;  %v5164_v35 = vadd.f32 %v11974_v26, %v4915_v38 }
 0x5c8   :  { %v6262_v58 = vpop.f32.mrf.mxu2 }
 0x5c9   :  { %v12071_v23 = vadd.f32 %v6262_v58, %v6214_v44  ;;  %6330 = vmatmul.bf16.gmra.mxu3 %v7654_v37  ;;  %v6225_v37 = vpop.f32.mrf.mxu1  ;;  %v4917_v44 = vadd.f32 %v11901_v45, %v12436_v11  ;;  %v5161_v58 = vadd.f32 %v11965_v24, %v4912_v39  ;;  %v5917_v24 = vpop.permute.xlu0 %5916 }
 0x5cb   :  { %v5166_v26 = vadd.f32 %v11993_v5, %v4917_v44 }
 0x5cc   :  { %v5407_v17 = vpop.f32.mrf.mxu3 }
 0x5cd   :  { %v5661_v51 = vpop.f32.mrf.mxu0 }
 0x5d0   :  { %v12081_v54 = vpop.f32.mrf.mxu2 }
 0x5d4   :  { %v5409_v43 = vpop.f32.mrf.mxu3 }
 0x5d5   :  { %6413 = vmatmul.bf16.gmra.mxu2 %v7590_v34  ;;  %v12437_v34 = vld [vmem:[#allocation31_spill] sm:$0xff]  ;;  %v5410_v40 = vadd.f32 %v5409_v43, %v5161_v58  ;;  %v5663_v38 = vpop.f32.mrf.mxu0 }
 0x5d6   :  { %v4907_v32 = vadd.f32 %v11806_v22, %v12437_v34  ;;  %v6224_v22 = vadd.f32 %v6223_v20, %v5917_v24 }
 0x5d7   :  { %v5659_v6 = vadd.f32 %v5658_v61, %v5410_v40 }
 0x5d8   :  { %v6267_v7 = vpop.f32.mrf.mxu2 }
 0x5d9   :  { %v12089_v33 = vadd.f32 %v6267_v7, %v6219_v14  ;;  %6335 = vmatmul.bf16.gmra.mxu3 %v7678_v62  ;;  %v12438_v62 = vld [vmem:[#allocation28_spill] sm:$0xff]  ;;  %v5156_v14 = vadd.f32 %v11932_v9, %v4907_v32  ;;  %v5408_v7 = vadd.f32 %v5407_v17, %v5159_v29  ;;  %v6228_v9 = vpop.f32.mrf.mxu1 }
 0x5da   :  { %v4905_v50 = vadd.f32 %v11785_v18, %v12438_v62 }
 0x5db   :  { %v5405_v49 = vadd.f32 %v5404_v42, %v5156_v14  ;;  %v5657_v4 = vadd.f32 %v5656_v36, %v5408_v7  ;;  %v7637_v36 = vld [vmem:[%s12320_s4 + $0x100] sm:$0xf]  ;;  %v5932_v14 = vpop.permute.xlu0 %5931 }
 0x5dc   :  { %v5412_v41 = vpop.f32.mrf.mxu3 }
 0x5dd   :  { %v5413_v3 = vadd.f32 %v5412_v41, %v5164_v35  ;;  %v5154_v41 = vadd.f32 %v11911_v48, %v4905_v50  ;;  %v5654_v17 = vadd.f32 %v12052_v19, %v5405_v49  ;;  %v5758_v61 = vmax.f32 %v5657_v4, 0.0  ;;  %v7950_v19 = vld [vmem:[%s12320_s4 + $0x114] sm:$0xf0] }
 0x5df   :  { %v5662_v45 = vadd.f32 %v5661_v51, %v5413_v3  ;;  %v5403_v5 = vadd.f32 %v12044_v8, %v5154_v41  ;;  %v5759_v51 = vmax.f32 %v5659_v6, 0.0  ;;  %v5922_v8 = vpop.permute.xlu1 %5921  ;;  %v5757_v44 = vmax.f32 %v5654_v17, 0.0 }
 0x5e0   :  { %v12106_v10 = vpop.f32.mrf.mxu2  ;;  %v6226_v11 = vadd.f32 %v6225_v37, %v5922_v8 }
 0x5e1   :  { %v5760_v18 = vmax.f32 %v5662_v45, 0.0  ;;  %v5652_v42 = vadd.f32 %v12035_v53, %v5403_v5  ;;  %v5856_v58 = vpack.c.bf16 %v5759_v51, %v5758_v61  ;;  %v6230_v32 = vpop.f32.mrf.mxu1  ;;  %v7661_v45 = vld [vmem:[%s12320_s4 + $0x130] sm:$0xf]  ;;  %v7543_v61 = vld [vmem:[%s12320_s4 + $0x58] sm:$0xf0] }
 0x5e2   :  { %v6231_v24 = vadd.f32 %v6230_v32, %v5932_v14 }
 0x5e3   :  { %v5947_v8 = vpop.permute.xlu0 %5946 }
 0x5e4   :  { %v5414_v12 = vpop.f32.mrf.mxu3 }
 0x5e5   :  { %v5415_v16 = vadd.f32 %v5414_v12, %v5166_v26  ;;  %6418 = vmatmul.bf16.gmra.mxu2 %v7614_v31  ;;  %v5756_v31 = vmax.f32 %v5652_v42, 0.0  ;;  %v5927_v26 = vpop.permute.xlu2 %5926 }
 0x5e6   :  { %v6229_v40 = vadd.f32 %v6228_v9, %v5927_v26  ;;  %v7962_v9 = vld [vmem:[%s12320_s4 + $0x174] sm:$0xf0] }
 0x5e7   :  { %v5664_v63 = vadd.f32 %v5663_v38, %v5415_v16  ;;  %v5855_v34 = vpack.c.bf16 %v5757_v44, %v5756_v31  ;;  %v7956_v16 = vld [vmem:[%s12320_s4 + $0x144] sm:$0xf0]  ;;  %v5937_v49 = vpop.permute.xlu1 %5936 }
 0x5e8   :  { %v6272_v43 = vpop.f32.mrf.mxu2 }
 0x5e9   :  { %v5761_v39 = vmax.f32 %v5664_v63, 0.0  ;;  %v12120_v35 = vadd.f32 %v6272_v43, %v6224_v22  ;;  %v6233_v7 = vpop.f32.mrf.mxu1  ;;  %v7519_v22 = vld [vmem:[%s12320_s4 + $0x28] sm:$0xf0] }
 0x5ea   :  { %v6234_v6 = vadd.f32 %v6233_v7, %v5937_v49 }
 0x5eb   :  { %v5857_v56 = vpack.c.bf16 %v5761_v39, %v5760_v18  ;;  %v7685_v39 = vld [vmem:[%s12320_s4 + $0x160] sm:$0xf] }
 0x5ec   :  { %v6301_v48 = vpop.f32.mrf.mxu3 }
 0x5ed   :  { %v12127_v20 = vadd.f32 %v6301_v48, %v12005_v57  ;;  %6439 = vmatpush.bf16.msrb.mxu3 %v5857_v56  ;;  %v7638_v57 = vor.u32 %v7950_v19, %v7637_v36  ;;  %v5942_v18 = vpop.permute.xlu2 %5941  ;;  %v7686_v48 = vor.u32 %v7962_v9, %v7685_v39 }
 0x5f0   :  { %v6274_v3 = vpop.f32.mrf.mxu2 }
 0x5f1   :  { %v12135_v53 = vadd.f32 %v6274_v3, %v6226_v11  ;;  %6440 = vmatpush.bf16.msrb.mxu3 %v5856_v58  ;;  %v6235_v63 = vpop.f32.mrf.mxu1 }
 0x5f2   :  { %v6236_v17 = vadd.f32 %v6235_v63, %v5942_v18 }
 0x5f4   :  { %v12137_v29 = vpop.f32.mrf.mxu3 }
 0x5f5   :  { %6423 = vmatmul.bf16.gmra.mxu2 %v7638_v57  ;;  %6441 = vmatpush.bf16.msrb.mxu3 %v5855_v34  ;;  %v5952_v57 = vpop.permute.xlu1 %5951 }
 0x5f8   :  { %v6277_v62 = vpop.f32.mrf.mxu2 }
 0x5f9   :  { %v12139_v50 = vadd.f32 %v6277_v62, %v6229_v40  ;;  %6442 = vmatpush.bf16.msrb.mxu3 %v12040_v15  ;;  %v7662_v15 = vor.u32 %v7956_v16, %v7661_v45  ;;  %v6238_v42 = vpop.f32.mrf.mxu1  ;;  %v7929_v62 = vld [vmem:[%s12320_s4 + $0x74] sm:$0xf] }
 0x5fa   :  { %v6239_v36 = vadd.f32 %v6238_v42, %v5947_v8 }
 0x5fc   :  { %v6306_v37 = vpop.f32.mrf.mxu3 }
 0x5fd   :  { %v12143_v12 = vadd.f32 %v6306_v37, %v12038_v13  ;;  %6443 = vmatpush.bf16.msrb.mxu3 %v12007_v60  ;;  %v7917_v60 = vld [vmem:[%s12320_s4 + $0x14] sm:$0xf]  ;;  %v7567_v37 = vld [vmem:[%s12320_s4 + $0x88] sm:$0xf0] }
 0x5fe   :  { %v7522_v43 = vor.u32 %v7917_v60, %v7519_v22  ;;  %v7570_v14 = vor.u32 %v7929_v62, %v7567_v37 }
 0x600   :  { %v6279_v41 = vpop.f32.mrf.mxu2 }
 0x601   :  { %v6280_v38 = vadd.f32 %v6279_v41, %v6231_v24  ;;  %6444 = vmatpush.bf16.msrb.mxu3 %v11978_v52  ;;  %v6240_v58 = vpop.f32.mrf.mxu1  ;;  %v7935_v24 = vld [vmem:[%s12320_s4 + $0xa4] sm:$0xf]  ;;  %v7591_v41 = vld [vmem:[%s12320_s4 + $0xb8] sm:$0xf0] }
 0x602   :  { %v6241_v34 = vadd.f32 %v6240_v58, %v5952_v57 }
 0x604   :  { %v12153_v13 = vpop.f32.mrf.mxu3 }
 0x605   :  { %6428 = vmatmul.bf16.gmra.mxu2 %v7662_v15  ;;  %6445 = vmatpush.bf16.msrb.mxu3 %v11948_v47  ;;  %v7594_v15 = vor.u32 %v7935_v24, %v7591_v41 }
 0x608   :  { %v6282_v5 = vpop.f32.mrf.mxu2 }
 0x609   :  { %v6283_v52 = vadd.f32 %v6282_v5, %v6234_v6  ;;  %6446 = vmatpush.bf16.msrb.mxu3 %v11914_v28  ;;  %v7615_v6 = vld [vmem:[%s12320_s4 + $0xe8] sm:$0xf0] }
 0x60c   :  { %v6311_v4 = vpop.f32.mrf.mxu3  ;;  %6447 = vmatmul.bf16.vlgmr.msrb.gmra.mxu3 %v7522_v43 }
 0x60d   :  { %v12164_v47 = vadd.f32 %v6311_v4, %v12071_v23  ;;  %v7923_v23 = vld [vmem:[%s12320_s4 + $0x44] sm:$0xf] }
 0x60e   :  { %v7546_v11 = vor.u32 %v7923_v23, %v7543_v61  ;;  %v6350_v23 = vpop.f32.mrf.mxu1 }
 0x610   :  { %v6284_v51 = vpop.f32.mrf.mxu2 }
 0x611   :  { %v6285_v56 = vadd.f32 %v6284_v51, %v6236_v17 }
 0x614   :  { %v12172_v28 = vpop.f32.mrf.mxu3 }
 0x615   :  { %6433 = vmatmul.bf16.gmra.mxu2 %v7686_v48 }
 0x616   :  { %v6352_v8 = vpop.f32.mrf.mxu1 }
 0x618   :  { %v6287_v19 = vpop.f32.mrf.mxu2 }
 0x619   :  { %v6288_v44 = vadd.f32 %v6287_v19, %v6239_v36  ;;  %v7959_v36 = vld [vmem:[%s12320_s4 + $0x164] sm:$0xf]  ;;  %v7687_v19 = vld [vmem:[%s12320_s4 + $0x178] sm:$0xf0] }
 0x61c   :  { %v6316_v3 = vpop.f32.mrf.mxu3  ;;  %6452 = vmatmul.bf16.gmra.mxu3 %v7546_v11 }
 0x61d   :  { %v12181_v31 = vadd.f32 %v6316_v3, %v12089_v33 }
 0x61e   :  { %v6355_v58 = vpop.f32.mrf.mxu1 }
 0x620   :  { %v6289_v32 = vpop.f32.mrf.mxu2 }
 0x621   :  { %v6290_v26 = vadd.f32 %v6289_v32, %v6241_v34  ;;  %v6206_v32 = vadd.f32 %v11942_v30, %v12042_v46  ;;  %v6211_v30 = vadd.f32 %v11976_v2, %v12073_v55 }
 0x623   :  { %v6255_v62 = vadd.f32 %v12024_v0, %v6206_v32  ;;  %v6356_v0 = vadd.f32 %v6355_v58, %v12143_v12 }
 0x624   :  { %v12183_v40 = vpop.f32.mrf.mxu3 }
 0x626   :  { %v6357_v57 = vpop.f32.mrf.mxu1 }
 0x628   :  { %v6399_v61 = vpop.f32.mrf.mxu2 }
 0x62c   :  { %v6321_v7 = vpop.f32.mrf.mxu3  ;;  %6457 = vmatmul.bf16.gmra.mxu3 %v7570_v14 }
 0x62d   :  { %v12192_v33 = vadd.f32 %v6321_v7, %v12120_v35  ;;  %v6304_v7 = vadd.f32 %v12137_v29, %v6255_v62 }
 0x62e   :  { %v6360_v24 = vpop.f32.mrf.mxu1 }
 0x62f   :  { %v6353_v41 = vadd.f32 %v6352_v8, %v6304_v7  ;;  %v6361_v12 = vadd.f32 %v6360_v24, %v12164_v47 }
 0x630   :  { %v6401_v11 = vpop.f32.mrf.mxu2 }
 0x634   :  { %v6323_v45 = vpop.f32.mrf.mxu3 }
 0x635   :  { %v12195_v16 = vadd.f32 %v6323_v45, %v12135_v53  ;;  %v7941_v53 = vld [vmem:[%s12320_s4 + $0xd4] sm:$0xf] }
 0x636   :  { %v7618_v63 = vor.u32 %v7941_v53, %v7615_v6  ;;  %v6362_v46 = vpop.f32.mrf.mxu1 }
 0x638   :  { %v6404_v3 = vpop.f32.mrf.mxu2 }
 0x639   :  { %v6405_v29 = vadd.f32 %v6404_v3, %v6356_v0 }
 0x63c   :  { %v6326_v60 = vpop.f32.mrf.mxu3  ;;  %6462 = vmatmul.bf16.gmra.mxu3 %v7594_v15 }
 0x63d   :  { %v12204_v22 = vadd.f32 %v6326_v60, %v12139_v50  ;;  %v7947_v50 = vld [vmem:[%s12320_s4 + $0x104] sm:$0xf]  ;;  %v6402_v60 = vadd.f32 %v6401_v11, %v6353_v41 }
 0x640   :  { %v6406_v34 = vpop.f32.mrf.mxu2 }
 0x644   :  { %v6328_v35 = vpop.f32.mrf.mxu3 }
 0x645   :  { %v12206_v49 = vadd.f32 %v6328_v35, %v6280_v38  ;;  %v7639_v38 = vld [vmem:[%s12320_s4 + $0x118] sm:$0xf0] }
 0x646   :  { %v7642_v39 = vor.u32 %v7947_v50, %v7639_v38 }
 0x648   :  { %v6409_v15 = vpop.f32.mrf.mxu2 }
 0x64c   :  { %v6331_v5 = vpop.f32.mrf.mxu3  ;;  %6467 = vmatmul.bf16.gmra.mxu3 %v7618_v63 }
 0x64d   :  { %v12214_v43 = vadd.f32 %v6331_v5, %v6283_v52  ;;  %v7953_v52 = vld [vmem:[%s12320_s4 + $0x134] sm:$0xf] }
 0x650   :  { %v6411_v6 = vpop.f32.mrf.mxu2 }
 0x654   :  { %v6333_v4 = vpop.f32.mrf.mxu3 }
 0x655   :  { %v12216_v18 = vadd.f32 %v6333_v4, %v6285_v56  ;;  %v7663_v56 = vld [vmem:[%s12320_s4 + $0x148] sm:$0xf0] }
 0x656   :  { %v7666_v42 = vor.u32 %v7953_v52, %v7663_v56 }
 0x658   :  { %v6414_v55 = vpop.f32.mrf.mxu2 }
 0x65c   :  { %v6336_v9 = vpop.f32.mrf.mxu3  ;;  %6472 = vmatmul.bf16.gmra.mxu3 %v7642_v39  ;;  %v6365_v39 = vpop.f32.mrf.mxu1 }
 0x65d   :  { %v12224_v17 = vadd.f32 %v6336_v9, %v6288_v44  ;;  %v7690_v44 = vor.u32 %v7959_v36, %v7687_v19 }
 0x664   :  { %v6338_v51 = vpop.f32.mrf.mxu3 }
 0x665   :  { %v12226_v48 = vadd.f32 %v6338_v51, %v6290_v26  ;;  %v6351_v26 = vadd.f32 %v6350_v23, %v12127_v20  ;;  %v6260_v20 = vadd.f32 %v12060_v21, %v6211_v30  ;;  %v6216_v21 = vadd.f32 %v12010_v59, %v12091_v25  ;;  %v6367_v23 = vpop.f32.mrf.mxu1 }
 0x666   :  { %v6410_v51 = vadd.f32 %v6409_v15, %v6361_v12  ;;  %v6366_v25 = vadd.f32 %v6365_v39, %v12181_v31 }
 0x667   :  { %v6400_v37 = vadd.f32 %v6399_v61, %v6351_v26  ;;  %v6309_v5 = vadd.f32 %v12153_v13, %v6260_v20  ;;  %v6265_v13 = vadd.f32 %v12081_v54, %v6216_v21  ;;  %v6416_v61 = vpop.f32.mrf.mxu2  ;;  %v6221_v54 = vadd.f32 %v12062_v27, %v12123_v1 }
 0x669   :  { %v6358_v50 = vadd.f32 %v6357_v57, %v6309_v5  ;;  %v6314_v56 = vadd.f32 %v12172_v28, %v6265_v13  ;;  %v6270_v28 = vadd.f32 %v12106_v10, %v6221_v54 }
 0x66b   :  { %v6407_v38 = vadd.f32 %v6406_v34, %v6358_v50  ;;  %v6363_v8 = vadd.f32 %v6362_v46, %v6314_v56  ;;  %v6319_v3 = vadd.f32 %v12183_v40, %v6270_v28 }
 0x66c   :  { %6477 = vmatmul.bf16.gmra.mxu3 %v7666_v42 }
 0x66d   :  { %v6412_v36 = vadd.f32 %v6411_v6, %v6363_v8  ;;  %v6370_v59 = vpop.f32.mrf.mxu1  ;;  %v6368_v34 = vadd.f32 %v6367_v23, %v6319_v3 }
 0x66e   :  { %v6371_v10 = vadd.f32 %v6370_v59, %v12192_v33 }
 0x66f   :  { %v6419_v47 = vpop.f32.mrf.mxu2  ;;  %v6417_v26 = vadd.f32 %v6416_v61, %v6368_v34 }
 0x670   :  { %v6420_v1 = vadd.f32 %v6419_v47, %v6371_v10 }
 0x675   :  { %v6372_v32 = vpop.f32.mrf.mxu1 }
 0x677   :  { %v6421_v62 = vpop.f32.mrf.mxu2 }
 0x67c   :  { %6482 = vmatmul.bf16.gmra.mxu3 %v7690_v44  ;;  %v6415_v44 = vadd.f32 %v6414_v55, %v6366_v25 }
 0x67d   :  { %v6375_v31 = vpop.f32.mrf.mxu1 }
 0x67f   :  { %v6424_v7 = vpop.f32.mrf.mxu2 }
 0x687   :  { %v6426_v33 = vpop.f32.mrf.mxu2 }
 0x68f   :  { %v6448_v14 = vpop.f32.mrf.mxu3  ;;  %v6429_v20 = vpop.f32.mrf.mxu2 }
 0x690   :  { %v6449_v45 = vadd.f32 %v6448_v14, %v6400_v37 }
 0x692   :  { %6488 = vst [vmem:[%s12324_s8] sm:$0xff] %v6449_v45  ;;  %v6373_v45 = vadd.f32 %v6372_v32, %v12195_v16 }
 0x694   :  { %v6422_v24 = vadd.f32 %v6421_v62, %v6373_v45 }
 0x697   :  { %v6450_v35 = vpop.f32.mrf.mxu3  ;;  %v6431_v50 = vpop.f32.mrf.mxu2 }
 0x698   :  { %v6451_v53 = vadd.f32 %v6450_v35, %v6402_v60  ;;  %v6377_v60 = vpop.f32.mrf.mxu1  ;;  %v6376_v35 = vadd.f32 %v6375_v31, %v12204_v22 }
 0x699   :  { %v6378_v16 = vadd.f32 %v6377_v60, %v12206_v49 }
 0x69a   :  { %6489 = vst [vmem:[%s12324_s8 + $0x8] sm:$0xff] %v6451_v53  ;;  %v6425_v53 = vadd.f32 %v6424_v7, %v6376_v35 }
 0x69f   :  { %v6453_v63 = vpop.f32.mrf.mxu3  ;;  %v6434_v12 = vpop.f32.mrf.mxu2 }
 0x6a0   :  { %v6454_v4 = vadd.f32 %v6453_v63, %v6405_v29  ;;  %v6380_v46 = vpop.f32.mrf.mxu1  ;;  %v6427_v29 = vadd.f32 %v6426_v33, %v6378_v16 }
 0x6a1   :  { %v6381_v22 = vadd.f32 %v6380_v46, %v12214_v43 }
 0x6a2   :  { %6490 = vst [vmem:[%s12324_s8 + $0x10] sm:$0xff] %v6454_v4 }
 0x6a3   :  { %v6430_v4 = vadd.f32 %v6429_v20, %v6381_v22 }
 0x6a7   :  { %v6455_v9 = vpop.f32.mrf.mxu3 }
 0x6a8   :  { %v6456_v2 = vadd.f32 %v6455_v9, %v6407_v38  ;;  %v6382_v5 = vpop.f32.mrf.mxu1 }
 0x6a9   :  { %v6383_v49 = vadd.f32 %v6382_v5, %v12216_v18  ;;  %v6436_v18 = vpop.f32.mrf.mxu2 }
 0x6aa   :  { %6491 = vst [vmem:[%s12324_s8 + $0x18] sm:$0xff] %v6456_v2 }
 0x6ab   :  { %v6432_v9 = vadd.f32 %v6431_v50, %v6383_v49 }
 0x6af   :  { %v6458_v52 = vpop.f32.mrf.mxu3 }
 0x6b0   :  { %v6459_v42 = vadd.f32 %v6458_v52, %v6410_v51  ;;  %v6385_v2 = vpop.f32.mrf.mxu1 }
 0x6b1   :  { %v6386_v43 = vadd.f32 %v6385_v2, %v12224_v17 }
 0x6b2   :  { %6492 = vst [vmem:[%s12324_s8 + $0x20] sm:$0xff] %v6459_v42 }
 0x6b3   :  { %v6435_v13 = vadd.f32 %v6434_v12, %v6386_v43 }
 0x6b7   :  { %v6460_v19 = vpop.f32.mrf.mxu3 }
 0x6b8   :  { %v6461_v11 = vadd.f32 %v6460_v19, %v6412_v36  ;;  %v6387_v56 = vpop.f32.mrf.mxu1 }
 0x6b9   :  { %v6388_v42 = vadd.f32 %v6387_v56, %v12226_v48 }
 0x6ba   :  { %6493 = vst [vmem:[%s12324_s8 + $0x28] sm:$0xff] %v6461_v11 }
 0x6bb   :  { %v6437_v23 = vadd.f32 %v6436_v18, %v6388_v42 }
 0x6bf   :  { %v6463_v58 = vpop.f32.mrf.mxu3 }
 0x6c0   :  { %v6464_v57 = vadd.f32 %v6463_v58, %v6415_v44 }
 0x6c2   :  { %6494 = vst [vmem:[%s12324_s8 + $0x30] sm:$0xff] %v6464_v57 }
 0x6c7   :  { %v6465_v37 = vpop.f32.mrf.mxu3 }
 0x6c8   :  { %v6466_v27 = vadd.f32 %v6465_v37, %v6417_v26 }
 0x6ca   :  { %6495 = vst [vmem:[%s12324_s8 + $0x38] sm:$0xff] %v6466_v27 }
 0x6cf   :  { %v6468_v40 = vpop.f32.mrf.mxu3 }
 0x6d0   :  { %v6469_v14 = vadd.f32 %v6468_v40, %v6420_v1 }
 0x6d2   :  { %6496 = vst [vmem:[%s12324_s8 + $0x40] sm:$0xff] %v6469_v14 }
 0x6d7   :  { %v6470_v41 = vpop.f32.mrf.mxu3 }
 0x6d8   :  { %v6471_v15 = vadd.f32 %v6470_v41, %v6422_v24 }
 0x6da   :  { %6497 = vst [vmem:[%s12324_s8 + $0x48] sm:$0xff] %v6471_v15 }
 0x6df   :  { %v6473_v30 = vpop.f32.mrf.mxu3 }
 0x6e0   :  { %v6474_v0 = vadd.f32 %v6473_v30, %v6425_v53 }
 0x6e2   :  { %6498 = vst [vmem:[%s12324_s8 + $0x50] sm:$0xff] %v6474_v0 }
 0x6e7   :  { %v6475_v6 = vpop.f32.mrf.mxu3 }
 0x6e8   :  { %v6476_v63 = vadd.f32 %v6475_v6, %v6427_v29 }
 0x6ea   :  { %6499 = vst [vmem:[%s12324_s8 + $0x58] sm:$0xff] %v6476_v63 }
 0x6ef   :  { %v6478_v38 = vpop.f32.mrf.mxu3 }
 0x6f0   :  { %v6479_v39 = vadd.f32 %v6478_v38, %v6430_v4 }
 0x6f2   :  { %6500 = vst [vmem:[%s12324_s8 + $0x60] sm:$0xff] %v6479_v39 }
 0x6f7   :  { %v6480_v55 = vpop.f32.mrf.mxu3 }
 0x6f8   :  { %v6481_v21 = vadd.f32 %v6480_v55, %v6432_v9 }
 0x6fa   :  { %6501 = vst [vmem:[%s12324_s8 + $0x68] sm:$0xff] %v6481_v21 }
 0x6ff   :  { %v6483_v51 = vpop.f32.mrf.mxu3 }
 0x700   :  { %v6484_v52 = vadd.f32 %v6483_v51, %v6435_v13 }
 0x702   :  { %6502 = vst [vmem:[%s12324_s8 + $0x70] sm:$0xff] %v6484_v52 }
 0x707   :  { %v6485_v61 = vpop.f32.mrf.mxu3 }
 0x708   :  { %v6486_v8 = vadd.f32 %v6485_v61, %v6437_v23 }
 0x70a   :  { %6503 = vst [vmem:[%s12324_s8 + $0x78] sm:$0xff] %v6486_v8 }

</bundles_post_ra>
